<compile_context>
chip_gen: v5e
topology: v5e:2x2
jax: 0.10.0
libtpu: 0.0.40
codegen_flags: <defaults>
</compile_context>

<pallas_src>
import functools

import jax
import jax.numpy as jnp
from jax import lax
from jax.experimental import pallas as pl
from jax.experimental.pallas import tpu as pltpu


def dncnn_kernel(xe_ref, w1_ref, wmid_ref, shift_ref, wlast_ref, mask_ref,
                 o_ref, buf, *, H, W, F, Fp, n_mid):
    """One grid step == one image; the whole DnCNN stack is fused.

    Layout: feature maps are stored flat as (R, Fp) with R = (H+2)*(W+2)+2 and
    row index r = y*(W+2) + x over the zero-padded spatial grid.  A 3x3 tap
    (ky, kx) of a 'same' conv is then the contiguous row slice
    [ky*(W+2)+kx : ky*(W+2)+kx + H*(W+2)), i.e. a pure row-offset read.  The
    resulting "wide" output has H*(W+2) rows; its two wrap-around columns per
    row are zeroed by `mask`, so when the slab is written back at row offset
    (W+2)+1 the halo columns of the destination buffer stay exactly zero.
    """
    Wp = W + 2
    HWp = H * Wp
    base = Wp + 1                        # flat row of interior pixel (0, 0)
    R = (H + 2) * Wp + 2                 # +2: tap (2,2) of the last wide row

    # Zero only the two thin halo strips (top + bottom); slab interiors are
    # fully rewritten every layer and in-slab halo columns are zeroed by the
    # column mask.  Unconditional per grid step -> megacore-safe.
    buf[:, 0:base, :] = jnp.zeros((2, base, Fp), jnp.bfloat16)
    buf[:, base + HWp:, :] = jnp.zeros((2, R - base - HWp, Fp), jnp.bfloat16)

    mask = mask_ref[...]                 # (HWp, 1) f32; 0 on wrap columns

    # ---- Layer 1: grouped conv == per-lane depthwise taps on the
    # pre-expanded input (pure VPU, no matmul), then ReLU. -------------------
    acc = jnp.zeros((HWp, Fp), jnp.float32)
    for ky in range(3):
        for kx in range(3):
            acc = acc + (xe_ref[0, pl.ds(ky * Wp + kx, HWp), :]
                         * w1_ref[ky, kx])
    buf[0, pl.ds(base, HWp), :] = (
        jnp.maximum(acc, 0.0) * mask).astype(jnp.bfloat16)

    # ---- Middle layers: 3x3 conv as 9 contiguous-slab MXU matmuls (bf16 in,
    # f32 accumulation), folded-BN shift, ReLU; ping-pong buffer slots. ------
    def mid_layer(l, carry):
        src = l % 2
        dst = 1 - src
        acc = jnp.zeros((HWp, Fp), jnp.float32)
        for ky in range(3):
            for kx in range(3):
                acc = acc + jnp.dot(
                    buf[src, pl.ds(ky * Wp + kx, HWp), :],
                    wmid_ref[l, ky, kx],
                    preferred_element_type=jnp.float32)
        y = jnp.maximum(acc + shift_ref[l], 0.0) * mask
        buf[dst, pl.ds(base, HWp), :] = y.astype(jnp.bfloat16)
        return carry

    lax.fori_loop(0, n_mid, mid_layer, 0)

    # ---- Last conv: single real output channel kept in lane 0 of a 128-wide
    # zero-padded weight so the final store is a full-lane (unmasked) store. -
    src = n_mid % 2                       # static: slot written last
    acc = jnp.zeros((HWp, 128), jnp.float32)
    for ky in range(3):
        for kx in range(3):
            acc = acc + jnp.dot(
                buf[src, pl.ds(ky * Wp + kx, HWp), :],
                wlast_ref[ky, kx],
                preferred_element_type=jnp.float32)

    # Residual head: x[:, -1, :, :] - out; the last true input channel sits in
    # lane F-1 of the (exact f32) expanded input.
    o_ref[0] = xe_ref[0, pl.ds(base, HWp), F - 1:F] - acc


def dncnn_pallas(x_nchw, w1_hwio, wmid_hwio, scale, shift, wlast_hwio):
    N, C, H, W = x_nchw.shape
    F = w1_hwio.shape[-1]
    n_mid = wmid_hwio.shape[0]
    Fp = max(128, ((F + 127) // 128) * 128)     # pad channels to full lanes
    Hp, Wp = H + 2, W + 2
    HWp = H * Wp
    R = Hp * Wp + 2

    f = jnp.float32
    # ---- pack parameters into the kernel layout (host/XLA side, free) ------
    # Grouped first conv: the block-diagonal HWIO weight has exactly one
    # nonzero Cin row per output channel -> per-output-lane taps (3, 3, 1, Fp).
    w1v = jnp.sum(w1_hwio, axis=2)[:, :, None, :]
    w1v = jnp.pad(w1v, ((0, 0), (0, 0), (0, 0), (0, Fp - F))).astype(f)

    # Fold the BN scale into the conv weights; keep only the shift in-kernel.
    wmid_p = wmid_hwio * scale[:, None, None, None, :]
    wmid_p = jnp.pad(wmid_p, ((0, 0), (0, 0), (0, 0),
                              (0, Fp - F), (0, Fp - F))).astype(jnp.bfloat16)
    shift_p = jnp.pad(shift, ((0, 0), (0, Fp - F)))[:, None, :].astype(f)
    wlast_p = jnp.pad(wlast_hwio, ((0, 0), (0, 0),
                                   (0, Fp - F), (0, 127))).astype(jnp.bfloat16)

    # Expanded input for the grouped conv (output channel o reads input
    # channel o // 18), zero-padded spatially (halo 1), channel-padded to Fp,
    # flattened to rows, plus 2 extra zero rows for the (2, 2) tap overrun.
    x = jnp.transpose(x_nchw, (0, 2, 3, 1)).astype(f)            # NHWC
    xe = jnp.repeat(x, F // C, axis=-1)                          # (N,H,W,F)
    xe = jnp.pad(xe, ((0, 0), (1, 1), (1, 1), (0, Fp - F)))      # (N,Hp,Wp,Fp)
    xe = xe.reshape(N, Hp * Wp, Fp)
    xe = jnp.pad(xe, ((0, 0), (0, 2), (0, 0)))                   # (N,R,Fp)

    # 0/1 mask that kills the 2 wrap-around columns of the wide (H, Wp) rows.
    col = jnp.arange(HWp, dtype=jnp.int32) % Wp
    colmask = (col < W).astype(f).reshape(HWp, 1)

    kernel = functools.partial(dncnn_kernel, H=H, W=W, F=F, Fp=Fp, n_mid=n_mid)
    out_wide = pl.pallas_call(
        kernel,
        out_shape=jax.ShapeDtypeStruct((N, HWp, 128), jnp.float32),
        grid=(N,),
        in_specs=[
            pl.BlockSpec((1, R, Fp), lambda b: (b, 0, 0)),
            pl.BlockSpec((3, 3, 1, Fp), lambda b: (0, 0, 0, 0)),
            pl.BlockSpec((n_mid, 3, 3, Fp, Fp), lambda b: (0, 0, 0, 0, 0)),
            pl.BlockSpec((n_mid, 1, Fp), lambda b: (0, 0, 0)),
            pl.BlockSpec((3, 3, Fp, 128), lambda b: (0, 0, 0, 0)),
            pl.BlockSpec((HWp, 1), lambda b: (0, 0)),
        ],
        out_specs=pl.BlockSpec((1, HWp, 128), lambda b: (b, 0, 0)),
        scratch_shapes=[pltpu.VMEM((2, R, Fp), jnp.bfloat16)],
        compiler_params=pltpu.CompilerParams(
            dimension_semantics=("parallel",)),
    )(xe, w1v, wmid_p, shift_p, wlast_p, colmask)

    # Lane 0 holds the residual in the wide layout; drop the wrap columns.
    out = out_wide[:, :, 0].reshape(N, H, Wp)[:, :, :W]
    return out[:, None, :, :]                                    # NCHW (C=1)


def make_params(key, channels, num_of_layers):
    """Deterministic synthetic parameters matching DnCNN.__init__ shapes."""
    C = channels
    F = 18 * C
    n_mid = num_of_layers - 2
    ks = jax.random.split(key, 7)

    # PyTorch-layout conv weights (bias=False everywhere).
    w1_t = jax.random.normal(ks[0], (F, 1, 3, 3), jnp.float32) * (2.0 / 9.0) ** 0.5
    wm_t = jax.random.normal(ks[1], (n_mid, F, F, 3, 3), jnp.float32) * (2.0 / (9.0 * F)) ** 0.5
    wl_t = jax.random.normal(ks[2], (1, F, 3, 3), jnp.float32) * (2.0 / (9.0 * F)) ** 0.5

    # BatchNorm2d params / running stats, folded (inference mode).
    gamma = 1.0 + 0.1 * jax.random.normal(ks[3], (n_mid, F), jnp.float32)
    beta = 0.1 * jax.random.normal(ks[4], (n_mid, F), jnp.float32)
    rmean = 0.1 * jax.random.normal(ks[5], (n_mid, F), jnp.float32)
    rvar = 1.0 + 0.5 * jax.random.uniform(ks[6], (n_mid, F), jnp.float32)
    eps = 1e-5
    scale = gamma / jnp.sqrt(rvar + eps)
    shift = beta - rmean * scale

    # Grouped first conv (groups=C, 18 outputs per input channel) ->
    # equivalent block-diagonal dense HWIO weight (3, 3, C, F).
    w1_hwo = jnp.transpose(w1_t[:, 0], (1, 2, 0))                       # (3,3,F)
    group = jnp.arange(F) // (F // C)
    gmask = (jnp.arange(C)[:, None] == group[None, :]).astype(jnp.float32)
    w1_hwio = w1_hwo[:, :, None, :] * gmask[None, None]                 # (3,3,C,F)

    wmid_hwio = jnp.transpose(wm_t, (0, 3, 4, 2, 1))                    # (n_mid,3,3,Fin,Fout)
    wlast_hwio = jnp.transpose(wl_t, (2, 3, 1, 0))                      # (3,3,F,1)

    return w1_hwio, wmid_hwio, scale, shift, wlast_hwio


def dncnn_reference(x_nchw, w1_hwio, wmid_hwio, scale, shift, wlast_hwio):
    """Plain-JAX f32 reference (XLA convs) with identical math."""
    dn = ('NHWC', 'HWIO', 'NHWC')
    x = jnp.transpose(x_nchw, (0, 2, 3, 1))
    y = lax.conv_general_dilated(x, w1_hwio, (1, 1), 'SAME', dimension_numbers=dn)
    y = jnp.maximum(y, 0.0)
    for l in range(wmid_hwio.shape[0]):
        y = lax.conv_general_dilated(y, wmid_hwio[l], (1, 1), 'SAME',
                                     dimension_numbers=dn)
        y = y * scale[l] + shift[l]
        y = jnp.maximum(y, 0.0)
    y = lax.conv_general_dilated(y, wlast_hwio, (1, 1), 'SAME',
                                 dimension_numbers=dn)
    out = x[..., -1:] - y
    return jnp.transpose(out, (0, 3, 1, 2))


if __name__ == "__main__":
    CHANNELS = 4
    NUM_LAYERS = 6          # DnCNN(channels=4, num_of_layers=6); features = 72
    N, H, W = 2, 16, 16

    key = jax.random.PRNGKey(0)
    kp, kx = jax.random.split(key)
    params = make_params(kp, CHANNELS, NUM_LAYERS)
    x = jax.random.normal(kx, (N, CHANNELS, H, W), jnp.float32)

    out = jax.jit(dncnn_pallas)(x, *params)
    out = jax.block_until_ready(out)
    assert out.shape == (N, 1, H, W), out.shape

    # Reference is pure f32; the kernel uses bf16 activations/weights with f32
    # accumulation, so size the tolerance for bf16 rounding across 6 conv
    # layers (real indexing/layout bugs produce O(1) errors).
    ref = dncnn_reference(x, *params)
    err = float(jnp.max(jnp.abs(out - ref)))
    assert err < 1e-1, f"max abs error {err}"

    print("KERNEL_OK")
</pallas_src>

<mosaic_0001>
module attributes {stable_mosaic.version = 11 : i64} {
  func.func @dncnn_kernel(%arg0: i32, %arg1: memref<1x326x128xf32, #tpu.memory_space<vmem>>, %arg2: memref<3x3x1x128xf32, #tpu.memory_space<vmem>>, %arg3: memref<4x3x3x128x128xbf16, #tpu.memory_space<vmem>>, %arg4: memref<4x1x128xf32, #tpu.memory_space<vmem>>, %arg5: memref<3x3x128x128xbf16, #tpu.memory_space<vmem>>, %arg6: memref<288x1xf32, #tpu.memory_space<vmem>>, %arg7: memref<1x288x128xf32, #tpu.memory_space<vmem>>, %arg8: memref<2x326x128xbf16, #tpu.memory_space<vmem>>) attributes {dimension_semantics = [#tpu.dimension_semantics<parallel>], iteration_bounds = array<i64: 2>, scalar_prefetch = 0 : i64, scratch_operands = 1 : i64, tpu.core_type = #tpu.core_type<tc>, window_params = [{transform_indices = @transform_0, window_bounds = array<i64: 1, 326, 128>}, {pipeline_mode = #tpu.pipeline_mode<synchronous>, transform_indices = @transform_1, window_bounds = array<i64: 3, 3, 1, 128>}, {pipeline_mode = #tpu.pipeline_mode<synchronous>, transform_indices = @transform_2, window_bounds = array<i64: 4, 3, 3, 128, 128>}, {pipeline_mode = #tpu.pipeline_mode<synchronous>, transform_indices = @transform_3, window_bounds = array<i64: 4, 1, 128>}, {pipeline_mode = #tpu.pipeline_mode<synchronous>, transform_indices = @transform_4, window_bounds = array<i64: 3, 3, 128, 128>}, {pipeline_mode = #tpu.pipeline_mode<synchronous>, transform_indices = @transform_5, window_bounds = array<i64: 288, 1>}, {transform_indices = @transform_6, window_bounds = array<i64: 1, 288, 128>}]} {
    %cst = arith.constant 0.000000e+00 : bf16
    %0 = vector.broadcast %cst : bf16 to vector<2x19x128xbf16>
    %c0 = arith.constant 0 : index
    %c0_0 = arith.constant 0 : index
    %c0_1 = arith.constant 0 : index
    %1 = vector.load %arg8[%c0, %c0_0, %c0_1] : memref<2x326x128xbf16, #tpu.memory_space<vmem>>, vector<2x19x128xbf16>
    tpu.vector_store %arg8[%c0, %c0_0, %c0_1], %0 {strides = array<i32>} : memref<2x326x128xbf16, #tpu.memory_space<vmem>>, vector<2x19x128xbf16>,
    %cst_2 = arith.constant 0.000000e+00 : bf16
    %2 = vector.broadcast %cst_2 : bf16 to vector<2x19x128xbf16>
    %c0_3 = arith.constant 0 : index
    %c307 = arith.constant 307 : index
    %c0_4 = arith.constant 0 : index
    %3 = vector.load %arg8[%c0_3, %c307, %c0_4] : memref<2x326x128xbf16, #tpu.memory_space<vmem>>, vector<2x19x128xbf16>
    tpu.vector_store %arg8[%c0_3, %c307, %c0_4], %2 {strides = array<i32>} : memref<2x326x128xbf16, #tpu.memory_space<vmem>>, vector<2x19x128xbf16>,
    %c0_5 = arith.constant 0 : index
    %c0_6 = arith.constant 0 : index
    %4 = vector.load %arg6[%c0_5, %c0_6] : memref<288x1xf32, #tpu.memory_space<vmem>>, vector<288x1xf32>
    %cst_7 = arith.constant 0.000000e+00 : f32
    %5 = vector.broadcast %cst_7 : f32 to vector<288x128xf32>
    %c0_8 = arith.constant 0 : index
    %c0_9 = arith.constant 0 : index
    %c0_10 = arith.constant 0 : index
    %6 = vector.load %arg1[%c0_8, %c0_9, %c0_10] : memref<1x326x128xf32, #tpu.memory_space<vmem>>, vector<1x288x128xf32>
    %7 = vector.shape_cast %6 : vector<1x288x128xf32> to vector<288x128xf32>
    %c0_11 = arith.constant 0 : index
    %c0_12 = arith.constant 0 : index
    %c0_13 = arith.constant 0 : index
    %c0_14 = arith.constant 0 : index
    %8 = vector.load %arg2[%c0_11, %c0_12, %c0_13, %c0_14] : memref<3x3x1x128xf32, #tpu.memory_space<vmem>>, vector<1x1x1x128xf32>
    %9 = vector.shape_cast %8 : vector<1x1x1x128xf32> to vector<1x128xf32>
    %10 = vector.broadcast %9 : vector<1x128xf32> to vector<288x128xf32>
    %11 = arith.mulf %7, %10 : vector<288x128xf32>
    %12 = arith.addf %5, %11 : vector<288x128xf32>
    %c0_15 = arith.constant 0 : index
    %c1 = arith.constant 1 : index
    %c0_16 = arith.constant 0 : index
    %13 = vector.load %arg1[%c0_15, %c1, %c0_16] : memref<1x326x128xf32, #tpu.memory_space<vmem>>, vector<1x288x128xf32>
    %14 = vector.shape_cast %13 : vector<1x288x128xf32> to vector<288x128xf32>
    %c0_17 = arith.constant 0 : index
    %c1_18 = arith.constant 1 : index
    %c0_19 = arith.constant 0 : index
    %c0_20 = arith.constant 0 : index
    %15 = vector.load %arg2[%c0_17, %c1_18, %c0_19, %c0_20] : memref<3x3x1x128xf32, #tpu.memory_space<vmem>>, vector<1x1x1x128xf32>
    %16 = vector.shape_cast %15 : vector<1x1x1x128xf32> to vector<1x128xf32>
    %17 = vector.broadcast %16 : vector<1x128xf32> to vector<288x128xf32>
    %18 = arith.mulf %14, %17 : vector<288x128xf32>
    %19 = arith.addf %12, %18 : vector<288x128xf32>
    %c0_21 = arith.constant 0 : index
    %c2 = arith.constant 2 : index
    %c0_22 = arith.constant 0 : index
    %20 = vector.load %arg1[%c0_21, %c2, %c0_22] : memref<1x326x128xf32, #tpu.memory_space<vmem>>, vector<1x288x128xf32>
    %21 = vector.shape_cast %20 : vector<1x288x128xf32> to vector<288x128xf32>
    %c0_23 = arith.constant 0 : index
    %c2_24 = arith.constant 2 : index
    %c0_25 = arith.constant 0 : index
    %c0_26 = arith.constant 0 : index
    %22 = vector.load %arg2[%c0_23, %c2_24, %c0_25, %c0_26] : memref<3x3x1x128xf32, #tpu.memory_space<vmem>>, vector<1x1x1x128xf32>
    %23 = vector.shape_cast %22 : vector<1x1x1x128xf32> to vector<1x128xf32>
    %24 = vector.broadcast %23 : vector<1x128xf32> to vector<288x128xf32>
    %25 = arith.mulf %21, %24 : vector<288x128xf32>
    %26 = arith.addf %19, %25 : vector<288x128xf32>
    %c0_27 = arith.constant 0 : index
    %c18 = arith.constant 18 : index
    %c0_28 = arith.constant 0 : index
    %27 = vector.load %arg1[%c0_27, %c18, %c0_28] : memref<1x326x128xf32, #tpu.memory_space<vmem>>, vector<1x288x128xf32>
    %28 = vector.shape_cast %27 : vector<1x288x128xf32> to vector<288x128xf32>
    %c1_29 = arith.constant 1 : index
    %c0_30 = arith.constant 0 : index
    %c0_31 = arith.constant 0 : index
    %c0_32 = arith.constant 0 : index
    %29 = vector.load %arg2[%c1_29, %c0_30, %c0_31, %c0_32] : memref<3x3x1x128xf32, #tpu.memory_space<vmem>>, vector<1x1x1x128xf32>
    %30 = vector.shape_cast %29 : vector<1x1x1x128xf32> to vector<1x128xf32>
    %31 = vector.broadcast %30 : vector<1x128xf32> to vector<288x128xf32>
    %32 = arith.mulf %28, %31 : vector<288x128xf32>
    %33 = arith.addf %26, %32 : vector<288x128xf32>
    %c0_33 = arith.constant 0 : index
    %c19 = arith.constant 19 : index
    %c0_34 = arith.constant 0 : index
    %34 = vector.load %arg1[%c0_33, %c19, %c0_34] : memref<1x326x128xf32, #tpu.memory_space<vmem>>, vector<1x288x128xf32>
    %35 = vector.shape_cast %34 : vector<1x288x128xf32> to vector<288x128xf32>
    %c1_35 = arith.constant 1 : index
    %c1_36 = arith.constant 1 : index
    %c0_37 = arith.constant 0 : index
    %c0_38 = arith.constant 0 : index
    %36 = vector.load %arg2[%c1_35, %c1_36, %c0_37, %c0_38] : memref<3x3x1x128xf32, #tpu.memory_space<vmem>>, vector<1x1x1x128xf32>
    %37 = vector.shape_cast %36 : vector<1x1x1x128xf32> to vector<1x128xf32>
    %38 = vector.broadcast %37 : vector<1x128xf32> to vector<288x128xf32>
    %39 = arith.mulf %35, %38 : vector<288x128xf32>
    %40 = arith.addf %33, %39 : vector<288x128xf32>
    %c0_39 = arith.constant 0 : index
    %c20 = arith.constant 20 : index
    %c0_40 = arith.constant 0 : index
    %41 = vector.load %arg1[%c0_39, %c20, %c0_40] : memref<1x326x128xf32, #tpu.memory_space<vmem>>, vector<1x288x128xf32>
    %42 = vector.shape_cast %41 : vector<1x288x128xf32> to vector<288x128xf32>
    %c1_41 = arith.constant 1 : index
    %c2_42 = arith.constant 2 : index
    %c0_43 = arith.constant 0 : index
    %c0_44 = arith.constant 0 : index
    %43 = vector.load %arg2[%c1_41, %c2_42, %c0_43, %c0_44] : memref<3x3x1x128xf32, #tpu.memory_space<vmem>>, vector<1x1x1x128xf32>
    %44 = vector.shape_cast %43 : vector<1x1x1x128xf32> to vector<1x128xf32>
    %45 = vector.broadcast %44 : vector<1x128xf32> to vector<288x128xf32>
    %46 = arith.mulf %42, %45 : vector<288x128xf32>
    %47 = arith.addf %40, %46 : vector<288x128xf32>
    %c0_45 = arith.constant 0 : index
    %c36 = arith.constant 36 : index
    %c0_46 = arith.constant 0 : index
    %48 = vector.load %arg1[%c0_45, %c36, %c0_46] : memref<1x326x128xf32, #tpu.memory_space<vmem>>, vector<1x288x128xf32>
    %49 = vector.shape_cast %48 : vector<1x288x128xf32> to vector<288x128xf32>
    %c2_47 = arith.constant 2 : index
    %c0_48 = arith.constant 0 : index
    %c0_49 = arith.constant 0 : index
    %c0_50 = arith.constant 0 : index
    %50 = vector.load %arg2[%c2_47, %c0_48, %c0_49, %c0_50] : memref<3x3x1x128xf32, #tpu.memory_space<vmem>>, vector<1x1x1x128xf32>
    %51 = vector.shape_cast %50 : vector<1x1x1x128xf32> to vector<1x128xf32>
    %52 = vector.broadcast %51 : vector<1x128xf32> to vector<288x128xf32>
    %53 = arith.mulf %49, %52 : vector<288x128xf32>
    %54 = arith.addf %47, %53 : vector<288x128xf32>
    %c0_51 = arith.constant 0 : index
    %c37 = arith.constant 37 : index
    %c0_52 = arith.constant 0 : index
    %55 = vector.load %arg1[%c0_51, %c37, %c0_52] : memref<1x326x128xf32, #tpu.memory_space<vmem>>, vector<1x288x128xf32>
    %56 = vector.shape_cast %55 : vector<1x288x128xf32> to vector<288x128xf32>
    %c2_53 = arith.constant 2 : index
    %c1_54 = arith.constant 1 : index
    %c0_55 = arith.constant 0 : index
    %c0_56 = arith.constant 0 : index
    %57 = vector.load %arg2[%c2_53, %c1_54, %c0_55, %c0_56] : memref<3x3x1x128xf32, #tpu.memory_space<vmem>>, vector<1x1x1x128xf32>
    %58 = vector.shape_cast %57 : vector<1x1x1x128xf32> to vector<1x128xf32>
    %59 = vector.broadcast %58 : vector<1x128xf32> to vector<288x128xf32>
    %60 = arith.mulf %56, %59 : vector<288x128xf32>
    %61 = arith.addf %54, %60 : vector<288x128xf32>
    %c0_57 = arith.constant 0 : index
    %c38 = arith.constant 38 : index
    %c0_58 = arith.constant 0 : index
    %62 = vector.load %arg1[%c0_57, %c38, %c0_58] : memref<1x326x128xf32, #tpu.memory_space<vmem>>, vector<1x288x128xf32>
    %63 = vector.shape_cast %62 : vector<1x288x128xf32> to vector<288x128xf32>
    %c2_59 = arith.constant 2 : index
    %c2_60 = arith.constant 2 : index
    %c0_61 = arith.constant 0 : index
    %c0_62 = arith.constant 0 : index
    %64 = vector.load %arg2[%c2_59, %c2_60, %c0_61, %c0_62] : memref<3x3x1x128xf32, #tpu.memory_space<vmem>>, vector<1x1x1x128xf32>
    %65 = vector.shape_cast %64 : vector<1x1x1x128xf32> to vector<1x128xf32>
    %66 = vector.broadcast %65 : vector<1x128xf32> to vector<288x128xf32>
    %67 = arith.mulf %63, %66 : vector<288x128xf32>
    %68 = arith.addf %61, %67 : vector<288x128xf32>
    %cst_63 = arith.constant 0.000000e+00 : f32
    %69 = vector.broadcast %cst_63 : f32 to vector<288x128xf32>
    %70 = arith.maximumf %68, %69 : vector<288x128xf32>
    %71 = vector.broadcast %4 : vector<288x1xf32> to vector<288x128xf32>
    %72 = arith.mulf %70, %71 : vector<288x128xf32>
    %73 = arith.truncf %72 : vector<288x128xf32> to vector<288x128xbf16>
    %c0_64 = arith.constant 0 : index
    %c19_65 = arith.constant 19 : index
    %c0_66 = arith.constant 0 : index
    %74 = vector.load %arg8[%c0_64, %c19_65, %c0_66] : memref<2x326x128xbf16, #tpu.memory_space<vmem>>, vector<1x288x128xbf16>
    %75 = vector.shape_cast %74 : vector<1x288x128xbf16> to vector<288x128xbf16>
    %76 = vector.shape_cast %73 : vector<288x128xbf16> to vector<1x288x128xbf16>
    tpu.vector_store %arg8[%c0_64, %c19_65, %c0_66], %76 {strides = array<i32>} : memref<2x326x128xbf16, #tpu.memory_space<vmem>>, vector<1x288x128xbf16>,
    %c0_i32 = arith.constant 0 : i32
    %c4_i32 = arith.constant 4 : i32
    %77 = arith.addi %c0_i32, %c4_i32 : i32
    %c1_i32 = arith.constant 1 : i32
    scf.for %arg9 = %c0_i32 to %77 step %c1_i32  : i32 {
      %c2_i32 = arith.constant 2 : i32
      %c0_i32_146 = arith.constant 0 : i32
      %140 = arith.cmpi eq, %c2_i32, %c0_i32_146 : i32
      %c1_i32_147 = arith.constant 1 : i32
      %141 = arith.select %140, %c1_i32_147, %c2_i32 : i32
      %142 = arith.remsi %arg9, %141 : i32
      %c0_i32_148 = arith.constant 0 : i32
      %143 = arith.cmpi ne, %142, %c0_i32_148 : i32
      %c0_i32_149 = arith.constant 0 : i32
      %144 = arith.cmpi slt, %142, %c0_i32_149 : i32
      %c0_i32_150 = arith.constant 0 : i32
      %145 = arith.cmpi slt, %141, %c0_i32_150 : i32
      %146 = arith.xori %144, %145 : i1
      %147 = arith.andi %146, %143 : i1
      %148 = arith.addi %142, %141 : i32
      %149 = arith.select %147, %148, %142 : i32
      %c1_i32_151 = arith.constant 1 : i32
      %150 = arith.subi %c1_i32_151, %149 : i32
      %cst_152 = arith.constant 0.000000e+00 : f32
      %151 = vector.broadcast %cst_152 : f32 to vector<288x128xf32>
      %152 = arith.index_cast %149 : i32 to index
      %c0_153 = arith.constant 0 : index
      %c0_154 = arith.constant 0 : index
      %153 = vector.load %arg8[%152, %c0_153, %c0_154] : memref<2x326x128xbf16, #tpu.memory_space<vmem>>, vector<1x288x128xbf16>
      %154 = vector.shape_cast %153 : vector<1x288x128xbf16> to vector<288x128xbf16>
      %155 = arith.index_cast %arg9 : i32 to index
      %c0_155 = arith.constant 0 : index
      %c0_156 = arith.constant 0 : index
      %c0_157 = arith.constant 0 : index
      %c0_158 = arith.constant 0 : index
      %156 = vector.load %arg3[%155, %c0_155, %c0_156, %c0_157, %c0_158] : memref<4x3x3x128x128xbf16, #tpu.memory_space<vmem>>, vector<1x1x1x128x128xbf16>
      %157 = vector.shape_cast %156 : vector<1x1x1x128x128xbf16> to vector<128x128xbf16>
      %cst_159 = arith.constant dense<0.000000e+00> : vector<288x128xf32>
      %158 = tpu.matmul %154, %157, %cst_159 {dimension_numbers = #tpu.dot_dimension_numbers<[1], [0], [0], [1], [0, 0, 1, 1], [], []>} : vector<288x128xbf16>, vector<128x128xbf16>, vector<288x128xf32> -> vector<288x128xf32>
      %159 = arith.addf %151, %158 : vector<288x128xf32>
      %160 = arith.index_cast %149 : i32 to index
      %c1_160 = arith.constant 1 : index
      %c0_161 = arith.constant 0 : index
      %161 = vector.load %arg8[%160, %c1_160, %c0_161] : memref<2x326x128xbf16, #tpu.memory_space<vmem>>, vector<1x288x128xbf16>
      %162 = vector.shape_cast %161 : vector<1x288x128xbf16> to vector<288x128xbf16>
      %163 = arith.index_cast %arg9 : i32 to index
      %c0_162 = arith.constant 0 : index
      %c1_163 = arith.constant 1 : index
      %c0_164 = arith.constant 0 : index
      %c0_165 = arith.constant 0 : index
      %164 = vector.load %arg3[%163, %c0_162, %c1_163, %c0_164, %c0_165] : memref<4x3x3x128x128xbf16, #tpu.memory_space<vmem>>, vector<1x1x1x128x128xbf16>
      %165 = vector.shape_cast %164 : vector<1x1x1x128x128xbf16> to vector<128x128xbf16>
      %cst_166 = arith.constant dense<0.000000e+00> : vector<288x128xf32>
      %166 = tpu.matmul %162, %165, %cst_166 {dimension_numbers = #tpu.dot_dimension_numbers<[1], [0], [0], [1], [0, 0, 1, 1], [], []>} : vector<288x128xbf16>, vector<128x128xbf16>, vector<288x128xf32> -> vector<288x128xf32>
      %167 = arith.addf %159, %166 : vector<288x128xf32>
      %168 = arith.index_cast %149 : i32 to index
      %c2_167 = arith.constant 2 : index
      %c0_168 = arith.constant 0 : index
      %169 = vector.load %arg8[%168, %c2_167, %c0_168] : memref<2x326x128xbf16, #tpu.memory_space<vmem>>, vector<1x288x128xbf16>
      %170 = vector.shape_cast %169 : vector<1x288x128xbf16> to vector<288x128xbf16>
      %171 = arith.index_cast %arg9 : i32 to index
      %c0_169 = arith.constant 0 : index
      %c2_170 = arith.constant 2 : index
      %c0_171 = arith.constant 0 : index
      %c0_172 = arith.constant 0 : index
      %172 = vector.load %arg3[%171, %c0_169, %c2_170, %c0_171, %c0_172] : memref<4x3x3x128x128xbf16, #tpu.memory_space<vmem>>, vector<1x1x1x128x128xbf16>
      %173 = vector.shape_cast %172 : vector<1x1x1x128x128xbf16> to vector<128x128xbf16>
      %cst_173 = arith.constant dense<0.000000e+00> : vector<288x128xf32>
      %174 = tpu.matmul %170, %173, %cst_173 {dimension_numbers = #tpu.dot_dimension_numbers<[1], [0], [0], [1], [0, 0, 1, 1], [], []>} : vector<288x128xbf16>, vector<128x128xbf16>, vector<288x128xf32> -> vector<288x128xf32>
      %175 = arith.addf %167, %174 : vector<288x128xf32>
      %176 = arith.index_cast %149 : i32 to index
      %c18_174 = arith.constant 18 : index
      %c0_175 = arith.constant 0 : index
      %177 = vector.load %arg8[%176, %c18_174, %c0_175] : memref<2x326x128xbf16, #tpu.memory_space<vmem>>, vector<1x288x128xbf16>
      %178 = vector.shape_cast %177 : vector<1x288x128xbf16> to vector<288x128xbf16>
      %179 = arith.index_cast %arg9 : i32 to index
      %c1_176 = arith.constant 1 : index
      %c0_177 = arith.constant 0 : index
      %c0_178 = arith.constant 0 : index
      %c0_179 = arith.constant 0 : index
      %180 = vector.load %arg3[%179, %c1_176, %c0_177, %c0_178, %c0_179] : memref<4x3x3x128x128xbf16, #tpu.memory_space<vmem>>, vector<1x1x1x128x128xbf16>
      %181 = vector.shape_cast %180 : vector<1x1x1x128x128xbf16> to vector<128x128xbf16>
      %cst_180 = arith.constant dense<0.000000e+00> : vector<288x128xf32>
      %182 = tpu.matmul %178, %181, %cst_180 {dimension_numbers = #tpu.dot_dimension_numbers<[1], [0], [0], [1], [0, 0, 1, 1], [], []>} : vector<288x128xbf16>, vector<128x128xbf16>, vector<288x128xf32> -> vector<288x128xf32>
      %183 = arith.addf %175, %182 : vector<288x128xf32>
      %184 = arith.index_cast %149 : i32 to index
      %c19_181 = arith.constant 19 : index
      %c0_182 = arith.constant 0 : index
      %185 = vector.load %arg8[%184, %c19_181, %c0_182] : memref<2x326x128xbf16, #tpu.memory_space<vmem>>, vector<1x288x128xbf16>
      %186 = vector.shape_cast %185 : vector<1x288x128xbf16> to vector<288x128xbf16>
      %187 = arith.index_cast %arg9 : i32 to index
      %c1_183 = arith.constant 1 : index
      %c1_184 = arith.constant 1 : index
      %c0_185 = arith.constant 0 : index
      %c0_186 = arith.constant 0 : index
      %188 = vector.load %arg3[%187, %c1_183, %c1_184, %c0_185, %c0_186] : memref<4x3x3x128x128xbf16, #tpu.memory_space<vmem>>, vector<1x1x1x128x128xbf16>
      %189 = vector.shape_cast %188 : vector<1x1x1x128x128xbf16> to vector<128x128xbf16>
      %cst_187 = arith.constant dense<0.000000e+00> : vector<288x128xf32>
      %190 = tpu.matmul %186, %189, %cst_187 {dimension_numbers = #tpu.dot_dimension_numbers<[1], [0], [0], [1], [0, 0, 1, 1], [], []>} : vector<288x128xbf16>, vector<128x128xbf16>, vector<288x128xf32> -> vector<288x128xf32>
      %191 = arith.addf %183, %190 : vector<288x128xf32>
      %192 = arith.index_cast %149 : i32 to index
      %c20_188 = arith.constant 20 : index
      %c0_189 = arith.constant 0 : index
      %193 = vector.load %arg8[%192, %c20_188, %c0_189] : memref<2x326x128xbf16, #tpu.memory_space<vmem>>, vector<1x288x128xbf16>
      %194 = vector.shape_cast %193 : vector<1x288x128xbf16> to vector<288x128xbf16>
      %195 = arith.index_cast %arg9 : i32 to index
      %c1_190 = arith.constant 1 : index
      %c2_191 = arith.constant 2 : index
      %c0_192 = arith.constant 0 : index
      %c0_193 = arith.constant 0 : index
      %196 = vector.load %arg3[%195, %c1_190, %c2_191, %c0_192, %c0_193] : memref<4x3x3x128x128xbf16, #tpu.memory_space<vmem>>, vector<1x1x1x128x128xbf16>
      %197 = vector.shape_cast %196 : vector<1x1x1x128x128xbf16> to vector<128x128xbf16>
      %cst_194 = arith.constant dense<0.000000e+00> : vector<288x128xf32>
      %198 = tpu.matmul %194, %197, %cst_194 {dimension_numbers = #tpu.dot_dimension_numbers<[1], [0], [0], [1], [0, 0, 1, 1], [], []>} : vector<288x128xbf16>, vector<128x128xbf16>, vector<288x128xf32> -> vector<288x128xf32>
      %199 = arith.addf %191, %198 : vector<288x128xf32>
      %200 = arith.index_cast %149 : i32 to index
      %c36_195 = arith.constant 36 : index
      %c0_196 = arith.constant 0 : index
      %201 = vector.load %arg8[%200, %c36_195, %c0_196] : memref<2x326x128xbf16, #tpu.memory_space<vmem>>, vector<1x288x128xbf16>
      %202 = vector.shape_cast %201 : vector<1x288x128xbf16> to vector<288x128xbf16>
      %203 = arith.index_cast %arg9 : i32 to index
      %c2_197 = arith.constant 2 : index
      %c0_198 = arith.constant 0 : index
      %c0_199 = arith.constant 0 : index
      %c0_200 = arith.constant 0 : index
      %204 = vector.load %arg3[%203, %c2_197, %c0_198, %c0_199, %c0_200] : memref<4x3x3x128x128xbf16, #tpu.memory_space<vmem>>, vector<1x1x1x128x128xbf16>
      %205 = vector.shape_cast %204 : vector<1x1x1x128x128xbf16> to vector<128x128xbf16>
      %cst_201 = arith.constant dense<0.000000e+00> : vector<288x128xf32>
      %206 = tpu.matmul %202, %205, %cst_201 {dimension_numbers = #tpu.dot_dimension_numbers<[1], [0], [0], [1], [0, 0, 1, 1], [], []>} : vector<288x128xbf16>, vector<128x128xbf16>, vector<288x128xf32> -> vector<288x128xf32>
      %207 = arith.addf %199, %206 : vector<288x128xf32>
      %208 = arith.index_cast %149 : i32 to index
      %c37_202 = arith.constant 37 : index
      %c0_203 = arith.constant 0 : index
      %209 = vector.load %arg8[%208, %c37_202, %c0_203] : memref<2x326x128xbf16, #tpu.memory_space<vmem>>, vector<1x288x128xbf16>
      %210 = vector.shape_cast %209 : vector<1x288x128xbf16> to vector<288x128xbf16>
      %211 = arith.index_cast %arg9 : i32 to index
      %c2_204 = arith.constant 2 : index
      %c1_205 = arith.constant 1 : index
      %c0_206 = arith.constant 0 : index
      %c0_207 = arith.constant 0 : index
      %212 = vector.load %arg3[%211, %c2_204, %c1_205, %c0_206, %c0_207] : memref<4x3x3x128x128xbf16, #tpu.memory_space<vmem>>, vector<1x1x1x128x128xbf16>
      %213 = vector.shape_cast %212 : vector<1x1x1x128x128xbf16> to vector<128x128xbf16>
      %cst_208 = arith.constant dense<0.000000e+00> : vector<288x128xf32>
      %214 = tpu.matmul %210, %213, %cst_208 {dimension_numbers = #tpu.dot_dimension_numbers<[1], [0], [0], [1], [0, 0, 1, 1], [], []>} : vector<288x128xbf16>, vector<128x128xbf16>, vector<288x128xf32> -> vector<288x128xf32>
      %215 = arith.addf %207, %214 : vector<288x128xf32>
      %216 = arith.index_cast %149 : i32 to index
      %c38_209 = arith.constant 38 : index
      %c0_210 = arith.constant 0 : index
      %217 = vector.load %arg8[%216, %c38_209, %c0_210] : memref<2x326x128xbf16, #tpu.memory_space<vmem>>, vector<1x288x128xbf16>
      %218 = vector.shape_cast %217 : vector<1x288x128xbf16> to vector<288x128xbf16>
      %219 = arith.index_cast %arg9 : i32 to index
      %c2_211 = arith.constant 2 : index
      %c2_212 = arith.constant 2 : index
      %c0_213 = arith.constant 0 : index
      %c0_214 = arith.constant 0 : index
      %220 = vector.load %arg3[%219, %c2_211, %c2_212, %c0_213, %c0_214] : memref<4x3x3x128x128xbf16, #tpu.memory_space<vmem>>, vector<1x1x1x128x128xbf16>
      %221 = vector.shape_cast %220 : vector<1x1x1x128x128xbf16> to vector<128x128xbf16>
      %cst_215 = arith.constant dense<0.000000e+00> : vector<288x128xf32>
      %222 = tpu.matmul %218, %221, %cst_215 {dimension_numbers = #tpu.dot_dimension_numbers<[1], [0], [0], [1], [0, 0, 1, 1], [], []>} : vector<288x128xbf16>, vector<128x128xbf16>, vector<288x128xf32> -> vector<288x128xf32>
      %223 = arith.addf %215, %222 : vector<288x128xf32>
      %224 = arith.index_cast %arg9 : i32 to index
      %c0_216 = arith.constant 0 : index
      %c0_217 = arith.constant 0 : index
      %225 = vector.load %arg4[%224, %c0_216, %c0_217] : memref<4x1x128xf32, #tpu.memory_space<vmem>>, vector<1x1x128xf32>
      %226 = vector.shape_cast %225 : vector<1x1x128xf32> to vector<1x128xf32>
      %227 = vector.broadcast %226 : vector<1x128xf32> to vector<288x128xf32>
      %228 = arith.addf %223, %227 : vector<288x128xf32>
      %cst_218 = arith.constant 0.000000e+00 : f32
      %229 = vector.broadcast %cst_218 : f32 to vector<288x128xf32>
      %230 = arith.maximumf %228, %229 : vector<288x128xf32>
      %231 = vector.broadcast %4 : vector<288x1xf32> to vector<288x128xf32>
      %232 = arith.mulf %230, %231 : vector<288x128xf32>
      %233 = arith.truncf %232 : vector<288x128xf32> to vector<288x128xbf16>
      %234 = arith.index_cast %150 : i32 to index
      %c19_219 = arith.constant 19 : index
      %c0_220 = arith.constant 0 : index
      %235 = vector.load %arg8[%234, %c19_219, %c0_220] : memref<2x326x128xbf16, #tpu.memory_space<vmem>>, vector<1x288x128xbf16>
      %236 = vector.shape_cast %235 : vector<1x288x128xbf16> to vector<288x128xbf16>
      %237 = vector.shape_cast %233 : vector<288x128xbf16> to vector<1x288x128xbf16>
      tpu.vector_store %arg8[%234, %c19_219, %c0_220], %237 {strides = array<i32>} : memref<2x326x128xbf16, #tpu.memory_space<vmem>>, vector<1x288x128xbf16>,
    }
    %c4_i32_67 = arith.constant 4 : i32
    %cst_68 = arith.constant 0.000000e+00 : f32
    %78 = vector.broadcast %cst_68 : f32 to vector<288x128xf32>
    %c0_69 = arith.constant 0 : index
    %c0_70 = arith.constant 0 : index
    %c0_71 = arith.constant 0 : index
    %79 = vector.load %arg8[%c0_69, %c0_70, %c0_71] : memref<2x326x128xbf16, #tpu.memory_space<vmem>>, vector<1x288x128xbf16>
    %80 = vector.shape_cast %79 : vector<1x288x128xbf16> to vector<288x128xbf16>
    %c0_72 = arith.constant 0 : index
    %c0_73 = arith.constant 0 : index
    %c0_74 = arith.constant 0 : index
    %c0_75 = arith.constant 0 : index
    %81 = vector.load %arg5[%c0_72, %c0_73, %c0_74, %c0_75] : memref<3x3x128x128xbf16, #tpu.memory_space<vmem>>, vector<1x1x128x128xbf16>
    %82 = vector.shape_cast %81 : vector<1x1x128x128xbf16> to vector<128x128xbf16>
    %cst_76 = arith.constant dense<0.000000e+00> : vector<288x128xf32>
    %83 = tpu.matmul %80, %82, %cst_76 {dimension_numbers = #tpu.dot_dimension_numbers<[1], [0], [0], [1], [0, 0, 1, 1], [], []>} : vector<288x128xbf16>, vector<128x128xbf16>, vector<288x128xf32> -> vector<288x128xf32>
    %84 = arith.addf %78, %83 : vector<288x128xf32>
    %c0_77 = arith.constant 0 : index
    %c1_78 = arith.constant 1 : index
    %c0_79 = arith.constant 0 : index
    %85 = vector.load %arg8[%c0_77, %c1_78, %c0_79] : memref<2x326x128xbf16, #tpu.memory_space<vmem>>, vector<1x288x128xbf16>
    %86 = vector.shape_cast %85 : vector<1x288x128xbf16> to vector<288x128xbf16>
    %c0_80 = arith.constant 0 : index
    %c1_81 = arith.constant 1 : index
    %c0_82 = arith.constant 0 : index
    %c0_83 = arith.constant 0 : index
    %87 = vector.load %arg5[%c0_80, %c1_81, %c0_82, %c0_83] : memref<3x3x128x128xbf16, #tpu.memory_space<vmem>>, vector<1x1x128x128xbf16>
    %88 = vector.shape_cast %87 : vector<1x1x128x128xbf16> to vector<128x128xbf16>
    %cst_84 = arith.constant dense<0.000000e+00> : vector<288x128xf32>
    %89 = tpu.matmul %86, %88, %cst_84 {dimension_numbers = #tpu.dot_dimension_numbers<[1], [0], [0], [1], [0, 0, 1, 1], [], []>} : vector<288x128xbf16>, vector<128x128xbf16>, vector<288x128xf32> -> vector<288x128xf32>
    %90 = arith.addf %84, %89 : vector<288x128xf32>
    %c0_85 = arith.constant 0 : index
    %c2_86 = arith.constant 2 : index
    %c0_87 = arith.constant 0 : index
    %91 = vector.load %arg8[%c0_85, %c2_86, %c0_87] : memref<2x326x128xbf16, #tpu.memory_space<vmem>>, vector<1x288x128xbf16>
    %92 = vector.shape_cast %91 : vector<1x288x128xbf16> to vector<288x128xbf16>
    %c0_88 = arith.constant 0 : index
    %c2_89 = arith.constant 2 : index
    %c0_90 = arith.constant 0 : index
    %c0_91 = arith.constant 0 : index
    %93 = vector.load %arg5[%c0_88, %c2_89, %c0_90, %c0_91] : memref<3x3x128x128xbf16, #tpu.memory_space<vmem>>, vector<1x1x128x128xbf16>
    %94 = vector.shape_cast %93 : vector<1x1x128x128xbf16> to vector<128x128xbf16>
    %cst_92 = arith.constant dense<0.000000e+00> : vector<288x128xf32>
    %95 = tpu.matmul %92, %94, %cst_92 {dimension_numbers = #tpu.dot_dimension_numbers<[1], [0], [0], [1], [0, 0, 1, 1], [], []>} : vector<288x128xbf16>, vector<128x128xbf16>, vector<288x128xf32> -> vector<288x128xf32>
    %96 = arith.addf %90, %95 : vector<288x128xf32>
    %c0_93 = arith.constant 0 : index
    %c18_94 = arith.constant 18 : index
    %c0_95 = arith.constant 0 : index
    %97 = vector.load %arg8[%c0_93, %c18_94, %c0_95] : memref<2x326x128xbf16, #tpu.memory_space<vmem>>, vector<1x288x128xbf16>
    %98 = vector.shape_cast %97 : vector<1x288x128xbf16> to vector<288x128xbf16>
    %c1_96 = arith.constant 1 : index
    %c0_97 = arith.constant 0 : index
    %c0_98 = arith.constant 0 : index
    %c0_99 = arith.constant 0 : index
    %99 = vector.load %arg5[%c1_96, %c0_97, %c0_98, %c0_99] : memref<3x3x128x128xbf16, #tpu.memory_space<vmem>>, vector<1x1x128x128xbf16>
    %100 = vector.shape_cast %99 : vector<1x1x128x128xbf16> to vector<128x128xbf16>
    %cst_100 = arith.constant dense<0.000000e+00> : vector<288x128xf32>
    %101 = tpu.matmul %98, %100, %cst_100 {dimension_numbers = #tpu.dot_dimension_numbers<[1], [0], [0], [1], [0, 0, 1, 1], [], []>} : vector<288x128xbf16>, vector<128x128xbf16>, vector<288x128xf32> -> vector<288x128xf32>
    %102 = arith.addf %96, %101 : vector<288x128xf32>
    %c0_101 = arith.constant 0 : index
    %c19_102 = arith.constant 19 : index
    %c0_103 = arith.constant 0 : index
    %103 = vector.load %arg8[%c0_101, %c19_102, %c0_103] : memref<2x326x128xbf16, #tpu.memory_space<vmem>>, vector<1x288x128xbf16>
    %104 = vector.shape_cast %103 : vector<1x288x128xbf16> to vector<288x128xbf16>
    %c1_104 = arith.constant 1 : index
    %c1_105 = arith.constant 1 : index
    %c0_106 = arith.constant 0 : index
    %c0_107 = arith.constant 0 : index
    %105 = vector.load %arg5[%c1_104, %c1_105, %c0_106, %c0_107] : memref<3x3x128x128xbf16, #tpu.memory_space<vmem>>, vector<1x1x128x128xbf16>
    %106 = vector.shape_cast %105 : vector<1x1x128x128xbf16> to vector<128x128xbf16>
    %cst_108 = arith.constant dense<0.000000e+00> : vector<288x128xf32>
    %107 = tpu.matmul %104, %106, %cst_108 {dimension_numbers = #tpu.dot_dimension_numbers<[1], [0], [0], [1], [0, 0, 1, 1], [], []>} : vector<288x128xbf16>, vector<128x128xbf16>, vector<288x128xf32> -> vector<288x128xf32>
    %108 = arith.addf %102, %107 : vector<288x128xf32>
    %c0_109 = arith.constant 0 : index
    %c20_110 = arith.constant 20 : index
    %c0_111 = arith.constant 0 : index
    %109 = vector.load %arg8[%c0_109, %c20_110, %c0_111] : memref<2x326x128xbf16, #tpu.memory_space<vmem>>, vector<1x288x128xbf16>
    %110 = vector.shape_cast %109 : vector<1x288x128xbf16> to vector<288x128xbf16>
    %c1_112 = arith.constant 1 : index
    %c2_113 = arith.constant 2 : index
    %c0_114 = arith.constant 0 : index
    %c0_115 = arith.constant 0 : index
    %111 = vector.load %arg5[%c1_112, %c2_113, %c0_114, %c0_115] : memref<3x3x128x128xbf16, #tpu.memory_space<vmem>>, vector<1x1x128x128xbf16>
    %112 = vector.shape_cast %111 : vector<1x1x128x128xbf16> to vector<128x128xbf16>
    %cst_116 = arith.constant dense<0.000000e+00> : vector<288x128xf32>
    %113 = tpu.matmul %110, %112, %cst_116 {dimension_numbers = #tpu.dot_dimension_numbers<[1], [0], [0], [1], [0, 0, 1, 1], [], []>} : vector<288x128xbf16>, vector<128x128xbf16>, vector<288x128xf32> -> vector<288x128xf32>
    %114 = arith.addf %108, %113 : vector<288x128xf32>
    %c0_117 = arith.constant 0 : index
    %c36_118 = arith.constant 36 : index
    %c0_119 = arith.constant 0 : index
    %115 = vector.load %arg8[%c0_117, %c36_118, %c0_119] : memref<2x326x128xbf16, #tpu.memory_space<vmem>>, vector<1x288x128xbf16>
    %116 = vector.shape_cast %115 : vector<1x288x128xbf16> to vector<288x128xbf16>
    %c2_120 = arith.constant 2 : index
    %c0_121 = arith.constant 0 : index
    %c0_122 = arith.constant 0 : index
    %c0_123 = arith.constant 0 : index
    %117 = vector.load %arg5[%c2_120, %c0_121, %c0_122, %c0_123] : memref<3x3x128x128xbf16, #tpu.memory_space<vmem>>, vector<1x1x128x128xbf16>
    %118 = vector.shape_cast %117 : vector<1x1x128x128xbf16> to vector<128x128xbf16>
    %cst_124 = arith.constant dense<0.000000e+00> : vector<288x128xf32>
    %119 = tpu.matmul %116, %118, %cst_124 {dimension_numbers = #tpu.dot_dimension_numbers<[1], [0], [0], [1], [0, 0, 1, 1], [], []>} : vector<288x128xbf16>, vector<128x128xbf16>, vector<288x128xf32> -> vector<288x128xf32>
    %120 = arith.addf %114, %119 : vector<288x128xf32>
    %c0_125 = arith.constant 0 : index
    %c37_126 = arith.constant 37 : index
    %c0_127 = arith.constant 0 : index
    %121 = vector.load %arg8[%c0_125, %c37_126, %c0_127] : memref<2x326x128xbf16, #tpu.memory_space<vmem>>, vector<1x288x128xbf16>
    %122 = vector.shape_cast %121 : vector<1x288x128xbf16> to vector<288x128xbf16>
    %c2_128 = arith.constant 2 : index
    %c1_129 = arith.constant 1 : index
    %c0_130 = arith.constant 0 : index
    %c0_131 = arith.constant 0 : index
    %123 = vector.load %arg5[%c2_128, %c1_129, %c0_130, %c0_131] : memref<3x3x128x128xbf16, #tpu.memory_space<vmem>>, vector<1x1x128x128xbf16>
    %124 = vector.shape_cast %123 : vector<1x1x128x128xbf16> to vector<128x128xbf16>
    %cst_132 = arith.constant dense<0.000000e+00> : vector<288x128xf32>
    %125 = tpu.matmul %122, %124, %cst_132 {dimension_numbers = #tpu.dot_dimension_numbers<[1], [0], [0], [1], [0, 0, 1, 1], [], []>} : vector<288x128xbf16>, vector<128x128xbf16>, vector<288x128xf32> -> vector<288x128xf32>
    %126 = arith.addf %120, %125 : vector<288x128xf32>
    %c0_133 = arith.constant 0 : index
    %c38_134 = arith.constant 38 : index
    %c0_135 = arith.constant 0 : index
    %127 = vector.load %arg8[%c0_133, %c38_134, %c0_135] : memref<2x326x128xbf16, #tpu.memory_space<vmem>>, vector<1x288x128xbf16>
    %128 = vector.shape_cast %127 : vector<1x288x128xbf16> to vector<288x128xbf16>
    %c2_136 = arith.constant 2 : index
    %c2_137 = arith.constant 2 : index
    %c0_138 = arith.constant 0 : index
    %c0_139 = arith.constant 0 : index
    %129 = vector.load %arg5[%c2_136, %c2_137, %c0_138, %c0_139] : memref<3x3x128x128xbf16, #tpu.memory_space<vmem>>, vector<1x1x128x128xbf16>
    %130 = vector.shape_cast %129 : vector<1x1x128x128xbf16> to vector<128x128xbf16>
    %cst_140 = arith.constant dense<0.000000e+00> : vector<288x128xf32>
    %131 = tpu.matmul %128, %130, %cst_140 {dimension_numbers = #tpu.dot_dimension_numbers<[1], [0], [0], [1], [0, 0, 1, 1], [], []>} : vector<288x128xbf16>, vector<128x128xbf16>, vector<288x128xf32> -> vector<288x128xf32>
    %132 = arith.addf %126, %131 : vector<288x128xf32>
    %c0_141 = arith.constant 0 : index
    %c19_142 = arith.constant 19 : index
    %c71 = arith.constant 71 : index
    %133 = vector.load %arg1[%c0_141, %c19_142, %c71] : memref<1x326x128xf32, #tpu.memory_space<vmem>>, vector<1x288x1xf32>
    %134 = vector.shape_cast %133 : vector<1x288x1xf32> to vector<288x1xf32>
    %135 = vector.broadcast %134 : vector<288x1xf32> to vector<288x128xf32>
    %136 = arith.subf %135, %132 : vector<288x128xf32>
    %c0_143 = arith.constant 0 : index
    %c0_144 = arith.constant 0 : index
    %c0_145 = arith.constant 0 : index
    %137 = vector.load %arg7[%c0_143, %c0_144, %c0_145] : memref<1x288x128xf32, #tpu.memory_space<vmem>>, vector<1x288x128xf32>
    %138 = vector.shape_cast %137 : vector<1x288x128xf32> to vector<288x128xf32>
    %139 = vector.shape_cast %136 : vector<288x128xf32> to vector<1x288x128xf32>
    tpu.vector_store %arg7[%c0_143, %c0_144, %c0_145], %139 {strides = array<i32>} : memref<1x288x128xf32, #tpu.memory_space<vmem>>, vector<1x288x128xf32>,
    return
  }
  func.func @transform_0(%arg0: i32) -> (i32, i32, i32) {
    %c0_i32 = arith.constant 0 : i32
    %c0_i32_0 = arith.constant 0 : i32
    %c0_i32_1 = arith.constant 0 : i32
    return %arg0, %c0_i32, %c0_i32_0 : i32, i32, i32
  }
  func.func @transform_1(%arg0: i32) -> (i32, i32, i32, i32) {
    %c0_i32 = arith.constant 0 : i32
    %c0_i32_0 = arith.constant 0 : i32
    %c0_i32_1 = arith.constant 0 : i32
    %c0_i32_2 = arith.constant 0 : i32
    %c0_i32_3 = arith.constant 0 : i32
    return %c0_i32, %c0_i32_0, %c0_i32_1, %c0_i32_2 : i32, i32, i32, i32
  }
  func.func @transform_2(%arg0: i32) -> (i32, i32, i32, i32, i32) {
    %c0_i32 = arith.constant 0 : i32
    %c0_i32_0 = arith.constant 0 : i32
    %c0_i32_1 = arith.constant 0 : i32
    %c0_i32_2 = arith.constant 0 : i32
    %c0_i32_3 = arith.constant 0 : i32
    %c0_i32_4 = arith.constant 0 : i32
    return %c0_i32, %c0_i32_0, %c0_i32_1, %c0_i32_2, %c0_i32_3 : i32, i32, i32, i32, i32
  }
  func.func @transform_3(%arg0: i32) -> (i32, i32, i32) {
    %c0_i32 = arith.constant 0 : i32
    %c0_i32_0 = arith.constant 0 : i32
    %c0_i32_1 = arith.constant 0 : i32
    %c0_i32_2 = arith.constant 0 : i32
    return %c0_i32, %c0_i32_0, %c0_i32_1 : i32, i32, i32
  }
  func.func @transform_4(%arg0: i32) -> (i32, i32, i32, i32) {
    %c0_i32 = arith.constant 0 : i32
    %c0_i32_0 = arith.constant 0 : i32
    %c0_i32_1 = arith.constant 0 : i32
    %c0_i32_2 = arith.constant 0 : i32
    %c0_i32_3 = arith.constant 0 : i32
    return %c0_i32, %c0_i32_0, %c0_i32_1, %c0_i32_2 : i32, i32, i32, i32
  }
  func.func @transform_5(%arg0: i32) -> (i32, i32) {
    %c0_i32 = arith.constant 0 : i32
    %c0_i32_0 = arith.constant 0 : i32
    %c0_i32_1 = arith.constant 0 : i32
    return %c0_i32, %c0_i32_0 : i32, i32
  }
  func.func @transform_6(%arg0: i32) -> (i32, i32, i32) {
    %c0_i32 = arith.constant 0 : i32
    %c0_i32_0 = arith.constant 0 : i32
    %c0_i32_1 = arith.constant 0 : i32
    return %arg0, %c0_i32, %c0_i32_0 : i32, i32, i32
  }
}

</mosaic_0001>

<bundles_post_ra>
// kernel: squeeze.1
= control target key start
LH: loop header
LB: loop body
LE: loop exit
PB: predicated region body
PF: predicated region fallthrough
CT: control target
= control target key end

     0   :  { %vm106_vm0 = vcmask 1014784   ;;  %s164_s12 = smov 4   ;;  %s165_s13 = smov 110   ;;  %vm119_vm1 = vcmask 1031168   ;;  %vm15_vm2 = vcmask 146432   ;;  %vm110_vm3 = vcmask 31744   ;;  %s265_s0 = inlined_call_operand.vmem [shape: f32[2,288], index: 0, kind: input, shape index: {}]   ;;  %s266_s1 = inlined_call_operand.vmem [shape: f32[2,16,18], index: 1, kind: output, shape index: {}]  }
   0x1   :  { %v129_v0 = vld [vmem:[%s265_s0 + $0x4] sm:$0x3]  ;;  %v130_v1 = vld [vmem:[%s265_s0 + $0x2] sm:$0x3]  ;;  %v12_v2 = vld [vmem:[%s265_s0] sm:$0x3] }
   0x2   :  { %7 = vst [vmem:[#allocation0] sm:$0x3] %v129_v0  ;;  %s163_s0 = smov 114   ;;  %s166_s14 = smov 112   ;;  %vm113_vm4 = vcmask 146464   ;;  %vm123_vm5 = vcmask 15360  }
   0x3   :  { %11 = vst [vmem:[#allocation0 + $0x10] sm:$0x3] %v130_v1  ;;  %s167_s15 = smov 2   ;;  %s168_s16 = smov 94   ;;  %vm126_vm6 = vcmask 146448  }
   0x4   :  { %13 = vst [vmem:[#allocation0 + $0x8] sm:$0x3] %v12_v2  ;;  %s169_s17 = smov 92   ;;  %s170_s18 = smov 76  }
   0x5   :  { %s171_s19 = smov 74   ;;  %s172_s20 = smov 58  }
   0x6   :  { %s173_s21 = smov 56   ;;  %s174_s22 = smov 40  }
   0x7   :  { %s175_s23 = smov 38   ;;  %s176_s24 = smov 22  }
   0x8   :  { %s177_s25 = smov 20  }
   0x9   :  { %v105_v3 = vld [vmem:[#allocation0] sm:$0x3]  }
   0xa   :  { %v18_v4 = vld [vmem:[#allocation0] sm:$0x3]   ;;  %v103_v5 = vld [vmem:[#allocation0 + $0x10] sm:$0x3]  }
   0xb   :  { %19 = vrot.lane.b32.xlu0 %v18_v4, %s163_s0  ;;  %v107_v6 = vsel %vm106_vm0, %v105_v3, %v103_v5  ;;  %v31_v7 = vld [vmem:[#allocation0 + $0x8] sm:$0x3]   ;;  %v118_v9 = vld [vmem:[#allocation0 + $0x10] sm:$0x3]  }
   0xc   :  { %108 = vrot.lane.b32.xlu1 %v107_v6, %s164_s12  ;;  %32 = vrot.lane.b32.xlu2 %v31_v7, %s165_s13  ;;  %v116_v8 = vld [vmem:[#allocation0 + $0x8] sm:$0x3]   ;;  %v25_v10 = vld [vmem:[#allocation0 + $0x10] sm:$0x3]  }
   0xd   :  { %v120_v11 = vsel %vm119_vm1, %v118_v9, %v116_v8  ;;  %v38_v12 = vld [vmem:[#allocation0 + $0x10] sm:$0x3]   ;;  %v44_v13 = vld [vmem:[#allocation0 + $0x8] sm:$0x3]  }
   0xe   :  { %v51_v14 = vld [vmem:[#allocation0 + $0x10] sm:$0x3]   ;;  %v57_v15 = vld [vmem:[#allocation0 + $0x8] sm:$0x3]  }
   0xf   :  { %v64_v16 = vld [vmem:[#allocation0 + $0x10] sm:$0x3]   ;;  %v70_v17 = vld [vmem:[#allocation0 + $0x8] sm:$0x3]  }
  0x10   :  { %v77_v18 = vld [vmem:[#allocation0 + $0x10] sm:$0x3]   ;;  %v83_v19 = vld [vmem:[#allocation0 + $0x8] sm:$0x3]  }
  0x11   :  { %v90_v20 = vld [vmem:[#allocation0 + $0x10] sm:$0x3]   ;;  %v96_v21 = vld [vmem:[#allocation0 + $0x8] sm:$0x3]  }
  0x12   :  { %v14_v22 = vld [vmem:[#allocation0 + $0x8] sm:$0x3]  }
  0x13   :  { %26 = vrot.lane.b32.xlu0 %v25_v10, %s166_s14  ;;  %16 = vst.msk [vmem:[%s266_s1] ss:$16 sm:$0x3] %vm15_vm2, %v14_v22  }
  0x14   :  { %121 = vrot.lane.b32.xlu1 %v120_v11, %s167_s15  ;;  %39 = vrot.lane.b32.xlu2 %v38_v12, %s168_s16 }
  0x1b   :  { %45 = vrot.lane.b32.xlu0 %v44_v13, %s169_s17 }
  0x1c   :  { %52 = vrot.lane.b32.xlu1 %v51_v14, %s170_s18  ;;  %58 = vrot.lane.b32.xlu2 %v57_v15, %s171_s19 }
  0x23   :  { %65 = vrot.lane.b32.xlu0 %v64_v16, %s172_s20 }
  0x24   :  { %71 = vrot.lane.b32.xlu1 %v70_v17, %s173_s21  ;;  %78 = vrot.lane.b32.xlu2 %v77_v18, %s174_s22 }
  0x2b   :  { %84 = vrot.lane.b32.xlu0 %v83_v19, %s175_s23 }
  0x2c   :  { %91 = vrot.lane.b32.xlu1 %v90_v20, %s176_s24  ;;  %97 = vrot.lane.b32.xlu2 %v96_v21, %s177_s25 }
  0x66   :  { %v33_v23 = vpop.permute.xlu2 %32  }
  0x67   :  { %133 = vst.msk [vmem:[%s266_s1 + $0x1] ss:$16 sm:$0x3] %vm15_vm2, %v33_v23  }
  0x6e   :  { %v40_v24 = vpop.permute.xlu2 %39  }
  0x6f   :  { %134 = vst.msk [vmem:[%s266_s1 + $0x9] ss:$16 sm:$0x3] %vm15_vm2, %v40_v24  }
  0x76   :  { %v59_v25 = vpop.permute.xlu2 %58  }
  0x77   :  { %137 = vst.msk [vmem:[%s266_s1 + $0x3] ss:$16 sm:$0x3] %vm15_vm2, %v59_v25  }
  0x7d   :  { %v20_v26 = vpop.permute.xlu0 %19  }
  0x7e   :  { %131 = vst.msk [vmem:[%s266_s1 + $0xf] ss:$16 sm:$0x3] %vm15_vm2, %v20_v26   ;;  %v109_v27 = vpop.permute.xlu1 %108   ;;  %v79_v28 = vpop.permute.xlu2 %78  }
  0x7f   :  { %144 = vst.msk [vmem:[%s266_s1 + $0xe] ss:$16 sm:$0x3] %vm110_vm3, %v109_v27  }
  0x80   :  { %145 = vst.msk [vmem:[%s266_s1 + $0xe] ss:$16 sm:$0x3] %vm113_vm4, %v109_v27  }
  0x81   :  { %140 = vst.msk [vmem:[%s266_s1 + $0xc] ss:$16 sm:$0x3] %vm15_vm2, %v79_v28  }
  0x85   :  { %v27_v29 = vpop.permute.xlu0 %26  }
  0x86   :  { %132 = vst.msk [vmem:[%s266_s1 + $0x8] ss:$16 sm:$0x3] %vm15_vm2, %v27_v29   ;;  %v122_v30 = vpop.permute.xlu1 %121   ;;  %v98_v31 = vpop.permute.xlu2 %97  }
  0x87   :  { %146 = vst.msk [vmem:[%s266_s1 + $0x7] ss:$16 sm:$0x3] %vm123_vm5, %v122_v30  }
  0x88   :  { %147 = vst.msk [vmem:[%s266_s1 + $0x7] ss:$16 sm:$0x3] %vm126_vm6, %v122_v30  }
  0x89   :  { %143 = vst.msk [vmem:[%s266_s1 + $0x6] ss:$16 sm:$0x3] %vm15_vm2, %v98_v31  }
  0x8d   :  { %v46_v32 = vpop.permute.xlu0 %45  }
  0x8e   :  { %135 = vst.msk [vmem:[%s266_s1 + $0x2] ss:$16 sm:$0x3] %vm15_vm2, %v46_v32   ;;  %v53_v33 = vpop.permute.xlu1 %52  }
  0x8f   :  { %136 = vst.msk [vmem:[%s266_s1 + $0xa] ss:$16 sm:$0x3] %vm15_vm2, %v53_v33  }
  0x95   :  { %v66_v34 = vpop.permute.xlu0 %65  }
  0x96   :  { %138 = vst.msk [vmem:[%s266_s1 + $0xb] ss:$16 sm:$0x3] %vm15_vm2, %v66_v34   ;;  %v72_v35 = vpop.permute.xlu1 %71  }
  0x97   :  { %139 = vst.msk [vmem:[%s266_s1 + $0x4] ss:$16 sm:$0x3] %vm15_vm2, %v72_v35  }
  0x9d   :  { %v85_v36 = vpop.permute.xlu0 %84  }
  0x9e   :  { %141 = vst.msk [vmem:[%s266_s1 + $0x5] ss:$16 sm:$0x3] %vm15_vm2, %v85_v36   ;;  %v92_v37 = vpop.permute.xlu1 %91  }
  0x9f   :  { %142 = vst.msk [vmem:[%s266_s1 + $0xd] ss:$16 sm:$0x3] %vm15_vm2, %v92_v37  }

// kernel: dncnn_pallas.1
= control target key start
LH: loop header
LB: loop body
LE: loop exit
PB: predicated region body
PF: predicated region fallthrough
CT: control target
= control target key end

     0   :  { %s10704_s21 = smov 0   ;;  %s14573_s0 = inlined_call_operand.vmem [shape: f32[2,326,128], index: 0, kind: input, shape index: {}]   ;;  %s14574_s1 = inlined_call_operand.vmem [shape: f32[3,3,1,128], index: 1, kind: input, shape index: {}]   ;;  %s14575_s2 = inlined_call_operand.vmem [shape: bf16[4,3,3,128,128], index: 2, kind: input, shape index: {}]   ;;  %s14576_s3 = inlined_call_operand.vmem [shape: f32[4,1,128], index: 3, kind: input, shape index: {}]   ;;  %s14577_s4 = inlined_call_operand.vmem [shape: bf16[3,3,128,128], index: 4, kind: input, shape index: {}]   ;;  %s14578_s5 = inlined_call_operand.vmem [shape: f32[288,1], index: 5, kind: input, shape index: {}]   ;;  %s14579_s6 = inlined_call_operand.vmem [shape: f32[2,288,128], index: 6, kind: output, shape index: {}]  }
   0x1 LB: > { %s8963_s22 = sadd.s32 4294967295, %s10661_s21   ;;  %p8967_p0 = scmp.ge.s32.totalorder %s10661_s21, 1  ;;  %s10661_s21 = sphi %s10704_s21, %s16_s21  }
   0x2   : > { %p212_p1 = scmp.lt.s32.totalorder %s10661_s21, 3 }
   0x4   : > { %p213_p2 = pnand %p8967_p0, %p212_p1 }
   0x6   : > { %216 = sbr.rel (%p213_p2) target bundleno = 1980 (0x7bc), region = 44 }
   0xb   : > { %v283_v0 = vld [vmem:[%s14578_s5 + $0x20] sm:$0xff]  ;;  %v281_v1 = vld [vmem:[%s14578_s5 + $0x10] sm:$0xff]  ;;  %v10667_v3 = vmov 0   ;;  %v284_v4 = vld [vmem:[%s14578_s5 + $0x28] sm:$0xff]  ;;  %p242_p3 = scmp.lt.s32.totalorder %s8963_s22, 1  ;;  %vm255_vm1 = vcmask 1041408  }
   0xc   : > { %v279_v2 = vld [vmem:[%s14578_s5] sm:$0xff]  ;;  %10567 = vset.pattern.permute.xlu2 %v10667_v3  ;;  %253 = vst [vmem:[#allocation2] sm:$0xf] %v10667_v3  ;;  %10566 = vset.pattern.permute.xlu1 %v10667_v3  ;;  %v282_v5 = vld [vmem:[%s14578_s5 + $0x18] sm:$0xff]  ;;  %v280_v6 = vld [vmem:[%s14578_s5 + $0x8] sm:$0xff]  ;;  %vm266_vm3 = vcmask 1043457  }
   0xd   : > { %254 = vst [vmem:[#allocation2 + $0x4] sm:$0xf] %v10667_v3  ;;  %10565 = vset.pattern.permute.xlu0 %v10667_v3  ;;  %1321 = vperm.xlu2 %10567, %v283_v0   ;;  %v287_v7 = vld [vmem:[%s14578_s5 + $0x40] sm:$0xff]  ;;  %v286_v8 = vld [vmem:[%s14578_s5 + $0x38] sm:$0xff]  ;;  %v285_v9 = vld [vmem:[%s14578_s5 + $0x30] sm:$0xff]  ;;  %s14785_s22 = smov (!%p242_p3, %s8963_s22), 1 }
   0xe   : > { %261 = vst [vmem:[#allocation2 + $0xa4] sm:$0xf] %v10667_v3  ;;  %1311 = vperm.xlu1 %10566, %v281_v1   ;;  %1301 = vperm.xlu0 %10565, %v279_v2   ;;  %v290_v10 = vld [vmem:[%s14578_s5 + $0x58] sm:$0xff]  ;;  %v289_v11 = vld [vmem:[%s14578_s5 + $0x50] sm:$0xff]  ;;  %v288_v12 = vld [vmem:[%s14578_s5 + $0x48] sm:$0xff]  ;;  %s10545_s23 = smul.u32 328, %s14785_s22 }
   0xf   : > { %262 = vst [vmem:[#allocation2 + $0xa8] sm:$0xf] %v10667_v3  ;;  %v293_v13 = vld [vmem:[%s14578_s5 + $0x70] sm:$0xff]  ;;  %v292_v14 = vld [vmem:[%s14578_s5 + $0x68] sm:$0xff]  ;;  %v291_v15 = vld [vmem:[%s14578_s5 + $0x60] sm:$0xff]  ;;  %s10546_s30 = smul.u32 288, %s14785_s22 }
  0x10   : > { %272 = vst [vmem:[#allocation2 + $0x9c] sm:$0xf] %v10667_v3  ;;  %v296_v16 = vld [vmem:[%s14578_s5 + $0x88] sm:$0xff]  ;;  %v295_v17 = vld [vmem:[%s14578_s5 + $0x80] sm:$0xff]  ;;  %v294_v18 = vld [vmem:[%s14578_s5 + $0x78] sm:$0xff]  ;;  %s10809_s12 = scalar_lea.vmem %s14573_s0, %s10545_s23  ;;  %s12136_s27 = smov 0  }
  0x11   : > { %273 = vst [vmem:[#allocation2 + $0xa0] sm:$0x7] %v10667_v3  ;;  %v299_v19 = vld [vmem:[%s14578_s5 + $0xa0] sm:$0xff]  ;;  %v298_v20 = vld [vmem:[%s14578_s5 + $0x98] sm:$0xff]  ;;  %v297_v21 = vld [vmem:[%s14578_s5 + $0x90] sm:$0xff]  ;;  %s11216_s22 = scalar_lea.vmem %s14579_s6, %s10546_s30 }
  0x12   : > { %277 = vst [vmem:[#allocation2 + $0x140] sm:$0xf] %v10667_v3  ;;  %v302_v22 = vld [vmem:[%s14578_s5 + $0xb8] sm:$0xff]  ;;  %v301_v23 = vld [vmem:[%s14578_s5 + $0xb0] sm:$0xff]  ;;  %v300_v24 = vld [vmem:[%s14578_s5 + $0xa8] sm:$0xff] }
  0x13   : > { %278 = vst [vmem:[#allocation2 + $0x144] sm:$0x7] %v10667_v3  ;;  %v10794_v25 = vld [vmem:[%s14574_s1] ss:$0 sm:$0xff]  ;;  %v10799_v26 = vld [vmem:[%s14574_s1 + $0x1] ss:$0 sm:$0xff] }
  0x14   : > { %v10804_v27 = vld [vmem:[%s14574_s1 + $0x2] ss:$0 sm:$0xff]  ;;  %v305_v28 = vld [vmem:[%s14578_s5 + $0xd0] sm:$0xff]  ;;  %v10817_v29 = vld [vmem:[%s14574_s1 + $0x3] ss:$0 sm:$0xff] }
  0x15   : > { %1326 = vperm.xlu2 %10567, %v284_v4   ;;  %v10822_v30 = vld [vmem:[%s14574_s1 + $0x4] ss:$0 sm:$0xff]  ;;  %v304_v34 = vld [vmem:[%s14578_s5 + $0xc8] sm:$0xff]  ;;  %v10835_v37 = vld [vmem:[%s10809_s12 + $0x32] sm:$0xff]  ;;  %vm256_vm0 = vsmask.f32 1280 }
  0x16   : > { %1316 = vperm.xlu1 %10566, %v282_v5   ;;  %1306 = vperm.xlu0 %10565, %v280_v6   ;;  %v319_v31 = vld [vmem:[%s10809_s12 + $0x20] sm:$0xff]  ;;  %v736_v39 = vld [vmem:[%s10809_s12 + $0x33] sm:$0xff]  ;;  %v664_v46 = vmul.f32 %v10817_v29, %v10835_v37  ;;  %v320_v47 = vld [vmem:[%s10809_s12 + $0x28] sm:$0xff]  ;;  %vm267_vm4 = vsmask.f32 7942 }
  0x17   : > { %v431_v32 = vld [vmem:[%s10809_s12 + $0x21] sm:$0xff]  ;;  %v359_v35 = vmul.f32 %v10794_v25, %v319_v31  ;;  %v10849_v42 = vld [vmem:[%s10809_s12 + $0x34] sm:$0xff]  ;;  %v432_v48 = vld [vmem:[%s10809_s12 + $0x29] sm:$0xff]  ;;  %v777_v50 = vmul.f32 %v10822_v30, %v736_v39  ;;  %v360_v51 = vmul.f32 %v10794_v25, %v320_v47  ;;  %vm1551_vm6 = vsmask.f32 5392 }
  0x18   : > { %v10827_v33 = vld [vmem:[%s10809_s12 + $0x22] sm:$0xff]  ;;  %v472_v36 = vmul.f32 %v10799_v26, %v431_v32  ;;  %v473_v52 = vmul.f32 %v10799_v26, %v432_v48  ;;  %v326_v55 = vld [vmem:[%s10809_s12 + $0x58] sm:$0xff]  ;;  %v10874_v58 = vld [vmem:[%s10809_s12 + $0x2a] sm:$0xff] }
  0x19   : > { %v585_v38 = vmul.f32 %v10804_v27, %v10827_v33  ;;  %v303_v40 = vld [vmem:[%s14578_s5 + $0xc0] sm:$0xff]  ;;  %v366_v61 = vmul.f32 %v10794_v25, %v326_v55  ;;  %v10887_v63 = vld [vmem:[%s14574_s1 + $0x8] ss:$0 sm:$0xff]  ;;  %v586_v3 = vmul.f32 %v10804_v27, %v10874_v58  ;;  %v306_v31 = vld [vmem:[%s14578_s5 + $0xd8] sm:$0xff] }
  0x1a   : > { %v10846_v41 = vld [vmem:[%s14574_s1 + $0x5] ss:$0 sm:$0xff]  ;;  %v10854_v43 = vld [vmem:[%s14574_s1 + $0x6] ss:$0 sm:$0xff]  ;;  %v10859_v44 = vld [vmem:[%s14574_s1 + $0x7] ss:$0 sm:$0xff]  ;;  %v508_v45 = vadd.f32 %v472_v36, %v359_v35  ;;  %v509_v2 = vadd.f32 %v473_v52, %v360_v51 }
  0x1b   : > { %v323_v49 = vld [vmem:[%s10809_s12 + $0x40] sm:$0xff]  ;;  %v10933_v36 = vld [vmem:[%s10809_s12 + $0x4c] sm:$0xff]  ;;  %v10941_v48 = vld [vmem:[%s10809_s12 + $0x54] sm:$0xff] }
  0x1c   : > { %v363_v53 = vmul.f32 %v10794_v25, %v323_v49  ;;  %v435_v54 = vld [vmem:[%s10809_s12 + $0x41] sm:$0xff]  ;;  %v438_v56 = vld [vmem:[%s10809_s12 + $0x59] sm:$0xff]  ;;  %v621_v57 = vadd.f32 %v585_v38, %v508_v45  ;;  %v553_v39 = vld [vmem:[%s10809_s12 + $0x6a] sm:$0xff]  ;;  %v970_v52 = vmul.f32 %v10854_v43, %v10933_v36 }
  0x1d   : > { %1341 = vperm.xlu2 %10567, %v287_v7   ;;  %v476_v59 = vmul.f32 %v10799_v26, %v435_v54  ;;  %v10878_v60 = vld [vmem:[%s10809_s12 + $0x42] sm:$0xff]  ;;  %v10882_v62 = vld [vmem:[%s10809_s12 + $0x5a] sm:$0xff]  ;;  %v479_v5 = vmul.f32 %v10799_v26, %v438_v56  ;;  %v890_v7 = vmul.f32 %v10846_v41, %v10849_v42  ;;  %v1042_v45 = vld [vmem:[%s10809_s12 + $0x4d] sm:$0xff]  ;;  %v894_v54 = vmul.f32 %v10846_v41, %v10941_v48 }
  0x1e   : > { %1336 = vperm.xlu1 %10566, %v286_v8   ;;  %1331 = vperm.xlu0 %10565, %v285_v9   ;;  %v10890_v0 = vld [vmem:[%s10809_s12 + $0x44] sm:$0xff]  ;;  %v589_v4 = vmul.f32 %v10804_v27, %v10878_v60  ;;  %v700_v6 = vadd.f32 %v664_v46, %v621_v57  ;;  %v10902_v9 = vld [vmem:[%s10809_s12 + $0x3a] sm:$0xff]  ;;  %v10951_v56 = vld [vmem:[%s10809_s12 + $0x6c] sm:$0xff] }
  0x1f   : > { %v1041_v1 = vld [vmem:[%s10809_s12 + $0x45] sm:$0xff]  ;;  %v740_v47 = vld [vmem:[%s10809_s12 + $0x53] sm:$0xff]  ;;  %vm11022_vm2 = vmand %vm255_vm1, %vm256_vm0 }
  0x20   : > { %v1154_v8 = vld [vmem:[%s10809_s12 + $0x46] sm:$0xff]  ;;  %v429_v57 = vld [vmem:[%s10809_s12 + $0x11] sm:$0xff]  ;;  %vm11081_vm5 = vmand %vm266_vm3, %vm267_vm4 }
  0x21   : > { %v1195_v32 = vmul.f32 %v10887_v63, %v1154_v8  ;;  %v743_v55 = vld [vmem:[%s10809_s12 + $0x6b] sm:$0xff]  ;;  %v10964_v8 = vld [vmem:[%s10809_s12 + $0x7c] sm:$0xff]  ;;  %vm11142_vm7 = vmor %vm256_vm0, %vm1551_vm6 }
  0x25   : > { %1356 = vperm.xlu2 %10567, %v290_v10   ;;  %v512_v10 = vadd.f32 %v476_v59, %v363_v53  ;;  %v781_v53 = vmul.f32 %v10822_v30, %v740_v47 }
  0x26   : > { %1351 = vperm.xlu1 %10566, %v289_v11   ;;  %1346 = vperm.xlu0 %10565, %v288_v12   ;;  %v10905_v11 = vld [vmem:[%s10809_s12 + $0x52] sm:$0xff]  ;;  %v592_v12 = vmul.f32 %v10804_v27, %v10882_v62 }
  0x2d   : > { %1371 = vperm.xlu2 %10567, %v293_v13   ;;  %v308_v13 = vld [vmem:[%s14578_s5 + $0xe8] sm:$0xff] }
  0x2e   : > { %1366 = vperm.xlu1 %10566, %v292_v14   ;;  %1361 = vperm.xlu0 %10565, %v291_v15   ;;  %v622_v14 = vadd.f32 %v586_v3, %v509_v2  ;;  %v665_v15 = vmul.f32 %v10817_v29, %v10902_v9  ;;  %v671_v2 = vmul.f32 %v10817_v29, %v553_v39  ;;  %v734_v39 = vld [vmem:[%s10809_s12 + $0x23] sm:$0xff] }
  0x2f   : > { %v784_v3 = vmul.f32 %v10822_v30, %v743_v55  ;;  %v662_v55 = vmul.f32 %v10817_v29, %v10827_v33 }
  0x35   : > { %1386 = vperm.xlu2 %10567, %v296_v16   ;;  %v668_v16 = vmul.f32 %v10817_v29, %v10905_v11 }
  0x36   : > { %1381 = vperm.xlu1 %10566, %v295_v17   ;;  %1376 = vperm.xlu0 %10565, %v294_v18   ;;  %v515_v17 = vadd.f32 %v479_v5, %v366_v61  ;;  %v317_v18 = vld [vmem:[%s10809_s12 + $0x10] sm:$0xff]  ;;  %v1083_v5 = vmul.f32 %v10859_v44, %v1042_v45 }
  0x37   : > { %v1155_v61 = vld [vmem:[%s10809_s12 + $0x4e] sm:$0xff] }
  0x38   : > { %v628_v49 = vadd.f32 %v592_v12, %v515_v17  ;;  %v470_v17 = vmul.f32 %v10799_v26, %v429_v57  ;;  %v309_v45 = vld [vmem:[%s14578_s5 + $0xf0] sm:$0xff] }
  0x3d   : > { %1401 = vperm.xlu2 %10567, %v299_v19   ;;  %v307_v19 = vld [vmem:[%s14578_s5 + $0xe0] sm:$0xff] }
  0x3e   : > { %1396 = vperm.xlu1 %10566, %v298_v20   ;;  %1391 = vperm.xlu0 %10565, %v297_v21   ;;  %v813_v20 = vadd.f32 %v777_v50, %v700_v6  ;;  %v969_v21 = vmul.f32 %v10854_v43, %v10890_v0  ;;  %v357_v50 = vmul.f32 %v10794_v25, %v317_v18  ;;  %v311_v18 = vld [vmem:[%s14578_s5 + $0x100] sm:$0xff] }
  0x45   : > { %1416 = vperm.xlu2 %10567, %v302_v22   ;;  %v1082_v22 = vmul.f32 %v10859_v44, %v1041_v1  ;;  %v10956_v1 = vld [vmem:[%s10809_s12 + $0x64] sm:$0xff] }
  0x46   : > { %1411 = vperm.xlu1 %10566, %v301_v23   ;;  %1406 = vperm.xlu0 %10565, %v300_v24   ;;  %v737_v23 = vld [vmem:[%s10809_s12 + $0x3b] sm:$0xff] }
  0x47   : > { %v10925_v24 = vld [vmem:[%s10809_s12 + $0x3c] sm:$0xff]  ;;  %v778_v35 = vmul.f32 %v10822_v30, %v737_v23  ;;  %v1158_v23 = vld [vmem:[%s10809_s12 + $0x66] sm:$0xff] }
  0x48   : > { %v891_v38 = vmul.f32 %v10846_v41, %v10925_v24 }
  0x4d   : > { %1431 = vperm.xlu2 %10567, %v305_v28   ;;  %v625_v28 = vadd.f32 %v589_v4, %v512_v10  ;;  %v10967_v10 = vld [vmem:[%s10809_s12 + $0x12] sm:$0xff] }
  0x4e   : > { %1426 = vperm.xlu1 %10566, %v304_v34   ;;  %1421 = vperm.xlu0 %10565, %v303_v40   ;;  %v701_v34 = vadd.f32 %v665_v15, %v622_v14  ;;  %v926_v40 = vadd.f32 %v890_v7, %v813_v20  ;;  %v973_v7 = vmul.f32 %v10854_v43, %v10956_v1 }
  0x4f   : > { %v704_v46 = vadd.f32 %v668_v16, %v625_v28  ;;  %v707_v14 = vadd.f32 %v671_v2, %v628_v49  ;;  %v897_v15 = vmul.f32 %v10846_v41, %v10951_v56  ;;  %v1048_v16 = vld [vmem:[%s10809_s12 + $0x7d] sm:$0xff]  ;;  %v1196_v20 = vmul.f32 %v10887_v63, %v1155_v61 }
  0x50   : > { %v814_v51 = vadd.f32 %v778_v35, %v701_v34  ;;  %v1005_v59 = vadd.f32 %v969_v21, %v926_v40  ;;  %v1161_v34 = vld [vmem:[%s10809_s12 + $0x7e] sm:$0xff]  ;;  %v506_v35 = vadd.f32 %v470_v17, %v357_v50  ;;  %v1199_v49 = vmul.f32 %v10887_v63, %v1158_v23  ;;  %v1152_v17 = vld [vmem:[%s10809_s12 + $0x36] sm:$0xff]  ;;  %v258_v23 = vld [vmem:[#allocation2 + $0x8] sm:$0x3] }
  0x51   : > { %v817_v6 = vadd.f32 %v781_v53, %v704_v46  ;;  %v820_v28 = vadd.f32 %v784_v3, %v707_v14  ;;  %v310_v40 = vld [vmem:[%s14578_s5 + $0xf8] sm:$0xff]  ;;  %v847_v50 = vld [vmem:[%s10809_s12 + $0x24] sm:$0xff]  ;;  %v1202_v61 = vmul.f32 %v10887_v63, %v1161_v34  ;;  %v775_v2 = vmul.f32 %v10822_v30, %v734_v39  ;;  %v329_v34 = vld [vmem:[%s10809_s12 + $0x70] sm:$0xff] }
  0x52   : > { %v927_v4 = vadd.f32 %v891_v38, %v814_v51  ;;  %v1118_v12 = vadd.f32 %v1082_v22, %v1005_v59  ;;  %v583_v38 = vmul.f32 %v10804_v27, %v10967_v10  ;;  %v1089_v51 = vmul.f32 %v10859_v44, %v1048_v16  ;;  %v315_v3 = vld [vmem:[%s10809_s12] sm:$0xff]  ;;  %v314_v14 = vld [vmem:[%s14578_s5 + $0x118] sm:$0xff] }
  0x53   : > { %v930_v21 = vadd.f32 %v894_v54, %v817_v6  ;;  %v933_v53 = vadd.f32 %v897_v15, %v820_v28  ;;  %v888_v33 = vmul.f32 %v10846_v41, %v847_v50  ;;  %v540_v6 = vld [vmem:[%s10809_s12 + $0x2] sm:$0xff] }
  0x54   : > { %v619_v54 = vadd.f32 %v583_v38, %v506_v35  ;;  %v313_v35 = vld [vmem:[%s14578_s5 + $0x110] sm:$0xff] }
  0x55   : > { %1446 = vperm.xlu2 %10567, %v308_v13   ;;  %v1045_v13 = vld [vmem:[%s10809_s12 + $0x65] sm:$0xff]  ;;  %v1009_v47 = vadd.f32 %v973_v7, %v930_v21 }
  0x56   : > { %1441 = vperm.xlu1 %10566, %v307_v19   ;;  %1436 = vperm.xlu0 %10565, %v306_v31   ;;  %v1006_v19 = vadd.f32 %v970_v52, %v927_v4  ;;  %v1086_v22 = vmul.f32 %v10859_v44, %v1045_v13  ;;  %v976_v31 = vmul.f32 %v10854_v43, %v10964_v8  ;;  %v1039_v13 = vld [vmem:[%s10809_s12 + $0x35] sm:$0xff] }
  0x57   : > { %v10995_v52 = vadd.f32 %v1195_v32, %v1118_v12  ;;  %v698_v4 = vadd.f32 %v662_v55, %v619_v54  ;;  %v967_v12 = vmul.f32 %v10854_v43, %v10849_v42  ;;  %v660_v54 = vmul.f32 %v10817_v29, %v10967_v10  ;;  %v1037_v55 = vld [vmem:[%s10809_s12 + $0x25] sm:$0xff] }
  0x58   : > { %v1119_v46 = vadd.f32 %v1083_v5, %v1006_v19  ;;  %v1122_v59 = vadd.f32 %v1086_v22, %v1009_v47  ;;  %v1012_v32 = vadd.f32 %v976_v31, %v933_v53  ;;  %v427_v5 = vld [vmem:[%s10809_s12 + $0x1] sm:$0xff]  ;;  %v732_v19 = vld [vmem:[%s10809_s12 + $0x13] sm:$0xff]  ;;  %v14629_v22 = vmov 0 }
  0x59   : > { %v811_v16 = vadd.f32 %v775_v2, %v698_v4  ;;  %v1267_v21 = vmax.f32 %v10995_v52, 0.0  ;;  %v14630_v22 = vsel %vm11022_vm2, 4294967295, %v14629_v22  ;;  %v468_v28 = vmul.f32 %v10799_v26, %v427_v5  ;;  %v11039_v47 = vld [vmem:[%s10809_s12 + $0x72] sm:$0xff]  ;;  %v556_v4 = vld [vmem:[%s10809_s12 + $0x82] sm:$0xff] }
  0x5a   : > { %v10999_v57 = vadd.f32 %v1196_v20, %v1119_v46  ;;  %v11007_v7 = vadd.f32 %v1199_v49, %v1122_v59  ;;  %v1125_v15 = vadd.f32 %v1089_v51, %v1012_v32  ;;  %v845_v20 = vld [vmem:[%s10809_s12 + $0x14] sm:$0xff]  ;;  %14631 = vst [vmem:[#allocation3_spill] sm:$0xff] %v14630_v22  ;;  %v581_v31 = vmul.f32 %v10804_v27, %v540_v6  ;;  %v312_v49 = vld [vmem:[%s14578_s5 + $0x108] sm:$0xff] }
  0x5b   : > { %v924_v39 = vadd.f32 %v888_v33, %v811_v16  ;;  %v441_v46 = vld [vmem:[%s10809_s12 + $0x71] sm:$0xff]  ;;  %v1193_v52 = vmul.f32 %v10887_v63, %v1152_v17  ;;  %v1150_v59 = vld [vmem:[%s10809_s12 + $0x26] sm:$0xff]  ;;  %v773_v2 = vmul.f32 %v10822_v30, %v732_v19  ;;  %v369_v32 = vmul.f32 %v10794_v25, %v329_v34 }
  0x5c   : > { %v1268_v42 = vmax.f32 %v10999_v57, 0.0  ;;  %v11032_v38 = vadd.f32 %v1202_v61, %v1125_v15  ;;  %v1271_v51 = vmax.f32 %v11007_v7, 0.0  ;;  %v746_v33 = vld [vmem:[%s10809_s12 + $0x83] sm:$0xff]  ;;  %v965_v6 = vmul.f32 %v10854_v43, %v847_v50  ;;  %v861_v15 = vld [vmem:[%s10809_s12 + $0x94] sm:$0xff] }
  0x5d   : > { %1461 = vperm.xlu2 %10567, %v311_v18   ;;  %v355_v18 = vmul.f32 %v10794_v25, %v315_v3  ;;  %v1003_v61 = vadd.f32 %v967_v12, %v924_v39  ;;  %v886_v3 = vmul.f32 %v10846_v41, %v845_v20  ;;  %v595_v10 = vmul.f32 %v10804_v27, %v11039_v47  ;;  %v11060_v12 = vld [vmem:[%s10809_s12 + $0x84] sm:$0xff]  ;;  %v318_v16 = vld [vmem:[%s10809_s12 + $0x18] sm:$0xff] }
  0x5e   : > { %1456 = vperm.xlu1 %10566, %v310_v40   ;;  %1451 = vperm.xlu0 %10565, %v309_v45   ;;  %v1080_v40 = vmul.f32 %v10859_v44, %v1039_v13  ;;  %v259_v45 = vsel %vm11022_vm2, 0, %v258_v23  ;;  %v482_v13 = vmul.f32 %v10799_v26, %v441_v46  ;;  %v1191_v50 = vmul.f32 %v10887_v63, %v1150_v59  ;;  %v1051_v34 = vld [vmem:[%s10809_s12 + $0x95] sm:$0xff] }
  0x5f   : > { %260 = vst [vmem:[#allocation2 + $0x8] sm:$0x3] %v259_v45  ;;  %v504_v53 = vadd.f32 %v468_v28, %v355_v18  ;;  %v1078_v18 = vmul.f32 %v10859_v44, %v1037_v55  ;;  %v674_v28 = vmul.f32 %v10817_v29, %v556_v4  ;;  %v979_v45 = vmul.f32 %v10854_v43, %v861_v15 }
  0x60   : > { %v518_v23 = vadd.f32 %v482_v13, %v369_v32  ;;  %v358_v46 = vmul.f32 %v10794_v25, %v318_v16  ;;  %v1164_v32 = vld [vmem:[%s10809_s12 + $0x96] sm:$0xff] }
  0x61   : > { %v617_v5 = vadd.f32 %v581_v31, %v504_v53  ;;  %v787_v31 = vmul.f32 %v10822_v30, %v746_v33  ;;  %v263_v33 = vld [vmem:[#allocation2 + $0xac] sm:$0x3]  ;;  %v274_v13 = vld [vmem:[#allocation2 + $0x13c] sm:$0xe] }
  0x63   : > { %v696_v20 = vadd.f32 %v660_v54, %v617_v5  ;;  %v631_v54 = vadd.f32 %v595_v10, %v518_v23  ;;  %v269_v5 = vld [vmem:[#allocation2 + $0x98] sm:$0xe]  ;;  %v663_v10 = vmul.f32 %v10817_v29, %v10874_v58  ;;  %v848_v58 = vld [vmem:[%s10809_s12 + $0x2c] sm:$0xff] }
  0x64   : > { %v270_v23 = vsel %vm11081_vm5, 0, %v269_v5  ;;  %v428_v5 = vld [vmem:[%s10809_s12 + $0x9] sm:$0xff] }
  0x65   : > { %1476 = vperm.xlu2 %10567, %v314_v14   ;;  %v1116_v14 = vadd.f32 %v1080_v40, %v1003_v61  ;;  %v900_v40 = vmul.f32 %v10846_v41, %v11060_v12  ;;  %v809_v53 = vadd.f32 %v773_v2, %v696_v20  ;;  %v14633_v61 = vmov 0  ;;  %271 = vst [vmem:[#allocation2 + $0x98] sm:$0xe] %v270_v23 }
  0x66   : > { %1471 = vperm.xlu1 %10566, %v313_v35   ;;  %1466 = vperm.xlu0 %10565, %v312_v49   ;;  %v430_v35 = vld [vmem:[%s10809_s12 + $0x19] sm:$0xff]  ;;  %v14634_v61 = vsel %vm11081_vm5, 4294967295, %v14633_v61  ;;  %v710_v2 = vadd.f32 %v674_v28, %v631_v54  ;;  %v264_v20 = vsel %vm11022_vm2, 0, %v263_v33  ;;  %v1205_v33 = vmul.f32 %v10887_v63, %v1164_v32 }
  0x67   : > { %v11067_v19 = vpop.permute.xlu2 %1321  ;;  %v543_v49 = vld [vmem:[%s10809_s12 + $0x1a] sm:$0xff]  ;;  %v11079_v59 = vadd.f32 %v1193_v52, %v1116_v14  ;;  %14635 = vst [vmem:[#allocation5_spill] sm:$0xff] %v14634_v61  ;;  %v471_v4 = vmul.f32 %v10799_v26, %v430_v35  ;;  %v922_v15 = vadd.f32 %v886_v3, %v809_v53  ;;  %v275_v3 = vsel %vm11081_vm5, 0, %v274_v13  ;;  %v316_v53 = vld [vmem:[%s10809_s12 + $0x8] sm:$0xff] }
  0x68   : > { %14632 = vst [vmem:[#allocation4_spill] sm:$0xff] %v11067_v19  ;;  %v1483_v39 = vmul.f32 %v11067_v19, %v1267_v21  ;;  %v1092_v21 = vmul.f32 %v10859_v44, %v1051_v34  ;;  %v584_v52 = vmul.f32 %v10804_v27, %v543_v49  ;;  %v735_v34 = vld [vmem:[%s10809_s12 + $0x2b] sm:$0xff]  ;;  %v823_v35 = vadd.f32 %v787_v31, %v710_v2 }
  0x69   : > { %265 = vst [vmem:[#allocation2 + $0xac] sm:$0x3] %v264_v20  ;;  %v1001_v28 = vadd.f32 %v965_v6, %v922_v15  ;;  %v541_v15 = vld [vmem:[%s10809_s12 + $0xa] sm:$0xff]  ;;  %v889_v32 = vmul.f32 %v10846_v41, %v848_v58  ;;  %v587_v19 = vmul.f32 %v10804_v27, %v10835_v37 }
  0x6a   : > { %v1519_v55 = vpack.c.bf16 %v1483_v39, %v1483_v39  ;;  %v507_v39 = vadd.f32 %v471_v4, %v358_v46  ;;  %276 = vst [vmem:[#allocation2 + $0x13c] sm:$0xe] %v275_v3  ;;  %v936_v6 = vadd.f32 %v900_v40, %v823_v35  ;;  %v776_v46 = vmul.f32 %v10822_v30, %v735_v34  ;;  %v1040_v4 = vld [vmem:[%s10809_s12 + $0x3d] sm:$0xff] }
  0x6b   : > { %v1114_v13 = vadd.f32 %v1078_v18, %v1001_v28  ;;  %v469_v34 = vmul.f32 %v10799_v26, %v428_v5  ;;  %v968_v28 = vmul.f32 %v10854_v43, %v10925_v24  ;;  %v1081_v57 = vmul.f32 %v10859_v44, %v1040_v4  ;;  %v733_v35 = vld [vmem:[%s10809_s12 + $0x1b] sm:$0xff] }
  0x6c   : > { %v1593_v16 = vshrl.u32 %v1519_v55, 16  ;;  %v1596_v14 = vshll.u32 %v1519_v55, 16  ;;  %v620_v31 = vadd.f32 %v584_v52, %v507_v39  ;;  %v1015_v18 = vadd.f32 %v979_v45, %v936_v6  ;;  %v1153_v52 = vld [vmem:[%s10809_s12 + $0x3e] sm:$0xff] }
  0x6d   : > { %v11115_v23 = vadd.f32 %v1191_v50, %v1114_v13  ;;  %v661_v45 = vmul.f32 %v10817_v29, %v543_v49  ;;  %v1194_v24 = vmul.f32 %v10887_v63, %v1153_v52  ;;  %v332_v13 = vld [vmem:[%s10809_s12 + $0x88] sm:$0xff] }
  0x6e   : > { %v1595_v54 = vrot.slane %v1593_v16, 6  ;;  %v1598_v55 = vrot.slane %v1596_v14, 7  ;;  %v356_v14 = vmul.f32 %v10794_v25, %v316_v53  ;;  %v699_v40 = vadd.f32 %v663_v10, %v620_v31  ;;  %v846_v10 = vld [vmem:[%s10809_s12 + $0x1c] sm:$0xff]  ;;  %v1151_v52 = vld [vmem:[%s10809_s12 + $0x2e] sm:$0xff] }
  0x6f   : > { %v11103_v20 = vpop.permute.xlu2 %1326  ;;  %v1128_v39 = vadd.f32 %v1092_v21, %v1015_v18  ;;  %v774_v21 = vmul.f32 %v10822_v30, %v733_v35  ;;  %v887_v18 = vmul.f32 %v10846_v41, %v846_v10  ;;  %v966_v35 = vmul.f32 %v10854_v43, %v848_v58 }
  0x70   : > { %14636 = vst [vmem:[#allocation6_spill] sm:$0xff] %v11103_v20  ;;  %v11108_v2 = vor.u32 %v1598_v55, %v1595_v54  ;;  %v1484_v16 = vmul.f32 %v11103_v20, %v1268_v42  ;;  %v582_v42 = vmul.f32 %v10804_v27, %v541_v15  ;;  %v812_v50 = vadd.f32 %v776_v46, %v699_v40  ;;  %v444_v46 = vld [vmem:[%s10809_s12 + $0x89] sm:$0xff] }
  0x71   : > { %v505_v53 = vadd.f32 %v469_v34, %v356_v14  ;;  %v11133_v15 = vld [vmem:[%s10809_s12 + $0x8a] sm:$0xff]  ;;  %v11135_v14 = vadd.f32 %v1205_v33, %v1128_v39  ;;  %v372_v33 = vmul.f32 %v10794_v25, %v332_v13  ;;  %v559_v39 = vld [vmem:[%s10809_s12 + $0x9a] sm:$0xff]  ;;  %v485_v10 = vmul.f32 %v10799_v26, %v444_v46 }
  0x72   : > { %v1520_v3 = vpack.c.bf16 %v1484_v16, %v1484_v16  ;;  %v1601_v54 = vrot.slane %v11108_v2, 4  ;;  %v925_v31 = vadd.f32 %v889_v32, %v812_v50  ;;  %v1038_v40 = vld [vmem:[%s10809_s12 + $0x2d] sm:$0xff]  ;;  %v14637_v32 = vmov 0 }
  0x73   : > { %v618_v4 = vadd.f32 %v582_v42, %v505_v53  ;;  %v14638_v32 = vsel %vm11142_vm7, 4294967295, %v14637_v32  ;;  %v1192_v13 = vmul.f32 %v10887_v63, %v1151_v52  ;;  %v677_v46 = vmul.f32 %v10817_v29, %v559_v39  ;;  %v1167_v39 = vld [vmem:[%s10809_s12 + $0xae] sm:$0xff] }
  0x74   : > { %v1603_v55 = vshrl.u32 %v1520_v3, 16  ;;  %v1606_v5 = vshll.u32 %v1520_v3, 16  ;;  %14639 = vst [vmem:[#allocation7_spill] sm:$0xff] %v14638_v32  ;;  %v1004_v3 = vadd.f32 %v968_v28, %v925_v31  ;;  %v598_v28 = vmul.f32 %v10804_v27, %v11133_v15  ;;  %v11163_v31 = vld [vmem:[%s10809_s12 + $0x9c] sm:$0xff] }
  0x75   : > { %v697_v42 = vadd.f32 %v661_v45, %v618_v4  ;;  %v749_v45 = vld [vmem:[%s10809_s12 + $0x9b] sm:$0xff]  ;;  %v521_v4 = vadd.f32 %v485_v10, %v372_v33  ;;  %v903_v33 = vmul.f32 %v10846_v41, %v11163_v31 }
  0x76   : > { %v1605_v49 = vrot.slane %v1603_v55, 6  ;;  %v1608_v16 = vrot.slane %v1606_v5, 7  ;;  %v1117_v55 = vadd.f32 %v1081_v57, %v1004_v3  ;;  %v1079_v5 = vmul.f32 %v10859_v44, %v1038_v40  ;;  %v322_v57 = vld [vmem:[%s10809_s12 + $0x38] sm:$0xff] }
  0x77   : > { %v11146_v34 = vpop.permute.xlu2 %1341  ;;  %v810_v58 = vadd.f32 %v774_v21, %v697_v42  ;;  %v790_v3 = vmul.f32 %v10822_v30, %v749_v45  ;;  %v434_v42 = vld [vmem:[%s10809_s12 + $0x39] sm:$0xff]  ;;  %v634_v6 = vadd.f32 %v598_v28, %v521_v4  ;;  %v739_v28 = vld [vmem:[%s10809_s12 + $0x4b] sm:$0xff] }
  0x78   : > { %14640 = vst [vmem:[#allocation8_spill] sm:$0xff] %v11146_v34  ;;  %v11151_v50 = vor.u32 %v1608_v16, %v1605_v49  ;;  %v1487_v53 = vmul.f32 %v11146_v34, %v1271_v51  ;;  %v864_v49 = vld [vmem:[%s10809_s12 + $0xac] sm:$0xff]  ;;  %v11173_v40 = vadd.f32 %v1194_v24, %v1117_v55  ;;  %v362_v24 = vmul.f32 %v10794_v25, %v322_v57 }
  0x79   : > { %v1054_v16 = vld [vmem:[%s10809_s12 + $0xad] sm:$0xff]  ;;  %v923_v52 = vadd.f32 %v887_v18, %v810_v58  ;;  %v982_v17 = vmul.f32 %v10854_v43, %v864_v49  ;;  %v713_v58 = vadd.f32 %v677_v46, %v634_v6  ;;  %v1208_v49 = vmul.f32 %v10887_v63, %v1167_v39 }
  0x7a   : > { %v1610_v7 = vsel %vm11142_vm7, %v1601_v54, %v11151_v50  ;;  %v1523_v51 = vpack.c.bf16 %v1487_v53, %v1487_v53  ;;  %v11184_v55 = vld [vmem:[%s10809_s12 + $0x4a] sm:$0xff]  ;;  %v1266_v21 = vmax.f32 %v11173_v40, 0.0  ;;  %v14642_v57 = vmax.f32 %v11032_v38, 0.0 }
  0x7b   : > { %1956 = vst [vmem:[#allocation2 + $0x1c] sm:$0xf] %v1610_v7  ;;  %v1002_v10 = vadd.f32 %v966_v35, %v923_v52  ;;  %v1095_v7 = vmul.f32 %v10859_v44, %v1054_v16  ;;  %v588_v16 = vmul.f32 %v10804_v27, %v10902_v9  ;;  %v826_v46 = vadd.f32 %v790_v3, %v713_v58 }
  0x7c   : > { %v1633_v54 = vshrl.u32 %v1523_v51, 16  ;;  %v1636_v53 = vshll.u32 %v1523_v51, 16  ;;  %v475_v51 = vmul.f32 %v10799_v26, %v434_v42  ;;  %v667_v40 = vmul.f32 %v10817_v29, %v11184_v55 }
  0x7d   : > { %v1115_v35 = vadd.f32 %v1079_v5, %v1002_v10  ;;  %v14645_v5 = vmax.f32 %v11079_v59, 0.0  ;;  %v14646_v9 = vmax.f32 %v11115_v23, 0.0  ;;  %v780_v10 = vmul.f32 %v10822_v30, %v739_v28 }
  0x7e   : > { %v1635_v18 = vrot.slane %v1633_v54, 6  ;;  %v1638_v45 = vrot.slane %v1636_v53, 7  ;;  %v511_v42 = vadd.f32 %v475_v51, %v362_v24  ;;  %v939_v58 = vadd.f32 %v903_v33, %v826_v46 }
  0x7f   : > { %v11188_v4 = vpop.permute.xlu2 %1356  ;;  %v1228_v39 = vadd.f32 %v1192_v13, %v1115_v35  ;;  %v893_v23 = vmul.f32 %v10846_v41, %v10933_v36 }
  0x80   : > { %14641 = vst [vmem:[#allocation9_spill] sm:$0xff] %v11188_v4  ;;  %v1490_v52 = vmul.f32 %v11188_v4, %v14642_v57  ;;  %v11197_v54 = vpop.permute.xlu1 %1311  ;;  %v11199_v6 = vpop.permute.xlu0 %1301  ;;  %v11211_v57 = vor.u32 %v1638_v45, %v1635_v18  ;;  %v624_v24 = vadd.f32 %v588_v16, %v511_v42  ;;  %v11219_v4 = vld [vmem:[%s10809_s12 + $0x5c] sm:$0xff]  ;;  %v1018_v18 = vadd.f32 %v982_v17, %v939_v58 }
  0x81   : > { %14643 = vst [vmem:[#allocation10_spill] sm:$0xff] %v11197_v54  ;;  %v1481_v53 = vmul.f32 %v11197_v54, %v14645_v5  ;;  %v1479_v38 = vmul.f32 %v11199_v6, %v14646_v9  ;;  %v1264_v5 = vmax.f32 %v1228_v39, 0.0 }
  0x82   : > { %14644 = vst [vmem:[#allocation11_spill] sm:$0xff] %v11199_v6  ;;  %v1526_v3 = vpack.c.bf16 %v1490_v52, %v1490_v52  ;;  %v703_v45 = vadd.f32 %v667_v40, %v624_v24  ;;  %v1131_v42 = vadd.f32 %v1095_v7, %v1018_v18  ;;  %v1949_v40 = vld [vmem:[#allocation2 + $0x8] sm:$0xe]  ;;  %v1169_v6 = vld [vmem:[%s10809_s12 + $0xbe] sm:$0xff] }
  0x83   : > { %v1517_v59 = vpack.c.bf16 %v1481_v53, %v1481_v53  ;;  %v1515_v51 = vpack.c.bf16 %v1479_v38, %v1479_v38  ;;  %v972_v53 = vmul.f32 %v10854_v43, %v11219_v4 }
  0x84   : > { %v1663_v13 = vshrl.u32 %v1526_v3, 16  ;;  %v1666_v28 = vshll.u32 %v1526_v3, 16  ;;  %v816_v9 = vadd.f32 %v780_v10, %v703_v45  ;;  %v14648_v3 = vmax.f32 %v11135_v14, 0.0  ;;  %v1044_v45 = vld [vmem:[%s10809_s12 + $0x5d] sm:$0xff] }
  0x85   : > { %v1573_v35 = vshrl.u32 %v1517_v59, 16  ;;  %v1576_v33 = vshll.u32 %v1517_v59, 16  ;;  %v1554_v16 = vshrl.u32 %v1515_v51, 16  ;;  %v1557_v52 = vshll.u32 %v1515_v51, 16  ;;  %v1157_v14 = vld [vmem:[%s10809_s12 + $0x5e] sm:$0xff] }
  0x86   : > { %v1665_v46 = vrot.slane %v1663_v13, 6  ;;  %v1668_v17 = vrot.slane %v1666_v28, 7  ;;  %v1244_v24 = vadd.f32 %v1208_v49, %v1131_v42  ;;  %v929_v59 = vadd.f32 %v893_v23, %v816_v9  ;;  %v433_v42 = vld [vmem:[%s10809_s12 + $0x31] sm:$0xff] }
  0x87   : > { %v1575_v38 = vrot.slane %v1573_v35, 6  ;;  %v1578_v39 = vrot.slane %v1576_v33, 7  ;;  %v1556_v34 = vrot.slane %v1554_v16, 6  ;;  %v1559_v20 = vrot.slane %v1557_v52, 7  ;;  %v11225_v36 = vpop.permute.xlu2 %1371  ;;  %v321_v16 = vld [vmem:[%s10809_s12 + $0x30] sm:$0xff] }
  0x88   : > { %14647 = vst [vmem:[#allocation12_spill] sm:$0xff] %v11225_v36  ;;  %v1493_v58 = vmul.f32 %v11225_v36, %v14648_v3  ;;  %v11230_v7 = vpop.permute.xlu1 %1316  ;;  %v11232_v10 = vpop.permute.xlu0 %1306  ;;  %v1008_v23 = vadd.f32 %v972_v53, %v929_v59 }
  0x89   : > { %14649 = vst [vmem:[#allocation13_spill] sm:$0xff] %v11230_v7  ;;  %v1560_v51 = vor.u32 %v1559_v20, %v1556_v34  ;;  %v1482_v13 = vmul.f32 %v11230_v7, %v1266_v21  ;;  %v1480_v18 = vmul.f32 %v11232_v10, %v1264_v5  ;;  %v1579_v35 = vor.u32 %v1578_v39, %v1575_v38 }
  0x8a   : > { %14650 = vst [vmem:[#allocation14_spill] sm:$0xff] %v11232_v10  ;;  %v1529_v33 = vpack.c.bf16 %v1493_v58, %v1493_v58  ;;  %v11243_v20 = vor.u32 %v1668_v17, %v1665_v46  ;;  %v1280_v21 = vmax.f32 %v1244_v24, 0.0  ;;  %v1085_v5 = vmul.f32 %v10859_v44, %v1044_v45 }
  0x8b   : > { %v1950_v3 = vsel %vm11081_vm5, %v1560_v51, %v1949_v40  ;;  %v1518_v49 = vpack.c.bf16 %v1482_v13, %v1482_v13  ;;  %v1516_v34 = vpack.c.bf16 %v1480_v18, %v1480_v18  ;;  %v1198_v39 = vmul.f32 %v10887_v63, %v1157_v14 }
  0x8c   : > { %1951 = vst [vmem:[#allocation2 + $0x8] sm:$0xe] %v1950_v3  ;;  %v361_v58 = vmul.f32 %v10794_v25, %v321_v16  ;;  %v1581_v52 = vrot.slane %v1579_v35, 4  ;;  %v1693_v28 = vshrl.u32 %v1529_v33, 16  ;;  %v1121_v17 = vadd.f32 %v1085_v5, %v1008_v23 }
  0x8d   : > { %v1583_v9 = vshrl.u32 %v1518_v49, 16  ;;  %v1586_v38 = vshll.u32 %v1518_v49, 16  ;;  %v1563_v36 = vshrl.u32 %v1516_v34, 16  ;;  %v1566_v40 = vshll.u32 %v1516_v34, 16 }
  0x8e   : > { %v474_v24 = vmul.f32 %v10799_v26, %v433_v42  ;;  %v1696_v59 = vshll.u32 %v1529_v33, 16  ;;  %v1234_v49 = vadd.f32 %v1198_v39, %v1121_v17  ;;  %v1561_v34 = vrot.slane %v1560_v51, 4  ;;  %v738_v33 = vld [vmem:[%s10809_s12 + $0x43] sm:$0xff] }
  0x8f   : > { %v1585_v13 = vrot.slane %v1583_v9, 6  ;;  %v1588_v53 = vrot.slane %v1586_v38, 7  ;;  %v11249_v46 = vpop.permute.xlu2 %1386  ;;  %v1565_v18 = vrot.slane %v1563_v36, 6  ;;  %v1568_v45 = vrot.slane %v1566_v40, 7 }
  0x90   : > { %14651 = vst [vmem:[#allocation15_spill] sm:$0xff] %v11249_v46  ;;  %v1496_v3 = vmul.f32 %v11249_v46, %v1280_v21  ;;  %v510_v16 = vadd.f32 %v474_v24, %v361_v58  ;;  %v11255_v7 = vpop.permute.xlu1 %1336  ;;  %v666_v23 = vmul.f32 %v10817_v29, %v10878_v60  ;;  %v1270_v5 = vmax.f32 %v1234_v49, 0.0  ;;  %v11422_v46 = vld [vmem:[%s10809_s12 + $0xcc] sm:$0xff] }
  0x91   : > { %v1589_v14 = vor.u32 %v1588_v53, %v1585_v13  ;;  %v1569_v9 = vor.u32 %v1568_v45, %v1565_v18  ;;  %14652 = vst [vmem:[#allocation16_spill] sm:$0xff] %v11255_v7  ;;  %v1695_v39 = vrot.slane %v1693_v28, 6  ;;  %v1698_v37 = vrot.slane %v1696_v59, 7  ;;  %v335_v28 = vld [vmem:[%s10809_s12 + $0xa0] sm:$0xff] }
  0x92   : > { %v1532_v38 = vpack.c.bf16 %v1496_v3, %v1496_v3  ;;  %v623_v42 = vadd.f32 %v587_v19, %v510_v16  ;;  %v1486_v40 = vmul.f32 %v11255_v7, %v1270_v5  ;;  %v779_v13 = vmul.f32 %v10822_v30, %v738_v33  ;;  %v1043_v19 = vld [vmem:[%s10809_s12 + $0x55] sm:$0xff]  ;;  %v447_v53 = vld [vmem:[%s10809_s12 + $0xa1] sm:$0xff] }
  0x93   : > { %v1590_v36 = vsel %vm11142_vm7, %v1581_v52, %v1589_v14  ;;  %v1591_v21 = vrot.slane %v1589_v14, 4  ;;  %v1570_v51 = vsel %vm11142_vm7, %v1561_v34, %v1569_v9  ;;  %v1571_v58 = vrot.slane %v1569_v9, 4  ;;  %v11277_v18 = vld [vmem:[%s10809_s12 + $0xa2] sm:$0xff]  ;;  %v11283_v16 = vld [vmem:[%s10809_s12 + $0xb2] sm:$0xff] }
  0x94   : > { %1954 = vst [vmem:[#allocation2 + $0x14] sm:$0xf] %v1590_v36  ;;  %v702_v52 = vadd.f32 %v666_v23, %v623_v42  ;;  %v1723_v24 = vshrl.u32 %v1532_v38, 16  ;;  %v1726_v59 = vshll.u32 %v1532_v38, 16  ;;  %v1522_v3 = vpack.c.bf16 %v1486_v40, %v1486_v40  ;;  %v1156_v34 = vld [vmem:[%s10809_s12 + $0x56] sm:$0xff]  ;;  %v11298_v42 = vld [vmem:[%s10809_s12 + $0xc4] sm:$0xff] }
  0x95   : > { %v1600_v60 = vsel %vm11142_vm7, %v1591_v21, %v11108_v2  ;;  %1952 = vst [vmem:[#allocation2 + $0xc] sm:$0xf] %v1570_v51  ;;  %v1580_v17 = vsel %vm11142_vm7, %v1571_v58, %v1579_v35  ;;  %v892_v2 = vmul.f32 %v10846_v41, %v10890_v0  ;;  %v971_v49 = vmul.f32 %v10854_v43, %v10941_v48  ;;  %v752_v21 = vld [vmem:[%s10809_s12 + $0xb3] sm:$0xff] }
  0x96   : > { %1955 = vst [vmem:[#allocation2 + $0x18] sm:$0xf] %v1600_v60  ;;  %v815_v14 = vadd.f32 %v779_v13, %v702_v52  ;;  %v11285_v35 = vor.u32 %v1698_v37, %v1695_v39  ;;  %v1084_v0 = vmul.f32 %v10859_v44, %v1043_v19  ;;  %v375_v9 = vmul.f32 %v10794_v25, %v335_v28  ;;  %v11295_v5 = vld [vmem:[%s10809_s12 + $0xb4] sm:$0xff] }
  0x97   : > { %1953 = vst [vmem:[#allocation2 + $0x10] sm:$0xf] %v1580_v17  ;;  %v488_v38 = vmul.f32 %v10799_v26, %v447_v53  ;;  %v1623_v23 = vshrl.u32 %v1522_v3, 16  ;;  %v1626_v33 = vshll.u32 %v1522_v3, 16  ;;  %v601_v48 = vmul.f32 %v10804_v27, %v11277_v18  ;;  %v325_v60 = vld [vmem:[%s10809_s12 + $0x50] sm:$0xff]  ;;  %v1057_v53 = vld [vmem:[%s10809_s12 + $0xc5] sm:$0xff]  ;;  %v11427_v7 = vpop.permute.xlu2 %1401 }
  0x98   : > { %v928_v36 = vadd.f32 %v892_v2, %v815_v14  ;;  %v11300_v39 = vrot.slane %v1723_v24, 6  ;;  %v11302_v37 = vrot.slane %v1726_v59, 7  ;;  %v680_v58 = vmul.f32 %v10817_v29, %v11283_v16  ;;  %v437_v40 = vld [vmem:[%s10809_s12 + $0x51] sm:$0xff]  ;;  %v1170_v17 = vld [vmem:[%s10809_s12 + $0xc6] sm:$0xff]  ;;  %14654 = vst [vmem:[#allocation18_spill] sm:$0xff] %v11427_v7 }
  0x99   : > { %v524_v51 = vadd.f32 %v488_v38, %v375_v9  ;;  %v1625_v52 = vrot.slane %v1623_v23, 6  ;;  %v1628_v13 = vrot.slane %v1626_v33, 7  ;;  %v1197_v28 = vmul.f32 %v10887_v63, %v1156_v34  ;;  %v11317_v14 = vld [vmem:[%s10809_s12 + $0x62] sm:$0xff]  ;;  %v11325_v33 = vld [vmem:[%s10809_s12 + $0x74] sm:$0xff] }
  0x9a   : > { %v1007_v19 = vadd.f32 %v971_v49, %v928_v36  ;;  %v793_v59 = vmul.f32 %v10822_v30, %v752_v21  ;;  %v906_v2 = vmul.f32 %v10846_v41, %v11295_v5  ;;  %v985_v3 = vmul.f32 %v10854_v43, %v11298_v42  ;;  %v742_v23 = vld [vmem:[%s10809_s12 + $0x63] sm:$0xff] }
  0x9b   : > { %v637_v24 = vadd.f32 %v601_v48, %v524_v51  ;;  %v11319_v9 = vor.u32 %v1628_v13, %v1625_v52  ;;  %v365_v34 = vmul.f32 %v10794_v25, %v325_v60  ;;  %v478_v38 = vmul.f32 %v10799_v26, %v437_v40  ;;  %v324_v52 = vld [vmem:[%s10809_s12 + $0x48] sm:$0xff]  ;;  %v1047_v60 = vld [vmem:[%s10809_s12 + $0x75] sm:$0xff] }
  0x9c   : > { %v1120_v49 = vadd.f32 %v1084_v0, %v1007_v19  ;;  %v1098_v48 = vmul.f32 %v10859_v44, %v1057_v53  ;;  %v1211_v21 = vmul.f32 %v10887_v63, %v1170_v17  ;;  %v591_v51 = vmul.f32 %v10804_v27, %v10905_v11  ;;  %v436_v40 = vld [vmem:[%s10809_s12 + $0x49] sm:$0xff]  ;;  %v1160_v11 = vld [vmem:[%s10809_s12 + $0x76] sm:$0xff] }
  0x9d   : > { %v716_v36 = vadd.f32 %v680_v58, %v637_v24  ;;  %v1631_v13 = vrot.slane %v11319_v9, 4  ;;  %v514_v25 = vadd.f32 %v478_v38, %v365_v34  ;;  %v670_v26 = vmul.f32 %v10817_v29, %v11317_v14  ;;  %v11337_v58 = vpop.permute.xlu0 %1331  ;;  %v11365_v38 = vld [vmem:[%s14574_s1 + $0x2] ss:$0 sm:$0xff] }
  0x9e   : > { %v1233_v0 = vadd.f32 %v1197_v28, %v1120_v49  ;;  %14653 = vst [vmem:[#allocation17_spill] sm:$0xff] %v11337_v58  ;;  %v783_v53 = vmul.f32 %v10822_v30, %v742_v23  ;;  %v896_v17 = vmul.f32 %v10846_v41, %v10956_v1  ;;  %v975_v27 = vmul.f32 %v10854_v43, %v11325_v33  ;;  %v741_v41 = vld [vmem:[%s10809_s12 + $0x5b] sm:$0xff] }
  0x9f   : > { %v829_v19 = vadd.f32 %v793_v59, %v716_v36  ;;  %v1640_v28 = vsel %vm11142_vm7, %v1631_v13, %v11211_v57  ;;  %v627_v24 = vadd.f32 %v591_v51, %v514_v25  ;;  %v11351_v59 = vld [vmem:[%s14574_s1] ss:$0 sm:$0xff]  ;;  %v1088_v43 = vmul.f32 %v10859_v44, %v1047_v60  ;;  %v11359_v49 = vld [vmem:[%s14574_s1 + $0x1] ss:$0 sm:$0xff]  ;;  %v338_v36 = vld [vmem:[%s10809_s12 + $0xb8] sm:$0xff] }
  0xa0   : > { %v1269_v29 = vmax.f32 %v1233_v0, 0.0  ;;  %v364_v30 = vmul.f32 %v11351_v59, %v324_v52  ;;  %1959 = vst [vmem:[#allocation2 + $0x28] sm:$0xf] %v1640_v28  ;;  %v477_v34 = vmul.f32 %v11359_v49, %v436_v40  ;;  %v590_v23 = vmul.f32 %v11365_v38, %v11184_v55  ;;  %v11375_v52 = vld [vmem:[%s14574_s1 + $0x3] ss:$0 sm:$0xff]  ;;  %v450_v0 = vld [vmem:[%s10809_s12 + $0xb9] sm:$0xff] }
  0xa1   : > { %v942_v1 = vadd.f32 %v906_v2, %v829_v19  ;;  %v706_v44 = vadd.f32 %v670_v26, %v627_v24  ;;  %v1201_v51 = vmul.f32 %v10887_v63, %v1160_v11  ;;  %v669_v13 = vmul.f32 %v11375_v52, %v10882_v62  ;;  %v11381_v25 = vld [vmem:[%s10809_s12 + $0xba] sm:$0xff]  ;;  %v11386_v26 = vld [vmem:[%s14574_s1 + $0x4] ss:$0 sm:$0xff]  ;;  %v11392_v40 = vld [vmem:[%s14574_s1 + $0x5] ss:$0 sm:$0xff] }
  0xa2   : > { %v1485_v2 = vmul.f32 %v11337_v58, %v1269_v29  ;;  %v513_v60 = vadd.f32 %v477_v34, %v364_v30  ;;  %v782_v63 = vmul.f32 %v11386_v26, %v741_v41  ;;  %v895_v62 = vmul.f32 %v11392_v40, %v11219_v4  ;;  %v1046_v19 = vld [vmem:[%s10809_s12 + $0x6d] sm:$0xff]  ;;  %v11400_v28 = vld [vmem:[%s14574_s1 + $0x6] ss:$0 sm:$0xff] }
  0xa3   : > { %v1021_v55 = vadd.f32 %v985_v3, %v942_v1  ;;  %v819_v3 = vadd.f32 %v783_v53, %v706_v44  ;;  %v974_v29 = vmul.f32 %v11400_v28, %v10951_v56  ;;  %v378_v24 = vmul.f32 %v11351_v59, %v338_v36  ;;  %v11406_v30 = vld [vmem:[%s10809_s12 + $0xca] sm:$0xff]  ;;  %v11415_v56 = vld [vmem:[%s14574_s1 + $0x7] ss:$0 sm:$0xff] }
  0xa4   : > { %v1521_v11 = vpack.c.bf16 %v1485_v2, %v1485_v2  ;;  %v626_v4 = vadd.f32 %v590_v23, %v513_v60  ;;  %v1159_v1 = vld [vmem:[%s10809_s12 + $0x6e] sm:$0xff]  ;;  %v491_v34 = vmul.f32 %v11359_v49, %v450_v0  ;;  %v604_v53 = vmul.f32 %v11365_v38, %v11381_v25 }
  0xa5   : > { %v1134_v41 = vadd.f32 %v1098_v48, %v1021_v55  ;;  %v932_v45 = vadd.f32 %v896_v17, %v819_v3  ;;  %v1087_v36 = vmul.f32 %v11415_v56, %v1046_v19  ;;  %v755_v48 = vld [vmem:[%s10809_s12 + $0xcb] sm:$0xff]  ;;  %v683_v0 = vmul.f32 %v11375_v52, %v11406_v30  ;;  %v11432_v19 = vld [vmem:[%s14574_s1 + $0x8] ss:$0 sm:$0xff] }
  0xa6   : > { %v1613_v2 = vshrl.u32 %v1521_v11, 16  ;;  %v1616_v44 = vshll.u32 %v1521_v11, 16  ;;  %v705_v23 = vadd.f32 %v669_v13, %v626_v4  ;;  %v527_v60 = vadd.f32 %v491_v34, %v378_v24  ;;  %v11425_v11 = vld [vmem:[%s10809_s12 + $0xdc] sm:$0xff]  ;;  %v328_v13 = vld [vmem:[%s10809_s12 + $0x68] sm:$0xff] }
  0xa7   : > { %v1247_v55 = vadd.f32 %v1211_v21, %v1134_v41  ;;  %v1011_v58 = vadd.f32 %v975_v27, %v932_v45  ;;  %v1200_v21 = vmul.f32 %v11432_v19, %v1159_v1  ;;  %v796_v34 = vmul.f32 %v11386_v26, %v755_v48 }
  0xa8   : > { %v1615_v17 = vrot.slane %v1613_v2, 6  ;;  %v1618_v3 = vrot.slane %v1616_v44, 7  ;;  %v818_v41 = vadd.f32 %v782_v63, %v705_v23  ;;  %v640_v4 = vadd.f32 %v604_v53, %v527_v60  ;;  %v440_v2 = vld [vmem:[%s10809_s12 + $0x69] sm:$0xff]  ;;  %v11445_v53 = vld [vmem:[%s10809_s12 + $0x7a] sm:$0xff] }
  0xa9   : > { %v1283_v24 = vmax.f32 %v1247_v55, 0.0  ;;  %v1124_v54 = vadd.f32 %v1088_v43, %v1011_v58  ;;  %v909_v45 = vmul.f32 %v11392_v40, %v11422_v46  ;;  %v988_v27 = vmul.f32 %v11400_v28, %v11425_v11  ;;  %v1060_v60 = vld [vmem:[%s10809_s12 + $0xdd] sm:$0xff] }
  0xaa   : > { %v1619_v44 = vor.u32 %v1618_v3, %v1615_v17  ;;  %v931_v1 = vadd.f32 %v895_v62, %v818_v41  ;;  %v719_v55 = vadd.f32 %v683_v0, %v640_v4  ;;  %v368_v63 = vmul.f32 %v11351_v59, %v328_v13  ;;  %v11455_v62 = vpop.permute.xlu1 %1351 }
  0xab   : > { %v1499_v61 = vmul.f32 %v11427_v7, %v1283_v24  ;;  %v14655_v48 = vrot.slane %v11151_v50, 4  ;;  %v1237_v23 = vadd.f32 %v1201_v51, %v1124_v54  ;;  %v481_v17 = vmul.f32 %v11359_v49, %v440_v2  ;;  %14656 = vst [vmem:[#allocation19_spill] sm:$0xff] %v11455_v62  ;;  %v10586_v24 = vld [vmem:[%s10809_s12 + $0x6a] sm:$0xff]  ;;  %v745_v50 = vld [vmem:[%s10809_s12 + $0x7b] sm:$0xff] }
  0xac   : > { %v1621_v43 = vrot.slane %v1619_v44, 4  ;;  %v1010_v0 = vadd.f32 %v974_v29, %v931_v1  ;;  %v832_v13 = vadd.f32 %v796_v34, %v719_v55  ;;  %v594_v41 = vmul.f32 %v10586_v24, %v11365_v38  ;;  %v1173_v51 = vld [vmem:[%s10809_s12 + $0xde] sm:$0xff] }
  0xad   : > { %v1620_v58 = vsel %vm11142_vm7, %v14655_v48, %v1619_v44  ;;  %v11453_v3 = vpack.c.bf16 %v1499_v61, %v1499_v61  ;;  %v1273_v54 = vmax.f32 %v1237_v23, 0.0  ;;  %v517_v44 = vadd.f32 %v481_v17, %v368_v63  ;;  %v11580_v7 = vld [vmem:[%s10809_s12 + $0xa4] sm:$0xff] }
  0xae   : > { %1957 = vst [vmem:[#allocation2 + $0x20] sm:$0xf] %v1620_v58  ;;  %v1630_v4 = vsel %vm11142_vm7, %v1621_v43, %v11319_v9  ;;  %v673_v61 = vmul.f32 %v11375_v52, %v11445_v53  ;;  %v1123_v34 = vadd.f32 %v1087_v36, %v1010_v0  ;;  %v945_v2 = vadd.f32 %v909_v45, %v832_v13  ;;  %v11472_v58 = vld [vmem:[%s10809_s12 + $0x8c] sm:$0xff]  ;;  %v11481_v13 = vpop.permute.xlu0 %1346 }
  0xaf   : > { %1958 = vst [vmem:[#allocation2 + $0x24] sm:$0xf] %v1630_v4  ;;  %v1753_v29 = vshrl.u32 %v11453_v3, 16  ;;  %v1101_v1 = vmul.f32 %v11415_v56, %v1060_v60  ;;  %v1489_v9 = vmul.f32 %v11455_v62, %v1273_v54  ;;  %v630_v48 = vadd.f32 %v594_v41, %v517_v44  ;;  %v327_v60 = vld [vmem:[%s10809_s12 + $0x60] sm:$0xff] }
  0xb0   : > { %v786_v63 = vmul.f32 %v11386_v26, %v745_v50  ;;  %v11476_v43 = vor.u32 %v11302_v37, %v11300_v39  ;;  %v1236_v23 = vadd.f32 %v1200_v21, %v1123_v34  ;;  %v1024_v36 = vadd.f32 %v988_v27, %v945_v2  ;;  %14657 = vst [vmem:[#allocation20_spill] sm:$0xff] %v11481_v13  ;;  %v1050_v50 = vld [vmem:[%s10809_s12 + $0x8d] sm:$0xff]  ;;  %v439_v4 = vld [vmem:[%s10809_s12 + $0x61] sm:$0xff] }
  0xb1   : > { %v1214_v45 = vmul.f32 %v11432_v19, %v1173_v51  ;;  %v1756_v17 = vshll.u32 %v11453_v3, 16  ;;  %v1525_v0 = vpack.c.bf16 %v1489_v9, %v1489_v9  ;;  %v709_v24 = vadd.f32 %v673_v61, %v630_v48  ;;  %v1163_v2 = vld [vmem:[%s10809_s12 + $0x8e] sm:$0xff]  ;;  %v1166_v62 = vld [vmem:[%s10809_s12 + $0xa6] sm:$0xff] }
  0xb2   : > { %v899_v41 = vmul.f32 %v11392_v40, %v10964_v8  ;;  %v11487_v39 = vrot.slane %v1753_v29, 6  ;;  %v1272_v37 = vmax.f32 %v1236_v23, 0.0  ;;  %v1137_v21 = vadd.f32 %v1101_v1, %v1024_v36  ;;  %v744_v29 = vld [vmem:[%s10809_s12 + $0x73] sm:$0xff]  ;;  %v11497_v1 = vpop.permute.xlu2 %1416 }
  0xb3   : > { %v978_v27 = vmul.f32 %v11400_v28, %v11472_v58  ;;  %v1653_v54 = vshrl.u32 %v1525_v0, 16  ;;  %v1656_v3 = vshll.u32 %v1525_v0, 16  ;;  %v822_v51 = vadd.f32 %v786_v63, %v709_v24  ;;  %14658 = vst [vmem:[#allocation21_spill] sm:$0xff] %v11497_v1 }
  0xb4   : > { %v367_v44 = vmul.f32 %v11351_v59, %v327_v60  ;;  %v1488_v61 = vmul.f32 %v11481_v13, %v1272_v37  ;;  %v1250_v34 = vadd.f32 %v1214_v45, %v1137_v21  ;;  %v1091_v8 = vmul.f32 %v11415_v56, %v1050_v50 }
  0xb5   : > { %v480_v9 = vmul.f32 %v11359_v49, %v439_v4  ;;  %v1655_v48 = vrot.slane %v1653_v54, 6  ;;  %v1658_v23 = vrot.slane %v1656_v3, 7  ;;  %v935_v36 = vadd.f32 %v899_v41, %v822_v51  ;;  %v341_v51 = vld [vmem:[%s10809_s12 + $0xd0] sm:$0xff] }
  0xb6   : > { %v593_v63 = vmul.f32 %v11365_v38, %v11317_v14  ;;  %v1524_v0 = vpack.c.bf16 %v1488_v61, %v1488_v61  ;;  %v1286_v60 = vmax.f32 %v1250_v34, 0.0  ;;  %v672_v45 = vmul.f32 %v11375_v52, %v11039_v47  ;;  %v11574_v55 = vpop.permute.xlu0 %1361 }
  0xb7   : > { %v516_v24 = vadd.f32 %v480_v9, %v367_v44  ;;  %v1659_v50 = vor.u32 %v1658_v23, %v1655_v48  ;;  %v1014_v37 = vadd.f32 %v978_v27, %v935_v36  ;;  %v1204_v4 = vmul.f32 %v11432_v19, %v1163_v2  ;;  %v1049_v23 = vld [vmem:[%s10809_s12 + $0x85] sm:$0xff]  ;;  %v11512_v36 = vld [vmem:[%s10809_s12 + $0xd2] sm:$0xff]  ;;  %14661 = vst [vmem:[#allocation23_spill] sm:$0xff] %v11574_v55 }
  0xb8   : > { %v785_v21 = vmul.f32 %v11386_v26, %v744_v29  ;;  %v1643_v54 = vshrl.u32 %v1524_v0, 16  ;;  %v1646_v41 = vshll.u32 %v1524_v0, 16  ;;  %v1502_v3 = vmul.f32 %v11497_v1, %v1286_v60  ;;  %v453_v29 = vld [vmem:[%s10809_s12 + $0xd1] sm:$0xff] }
  0xb9   : > { %v629_v14 = vadd.f32 %v593_v63, %v516_v24  ;;  %v1758_v61 = vrot.slane %v1756_v17, 7  ;;  %v1661_v44 = vrot.slane %v1659_v50, 4  ;;  %v1127_v34 = vadd.f32 %v1091_v8, %v1014_v37 }
  0xba   : > { %v898_v47 = vmul.f32 %v11392_v40, %v11325_v33  ;;  %v1645_v27 = vrot.slane %v1643_v54, 6  ;;  %v1648_v9 = vrot.slane %v1646_v41, 7  ;;  %v1538_v2 = vpack.c.bf16 %v1502_v3, %v1502_v3  ;;  %v11523_v54 = vld [vmem:[%s10809_s12 + $0xe2] sm:$0xff] }
  0xbb   : > { %v708_v48 = vadd.f32 %v672_v45, %v629_v14  ;;  %v1670_v63 = vsel %vm11142_vm7, %v1661_v44, %v11243_v20  ;;  %v1240_v17 = vadd.f32 %v1204_v4, %v1127_v34  ;;  %v977_v8 = vmul.f32 %v11400_v28, %v11060_v12  ;;  %v11520_v45 = vpop.permute.xlu1 %1366  ;;  %v1162_v3 = vld [vmem:[%s10809_s12 + $0x86] sm:$0xff] }
  0xbc   : > { %v381_v33 = vmul.f32 %v11351_v59, %v341_v51  ;;  %1962 = vst [vmem:[#allocation2 + $0x34] sm:$0xf] %v1670_v63  ;;  %v1649_v0 = vor.u32 %v1648_v9, %v1645_v27  ;;  %v1783_v60 = vshrl.u32 %v1538_v2, 16  ;;  %v1786_v24 = vshll.u32 %v1538_v2, 16  ;;  %v758_v9 = vld [vmem:[%s10809_s12 + $0xe3] sm:$0xff] }
  0xbd   : > { %14659 = vst [vmem:[#allocation22_spill] sm:$0xff] %v11520_v45  ;;  %v821_v37 = vadd.f32 %v785_v21, %v708_v48  ;;  %v1276_v41 = vmax.f32 %v1240_v17, 0.0  ;;  %v1090_v4 = vmul.f32 %v11415_v56, %v1049_v23  ;;  %v494_v12 = vmul.f32 %v11359_v49, %v453_v29  ;;  %v11539_v63 = vld [vmem:[%s10809_s12 + $0xe4] sm:$0xff] }
  0xbe   : > { %v607_v14 = vmul.f32 %v11365_v38, %v11512_v36  ;;  %v14660_v51 = vrot.slane %v11211_v57, 4  ;;  %v1651_v21 = vrot.slane %v1649_v0, 4  ;;  %v1785_v34 = vrot.slane %v1783_v60, 6  ;;  %v331_v57 = vld [vmem:[%s10809_s12 + $0x80] sm:$0xff] }
  0xbf   : > { %v1788_v27 = vrot.slane %v1786_v24, 7  ;;  %v1492_v2 = vmul.f32 %v11520_v45, %v1276_v41  ;;  %v934_v48 = vadd.f32 %v898_v47, %v821_v37  ;;  %v530_v23 = vadd.f32 %v494_v12, %v381_v33  ;;  %v443_v17 = vld [vmem:[%s10809_s12 + $0x81] sm:$0xff]  ;;  %v11552_v12 = vld [vmem:[%s10809_s12 + $0xf4] sm:$0xff] }
  0xc0   : > { %v1650_v44 = vsel %vm11142_vm7, %v14660_v51, %v1649_v0  ;;  %v686_v29 = vmul.f32 %v11375_v52, %v11523_v54  ;;  %v11545_v0 = vor.u32 %v1758_v61, %v11487_v39  ;;  %v1660_v60 = vsel %vm11142_vm7, %v1651_v21, %v1659_v50 }
  0xc1   : > { %1960 = vst [vmem:[#allocation2 + $0x2c] sm:$0xf] %v1650_v44  ;;  %v1203_v24 = vmul.f32 %v11432_v19, %v1162_v3  ;;  %v1528_v47 = vpack.c.bf16 %v1492_v2, %v1492_v2  ;;  %v1013_v33 = vadd.f32 %v977_v8, %v934_v48  ;;  %v643_v37 = vadd.f32 %v607_v14, %v530_v23  ;;  %v11555_v44 = vld [vmem:[%s10809_s12 + $0x92] sm:$0xff] }
  0xc2   : > { %1961 = vst [vmem:[#allocation2 + $0x30] sm:$0xf] %v1660_v60  ;;  %v799_v41 = vmul.f32 %v11386_v26, %v758_v9  ;;  %v11557_v39 = vor.u32 %v1788_v27, %v1785_v34  ;;  %v912_v50 = vmul.f32 %v11392_v40, %v11539_v63  ;;  %v371_v61 = vmul.f32 %v11351_v59, %v331_v57  ;;  %v1063_v2 = vld [vmem:[%s10809_s12 + $0xf5] sm:$0xff]  ;;  %v10587_v60 = vld [vmem:[%s10809_s12 + $0x82] sm:$0xff] }
  0xc3   : > { %v484_v3 = vmul.f32 %v11359_v49, %v443_v17  ;;  %v1683_v21 = vshrl.u32 %v1528_v47, 16  ;;  %v1686_v8 = vshll.u32 %v1528_v47, 16  ;;  %v1126_v14 = vadd.f32 %v1090_v4, %v1013_v33  ;;  %v1176_v48 = vld [vmem:[%s10809_s12 + $0xf6] sm:$0xff] }
  0xc4   : > { %v722_v9 = vadd.f32 %v686_v29, %v643_v37  ;;  %v748_v23 = vld [vmem:[%s10809_s12 + $0x93] sm:$0xff]  ;;  %v991_v34 = vmul.f32 %v11400_v28, %v11552_v12  ;;  %v597_v51 = vmul.f32 %v10587_v60, %v11365_v38  ;;  %v676_v57 = vmul.f32 %v11375_v52, %v11555_v44 }
  0xc5   : > { %v520_v27 = vadd.f32 %v484_v3, %v371_v61  ;;  %v1685_v17 = vrot.slane %v1683_v21, 6  ;;  %v1688_v47 = vrot.slane %v1686_v8, 7  ;;  %v1239_v4 = vadd.f32 %v1203_v24, %v1126_v14  ;;  %v330_v33 = vld [vmem:[%s10809_s12 + $0x78] sm:$0xff] }
  0xc6   : > { %v835_v29 = vadd.f32 %v799_v41, %v722_v9  ;;  %v442_v37 = vld [vmem:[%s10809_s12 + $0x79] sm:$0xff]  ;;  %v1104_v1 = vmul.f32 %v11415_v56, %v1063_v2  ;;  %v1217_v61 = vmul.f32 %v11432_v19, %v1176_v48  ;;  %v789_v60 = vmul.f32 %v11386_v26, %v748_v23  ;;  %v1053_v9 = vld [vmem:[%s10809_s12 + $0xa5] sm:$0xff] }
  0xc7   : > { %v633_v3 = vadd.f32 %v597_v51, %v520_v27  ;;  %v11582_v21 = vor.u32 %v1688_v47, %v1685_v17  ;;  %v1275_v8 = vmax.f32 %v1239_v4, 0.0  ;;  %v10588_v41 = vld [vmem:[%s10809_s12 + $0x94] sm:$0xff]  ;;  %v370_v2 = vmul.f32 %v11351_v59, %v330_v33  ;;  %v747_v47 = vld [vmem:[%s10809_s12 + $0x8b] sm:$0xff] }
  0xc8   : > { %v948_v24 = vadd.f32 %v912_v50, %v835_v29  ;;  %v902_v14 = vmul.f32 %v10588_v41, %v11392_v40  ;;  %v483_v51 = vmul.f32 %v11359_v49, %v442_v37  ;;  %v596_v48 = vmul.f32 %v11365_v38, %v11445_v53  ;;  %v344_v37 = vld [vmem:[%s10809_s12 + $0xe8] sm:$0xff] }
  0xc9   : > { %v712_v45 = vadd.f32 %v676_v57, %v633_v3  ;;  %v1691_v23 = vrot.slane %v11582_v21, 4  ;;  %v1491_v50 = vmul.f32 %v11574_v55, %v1275_v8  ;;  %v981_v17 = vmul.f32 %v11400_v28, %v11580_v7 }
  0xca   : > { %v1027_v27 = vadd.f32 %v991_v34, %v948_v24  ;;  %v1094_v4 = vmul.f32 %v11415_v56, %v1053_v9  ;;  %v519_v29 = vadd.f32 %v483_v51, %v370_v2  ;;  %v675_v33 = vmul.f32 %v11375_v52, %v11133_v15  ;;  %v456_v24 = vld [vmem:[%s10809_s12 + $0xe9] sm:$0xff] }
  0xcb   : > { %v825_v57 = vadd.f32 %v789_v60, %v712_v45  ;;  %v1700_v53 = vsel %vm11142_vm7, %v1691_v23, %v11285_v35  ;;  %v1527_v3 = vpack.c.bf16 %v1491_v50, %v1491_v50  ;;  %v1207_v34 = vmul.f32 %v11432_v19, %v1166_v62  ;;  %v11607_v45 = vld [vmem:[%s10809_s12 + $0xea] sm:$0xff]  ;;  %v11614_v62 = vld [vmem:[%s10809_s12 + $0xfa] sm:$0xff]  ;;  %v11616_v50 = vpop.permute.xlu2 %1431 }
  0xcc   : > { %v1140_v8 = vadd.f32 %v1104_v1, %v1027_v27  ;;  %1965 = vst [vmem:[#allocation2 + $0x40] sm:$0xf] %v1700_v53  ;;  %v632_v41 = vadd.f32 %v596_v48, %v519_v29  ;;  %v788_v15 = vmul.f32 %v11386_v26, %v747_v47  ;;  %v901_v9 = vmul.f32 %v11392_v40, %v11472_v58  ;;  %v1165_v48 = vld [vmem:[%s10809_s12 + $0x9e] sm:$0xff] }
  0xcd   : > { %v938_v60 = vadd.f32 %v902_v14, %v825_v57  ;;  %v1673_v2 = vshrl.u32 %v1527_v3, 16  ;;  %v1676_v51 = vshll.u32 %v1527_v3, 16  ;;  %v384_v1 = vmul.f32 %v11351_v59, %v344_v37  ;;  %14662 = vst [vmem:[#allocation24_spill] sm:$0xff] %v11616_v50  ;;  %v1052_v14 = vld [vmem:[%s10809_s12 + $0x9d] sm:$0xff] }
  0xce   : > { %v1253_v23 = vadd.f32 %v1217_v61, %v1140_v8  ;;  %v711_v53 = vadd.f32 %v675_v33, %v632_v41  ;;  %v497_v47 = vmul.f32 %v11359_v49, %v456_v24  ;;  %v610_v58 = vmul.f32 %v11365_v38, %v11607_v45  ;;  %v761_v3 = vld [vmem:[%s10809_s12 + $0xfb] sm:$0xff] }
  0xcf   : > { %v1017_v27 = vadd.f32 %v981_v17, %v938_v60  ;;  %v1675_v57 = vrot.slane %v1673_v2, 6  ;;  %v1678_v29 = vrot.slane %v1676_v51, 7  ;;  %v980_v37 = vmul.f32 %v11400_v28, %v11163_v31  ;;  %v11629_v24 = vld [vmem:[%s10809_s12 + $0xfc] sm:$0xff] }
  0xd0   : > { %v1289_v61 = vmax.f32 %v1253_v23, 0.0  ;;  %v824_v17 = vadd.f32 %v788_v15, %v711_v53  ;;  %v533_v33 = vadd.f32 %v497_v47, %v384_v1  ;;  %v689_v60 = vmul.f32 %v11375_v52, %v11614_v62  ;;  %v334_v23 = vld [vmem:[%s10809_s12 + $0x98] sm:$0xff]  ;;  %v11637_v15 = vld [vmem:[%s10809_s12 + $0x10c] sm:$0xff] }
  0xd1   : > { %v1130_v8 = vadd.f32 %v1094_v4, %v1017_v27  ;;  %v1679_v41 = vor.u32 %v1678_v29, %v1675_v57  ;;  %v1093_v2 = vmul.f32 %v11415_v56, %v1052_v14  ;;  %v1206_v51 = vmul.f32 %v11432_v19, %v1165_v48  ;;  %v446_v1 = vld [vmem:[%s10809_s12 + $0x99] sm:$0xff]  ;;  %v11644_v57 = vpop.permute.xlu1 %1381 }
  0xd2   : > { %v1505_v55 = vmul.f32 %v11616_v50, %v1289_v61  ;;  %v937_v13 = vadd.f32 %v901_v9, %v824_v17  ;;  %v646_v10 = vadd.f32 %v610_v58, %v533_v33  ;;  %v802_v4 = vmul.f32 %v11386_v26, %v761_v3  ;;  %14664 = vst [vmem:[#allocation25_spill] sm:$0xff] %v11644_v57  ;;  %v1179_v33 = vld [vmem:[%s10809_s12 + $0x10e] sm:$0xff] }
  0xd3   : > { %v1243_v31 = vadd.f32 %v1207_v34, %v1130_v8  ;;  %v14663_v27 = vrot.slane %v11243_v20, 4  ;;  %v1681_v47 = vrot.slane %v1679_v41, 4  ;;  %v915_v34 = vmul.f32 %v11392_v40, %v11629_v24  ;;  %v11650_v20 = vld [vmem:[%s10809_s12 + $0xaa] sm:$0xff] }
  0xd4   : > { %v1541_v14 = vpack.c.bf16 %v1505_v55, %v1505_v55  ;;  %v1016_v48 = vadd.f32 %v980_v37, %v937_v13  ;;  %v725_v58 = vadd.f32 %v689_v60, %v646_v10  ;;  %v374_v29 = vmul.f32 %v11351_v59, %v334_v23  ;;  %v1066_v8 = vld [vmem:[%s10809_s12 + $0x10d] sm:$0xff]  ;;  %v10589_v60 = vld [vmem:[%s10809_s12 + $0x9a] sm:$0xff] }
  0xd5   : > { %v1680_v53 = vsel %vm11142_vm7, %v14663_v27, %v1679_v41  ;;  %v1279_v9 = vmax.f32 %v1243_v31, 0.0  ;;  %v1690_v55 = vsel %vm11142_vm7, %v1681_v47, %v11582_v21  ;;  %v994_v3 = vmul.f32 %v11400_v28, %v11637_v15  ;;  %v751_v23 = vld [vmem:[%s10809_s12 + $0xab] sm:$0xff] }
  0xd6   : > { %1963 = vst [vmem:[#allocation2 + $0x38] sm:$0xf] %v1680_v53  ;;  %v487_v17 = vmul.f32 %v11359_v49, %v446_v1  ;;  %v1129_v13 = vadd.f32 %v1093_v2, %v1016_v48  ;;  %v838_v37 = vadd.f32 %v802_v4, %v725_v58  ;;  %v600_v41 = vmul.f32 %v10589_v60, %v11365_v38  ;;  %v11670_v4 = vld [vmem:[%s10809_s12 + $0xbc] sm:$0xff]  ;;  %v11672_v48 = vpop.permute.xlu0 %1376 }
  0xd7   : > { %1964 = vst [vmem:[#allocation2 + $0x3c] sm:$0xf] %v1690_v55  ;;  %v1495_v10 = vmul.f32 %v11644_v57, %v1279_v9  ;;  %v1813_v21 = vshrl.u32 %v1541_v14, 16  ;;  %v679_v53 = vmul.f32 %v11375_v52, %v11650_v20  ;;  %v1107_v2 = vmul.f32 %v11415_v56, %v1066_v8  ;;  %v10590_v8 = vld [vmem:[%s10809_s12 + $0xac] sm:$0xff] }
  0xd8   : > { %v523_v27 = vadd.f32 %v487_v17, %v374_v29  ;;  %v1242_v47 = vadd.f32 %v1206_v51, %v1129_v13  ;;  %v951_v55 = vadd.f32 %v915_v34, %v838_v37  ;;  %v1816_v9 = vshll.u32 %v1541_v14, 16  ;;  %14665 = vst [vmem:[#allocation26_spill] sm:$0xff] %v11672_v48  ;;  %v333_v51 = vld [vmem:[%s10809_s12 + $0x90] sm:$0xff] }
  0xd9   : > { %v1531_v1 = vpack.c.bf16 %v1495_v10, %v1495_v10  ;;  %v1220_v58 = vmul.f32 %v11432_v19, %v1179_v33  ;;  %v792_v29 = vmul.f32 %v11386_v26, %v751_v23  ;;  %v445_v34 = vld [vmem:[%s10809_s12 + $0x91] sm:$0xff]  ;;  %v1815_v13 = vrot.slane %v1813_v21, 6 }
  0xda   : > { %v636_v60 = vadd.f32 %v600_v41, %v523_v27  ;;  %v1278_v61 = vmax.f32 %v1242_v47, 0.0  ;;  %v1030_v10 = vadd.f32 %v994_v3, %v951_v55  ;;  %v905_v14 = vmul.f32 %v10590_v8, %v11392_v40 }
  0xdb   : > { %v1713_v17 = vshrl.u32 %v1531_v1, 16  ;;  %v1716_v31 = vshll.u32 %v1531_v1, 16  ;;  %v984_v33 = vmul.f32 %v11400_v28, %v11670_v4  ;;  %v1056_v1 = vld [vmem:[%s10809_s12 + $0xbd] sm:$0xff]  ;;  %v373_v3 = vmul.f32 %v11351_v59, %v333_v51 }
  0xdc   : > { %v715_v37 = vadd.f32 %v679_v53, %v636_v60  ;;  %v1494_v23 = vmul.f32 %v11672_v48, %v1278_v61  ;;  %v1143_v50 = vadd.f32 %v1107_v2, %v1030_v10  ;;  %v486_v21 = vmul.f32 %v11359_v49, %v445_v34 }
  0xdd   : > { %v1715_v41 = vrot.slane %v1713_v17, 6  ;;  %v1718_v27 = vrot.slane %v1716_v31, 7  ;;  %v599_v53 = vmul.f32 %v11365_v38, %v11555_v44  ;;  %v1818_v55 = vrot.slane %v1816_v9, 7  ;;  %v750_v31 = vld [vmem:[%s10809_s12 + $0xa3] sm:$0xff]  ;;  %v11690_v17 = vpop.permute.xlu2 %1446 }
  0xde   : > { %v828_v47 = vadd.f32 %v792_v29, %v715_v37  ;;  %v1530_v8 = vpack.c.bf16 %v1494_v23, %v1494_v23  ;;  %v1256_v57 = vadd.f32 %v1220_v58, %v1143_v50  ;;  %14666 = vst [vmem:[#allocation27_spill] sm:$0xff] %v11690_v17  ;;  %v1097_v2 = vmul.f32 %v11415_v56, %v1056_v1  ;;  %v347_v37 = vld [vmem:[%s10809_s12 + $0x100] sm:$0xff] }
  0xdf   : > { %v1719_v60 = vor.u32 %v1718_v27, %v1715_v41  ;;  %v522_v29 = vadd.f32 %v486_v21, %v373_v3  ;;  %v678_v10 = vmul.f32 %v11375_v52, %v11277_v18  ;;  %v1210_v58 = vmul.f32 %v11432_v19, %v1169_v6  ;;  %v1055_v21 = vld [vmem:[%s10809_s12 + $0xb5] sm:$0xff] }
  0xe0   : > { %v941_v61 = vadd.f32 %v905_v14, %v828_v47  ;;  %v1703_v44 = vshrl.u32 %v1530_v8, 16  ;;  %v1706_v34 = vshll.u32 %v1530_v8, 16  ;;  %v1292_v9 = vmax.f32 %v1256_v57, 0.0  ;;  %v459_v14 = vld [vmem:[%s10809_s12 + $0x101] sm:$0xff] }
  0xe1   : > { %v1721_v51 = vrot.slane %v1719_v60, 4  ;;  %v635_v41 = vadd.f32 %v599_v53, %v522_v29  ;;  %v791_v27 = vmul.f32 %v11386_v26, %v750_v31  ;;  %v11704_v57 = vld [vmem:[%s10809_s12 + $0x102] sm:$0xff]  ;;  %v904_v6 = vmul.f32 %v11392_v40, %v11580_v7  ;;  %v1168_v7 = vld [vmem:[%s10809_s12 + $0xb6] sm:$0xff] }
  0xe2   : > { %v1020_v50 = vadd.f32 %v984_v33, %v941_v61  ;;  %v1705_v1 = vrot.slane %v1703_v44, 6  ;;  %v1708_v18 = vrot.slane %v1706_v34, 7  ;;  %v1508_v47 = vmul.f32 %v11690_v17, %v1292_v9 }
  0xe3   : > { %v1730_v23 = vsel %vm11142_vm7, %v1721_v51, %v11476_v43  ;;  %v714_v3 = vadd.f32 %v678_v10, %v635_v41  ;;  %v387_v53 = vmul.f32 %v11351_v59, %v347_v37  ;;  %v11710_v8 = vor.u32 %v1818_v55, %v1815_v13  ;;  %v11714_v51 = vld [vmem:[%s10809_s12 + $0x112] sm:$0xff] }
  0xe4   : > { %1968 = vst [vmem:[#allocation2 + $0x4c] sm:$0xf] %v1730_v23  ;;  %v1133_v33 = vadd.f32 %v1097_v2, %v1020_v50  ;;  %v1709_v31 = vor.u32 %v1708_v18, %v1705_v1  ;;  %v1544_v61 = vpack.c.bf16 %v1508_v47, %v1508_v47  ;;  %v500_v29 = vmul.f32 %v11359_v49, %v459_v14  ;;  %v11725_v50 = vpop.permute.xlu1 %1396  ;;  %v764_v41 = vld [vmem:[%s10809_s12 + $0x113] sm:$0xff]  ;;  %v11767_v47 = vpop.permute.xlu0 %1391 }
  0xe5   : > { %v827_v34 = vadd.f32 %v791_v27, %v714_v3  ;;  %v983_v2 = vmul.f32 %v11400_v28, %v11295_v5  ;;  %v613_v10 = vmul.f32 %v11365_v38, %v11704_v57  ;;  %v14667_v13 = vrot.slane %v11285_v35, 4  ;;  %14668 = vst [vmem:[#allocation28_spill] sm:$0xff] %v11725_v50  ;;  %v11732_v35 = vld [vmem:[%s10809_s12 + $0x114] sm:$0xff] }
  0xe6   : > { %v1246_v44 = vadd.f32 %v1210_v58, %v1133_v33  ;;  %v1711_v9 = vrot.slane %v1709_v31, 4  ;;  %v1843_v37 = vshrl.u32 %v1544_v61, 16  ;;  %v1096_v58 = vmul.f32 %v11415_v56, %v1055_v21  ;;  %v337_v1 = vld [vmem:[%s10809_s12 + $0xb0] sm:$0xff]  ;;  %14669 = vst [vmem:[#allocation29_spill] sm:$0xff] %v11767_v47 }
  0xe7   : > { %v1710_v55 = vsel %vm11142_vm7, %v14667_v13, %v1709_v31  ;;  %v940_v5 = vadd.f32 %v904_v6, %v827_v34  ;;  %v536_v14 = vadd.f32 %v500_v29, %v387_v53  ;;  %v692_v23 = vmul.f32 %v11375_v52, %v11714_v51  ;;  %v449_v18 = vld [vmem:[%s10809_s12 + $0xb1] sm:$0xff]  ;;  %v11746_v34 = vld [vmem:[%s10809_s12 + $0xc2] sm:$0xff] }
  0xe8   : > { %1966 = vst [vmem:[#allocation2 + $0x44] sm:$0xf] %v1710_v55  ;;  %v1282_v27 = vmax.f32 %v1246_v44, 0.0  ;;  %v1720_v33 = vsel %vm11142_vm7, %v1711_v9, %v1719_v60  ;;  %v1846_v3 = vshll.u32 %v1544_v61, 16  ;;  %v1209_v21 = vmul.f32 %v11432_v19, %v1168_v7  ;;  %v11743_v44 = vld [vmem:[%s10809_s12 + $0x124] sm:$0xff] }
  0xe9   : > { %1967 = vst [vmem:[#allocation2 + $0x48] sm:$0xf] %v1720_v33  ;;  %v1019_v53 = vadd.f32 %v983_v2, %v940_v5  ;;  %v649_v31 = vadd.f32 %v613_v10, %v536_v14  ;;  %v805_v29 = vmul.f32 %v11386_v26, %v764_v41  ;;  %v11748_v13 = vrot.slane %v1843_v37, 6  ;;  %v1069_v9 = vld [vmem:[%s10809_s12 + $0x125] sm:$0xff] }
  0xea   : > { %v1498_v6 = vmul.f32 %v11725_v50, %v1282_v27  ;;  %v918_v60 = vmul.f32 %v11392_v40, %v11732_v35  ;;  %v377_v61 = vmul.f32 %v11351_v59, %v337_v1  ;;  %v490_v7 = vmul.f32 %v11359_v49, %v449_v18  ;;  %v1182_v41 = vld [vmem:[%s10809_s12 + $0x126] sm:$0xff] }
  0xeb   : > { %v1132_v2 = vadd.f32 %v1096_v58, %v1019_v53  ;;  %v728_v10 = vadd.f32 %v692_v23, %v649_v31  ;;  %v603_v27 = vmul.f32 %v11365_v38, %v11283_v16  ;;  %v754_v5 = vld [vmem:[%s10809_s12 + $0xc3] sm:$0xff]  ;;  %v11759_v37 = vrot.slane %v1846_v3, 7 }
  0xec   : > { %v1534_v55 = vpack.c.bf16 %v1498_v6, %v1498_v6  ;;  %v997_v14 = vmul.f32 %v11400_v28, %v11743_v44  ;;  %v526_v33 = vadd.f32 %v490_v7, %v377_v61  ;;  %v682_v1 = vmul.f32 %v11375_v52, %v11746_v34  ;;  %v336_v53 = vld [vmem:[%s10809_s12 + $0xa8] sm:$0xff] }
  0xed   : > { %v1245_v58 = vadd.f32 %v1209_v21, %v1132_v2  ;;  %v841_v23 = vadd.f32 %v805_v29, %v728_v10  ;;  %v448_v31 = vld [vmem:[%s10809_s12 + $0xa9] sm:$0xff]  ;;  %v1110_v16 = vmul.f32 %v11415_v56, %v1069_v9  ;;  %v1223_v3 = vmul.f32 %v11432_v19, %v1182_v41  ;;  %v11773_v21 = vld [vmem:[%s10809_s12 + $0xd4] sm:$0xff] }
  0xee   : > { %v1743_v18 = vshrl.u32 %v1534_v55, 16  ;;  %v1746_v6 = vshll.u32 %v1534_v55, 16  ;;  %v639_v17 = vadd.f32 %v603_v27, %v526_v33  ;;  %v795_v61 = vmul.f32 %v11386_v26, %v754_v5  ;;  %v1059_v10 = vld [vmem:[%s10809_s12 + $0xd5] sm:$0xff] }
  0xef   : > { %v1281_v48 = vmax.f32 %v1245_v58, 0.0  ;;  %v954_v55 = vadd.f32 %v918_v60, %v841_v23  ;;  %v908_v2 = vmul.f32 %v11392_v40, %v11298_v42  ;;  %v376_v9 = vmul.f32 %v11351_v59, %v336_v53  ;;  %v350_v53 = vld [vmem:[%s10809_s12 + $0x118] sm:$0xff] }
  0xf0   : > { %v1745_v7 = vrot.slane %v1743_v18, 6  ;;  %v1748_v50 = vrot.slane %v1746_v6, 7  ;;  %v718_v29 = vadd.f32 %v682_v1, %v639_v17  ;;  %v489_v41 = vmul.f32 %v11359_v49, %v448_v31  ;;  %v1172_v18 = vld [vmem:[%s10809_s12 + $0xd6] sm:$0xff] }
  0xf1   : > { %v1497_v5 = vmul.f32 %v11767_v47, %v1281_v48  ;;  %v1033_v33 = vadd.f32 %v997_v14, %v954_v55  ;;  %v602_v60 = vmul.f32 %v11365_v38, %v11650_v20  ;;  %v753_v17 = vld [vmem:[%s10809_s12 + $0xbb] sm:$0xff]  ;;  %v987_v42 = vmul.f32 %v11400_v28, %v11773_v21 }
  0xf2   : > { %v11780_v27 = vor.u32 %v1748_v50, %v1745_v7  ;;  %v831_v1 = vadd.f32 %v795_v61, %v718_v29  ;;  %v525_v6 = vadd.f32 %v489_v41, %v376_v9  ;;  %v681_v58 = vmul.f32 %v11375_v52, %v11381_v25  ;;  %v462_v55 = vld [vmem:[%s10809_s12 + $0x119] sm:$0xff] }
  0xf3   : > { %v1533_v23 = vpack.c.bf16 %v1497_v5, %v1497_v5  ;;  %v1146_v48 = vadd.f32 %v1110_v16, %v1033_v33  ;;  %v1100_v14 = vmul.f32 %v11415_v56, %v1059_v10  ;;  %v1213_v20 = vmul.f32 %v11432_v19, %v1172_v18  ;;  %v11801_v41 = vld [vmem:[%s10809_s12 + $0x11a] sm:$0xff] }
  0xf4   : > { %v1751_v50 = vrot.slane %v11780_v27, 4  ;;  %v944_v31 = vadd.f32 %v908_v2, %v831_v1  ;;  %v638_v61 = vadd.f32 %v602_v60, %v525_v6  ;;  %v794_v7 = vmul.f32 %v11386_v26, %v753_v17  ;;  %v11803_v2 = vpop.permute.xlu2 %1461  ;;  %v654_v60 = vld [vmem:[%s10809_s12 + $0x12a] sm:$0xff] }
  0xf5   : > { %v1733_v29 = vshrl.u32 %v1533_v23, 16  ;;  %v1736_v9 = vshll.u32 %v1533_v23, 16  ;;  %v1259_v16 = vadd.f32 %v1223_v3, %v1146_v48  ;;  %14670 = vst [vmem:[#allocation30_spill] sm:$0xff] %v11803_v2  ;;  %v907_v33 = vmul.f32 %v11392_v40, %v11670_v4  ;;  %v767_v23 = vld [vmem:[%s10809_s12 + $0x12b] sm:$0xff] }
  0xf6   : > { %v1760_v25 = vsel %vm11142_vm7, %v1751_v50, %v11545_v0  ;;  %v1023_v10 = vadd.f32 %v987_v42, %v944_v31  ;;  %v717_v5 = vadd.f32 %v681_v58, %v638_v61  ;;  %v390_v18 = vmul.f32 %v11351_v59, %v350_v53  ;;  %v1058_v50 = vld [vmem:[%s10809_s12 + $0xcd] sm:$0xff] }
  0xf7   : > { %1971 = vst [vmem:[#allocation2 + $0x58] sm:$0xf] %v1760_v25  ;;  %v1735_v17 = vrot.slane %v1733_v29, 6  ;;  %v1738_v1 = vrot.slane %v1736_v9, 7  ;;  %v1295_v6 = vmax.f32 %v1259_v16, 0.0  ;;  %v503_v3 = vmul.f32 %v11359_v49, %v462_v55  ;;  %v1171_v31 = vld [vmem:[%s10809_s12 + $0xce] sm:$0xff] }
  0xf8   : > { %v1136_v48 = vadd.f32 %v1100_v14, %v1023_v10  ;;  %v830_v25 = vadd.f32 %v794_v7, %v717_v5  ;;  %v986_v42 = vmul.f32 %v11400_v28, %v11422_v46  ;;  %v616_v4 = vmul.f32 %v11365_v38, %v11801_v41  ;;  %v11822_v16 = vld [vmem:[%s10809_s12 + $0x12c] sm:$0xff]  ;;  %v959_v46 = vld [vmem:[%s10809_s12 + $0x13c] sm:$0xff] }
  0xf9   : > { %v1739_v58 = vor.u32 %v1738_v1, %v1735_v17  ;;  %v1511_v53 = vmul.f32 %v11803_v2, %v1295_v6  ;;  %v539_v61 = vadd.f32 %v503_v3, %v390_v18  ;;  %v695_v29 = vmul.f32 %v11375_v52, %v654_v60  ;;  %v11829_v18 = vpop.permute.xlu1 %1411 }
  0xfa   : > { %v1249_v55 = vadd.f32 %v1213_v20, %v1136_v48  ;;  %v943_v9 = vadd.f32 %v907_v33, %v830_v25  ;;  %v1099_v14 = vmul.f32 %v11415_v56, %v1058_v50  ;;  %v808_v7 = vmul.f32 %v11386_v26, %v767_v23  ;;  %14672 = vst [vmem:[#allocation31_spill] sm:$0xff] %v11829_v18  ;;  %v340_v20 = vld [vmem:[%s10809_s12 + $0xc8] sm:$0xff] }
  0xfb   : > { %v14671_v10 = vrot.slane %v11476_v43, 4  ;;  %v1741_v17 = vrot.slane %v1739_v58, 4  ;;  %v1547_v1 = vpack.c.bf16 %v1511_v53, %v1511_v53  ;;  %v652_v60 = vadd.f32 %v616_v4, %v539_v61  ;;  %v452_v33 = vld [vmem:[%s10809_s12 + $0xc9] sm:$0xff]  ;;  %v1072_v53 = vld [vmem:[%s10809_s12 + $0x13d] sm:$0xff] }
  0xfc   : > { %v11835_v6 = vor.u32 %v11759_v37, %v11748_v13  ;;  %v1285_v43 = vmax.f32 %v1249_v55, 0.0  ;;  %v1022_v50 = vadd.f32 %v986_v42, %v943_v9  ;;  %v1212_v3 = vmul.f32 %v11432_v19, %v1171_v31  ;;  %v1185_v42 = vld [vmem:[%s10809_s12 + $0x13e] sm:$0xff] }
  0xfd   : > { %v1740_v5 = vsel %vm11142_vm7, %v14671_v10, %v1739_v58  ;;  %v1750_v23 = vsel %vm11142_vm7, %v1741_v17, %v11780_v27  ;;  %v731_v48 = vadd.f32 %v695_v29, %v652_v60  ;;  %v921_v25 = vmul.f32 %v11392_v40, %v11822_v16  ;;  %v11845_v58 = vld [vmem:[%s10809_s12 + $0xda] sm:$0xff] }
  0xfe   : > { %1969 = vst [vmem:[#allocation2 + $0x50] sm:$0xf] %v1740_v5  ;;  %v1000_v4 = vmul.f32 %v11400_v28, %v959_v46  ;;  %v1501_v13 = vmul.f32 %v11829_v18, %v1285_v43  ;;  %v1135_v37 = vadd.f32 %v1099_v14, %v1022_v50  ;;  %v380_v31 = vmul.f32 %v11351_v59, %v340_v20  ;;  %v757_v55 = vld [vmem:[%s10809_s12 + $0xdb] sm:$0xff]  ;;  %v11857_v5 = vpop.permute.xlu0 %1406  ;;  %v11863_v20 = vld [vmem:[%s10809_s12 + $0xec] sm:$0xff] }
  0xff   : > { %1970 = vst [vmem:[#allocation2 + $0x54] sm:$0xf] %v1750_v23  ;;  %v493_v61 = vmul.f32 %v11359_v49, %v452_v33  ;;  %v1873_v27 = vshrl.u32 %v1547_v1, 16  ;;  %v1876_v29 = vshll.u32 %v1547_v1, 16  ;;  %v844_v9 = vadd.f32 %v808_v7, %v731_v48  ;;  %v339_v33 = vld [vmem:[%s10809_s12 + $0xc0] sm:$0xff] }
 0x100   : > { %v606_v40 = vmul.f32 %v11365_v38, %v11406_v30  ;;  %v1537_v28 = vpack.c.bf16 %v1501_v13, %v1501_v13  ;;  %v1248_v46 = vadd.f32 %v1212_v3, %v1135_v37  ;;  %v685_v14 = vmul.f32 %v11375_v52, %v11845_v58  ;;  %14673 = vst [vmem:[#allocation32_spill] sm:$0xff] %v11857_v5  ;;  %v451_v43 = vld [vmem:[%s10809_s12 + $0xc1] sm:$0xff]  ;;  %v1062_v13 = vld [vmem:[%s10809_s12 + $0xed] sm:$0xff] }
 0x101   : > { %v529_v10 = vadd.f32 %v493_v61, %v380_v31  ;;  %v957_v59 = vadd.f32 %v921_v25, %v844_v9  ;;  %v1113_v49 = vmul.f32 %v11415_v56, %v1072_v53  ;;  %v1226_v17 = vmul.f32 %v11432_v19, %v1185_v42  ;;  %v11874_v56 = vld [vmem:[%s14574_s1 + $0x5] ss:$0 sm:$0xff]  ;;  %v11896_v31 = vld [vmem:[%s14574_s1 + $0x1] ss:$0 sm:$0xff]  ;;  %v1175_v9 = vld [vmem:[%s10809_s12 + $0xee] sm:$0xff] }
 0x102   : > { %v798_v7 = vmul.f32 %v11386_v26, %v757_v55  ;;  %v1773_v1 = vshrl.u32 %v1537_v28, 16  ;;  %v1776_v60 = vshll.u32 %v1537_v28, 16  ;;  %v1284_v38 = vmax.f32 %v1248_v46, 0.0  ;;  %v756_v46 = vld [vmem:[%s10809_s12 + $0xd3] sm:$0xff] }
 0x103   : > { %v642_v30 = vadd.f32 %v606_v40, %v529_v10  ;;  %v11867_v50 = vrot.slane %v1873_v27, 6  ;;  %v11869_v52 = vrot.slane %v1876_v29, 7  ;;  %v1036_v3 = vadd.f32 %v1000_v4, %v957_v59  ;;  %v11883_v4 = vld [vmem:[%s14574_s1 + $0x6] ss:$0 sm:$0xff]  ;;  %v11903_v40 = vld [vmem:[%s14574_s1 + $0x2] ss:$0 sm:$0xff] }
 0x104   : > { %v911_v26 = vmul.f32 %v11874_v56, %v11425_v11  ;;  %v1775_v19 = vrot.slane %v1773_v1, 6  ;;  %v1778_v23 = vrot.slane %v1776_v60, 7  ;;  %v1500_v48 = vmul.f32 %v11857_v5, %v1284_v38  ;;  %v11890_v11 = vld [vmem:[%s14574_s1] ss:$0 sm:$0xff]  ;;  %v11921_v38 = vpop.permute.xlu2 %1476 }
 0x105   : > { %v721_v25 = vadd.f32 %v685_v14, %v642_v30  ;;  %v1149_v37 = vadd.f32 %v1113_v49, %v1036_v3  ;;  %v990_v53 = vmul.f32 %v11883_v4, %v11863_v20  ;;  %v379_v42 = vmul.f32 %v11890_v11, %v339_v33  ;;  %v11911_v14 = vld [vmem:[%s14574_s1 + $0x7] ss:$0 sm:$0xff]  ;;  %14674 = vst [vmem:[#allocation33_spill] sm:$0xff] %v11921_v38 }
 0x106   : > { %v492_v61 = vmul.f32 %v11896_v31, %v451_v43  ;;  %v1779_v55 = vor.u32 %v1778_v23, %v1775_v19  ;;  %v1536_v27 = vpack.c.bf16 %v1500_v48, %v1500_v48  ;;  %v605_v28 = vmul.f32 %v11903_v40, %v11746_v34  ;;  %v11926_v43 = vld [vmem:[%s14574_s1 + $0x8] ss:$0 sm:$0xff]  ;;  %v343_v48 = vld [vmem:[%s10809_s12 + $0xe0] sm:$0xff] }
 0x107   : > { %v834_v29 = vadd.f32 %v798_v7, %v721_v25  ;;  %v1262_v10 = vadd.f32 %v1226_v17, %v1149_v37  ;;  %v1103_v59 = vmul.f32 %v11911_v14, %v1062_v13  ;;  %v11917_v7 = vld [vmem:[%s14574_s1 + $0x3] ss:$0 sm:$0xff]  ;;  %v1216_v3 = vmul.f32 %v11926_v43, %v1175_v9 }
 0x108   : > { %v528_v49 = vadd.f32 %v492_v61, %v379_v42  ;;  %v684_v34 = vmul.f32 %v11917_v7, %v11512_v36  ;;  %v1781_v1 = vrot.slane %v1779_v55, 4  ;;  %v1763_v17 = vshrl.u32 %v1536_v27, 16  ;;  %v11932_v36 = vld [vmem:[%s14574_s1 + $0x4] ss:$0 sm:$0xff]  ;;  %v11941_v61 = vld [vmem:[%s10809_s12 + $0xf2] sm:$0xff] }
 0x109   : > { %v1766_v60 = vshll.u32 %v1536_v27, 16  ;;  %v947_v30 = vadd.f32 %v911_v26, %v834_v29  ;;  %v1298_v33 = vmax.f32 %v1262_v10, 0.0  ;;  %v797_v23 = vmul.f32 %v11932_v36, %v756_v46  ;;  %v455_v25 = vld [vmem:[%s10809_s12 + $0xe1] sm:$0xff] }
 0x10a   : > { %v641_v19 = vadd.f32 %v605_v28, %v528_v49  ;;  %v1790_v26 = vsel %vm11142_vm7, %v1781_v1, %v11557_v39  ;;  %v1765_v13 = vrot.slane %v1763_v17, 6  ;;  %v910_v9 = vmul.f32 %v11874_v56, %v11773_v21  ;;  %v1061_v49 = vld [vmem:[%s10809_s12 + $0xe5] sm:$0xff]  ;;  %v760_v21 = vld [vmem:[%s10809_s12 + $0xf3] sm:$0xff] }
 0x10b   : > { %v1768_v37 = vrot.slane %v1766_v60, 7  ;;  %v1026_v42 = vadd.f32 %v990_v53, %v947_v30  ;;  %1974 = vst [vmem:[#allocation2 + $0x64] sm:$0xf] %v1790_v26  ;;  %v1514_v27 = vmul.f32 %v11921_v38, %v1298_v33  ;;  %v989_v28 = vmul.f32 %v11883_v4, %v11539_v63 }
 0x10c   : > { %v720_v29 = vadd.f32 %v684_v34, %v641_v19  ;;  %v383_v1 = vmul.f32 %v11890_v11, %v343_v48  ;;  %v496_v53 = vmul.f32 %v11896_v31, %v455_v25  ;;  %v609_v34 = vmul.f32 %v11903_v40, %v11523_v54  ;;  %v1174_v48 = vld [vmem:[%s10809_s12 + $0xe6] sm:$0xff]  ;;  %v11961_v54 = vpop.permute.xlu1 %1426 }
 0x10d   : > { %v1769_v46 = vor.u32 %v1768_v37, %v1765_v13  ;;  %v1139_v10 = vadd.f32 %v1103_v59, %v1026_v42  ;;  %v1550_v17 = vpack.c.bf16 %v1514_v27, %v1514_v27  ;;  %v688_v30 = vmul.f32 %v11917_v7, %v11941_v61  ;;  %14676 = vst [vmem:[#allocation34_spill] sm:$0xff] %v11961_v54  ;;  %v11965_v42 = vld [vmem:[%s10809_s12 + $0x104] sm:$0xff] }
 0x10e   : > { %v833_v60 = vadd.f32 %v797_v23, %v720_v29  ;;  %v14675_v33 = vrot.slane %v11545_v0, 4  ;;  %v532_v25 = vadd.f32 %v496_v53, %v383_v1  ;;  %v1102_v37 = vmul.f32 %v11911_v14, %v1061_v49  ;;  %v1065_v49 = vld [vmem:[%s10809_s12 + $0x105] sm:$0xff] }
 0x10f   : > { %v1771_v59 = vrot.slane %v1769_v46, 4  ;;  %v1252_v19 = vadd.f32 %v1216_v3, %v1139_v10  ;;  %v1903_v23 = vshrl.u32 %v1550_v17, 16  ;;  %v1906_v26 = vshll.u32 %v1550_v17, 16  ;;  %v454_v10 = vld [vmem:[%s10809_s12 + $0xd9] sm:$0xff] }
 0x110   : > { %v1770_v63 = vsel %vm11142_vm7, %v14675_v33, %v1769_v46  ;;  %v946_v13 = vadd.f32 %v910_v9, %v833_v60  ;;  %v645_v29 = vadd.f32 %v609_v34, %v532_v25  ;;  %v801_v3 = vmul.f32 %v11932_v36, %v760_v21  ;;  %v342_v46 = vld [vmem:[%s10809_s12 + $0xd8] sm:$0xff] }
 0x111   : > { %1972 = vst [vmem:[#allocation2 + $0x5c] sm:$0xf] %v1770_v63  ;;  %v1780_v0 = vsel %vm11142_vm7, %v1771_v59, %v1779_v55  ;;  %v1288_v27 = vmax.f32 %v1252_v19, 0.0  ;;  %v1905_v1 = vrot.slane %v1903_v23, 6  ;;  %v1908_v53 = vrot.slane %v1906_v26, 7  ;;  %v1178_v59 = vld [vmem:[%s10809_s12 + $0x106] sm:$0xff] }
 0x112   : > { %1973 = vst [vmem:[#allocation2 + $0x60] sm:$0xf] %v1780_v0  ;;  %v1025_v17 = vadd.f32 %v989_v28, %v946_v13  ;;  %v1215_v9 = vmul.f32 %v11926_v43, %v1174_v48  ;;  %v724_v33 = vadd.f32 %v688_v30, %v645_v29  ;;  %v914_v55 = vmul.f32 %v11874_v56, %v11552_v12  ;;  %v1987_v48 = vld [vmem:[#allocation2 + $0x98] sm:$0x3]  ;;  %v759_v26 = vld [vmem:[%s10809_s12 + $0xeb] sm:$0xff] }
 0x113   : > { %v1504_v60 = vmul.f32 %v11961_v54, %v1288_v27  ;;  %v993_v34 = vmul.f32 %v11883_v4, %v11965_v42  ;;  %v11979_v21 = vor.u32 %v1908_v53, %v1905_v1  ;;  %v382_v19 = vmul.f32 %v11890_v11, %v342_v46  ;;  %v346_v53 = vld [vmem:[%s10809_s12 + $0xf8] sm:$0xff] }
 0x114   : > { %v1138_v63 = vadd.f32 %v1102_v37, %v1025_v17  ;;  %v495_v28 = vmul.f32 %v11896_v31, %v454_v10  ;;  %v837_v23 = vadd.f32 %v801_v3, %v724_v33  ;;  %v1106_v30 = vmul.f32 %v11911_v14, %v1065_v49  ;;  %v11991_v10 = vpop.permute.xlu0 %1421 }
 0x115   : > { %v1540_v25 = vpack.c.bf16 %v1504_v60, %v1504_v60  ;;  %v608_v12 = vmul.f32 %v11903_v40, %v11845_v58  ;;  %v1911_v13 = vrot.slane %v11979_v21, 4  ;;  %v687_v27 = vmul.f32 %v11917_v7, %v11607_v45  ;;  %14677 = vst [vmem:[#allocation35_spill] sm:$0xff] %v11991_v10  ;;  %v458_v60 = vld [vmem:[%s10809_s12 + $0xf9] sm:$0xff] }
 0x116   : > { %v1251_v0 = vadd.f32 %v1215_v9, %v1138_v63  ;;  %v531_v37 = vadd.f32 %v495_v28, %v382_v19  ;;  %v950_v3 = vadd.f32 %v914_v55, %v837_v23  ;;  %v1219_v1 = vmul.f32 %v11926_v43, %v1178_v59  ;;  %v1064_v19 = vld [vmem:[%s10809_s12 + $0xfd] sm:$0xff] }
 0x117   : > { %v1803_v29 = vshrl.u32 %v1540_v25, 16  ;;  %v1806_v46 = vshll.u32 %v1540_v25, 16  ;;  %v1988_v58 = vsel %vm11022_vm2, %v1911_v13, %v1987_v48  ;;  %v800_v49 = vmul.f32 %v11932_v36, %v759_v26  ;;  %v1177_v59 = vld [vmem:[%s10809_s12 + $0xfe] sm:$0xff] }
 0x118   : > { %v1287_v17 = vmax.f32 %v1251_v0, 0.0  ;;  %v644_v9 = vadd.f32 %v608_v12, %v531_v37  ;;  %1989 = vst [vmem:[#allocation2 + $0x98] sm:$0x3] %v1988_v58  ;;  %v1029_v63 = vadd.f32 %v993_v34, %v950_v3  ;;  %v913_v55 = vmul.f32 %v11874_v56, %v11863_v20  ;;  %v12008_v12 = vld [vmem:[%s10809_s12 + $0x10a] sm:$0xff]  ;;  %v12019_v58 = vld [vmem:[%s10809_s12 + $0x11c] sm:$0xff] }
 0x119   : > { %v1805_v45 = vrot.slane %v1803_v29, 6  ;;  %v1808_v33 = vrot.slane %v1806_v46, 7  ;;  %v992_v48 = vmul.f32 %v11883_v4, %v11629_v24  ;;  %v386_v23 = vmul.f32 %v11890_v11, %v346_v53  ;;  %v763_v0 = vld [vmem:[%s10809_s12 + $0x10b] sm:$0xff] }
 0x11a   : > { %v1503_v28 = vmul.f32 %v11991_v10, %v1287_v17  ;;  %v723_v25 = vadd.f32 %v687_v27, %v644_v9  ;;  %v1142_v13 = vadd.f32 %v1106_v30, %v1029_v63  ;;  %v499_v34 = vmul.f32 %v11896_v31, %v458_v60  ;;  %v12021_v9 = vpop.permute.xlu1 %1441 }
 0x11b   : > { %v1809_v26 = vor.u32 %v1808_v33, %v1805_v45  ;;  %v612_v20 = vmul.f32 %v11903_v40, %v11614_v62  ;;  %v1105_v29 = vmul.f32 %v11911_v14, %v1064_v19  ;;  %v1218_v24 = vmul.f32 %v11926_v43, %v1177_v59  ;;  %14678 = vst [vmem:[#allocation36_spill] sm:$0xff] %v12021_v9  ;;  %v345_v45 = vld [vmem:[%s10809_s12 + $0xf0] sm:$0xff] }
 0x11c   : > { %v1539_v37 = vpack.c.bf16 %v1503_v28, %v1503_v28  ;;  %v836_v27 = vadd.f32 %v800_v49, %v723_v25  ;;  %v1255_v3 = vadd.f32 %v1219_v1, %v1142_v13  ;;  %v535_v53 = vadd.f32 %v499_v34, %v386_v23  ;;  %v457_v33 = vld [vmem:[%s10809_s12 + $0xf1] sm:$0xff]  ;;  %v1068_v28 = vld [vmem:[%s10809_s12 + $0x11d] sm:$0xff] }
 0x11d   : > { %v1811_v46 = vrot.slane %v1809_v26, 4  ;;  %v691_v30 = vmul.f32 %v11917_v7, %v12008_v12  ;;  %v804_v49 = vmul.f32 %v11932_v36, %v763_v0  ;;  %v917_v59 = vmul.f32 %v11874_v56, %v11637_v15 }
 0x11e   : > { %v1793_v17 = vshrl.u32 %v1539_v37, 16  ;;  %v1796_v62 = vshll.u32 %v1539_v37, 16  ;;  %v949_v60 = vadd.f32 %v913_v55, %v836_v27  ;;  %v1291_v63 = vmax.f32 %v1255_v3, 0.0 }
 0x11f   : > { %v1820_v1 = vsel %vm11142_vm7, %v1811_v46, %v11710_v8  ;;  %v648_v19 = vadd.f32 %v612_v20, %v535_v53  ;;  %v996_v13 = vmul.f32 %v11883_v4, %v12019_v58  ;;  %v385_v37 = vmul.f32 %v11890_v11, %v345_v45  ;;  %v762_v20 = vld [vmem:[%s10809_s12 + $0x103] sm:$0xff] }
 0x120   : > { %1977 = vst [vmem:[#allocation2 + $0x70] sm:$0xf] %v1820_v1  ;;  %v1795_v25 = vrot.slane %v1793_v17, 6  ;;  %v1798_v23 = vrot.slane %v1796_v62, 7  ;;  %v1028_v55 = vadd.f32 %v992_v48, %v949_v60  ;;  %v1507_v34 = vmul.f32 %v12021_v9, %v1291_v63  ;;  %v1181_v62 = vld [vmem:[%s10809_s12 + $0x11e] sm:$0xff] }
 0x121   : > { %v727_v0 = vadd.f32 %v691_v30, %v648_v19  ;;  %v498_v27 = vmul.f32 %v11896_v31, %v457_v33  ;;  %v1109_v15 = vmul.f32 %v11911_v14, %v1068_v28  ;;  %v611_v53 = vmul.f32 %v11903_v40, %v11941_v61 }
 0x122   : > { %v1799_v46 = vor.u32 %v1798_v23, %v1795_v25  ;;  %v1141_v3 = vadd.f32 %v1105_v29, %v1028_v55  ;;  %v1543_v48 = vpack.c.bf16 %v1507_v34, %v1507_v34  ;;  %v690_v30 = vmul.f32 %v11917_v7, %v11704_v57  ;;  %v349_v57 = vld [vmem:[%s10809_s12 + $0x110] sm:$0xff] }
 0x123   : > { %v840_v17 = vadd.f32 %v804_v49, %v727_v0  ;;  %v534_v60 = vadd.f32 %v498_v27, %v385_v37  ;;  %v14679_v45 = vrot.slane %v11557_v39, 4  ;;  %v803_v63 = vmul.f32 %v11932_v36, %v762_v20  ;;  %v12049_v49 = vpop.permute.xlu0 %1436  ;;  %v461_v23 = vld [vmem:[%s10809_s12 + $0x111] sm:$0xff] }
 0x124   : > { %v1801_v29 = vrot.slane %v1799_v46, 4  ;;  %v1254_v1 = vadd.f32 %v1218_v24, %v1141_v3  ;;  %v1833_v61 = vshrl.u32 %v1543_v48, 16  ;;  %v1836_v19 = vshll.u32 %v1543_v48, 16  ;;  %14680 = vst [vmem:[#allocation37_spill] sm:$0xff] %v12049_v49 }
 0x125   : > { %v1800_v33 = vsel %vm11142_vm7, %v14679_v45, %v1799_v46  ;;  %v953_v28 = vadd.f32 %v917_v59, %v840_v17  ;;  %v647_v25 = vadd.f32 %v611_v53, %v534_v60  ;;  %v1222_v24 = vmul.f32 %v11926_v43, %v1181_v62  ;;  %v1067_v59 = vld [vmem:[%s10809_s12 + $0x115] sm:$0xff]  ;;  %v653_v46 = vld [vmem:[%s10809_s12 + $0x122] sm:$0xff] }
 0x126   : > { %1975 = vst [vmem:[#allocation2 + $0x68] sm:$0xf] %v1800_v33  ;;  %v1810_v39 = vsel %vm11142_vm7, %v1801_v29, %v1809_v26  ;;  %v1290_v55 = vmax.f32 %v1254_v1, 0.0  ;;  %v916_v34 = vmul.f32 %v11874_v56, %v11965_v42  ;;  %v1835_v0 = vrot.slane %v1833_v61, 6  ;;  %v1180_v26 = vld [vmem:[%s10809_s12 + $0x116] sm:$0xff] }
 0x127   : > { %1976 = vst [vmem:[#allocation2 + $0x6c] sm:$0xf] %v1810_v39  ;;  %v1838_v37 = vrot.slane %v1836_v19, 7  ;;  %v1032_v27 = vadd.f32 %v996_v13, %v953_v28  ;;  %v726_v20 = vadd.f32 %v690_v30, %v647_v25  ;;  %v995_v53 = vmul.f32 %v11883_v4, %v11732_v35  ;;  %v766_v30 = vld [vmem:[%s10809_s12 + $0x123] sm:$0xff] }
 0x128   : > { %v1506_v3 = vmul.f32 %v12049_v49, %v1290_v55  ;;  %v389_v48 = vmul.f32 %v11890_v11, %v349_v57  ;;  %v502_v17 = vmul.f32 %v11896_v31, %v461_v23  ;;  %v615_v13 = vmul.f32 %v11903_v40, %v11714_v51  ;;  %v12073_v57 = vpop.permute.xlu1 %1456  ;;  %v348_v39 = vld [vmem:[%s10809_s12 + $0x108] sm:$0xff] }
 0x129   : > { %v1839_v42 = vor.u32 %v1838_v37, %v1835_v0  ;;  %v1145_v62 = vadd.f32 %v1109_v15, %v1032_v27  ;;  %v839_v60 = vadd.f32 %v803_v63, %v726_v20  ;;  %v1108_v33 = vmul.f32 %v11911_v14, %v1067_v59  ;;  %v958_v15 = vld [vmem:[%s10809_s12 + $0x134] sm:$0xff]  ;;  %14681 = vst [vmem:[#allocation38_spill] sm:$0xff] %v12073_v57  ;;  %v460_v55 = vld [vmem:[%s10809_s12 + $0x109] sm:$0xff] }
 0x12a   : > { %v1542_v45 = vpack.c.bf16 %v1506_v3, %v1506_v3  ;;  %v538_v29 = vadd.f32 %v502_v17, %v389_v48  ;;  %v694_v35 = vmul.f32 %v11917_v7, %v653_v46  ;;  %v1221_v28 = vmul.f32 %v11926_v43, %v1180_v26  ;;  %v1071_v27 = vld [vmem:[%s10809_s12 + $0x135] sm:$0xff] }
 0x12b   : > { %v1841_v1 = vrot.slane %v1839_v42, 4  ;;  %v1258_v61 = vadd.f32 %v1222_v24, %v1145_v62  ;;  %v952_v19 = vadd.f32 %v916_v34, %v839_v60  ;;  %v807_v23 = vmul.f32 %v11932_v36, %v766_v30  ;;  %v765_v60 = vld [vmem:[%s10809_s12 + $0x11b] sm:$0xff] }
 0x12c   : > { %v1823_v63 = vshrl.u32 %v1542_v45, 16  ;;  %v1826_v25 = vshll.u32 %v1542_v45, 16  ;;  %v651_v51 = vadd.f32 %v615_v13, %v538_v29  ;;  %v920_v34 = vmul.f32 %v11874_v56, %v11743_v44 }
 0x12d   : > { %v1850_v0 = vsel %vm11142_vm7, %v1841_v1, %v11835_v6  ;;  %v1294_v37 = vmax.f32 %v1258_v61, 0.0  ;;  %v1031_v24 = vadd.f32 %v995_v53, %v952_v19  ;;  %v999_v3 = vmul.f32 %v11883_v4, %v958_v15  ;;  %v12099_v19 = vpop.permute.xlu0 %1451 }
 0x12e   : > { %1980 = vst [vmem:[#allocation2 + $0x7c] sm:$0xf] %v1850_v0  ;;  %v1825_v20 = vrot.slane %v1823_v63, 6  ;;  %v1828_v59 = vrot.slane %v1826_v25, 7  ;;  %v730_v46 = vadd.f32 %v694_v35, %v651_v51  ;;  %v388_v17 = vmul.f32 %v11890_v11, %v348_v39  ;;  %v1184_v35 = vld [vmem:[%s10809_s12 + $0x136] sm:$0xff]  ;;  %v1070_v0 = vld [vmem:[%s10809_s12 + $0x12d] sm:$0xff] }
 0x12f   : > { %v1510_v26 = vmul.f32 %v12073_v57, %v1294_v37  ;;  %v1144_v48 = vadd.f32 %v1108_v33, %v1031_v24  ;;  %v501_v62 = vmul.f32 %v11896_v31, %v460_v55  ;;  %v1112_v44 = vmul.f32 %v11911_v14, %v1071_v27  ;;  %14683 = vst [vmem:[#allocation39_spill] sm:$0xff] %v12099_v19 }
 0x130   : > { %v1829_v53 = vor.u32 %v1828_v59, %v1825_v20  ;;  %v843_v13 = vadd.f32 %v807_v23, %v730_v46  ;;  %v614_v30 = vmul.f32 %v11903_v40, %v12008_v12  ;;  %v693_v61 = vmul.f32 %v11917_v7, %v11801_v41  ;;  %v1183_v20 = vld [vmem:[%s10809_s12 + $0x12e] sm:$0xff] }
 0x131   : > { %v1546_v45 = vpack.c.bf16 %v1510_v26, %v1510_v26  ;;  %v1257_v29 = vadd.f32 %v1221_v28, %v1144_v48  ;;  %v537_v1 = vadd.f32 %v501_v62, %v388_v17  ;;  %v14682_v33 = vrot.slane %v11710_v8, 4  ;;  %v12115_v48 = vpop.permute.xlu1 %1471 }
 0x132   : > { %v1831_v31 = vrot.slane %v1829_v53, 4  ;;  %v956_v15 = vadd.f32 %v920_v34, %v843_v13  ;;  %v806_v63 = vmul.f32 %v11932_v36, %v765_v60  ;;  %v1225_v7 = vmul.f32 %v11926_v43, %v1184_v35  ;;  %14684 = vst [vmem:[#allocation40_spill] sm:$0xff] %v12115_v48 }
 0x133   : > { %v1830_v11 = vsel %vm11142_vm7, %v14682_v33, %v1829_v53  ;;  %v1863_v40 = vshrl.u32 %v1546_v45, 16  ;;  %v1866_v12 = vshll.u32 %v1546_v45, 16  ;;  %v1293_v28 = vmax.f32 %v1257_v29, 0.0 }
 0x134   : > { %1978 = vst [vmem:[#allocation2 + $0x74] sm:$0xf] %v1830_v11  ;;  %v650_v25 = vadd.f32 %v614_v30, %v537_v1  ;;  %v1840_v41 = vsel %vm11142_vm7, %v1831_v31, %v1839_v42  ;;  %v1035_v8 = vadd.f32 %v999_v3, %v956_v15  ;;  %v919_v51 = vmul.f32 %v11874_v56, %v12019_v58 }
 0x135   : > { %1979 = vst [vmem:[#allocation2 + $0x78] sm:$0xf] %v1840_v41  ;;  %v1865_v23 = vrot.slane %v1863_v40, 6  ;;  %v1868_v39 = vrot.slane %v1866_v12, 7  ;;  %v1509_v36 = vmul.f32 %v12099_v19, %v1293_v28  ;;  %v998_v42 = vmul.f32 %v11883_v4, %v11822_v16 }
 0x136   : > { %v729_v55 = vadd.f32 %v693_v61, %v650_v25  ;;  %v1148_v37 = vadd.f32 %v1112_v44, %v1035_v8  ;;  %v1879_v59 = vor.u32 %v11869_v52, %v11867_v50  ;;  %v1111_v56 = vmul.f32 %v11911_v14, %v1070_v0  ;;  %v12124_v61 = vpop.permute.xlu0 %1466 }
 0x137   : > { %v1869_v24 = vor.u32 %v1868_v39, %v1865_v23  ;;  %v1545_v34 = vpack.c.bf16 %v1509_v36, %v1509_v36  ;;  %v1224_v60 = vmul.f32 %v11926_v43, %v1183_v20  ;;  %v1851_v52 = vrot.slane %v11835_v6, 4  ;;  %14685 = vst [vmem:[#allocation41_spill] sm:$0xff] %v12124_v61 }
 0x138   : > { %v842_v27 = vadd.f32 %v806_v63, %v729_v55  ;;  %v1261_v46 = vadd.f32 %v1225_v7, %v1148_v37 }
 0x139   : > { %v1871_v58 = vrot.slane %v1869_v24, 4  ;;  %v1853_v3 = vshrl.u32 %v1545_v34, 16  ;;  %v1856_v26 = vshll.u32 %v1545_v34, 16 }
 0x13a   : > { %v955_v17 = vadd.f32 %v919_v51, %v842_v27  ;;  %v1297_v62 = vmax.f32 %v1261_v46, 0.0  ;;  %v1881_v51 = vrot.slane %v1879_v59, 4 }
 0x13b   : > { %v1880_v53 = vsel %vm11142_vm7, %v1871_v58, %v1879_v59  ;;  %v1855_v16 = vrot.slane %v1853_v3, 6  ;;  %v1858_v4 = vrot.slane %v1856_v26, 7 }
 0x13c   : > { %v1034_v13 = vadd.f32 %v998_v42, %v955_v17  ;;  %1983 = vst [vmem:[#allocation2 + $0x88] sm:$0xf] %v1880_v53  ;;  %v1513_v50 = vmul.f32 %v12115_v48, %v1297_v62 }
 0x13d   : > { %v1859_v14 = vor.u32 %v1858_v4, %v1855_v16 }
 0x13e   : > { %v1147_v44 = vadd.f32 %v1111_v56, %v1034_v13  ;;  %v1549_v30 = vpack.c.bf16 %v1513_v50, %v1513_v50 }
 0x13f   : > { %v1860_v45 = vsel %vm11142_vm7, %v1851_v52, %v1859_v14  ;;  %v1861_v29 = vrot.slane %v1859_v14, 4 }
 0x140   : > { %v1260_v35 = vadd.f32 %v1224_v60, %v1147_v44  ;;  %1981 = vst [vmem:[#allocation2 + $0x80] sm:$0xf] %v1860_v45  ;;  %v1893_v43 = vshrl.u32 %v1549_v30, 16  ;;  %v1896_v1 = vshll.u32 %v1549_v30, 16 }
 0x141   : > { %v1870_v33 = vsel %vm11142_vm7, %v1861_v29, %v1869_v24 }
 0x142   : > { %v1296_v11 = vmax.f32 %v1260_v35, 0.0  ;;  %1982 = vst [vmem:[#allocation2 + $0x84] sm:$0xf] %v1870_v33  ;;  %v1895_v31 = vrot.slane %v1893_v43, 6  ;;  %v1898_v6 = vrot.slane %v1896_v1, 7 }
 0x144   : > { %v1512_v15 = vmul.f32 %v12124_v61, %v1296_v11  ;;  %v1899_v63 = vor.u32 %v1898_v6, %v1895_v31 }
 0x146   : > { %v1548_v40 = vpack.c.bf16 %v1512_v15, %v1512_v15  ;;  %v1901_v12 = vrot.slane %v1899_v63, 4 }
 0x148   : > { %v1883_v28 = vshrl.u32 %v1548_v40, 16  ;;  %v1886_v25 = vshll.u32 %v1548_v40, 16  ;;  %v1910_v41 = vsel %vm11142_vm7, %v1901_v12, %v11979_v21 }
 0x149   : > { %1986 = vst [vmem:[#allocation2 + $0x94] sm:$0xf] %v1910_v41 }
 0x14a   : > { %v1885_v8 = vrot.slane %v1883_v28, 6  ;;  %v1888_v7 = vrot.slane %v1886_v25, 7 }
 0x14c   : > { %v1889_v23 = vor.u32 %v1888_v7, %v1885_v8 }
 0x14e   : > { %v1890_v39 = vsel %vm11142_vm7, %v1881_v51, %v1889_v23  ;;  %v1891_v36 = vrot.slane %v1889_v23, 4 }
 0x14f   : > { %1984 = vst [vmem:[#allocation2 + $0x8c] sm:$0xf] %v1890_v39 }
 0x150   : > { %v1900_v55 = vsel %vm11142_vm7, %v1891_v36, %v1899_v63 }
 0x151   : > { %1985 = vst [vmem:[#allocation2 + $0x90] sm:$0xf] %v1900_v55 }
 0x152 LB: >> { %s10252_s28 = smul.u32 576, %s10665_s27  ;;  %p1996_p4 = scmp.lt.s32.totalorder %s10665_s27, 0  ;;  %vm2180_vm8 = vsmask.f32 7424  ;;  %vm2682_vm9 = vcmask 1046528   ;;  %vm3726_vm12 = vcmask 1045504   ;;  %s10665_s27 = sphi %s12136_s27, %s1995_s27  }
 0x153   : >> { %s1997_s29 = ssub.s32 0, %s10665_s27  ;;  %vm3331_vm10 = vsmask.f32 6400  ;;  %vm4375_vm11 = vsmask.f32 5376  ;;  %vm4770_vm13 = vcmask 1044480   ;;  %s12752_s18 = scalar_lea.vmem %s14576_s3, %s10665_s27 }
 0x154   : >> { %s12147_s8 = scalar_lea.vmem %s14575_s2, %s10252_s28  ;;  %s8978_s9 = smin.u32 %s10665_s27, %s1997_s29 }
 0x155   : >> { %v10268_v21 = vld [vmem:[%s12147_s8 + $0x78] sm:$0xff]  ;;  %s1999_s10 = sand.u32 1, %s8978_s9   ;;  %v10267_v0 = vld [vmem:[%s12147_s8 + $0x70] sm:$0xff]  ;;  %v10266_v37 = vld [vmem:[%s12147_s8 + $0x68] sm:$0xff]  ;;  %s1995_s27 = sadd.s32 1, %s10665_s27  }
 0x156   : >> { %s2000_s11 = ssub.s32 0, %s1999_s10  ;;  %10497 = vmatpush.bf16.msra.mxu1 %v10268_v21  ;;  %10498 = vmatpush.bf16.msra.mxu2 %v10268_v21  ;;  %v10265_v24 = vld [vmem:[%s12147_s8 + $0x60] sm:$0xff]  ;;  %v10264_v27 = vld [vmem:[%s12147_s8 + $0x58] sm:$0xff]  ;;  %v10263_v58 = vld [vmem:[%s12147_s8 + $0x50] sm:$0xff]  ;;  %p1992_p6 = scmp.ge.s32.totalorder %s1995_s27, 4  }
 0x157   : >> { %s14787_s11 = smov (!%p1996_p4, %s2000_s11), %s1999_s10  ;;  %2395 = vmatpush.bf16.msra.mxu0 %v10268_v21  ;;  %10499 = vmatpush.bf16.msra.mxu3 %v10268_v21  ;;  %v10262_v13 = vld [vmem:[%s12147_s8 + $0x48] sm:$0xff]  ;;  %v10261_v33 = vld [vmem:[%s12147_s8 + $0x40] sm:$0xff]  ;;  %v10276_v63 = vld [vmem:[%s12147_s8 + $0xb8] sm:$0xff] }
 0x158   : >> { %p8980_p5 = scmp.lt.s32.totalorder %s14787_s11, 0  ;;  %s2006_s13 = sadd.s32 2, %s14787_s11  ;;  %v10260_v28 = vld [vmem:[%s12147_s8 + $0x38] sm:$0xff]  ;;  %v10275_v39 = vld [vmem:[%s12147_s8 + $0xb0] sm:$0xff] }
 0x159   : >> { %v10309_v25 = vld [vmem:[%s12147_s8 + $0x138] sm:$0xff]  ;;  %v10259_v36 = vld [vmem:[%s12147_s8 + $0x30] sm:$0xff] }
 0x15a   : >> { %10500 = vmatpush.bf16.msra.mxu1 %v10267_v0  ;;  %10501 = vmatpush.bf16.msra.mxu2 %v10267_v0  ;;  %s14789_s13 = smov (!%p8980_p5, %s2006_s13), %s14787_s11  ;;  %v10308_v55 = vld [vmem:[%s12147_s8 + $0x130] sm:$0xff]  ;;  %v10313_v18 = vld [vmem:[%s12147_s8 + $0x158] sm:$0xff] }
 0x15b   : >> { %2396 = vmatpush.bf16.msra.mxu0 %v10267_v0  ;;  %10502 = vmatpush.bf16.msra.mxu3 %v10267_v0  ;;  %s10234_s14 = smul.u32 164, %s14789_s13  ;;  %v10354_v5 = vld [vmem:[%s12147_s8 + $0x218] sm:$0xff]  ;;  %s2008_s19 = ssub.s32 1, %s14789_s13 }
 0x15c   : >> { %s10359_s20 = smul.u32 164, %s2008_s19 }
 0x15d   : >> { %s12157_s15 = scalar_lea.vmem [#allocation2], %s10234_s14 }
 0x15e   : >> { %10503 = vmatpush.bf16.msra.mxu1 %v10266_v37  ;;  %10504 = vmatpush.bf16.msra.mxu2 %v10266_v37  ;;  %v12160_v34 = vld [vmem:[%s12157_s15 + $0x28] sm:$0xff]  ;;  %v12164_v42 = vld [vmem:[%s12157_s15 + $0x50] sm:$0xff]  ;;  %v12167_v20 = vld [vmem:[%s12157_s15] sm:$0xff]   ;;  %s12980_s23 = scalar_lea.vmem [#allocation2], %s10359_s20 }
 0x15f   : >> { %2397 = vmatpush.bf16.msra.mxu0 %v10266_v37  ;;  %10505 = vmatpush.bf16.msra.mxu3 %v10266_v37  ;;  %v12170_v59 = vld [vmem:[%s12157_s15 + $0x30] sm:$0xff]  ;;  %v2221_v46 = vshll.u32 %v12160_v34, 16  ;;  %v12174_v56 = vld [vmem:[%s12157_s15 + $0x58] sm:$0xff]  ;;  %v2261_v3 = vshll.u32 %v12164_v42, 16  ;;  %v12179_v26 = vld [vmem:[%s12157_s15 + $0x8] sm:$0xff]  ;;  %v2184_v17 = vshll.u32 %v12167_v20, 16 }
 0x160   : >> { %v10249_v62 = vld [vmem:[%s12157_s15 + $0x78] sm:$0xff]  ;;  %v2225_v53 = vshrl.u32 %v12160_v34, 16  ;;  %v2229_v16 = vshll.u32 %v12170_v59, 16  ;;  %v2269_v4 = vshll.u32 %v12174_v56, 16  ;;  %v2265_v52 = vshrl.u32 %v12164_v42, 16  ;;  %v12193_v14 = vld [vmem:[%s12157_s15 + $0x80] sm:$0xff] }
 0x161   : >> { %v12183_v60 = vrot.slane %v2221_v46, 1  ;;  %v12189_v50 = vrot.slane %v2261_v3, 1  ;;  %v2301_v44 = vshll.u32 %v10249_v62, 16  ;;  %v2182_v30 = vshrl.u32 %v12167_v20, 16  ;;  %v12217_v21 = vld [vmem:[%s12157_s15 + $0x38] sm:$0xff]  ;;  %v12220_v0 = vld [vmem:[%s12157_s15 + $0x60] sm:$0xff] }
 0x162   : >> { %10506 = vmatpush.bf16.msra.mxu1 %v10265_v24  ;;  %10507 = vmatpush.bf16.msra.mxu2 %v10265_v24  ;;  %v2186_v45 = vrot.slane %v2184_v17, 1  ;;  %v2189_v29 = vshll.u32 %v12179_v26, 16  ;;  %v2231_v43 = vrot.slane %v2229_v16, 1  ;;  %v12198_v1 = vrot.slane %v2269_v4, 1  ;;  %v10274_v46 = vld [vmem:[%s12147_s8 + $0xa8] sm:$0xff]  ;;  %v10300_v4 = vld [vmem:[%s12147_s8 + $0xf0] sm:$0xff] }
 0x163   : >> { %2398 = vmatpush.bf16.msra.mxu0 %v10265_v24  ;;  %10508 = vmatpush.bf16.msra.mxu3 %v10265_v24  ;;  %v2227_v35 = vor.u32 %v2225_v53, %v12183_v60  ;;  %v2267_v11 = vor.u32 %v2265_v52, %v12189_v50  ;;  %v12202_v31 = vrot.slane %v2301_v44, 1  ;;  %v2305_v6 = vshrl.u32 %v10249_v62, 16  ;;  %v10301_v24 = vld [vmem:[%s12147_s8 + $0xf8] sm:$0xff]  ;;  %v10307_v3 = vld [vmem:[%s12147_s8 + $0x128] sm:$0xff] }
 0x164   : >> { %v2309_v15 = vshll.u32 %v12193_v14, 16  ;;  %v2187_v40 = vor.u32 %v2186_v45, %v2182_v30  ;;  %v2191_v12 = vrot.slane %v2189_v29, 1  ;;  %v2233_v17 = vshrl.u32 %v12170_v59, 16  ;;  %v10273_v30 = vld [vmem:[%s12147_s8 + $0xa0] sm:$0xff] }
 0x165   : >> { %v2232_v41 = vsel %vm2180_vm8, %v2227_v35, %v2231_v43  ;;  %v2272_v8 = vsel %vm2180_vm8, %v2267_v11, %v12198_v1  ;;  %v2307_v7 = vor.u32 %v2305_v6, %v12202_v31  ;;  %v2237_v62 = vshll.u32 %v12217_v21, 16  ;;  %v10257_v45 = vld [vmem:[%s12147_s8 + $0x20] sm:$0xff] }
 0x166   : >> { %10509 = vmatpush.bf16.msra.mxu1 %v10264_v27  ;;  %10510 = vmatpush.bf16.msra.mxu2 %v10264_v27  ;;  %v2311_v51 = vrot.slane %v2309_v15, 1  ;;  %v2192_v23 = vsel %vm2180_vm8, %v2187_v40, %v2191_v12  ;;  %v2273_v53 = vshrl.u32 %v12174_v56, 16  ;;  %v2277_v16 = vshll.u32 %v12220_v0, 16  ;;  %v10306_v29 = vld [vmem:[%s12147_s8 + $0x120] sm:$0xff]  ;;  %v10299_v40 = vld [vmem:[%s12147_s8 + $0xe8] sm:$0xff] }
 0x167   : >> { %2399 = vmatpush.bf16.msra.mxu0 %v10264_v27  ;;  %10511 = vmatpush.bf16.msra.mxu3 %v10264_v27  ;;  %v12225_v27 = vld [vmem:[%s12157_s15 + $0x10] sm:$0xff]  ;;  %v2193_v52 = vshrl.u32 %v12179_v26, 16  ;;  %v2235_v35 = vor.u32 %v2233_v17, %v2231_v43  ;;  %v2313_v15 = vshrl.u32 %v12193_v14, 16  ;;  %v10287_v47 = vld [vmem:[%s12157_s15 + $0x60] sm:$0xff] }
 0x168   : >> { %v2312_v37 = vsel %vm2180_vm8, %v2307_v7, %v2311_v51  ;;  %v2197_v44 = vshll.u32 %v12225_v27, 16  ;;  %v2275_v11 = vor.u32 %v2273_v53, %v12198_v1  ;;  %v2279_v6 = vrot.slane %v2277_v16, 1  ;;  %v10256_v43 = vld [vmem:[%s12147_s8 + $0x18] sm:$0xff]  ;;  %v10255_v16 = vld [vmem:[%s12147_s8 + $0x10] sm:$0xff] }
 0x169   : >> { %v2315_v14 = vor.u32 %v2313_v15, %v2311_v51  ;;  %v2067_v51 = vld [vmem:[%s12157_s15 + $0x90] sm:$0x1]  ;;  %v12271_v53 = vld [vmem:[%s12157_s15 + $0x18] sm:$0xff] }
 0x16a   : >> { %10512 = vmatpush.bf16.msra.mxu1 %v10263_v58  ;;  %10513 = vmatpush.bf16.msra.mxu2 %v10263_v58  ;;  %v2280_v7 = vsel %vm2180_vm8, %v2275_v11, %v2279_v6  ;;  %v2160_v17 = vunpack.c.l.b16 %v2067_v51  ;;  %v12282_v11 = vld [vmem:[%s12157_s15 + $0x20] sm:$0xff] }
 0x16b   : >> { %2400 = vmatpush.bf16.msra.mxu0 %v10263_v58  ;;  %10514 = vmatpush.bf16.msra.mxu3 %v10263_v58  ;;  %v10258_v58 = vld [vmem:[%s12147_s8 + $0x28] sm:$0xff] }
 0x16c   : >> { %v12284_v15 = vpack.c.b16 %v2160_v17, %v2160_v17 }
 0x16e   : >> { %10515 = vmatpush.bf16.msra.mxu1 %v10262_v13  ;;  %10516 = vmatpush.bf16.msra.mxu2 %v10262_v13  ;;  %v2325_v51 = vshll.u32 %v12284_v15, 16 }
 0x16f   : >> { %2401 = vmatpush.bf16.msra.mxu0 %v10262_v13  ;;  %10517 = vmatpush.bf16.msra.mxu3 %v10262_v13  ;;  %v12236_v13 = vld [vmem:[%s12157_s15 + $0x88] sm:$0xff] }
 0x170   : >> { %v2327_v17 = vrot.slane %v2325_v51, 1  ;;  %v2209_v51 = vshrl.u32 %v12271_v53, 16 }
 0x172   : >> { %10518 = vmatpush.bf16.msra.mxu1 %v10261_v33  ;;  %10519 = vmatpush.bf16.msra.mxu2 %v10261_v33 }
 0x173   : >> { %2402 = vmatpush.bf16.msra.mxu0 %v10261_v33  ;;  %10520 = vmatpush.bf16.msra.mxu3 %v10261_v33  ;;  %v2239_v33 = vrot.slane %v2237_v62, 1 }
 0x175   : >> { %2428 = vmatmul.bf16.vlgmr.msra.gmra.mxu1 %v2232_v41  ;;  %2453 = vmatmul.bf16.vlgmr.msra.gmra.mxu2 %v2272_v8  ;;  %v2199_v41 = vrot.slane %v2197_v44, 1  ;;  %v10272_v8 = vld [vmem:[%s12147_s8 + $0x98] sm:$0xff]  ;;  %v2240_v1 = vsel %vm2180_vm8, %v2235_v35, %v2239_v33 }
 0x176   : >> { %2786 = vmatpush.bf16.msrb.mxu2 %v10276_v63  ;;  %2560 = vmatpush.bf16.msrb.mxu1 %v10260_v28  ;;  %v2317_v63 = vshll.u32 %v12236_v13, 16  ;;  %v12248_v28 = vld [vmem:[%s12157_s15 + $0x48] sm:$0xff] }
 0x177   : >> { %3568 = vmatpush.bf16.msrb.mxu0 %v10309_v25  ;;  %2478 = vmatmul.bf16.vlgmr.msra.gmra.mxu3 %v2312_v37  ;;  %v2195_v25 = vor.u32 %v2193_v52, %v2191_v12  ;;  %v2253_v12 = vshll.u32 %v12248_v28, 16  ;;  %v2257_v62 = vshrl.u32 %v12248_v28, 16  ;;  %v10304_v52 = vld [vmem:[%s12147_s8 + $0x110] sm:$0xff] }
 0x178   : >> { %2403 = vmatmul.bf16.vlgmr.msra.gmra.mxu0 %v2192_v23  ;;  %3173 = vmatpush.bf16.msrb.mxu3 %v10301_v24  ;;  %v2319_v23 = vrot.slane %v2317_v63, 1  ;;  %v10297_v63 = vld [vmem:[%s12147_s8 + $0xd8] sm:$0xff] }
 0x179   : >> { %v12264_v24 = vrot.slane %v2253_v12, 1  ;;  %v2213_v12 = vshll.u32 %v12282_v11, 16 }
 0x17a   : >> { %2787 = vmatpush.bf16.msrb.mxu2 %v10275_v39  ;;  %2561 = vmatpush.bf16.msrb.mxu1 %v10259_v36  ;;  %v2200_v39 = vsel %vm2180_vm8, %v2195_v25, %v2199_v41  ;;  %v12257_v36 = vld [vmem:[%s12157_s15 + $0x40] sm:$0xff]  ;;  %v2320_v37 = vsel %vm2180_vm8, %v2315_v14, %v2319_v23  ;;  %v2201_v25 = vshrl.u32 %v12225_v27, 16 }
 0x17b   : >> { %3569 = vmatpush.bf16.msrb.mxu0 %v10308_v55  ;;  %v12260_v55 = vld [vmem:[%s12157_s15 + $0x68] sm:$0xff]  ;;  %v2259_v44 = vor.u32 %v2257_v62, %v12264_v24 }
 0x17c   : >> { %3174 = vmatpush.bf16.msrb.mxu3 %v10300_v4  ;;  %v10270_v4 = vld [vmem:[%s12147_s8 + $0x88] sm:$0xff]  ;;  %v2285_v35 = vshll.u32 %v12260_v55, 16 }
 0x17e   : >> { %2788 = vmatpush.bf16.msrb.mxu2 %v10274_v46  ;;  %2562 = vmatpush.bf16.msrb.mxu1 %v10258_v58  ;;  %v10271_v46 = vld [vmem:[%s12147_s8 + $0x90] sm:$0xff]  ;;  %v10305_v58 = vld [vmem:[%s12147_s8 + $0x118] sm:$0xff]  ;;  %v2287_v14 = vrot.slane %v2285_v35, 1  ;;  %v2921_v35 = vld [vmem:[%s12157_s15 + $0x8] sm:$0xe] }
 0x17f   : >> { %3570 = vmatpush.bf16.msrb.mxu0 %v10307_v3  ;;  %v10298_v3 = vld [vmem:[%s12147_s8 + $0xe0] sm:$0xff] }
 0x180   : >> { %3175 = vmatpush.bf16.msrb.mxu3 %v10299_v40  ;;  %v12289_v40 = vsel %vm2180_vm8, %v2259_v44, %v12189_v50  ;;  %v10296_v50 = vld [vmem:[%s12147_s8 + $0xd0] sm:$0xff]  ;;  %v10295_v44 = vld [vmem:[%s12147_s8 + $0xc8] sm:$0xff] }
 0x182   : >> { %2789 = vmatpush.bf16.msrb.mxu2 %v10273_v30  ;;  %2563 = vmatpush.bf16.msrb.mxu1 %v10257_v45  ;;  %v2241_v30 = vshrl.u32 %v12217_v21, 16  ;;  %v2245_v45 = vshll.u32 %v12257_v36, 16 }
 0x183   : >> { %3571 = vmatpush.bf16.msrb.mxu0 %v10306_v29  ;;  %v2281_v29 = vshrl.u32 %v12220_v0, 16 }
 0x184   : >> { %3176 = vmatpush.bf16.msrb.mxu3 %v10298_v3 }
 0x185   : >> { %2433 = vmatmul.bf16.gmra.mxu1 %v2240_v1  ;;  %2458 = vmatmul.bf16.gmra.mxu2 %v2280_v7  ;;  %v2247_v1 = vrot.slane %v2245_v45, 1  ;;  %v2283_v7 = vor.u32 %v2281_v29, %v2279_v6  ;;  %v2215_v6 = vrot.slane %v2213_v12, 1  ;;  %v10303_v45 = vld [vmem:[%s12147_s8 + $0x108] sm:$0xff]  ;;  %v10253_v29 = vld [vmem:[%s12147_s8] sm:$0xff]  ;;  %v3014_v12 = vunpack.c.l.b16 %v2921_v35 }
 0x186   : >> { %2790 = vmatpush.bf16.msrb.mxu2 %v10272_v8  ;;  %2564 = vmatpush.bf16.msrb.mxu1 %v10256_v43  ;;  %v2205_v8 = vshll.u32 %v12271_v53, 16  ;;  %v2243_v43 = vor.u32 %v2241_v30, %v2239_v33  ;;  %v10269_v30 = vld [vmem:[%s12147_s8 + $0x80] sm:$0xff] }
 0x187   : >> { %3572 = vmatpush.bf16.msrb.mxu0 %v10305_v58  ;;  %2483 = vmatmul.bf16.gmra.mxu3 %v2320_v37  ;;  %v2203_v37 = vor.u32 %v2201_v25, %v2199_v41  ;;  %v2288_v33 = vsel %vm2180_vm8, %v2283_v7, %v2287_v14  ;;  %v12302_v41 = vld [vmem:[%s12157_s15 + $0x70] sm:$0xff]  ;;  %v12315_v25 = vld [vmem:[%s12157_s15 + $0xc] sm:$0xf]  ;;  %v2289_v7 = vshrl.u32 %v12260_v55, 16 }
 0x188   : >> { %2408 = vmatmul.bf16.gmra.mxu0 %v2200_v39  ;;  %v2321_v39 = vshrl.u32 %v12236_v13, 16  ;;  %3177 = vmatpush.bf16.msrb.mxu3 %v10297_v63  ;;  %v2248_v58 = vsel %vm2180_vm8, %v2243_v43, %v2247_v1  ;;  %v2217_v13 = vshrl.u32 %v12282_v11, 16  ;;  %v10294_v63 = vld [vmem:[%s12147_s8 + $0xc0] sm:$0xff] }
 0x189   : >> { %v10302_v43 = vld [vmem:[%s12147_s8 + $0x100] sm:$0xff] }
 0x18a   : >> { %2791 = vmatpush.bf16.msrb.mxu2 %v10271_v46  ;;  %2565 = vmatpush.bf16.msrb.mxu1 %v10255_v16  ;;  %v2207_v46 = vrot.slane %v2205_v8, 1  ;;  %v2323_v3 = vor.u32 %v2321_v39, %v2319_v23  ;;  %v2219_v16 = vor.u32 %v2217_v13, %v2215_v6  ;;  %v2249_v8 = vshrl.u32 %v12257_v36, 16 }
 0x18b   : >> { %3573 = vmatpush.bf16.msrb.mxu0 %v10304_v52  ;;  %v14604_v39 = vunpack.c.l.b16 %v12315_v25 }
 0x18c   : >> { %3178 = vmatpush.bf16.msrb.mxu3 %v10296_v50  ;;  %v2208_v62 = vsel %vm2180_vm8, %v2203_v37, %v2207_v46  ;;  %v2328_v23 = vsel %vm2180_vm8, %v2323_v3, %v2327_v17  ;;  %v2224_v52 = vsel %vm2180_vm8, %v2219_v16, %v12183_v60  ;;  %v2293_v60 = vshll.u32 %v12302_v41, 16 }
 0x18d   : >> { %v2251_v50 = vor.u32 %v2249_v8, %v2247_v1  ;;  %v2291_v37 = vor.u32 %v2289_v7, %v2287_v14  ;;  %v3051_v3 = vpack.c.b16 %v14604_v39, %v3014_v12  ;;  %v2211_v17 = vor.u32 %v2209_v51, %v2207_v46  ;;  %v10342_v1 = vld [vmem:[%s12147_s8 + $0x1b8] sm:$0xff] }
 0x18e   : >> { %2792 = vmatpush.bf16.msrb.mxu2 %v10270_v4  ;;  %v10254_v4 = vld [vmem:[%s12147_s8 + $0x8] sm:$0xff]  ;;  %v10317_v46 = vld [vmem:[%s12147_s8 + $0x178] sm:$0xff] }
 0x18f   : >> { %2566 = vmatpush.bf16.msrb.mxu1 %v10254_v4  ;;  %3574 = vmatpush.bf16.msrb.mxu0 %v10303_v45  ;;  %v2256_v13 = vsel %vm2180_vm8, %v2251_v50, %v12264_v24  ;;  %v3070_v16 = vrot.slane %v3051_v3, 1  ;;  %v10358_v24 = vld [vmem:[%s12147_s8 + $0x238] sm:$0xff]  ;;  %v3333_v7 = vshrl.u32 %v3051_v3, 16 }
 0x190   : >> { %3179 = vmatpush.bf16.msrb.mxu3 %v10295_v44  ;;  %v10350_v44 = vld [vmem:[%s12147_s8 + $0x1f8] sm:$0xff] }
 0x191   : >> { %v10278_v45 = vld [vmem:[%s12157_s15 + $0x18] sm:$0xff] }
 0x192   : >> { %2793 = vmatpush.bf16.msrb.mxu2 %v10269_v30  ;;  %v3073_v35 = vrot.slane %v10278_v45, 1 }
 0x193   : >> { %2567 = vmatpush.bf16.msrb.mxu1 %v10253_v29  ;;  %3575 = vmatpush.bf16.msrb.mxu0 %v10302_v43  ;;  %v10492_v43 = vld [vmem:[%s12157_s15] sm:$0xe] }
 0x194   : >> { %3180 = vmatpush.bf16.msrb.mxu3 %v10294_v63  ;;  %v10491_v63 = vld [vmem:[%s12157_s15] sm:$0xf0] }
 0x195   : >> { %2438 = vmatmul.bf16.gmra.mxu1 %v2248_v58  ;;  %2463 = vmatmul.bf16.gmra.mxu2 %v2288_v33  ;;  %v2295_v58 = vrot.slane %v2293_v60, 1  ;;  %v10277_v33 = vld [vmem:[%s12157_s15 + $0x10] sm:$0xff]  ;;  %v3336_v60 = vshll.u32 %v3051_v3, 16  ;;  %v10493_v50 = vor.u32 %v10492_v43, %v10491_v63 }
 0x196   : >> { %v3071_v4 = vrot.slane %v10277_v33, 1  ;;  %4217 = vmatpush.bf16.msra.mxu2 %v10342_v1  ;;  %v3341_v12 = vshrl.u32 %v10277_v33, 16  ;;  %v3344_v51 = vshll.u32 %v10277_v33, 16  ;;  %v10341_v1 = vld [vmem:[%s12147_s8 + $0x1b0] sm:$0xff] }
 0x197   : >> { %2488 = vmatmul.bf16.gmra.mxu3 %v2328_v23  ;;  %v2216_v23 = vsel %vm2180_vm8, %v2211_v17, %v2215_v6  ;;  %3830 = vmatpush.bf16.msra.mxu1 %v10317_v46  ;;  %v2297_v6 = vshrl.u32 %v12302_v41, 16  ;;  %v3350_v46 = vshrl.u32 %v10278_v45, 16  ;;  %v10357_v43 = vld [vmem:[%s12147_s8 + $0x230] sm:$0xff] }
 0x198   : >> { %2413 = vmatmul.bf16.gmra.mxu0 %v2208_v62  ;;  %v2296_v62 = vsel %vm2180_vm8, %v2291_v37, %v2295_v58  ;;  %v3072_v14 = vsel %vm2682_vm9, %v3070_v16, %v3071_v4  ;;  %4612 = vmatpush.bf16.msra.mxu3 %v10350_v44  ;;  %v3074_v8 = vsel %vm2682_vm9, %v3071_v4, %v3073_v35  ;;  %v3335_v37 = vrot.slane %v3333_v7, 1  ;;  %v10316_v44 = vld [vmem:[%s12147_s8 + $0x170] sm:$0xff] }
 0x199   : >> { %4874 = vmatpush.bf16.msra.mxu0 %v10358_v24  ;;  %v2299_v30 = vor.u32 %v2297_v6, %v2295_v58  ;;  %v3338_v58 = vrot.slane %v3336_v60, 2  ;;  %v3346_v17 = vrot.slane %v3344_v51, 2  ;;  %v3353_v24 = vshll.u32 %v10278_v45, 16 }
 0x19a   : >> { %4218 = vmatpush.bf16.msra.mxu2 %v10341_v1  ;;  %v3352_v6 = vrot.slane %v3350_v46, 1  ;;  %v10282_v1 = vld [vmem:[%s12157_s15 + $0x38] sm:$0xff] }
 0x19b   : >> { %v2304_v29 = vsel %vm2180_vm8, %v2299_v30, %v12202_v31  ;;  %v3343_v31 = vrot.slane %v3341_v12, 1  ;;  %3831 = vmatpush.bf16.msra.mxu1 %v10316_v44  ;;  %v3355_v30 = vrot.slane %v3353_v24, 2  ;;  %v3081_v24 = vrot.slane %v10282_v1, 1 }
 0x19d   : >> { %v3347_v16 = vor.u32 %v3346_v17, %v3343_v31  ;;  %v3356_v63 = vor.u32 %v3355_v30, %v3352_v6  ;;  %4875 = vmatpush.bf16.msra.mxu0 %v10357_v43 }
 0x19f   : >> { %v3357_v7 = vsel %vm3331_vm10, %v3347_v16, %v3356_v63 }
 0x1a5   : >> { %2443 = vmatmul.bf16.gmra.mxu1 %v2256_v13  ;;  %2468 = vmatmul.bf16.gmra.mxu2 %v2296_v62  ;;  %v10279_v13 = vld [vmem:[%s12157_s15 + $0x20] sm:$0xff]  ;;  %v3339_v62 = vor.u32 %v3338_v58, %v3335_v37  ;;  %v2688_v37 = vrot.slane %v12271_v53, 1  ;;  %v10281_v58 = vld [vmem:[%s12157_s15 + $0x30] sm:$0xff] }
 0x1a6   : >> { %v3075_v4 = vrot.slane %v10279_v13, 1  ;;  %v3359_v60 = vshrl.u32 %v10279_v13, 16  ;;  %v3362_v12 = vshll.u32 %v10279_v13, 16 }
 0x1a7   : >> { %3181 = vmatmul.bf16.vlgmr.msrb.gmra.mxu3 %v3072_v14  ;;  %v3348_v33 = vsel %vm3331_vm10, %v3339_v62, %v3347_v16  ;;  %v10349_v14 = vld [vmem:[%s12147_s8 + $0x1f0] sm:$0xff] }
 0x1a8   : >> { %2418 = vmatmul.bf16.gmra.mxu0 %v2216_v23  ;;  %v3076_v23 = vsel %vm2682_vm9, %v3073_v35, %v3075_v4  ;;  %4613 = vmatpush.bf16.msra.mxu3 %v10349_v14  ;;  %v3361_v51 = vrot.slane %v3359_v60, 1 }
 0x1b5   : >> { %2448 = vmatmul.bf16.gmra.mxu1 %v12289_v40  ;;  %2473 = vmatmul.bf16.gmra.mxu2 %v2304_v29  ;;  %v2683_v40 = vrot.slane %v10493_v50, 1  ;;  %v2686_v29 = vrot.slane %v12225_v27, 1  ;;  %v3364_v50 = vrot.slane %v3362_v12, 2 }
 0x1b7   : >> { %3186 = vmatmul.bf16.gmra.mxu3 %v3074_v8  ;;  %v3365_v31 = vor.u32 %v3364_v50, %v3361_v51  ;;  %v2689_v17 = vsel %vm2682_vm9, %v2686_v29, %v2688_v37  ;;  %v10283_v51 = vld [vmem:[%s12157_s15 + $0x40] sm:$0xff] }
 0x1b8   : >> { %2423 = vmatmul.bf16.gmra.mxu0 %v2224_v52  ;;  %v2684_v52 = vrot.slane %v12179_v26, 1 }
 0x1ba   : >> { %v2685_v3 = vsel %vm2682_vm9, %v2683_v40, %v2684_v52  ;;  %v2687_v8 = vsel %vm2682_vm9, %v2684_v52, %v2686_v29  ;;  %v3079_v40 = vrot.slane %v10281_v58, 1 }
 0x1bc   : >> { %v3082_v29 = vsel %vm2682_vm9, %v3079_v40, %v3081_v24 }
 0x1c5   : >> { %2568 = vmatmul.bf16.vlgmr.msrb.gmra.mxu1 %v12167_v20  ;;  %2794 = vmatmul.bf16.vlgmr.msrb.gmra.mxu2 %v2685_v3  ;;  %v10280_v20 = vld [vmem:[%s12157_s15 + $0x28] sm:$0xff] }
 0x1c6   : >> { %v3077_v35 = vrot.slane %v10280_v20, 1  ;;  %v3368_v13 = vshrl.u32 %v10280_v20, 16  ;;  %v3371_v62 = vshll.u32 %v10280_v20, 16  ;;  %v10356_v20 = vld [vmem:[%s12147_s8 + $0x228] sm:$0xff] }
 0x1c7   : >> { %3191 = vmatmul.bf16.gmra.mxu3 %v3076_v23  ;;  %v2690_v23 = vrot.slane %v12282_v11, 1  ;;  %4876 = vmatpush.bf16.msra.mxu0 %v10356_v20 }
 0x1c8   : >> { %3576 = vmatmul.bf16.vlgmr.msrb.gmra.mxu0 %v3348_v33  ;;  %v3078_v45 = vsel %vm2682_vm9, %v3075_v4, %v3077_v35  ;;  %v3080_v52 = vsel %vm2682_vm9, %v3077_v35, %v3079_v40  ;;  %v3370_v16 = vrot.slane %v3368_v13, 1  ;;  %v3373_v3 = vrot.slane %v3371_v62, 2  ;;  %v10340_v4 = vld [vmem:[%s12147_s8 + $0x1a8] sm:$0xff] }
 0x1c9   : >> { %v10348_v33 = vld [vmem:[%s12147_s8 + $0x1e8] sm:$0xff]  ;;  %4219 = vmatpush.bf16.msra.mxu2 %v10340_v4  ;;  %v2691_v46 = vsel %vm2682_vm9, %v2688_v37, %v2690_v23  ;;  %v3386_v62 = vshrl.u32 %v10282_v1, 16 }
 0x1ca   : >> { %4614 = vmatpush.bf16.msra.mxu3 %v10348_v33  ;;  %v3374_v14 = vor.u32 %v3373_v3, %v3370_v16  ;;  %v3389_v16 = vshll.u32 %v10282_v1, 16  ;;  %v10339_v1 = vld [vmem:[%s12147_s8 + $0x1a0] sm:$0xff] }
 0x1cc   : >> { %v3375_v30 = vsel %vm3331_vm10, %v3365_v31, %v3374_v14 }
 0x1cd   : >> { %4220 = vmatpush.bf16.msra.mxu2 %v10339_v1 }
 0x1d5   : >> { %2573 = vmatmul.bf16.gmra.mxu1 %v12179_v26  ;;  %2799 = vmatmul.bf16.gmra.mxu2 %v2687_v8  ;;  %v3366_v26 = vsel %vm3331_vm10, %v3356_v63, %v3365_v31  ;;  %v3377_v63 = vshrl.u32 %v10281_v58, 16  ;;  %v3380_v8 = vshll.u32 %v10281_v58, 16 }
 0x1d7   : >> { %3196 = vmatmul.bf16.gmra.mxu3 %v3078_v45  ;;  %v3379_v45 = vrot.slane %v3377_v63, 1  ;;  %v3382_v60 = vrot.slane %v3380_v8, 2  ;;  %v10347_v8 = vld [vmem:[%s12147_s8 + $0x1e0] sm:$0xff] }
 0x1d8   : >> { %3581 = vmatmul.bf16.gmra.mxu0 %v3357_v7  ;;  %4615 = vmatpush.bf16.msra.mxu3 %v10347_v8 }
 0x1d9   : >> { %v3383_v50 = vor.u32 %v3382_v60, %v3379_v45 }
 0x1e5   : >> { %2578 = vmatmul.bf16.gmra.mxu1 %v12225_v27  ;;  %2804 = vmatmul.bf16.gmra.mxu2 %v2689_v17  ;;  %v10315_v27 = vld [vmem:[%s12147_s8 + $0x168] sm:$0xff]  ;;  %v3083_v17 = vrot.slane %v10283_v51, 1 }
 0x1e6   : >> { %3832 = vmatpush.bf16.msra.mxu1 %v10315_v27 }
 0x1e7   : >> { %3201 = vmatmul.bf16.gmra.mxu3 %v3080_v52  ;;  %v3084_v13 = vsel %vm2682_vm9, %v3081_v24, %v3083_v17 }
 0x1e8   : >> { %3586 = vmatmul.bf16.gmra.mxu0 %v3366_v26  ;;  %v3384_v26 = vsel %vm3331_vm10, %v3374_v14, %v3383_v50  ;;  %v3391_v14 = vrot.slane %v3389_v16, 2 }
 0x1f2   : >> { %v12370_v44 = vpop.f32.mrf.mxu1 }
 0x1f5   : >> { %v12373_v6 = vpop.f32.mrf.mxu0  ;;  %2583 = vmatmul.bf16.gmra.mxu1 %v12271_v53  ;;  %2809 = vmatmul.bf16.gmra.mxu2 %v2691_v46  ;;  %v2692_v53 = vrot.slane %v12160_v34, 1  ;;  %v10284_v46 = vld [vmem:[%s12157_s15 + $0x48] sm:$0xff] }
 0x1f6   : >> { %v3085_v63 = vrot.slane %v10284_v46, 1 }
 0x1f7   : >> { %3206 = vmatmul.bf16.gmra.mxu3 %v3082_v29  ;;  %v2693_v58 = vsel %vm2682_vm9, %v2690_v23, %v2692_v53  ;;  %v3388_v23 = vrot.slane %v3386_v62, 1  ;;  %v3398_v62 = vshll.u32 %v10283_v51, 16 }
 0x1f8   : >> { %3591 = vmatmul.bf16.gmra.mxu0 %v3375_v30  ;;  %v12379_v35 = vpop.f32.mrf.mxu2 }
 0x1f9   : >> { %v3392_v30 = vor.u32 %v3391_v14, %v3388_v23  ;;  %v3400_v8 = vrot.slane %v3398_v62, 2 }
 0x1fa   : >> { %v12381_v43 = vpop.f32.mrf.mxu1  ;;  %v12385_v12 = vpop.f32.mrf.mxu3 }
 0x1fb   : >> { %14686 = vst [vmem:[#allocation42_spill] sm:$0xff] %v12385_v12  ;;  %v3393_v60 = vsel %vm3331_vm10, %v3383_v50, %v3392_v30  ;;  %v10355_v50 = vld [vmem:[%s12147_s8 + $0x220] sm:$0xff] }
 0x1fc   : >> { %4877 = vmatpush.bf16.msra.mxu0 %v10355_v50  ;;  %v3404_v50 = vshrl.u32 %v10284_v46, 16 }
 0x1fd   : >> { %v12383_v7 = vpop.f32.mrf.mxu0 }
 0x200   : >> { %v12389_v37 = vpop.f32.mrf.mxu2  ;;  %4878 = vmatpush.bf16.msra.mxu0 %v10354_v5 }
 0x202   : >> { %v12391_v31 = vpop.f32.mrf.mxu1  ;;  %v12397_v52 = vpop.f32.mrf.mxu3 }
 0x203   : >> { %14687 = vst [vmem:[#allocation43_spill] sm:$0xff] %v12397_v52 }
 0x205   : >> { %v12394_v40 = vpop.f32.mrf.mxu0  ;;  %2588 = vmatmul.bf16.gmra.mxu1 %v12282_v11  ;;  %2814 = vmatmul.bf16.gmra.mxu2 %v2693_v58  ;;  %v2694_v11 = vrot.slane %v12170_v59, 1 }
 0x207   : >> { %3211 = vmatmul.bf16.gmra.mxu3 %v3084_v13  ;;  %v2695_v20 = vsel %vm2682_vm9, %v2692_v53, %v2694_v11  ;;  %v3086_v13 = vsel %vm2682_vm9, %v3083_v17, %v3085_v63  ;;  %v3395_v53 = vshrl.u32 %v10283_v51, 16 }
 0x208   : >> { %3596 = vmatmul.bf16.gmra.mxu0 %v3384_v26  ;;  %v12401_v3 = vpop.f32.mrf.mxu2  ;;  %v10314_v26 = vld [vmem:[%s12147_s8 + $0x160] sm:$0xff] }
 0x209   : >> { %3833 = vmatpush.bf16.msra.mxu1 %v10314_v26  ;;  %v3397_v1 = vrot.slane %v3395_v53, 1 }
 0x20a   : >> { %v12403_v4 = vpop.f32.mrf.mxu1  ;;  %v12407_v27 = vpop.f32.mrf.mxu3 }
 0x20b   : >> { %14688 = vst [vmem:[#allocation44_spill] sm:$0xff] %v12407_v27  ;;  %v3401_v17 = vor.u32 %v3400_v8, %v3397_v1  ;;  %v3407_v1 = vshll.u32 %v10284_v46, 16 }
 0x20d   : >> { %v12405_v33 = vpop.f32.mrf.mxu0  ;;  %v3402_v38 = vsel %vm3331_vm10, %v3392_v30, %v3401_v17  ;;  %v3406_v30 = vrot.slane %v3404_v50, 1  ;;  %v3409_v61 = vrot.slane %v3407_v1, 2  ;;  %v10338_v50 = vld [vmem:[%s12147_s8 + $0x198] sm:$0xff]  ;;  %3834 = vmatpush.bf16.msra.mxu1 %v10313_v18 }
 0x20e   : >> { %v10346_v1 = vld [vmem:[%s12147_s8 + $0x1d8] sm:$0xff]  ;;  %4221 = vmatpush.bf16.msra.mxu2 %v10338_v50 }
 0x20f   : >> { %4616 = vmatpush.bf16.msra.mxu3 %v10346_v1  ;;  %v3091_v1 = vrot.slane %v10287_v47, 1 }
 0x210   : >> { %v12411_v24 = vpop.f32.mrf.mxu2 }
 0x212   : >> { %v12414_v29 = vpop.f32.mrf.mxu1  ;;  %v12421_v58 = vpop.f32.mrf.mxu3 }
 0x213   : >> { %14689 = vst [vmem:[#allocation45_spill] sm:$0xff] %v12421_v58 }
 0x215   : >> { %v12418_v45 = vpop.f32.mrf.mxu0  ;;  %2593 = vmatmul.bf16.gmra.mxu1 %v12160_v34  ;;  %2819 = vmatmul.bf16.gmra.mxu2 %v2695_v20  ;;  %v2696_v20 = vrot.slane %v12217_v21, 1 }
 0x217   : >> { %3216 = vmatmul.bf16.gmra.mxu3 %v3086_v13  ;;  %v2697_v26 = vsel %vm2682_vm9, %v2694_v11, %v2696_v20 }
 0x218   : >> { %3601 = vmatmul.bf16.gmra.mxu0 %v3393_v60  ;;  %v12426_v16 = vpop.f32.mrf.mxu2  ;;  %v10285_v60 = vld [vmem:[%s12157_s15 + $0x50] sm:$0xff] }
 0x219   : >> { %v3087_v13 = vrot.slane %v10285_v60, 1  ;;  %v3416_v54 = vshll.u32 %v10285_v60, 16 }
 0x21a   : >> { %v12428_v23 = vpop.f32.mrf.mxu1  ;;  %v12433_v34 = vpop.f32.mrf.mxu3 }
 0x21b   : >> { %14690 = vst [vmem:[#allocation46_spill] sm:$0xff] %v12433_v34  ;;  %v3088_v62 = vsel %vm2682_vm9, %v3085_v63, %v3087_v13 }
 0x21d   : >> { %v12431_v14 = vpop.f32.mrf.mxu0 }
 0x220   : >> { %v12437_v39 = vpop.f32.mrf.mxu2 }
 0x222   : >> { %v12439_v51 = vpop.f32.mrf.mxu1  ;;  %v12445_v53 = vpop.f32.mrf.mxu3 }
 0x223   : >> { %14691 = vst [vmem:[#allocation47_spill] sm:$0xff] %v12445_v53 }
 0x225   : >> { %v12442_v22 = vpop.f32.mrf.mxu0  ;;  %2598 = vmatmul.bf16.gmra.mxu1 %v12170_v59  ;;  %2824 = vmatmul.bf16.gmra.mxu2 %v2697_v26  ;;  %v2698_v59 = vrot.slane %v12257_v36, 1  ;;  %v10286_v26 = vld [vmem:[%s12157_s15 + $0x58] sm:$0xff] }
 0x227   : >> { %3221 = vmatmul.bf16.gmra.mxu3 %v3088_v62  ;;  %v2699_v46 = vsel %vm2682_vm9, %v2696_v20, %v2698_v59  ;;  %v3089_v62 = vrot.slane %v10286_v26, 1 }
 0x228   : >> { %3606 = vmatmul.bf16.gmra.mxu0 %v3402_v38  ;;  %v12449_v8 = vpop.f32.mrf.mxu2  ;;  %v3410_v38 = vor.u32 %v3409_v61, %v3406_v30  ;;  %v3413_v30 = vshrl.u32 %v10285_v60, 16 }
 0x229   : >> { %v3090_v61 = vsel %vm2682_vm9, %v3087_v13, %v3089_v62  ;;  %v2700_v13 = vrot.slane %v12248_v28, 1  ;;  %v3092_v18 = vsel %vm2682_vm9, %v3089_v62, %v3091_v1 }
 0x22a   : >> { %v12451_v11 = vpop.f32.mrf.mxu1  ;;  %v3182_v2 = vpop.f32.mrf.mxu3  ;;  %v3411_v9 = vsel %vm3331_vm10, %v3401_v17, %v3410_v38 }
 0x22d   : >> { %v12453_v48 = vpop.f32.mrf.mxu0 }
 0x230   : >> { %v12457_v57 = vpop.f32.mrf.mxu2 }
 0x232   : >> { %v12459_v63 = vpop.f32.mrf.mxu1  ;;  %v3184_v49 = vpop.f32.mrf.mxu3 }
 0x235   : >> { %v12462_v19 = vpop.f32.mrf.mxu0  ;;  %2603 = vmatmul.bf16.gmra.mxu1 %v12217_v21  ;;  %2829 = vmatmul.bf16.gmra.mxu2 %v2699_v46  ;;  %v3415_v21 = vrot.slane %v3413_v30, 1  ;;  %v3418_v46 = vrot.slane %v3416_v54, 2  ;;  %v3422_v54 = vshrl.u32 %v10286_v26, 16 }
 0x237   : >> { %3226 = vmatmul.bf16.gmra.mxu3 %v3090_v61  ;;  %v3419_v60 = vor.u32 %v3418_v46, %v3415_v21  ;;  %v2701_v61 = vsel %vm2682_vm9, %v2698_v59, %v2700_v13  ;;  %v3425_v21 = vshll.u32 %v10286_v26, 16 }
 0x238   : >> { %3611 = vmatmul.bf16.gmra.mxu0 %v3411_v9  ;;  %v12469_v20 = vpop.f32.mrf.mxu2 }
 0x239   : >> { %v3420_v34 = vsel %vm3331_vm10, %v3410_v38, %v3419_v60  ;;  %v3424_v38 = vrot.slane %v3422_v54, 1  ;;  %v3427_v12 = vrot.slane %v3425_v21, 2 }
 0x23a   : >> { %v12471_v17 = vpop.f32.mrf.mxu1  ;;  %v3187_v9 = vpop.f32.mrf.mxu3 }
 0x23d   : >> { %v12473_v10 = vpop.f32.mrf.mxu0 }
 0x240   : >> { %v12479_v50 = vpop.f32.mrf.mxu2 }
 0x241   : >> { %14692 = vst [vmem:[#allocation48_spill] sm:$0xff] %v12479_v50 }
 0x242   : >> { %v2569_v32 = vpop.f32.mrf.mxu1  ;;  %v12483_v30 = vpop.f32.mrf.mxu3 }
 0x243   : >> { %v2570_v5 = vadd.f32 %v2569_v32, %v12373_v6  ;;  %v3428_v6 = vor.u32 %v3427_v12, %v3424_v38 }
 0x245   : >> { %v3577_v53 = vpop.f32.mrf.mxu0  ;;  %2608 = vmatmul.bf16.gmra.mxu1 %v12257_v36  ;;  %2834 = vmatmul.bf16.gmra.mxu2 %v2701_v61  ;;  %v12494_v61 = vld [vmem:[%s12157_s15 + $0x68] sm:$0xff]  ;;  %v3429_v21 = vsel %vm3331_vm10, %v3419_v60, %v3428_v6 }
 0x247   : >> { %3231 = vmatmul.bf16.gmra.mxu3 %v3092_v18 }
 0x248   : >> { %3616 = vmatmul.bf16.gmra.mxu0 %v3420_v34  ;;  %v2795_v46 = vpop.f32.mrf.mxu2  ;;  %v2702_v34 = vrot.slane %v12164_v42, 1 }
 0x249   : >> { %v2885_v58 = vadd.f32 %v2795_v46, %v2570_v5 }
 0x24a   : >> { %v2571_v59 = vpop.f32.mrf.mxu1  ;;  %v12488_v50 = vpop.f32.mrf.mxu3  ;;  %v2703_v18 = vsel %vm2682_vm9, %v2700_v13, %v2702_v34 }
 0x24b   : >> { %v3272_v27 = vadd.f32 %v3182_v2, %v2885_v58  ;;  %v2572_v32 = vadd.f32 %v2571_v59, %v12383_v7  ;;  %v3093_v2 = vrot.slane %v12494_v61, 1 }
 0x24d   : >> { %v3579_v52 = vpop.f32.mrf.mxu0  ;;  %v12490_v36 = vadd.f32 %v3577_v53, %v3272_v27  ;;  %v3094_v7 = vsel %vm2682_vm9, %v3091_v1, %v3093_v2  ;;  %v3431_v53 = vshrl.u32 %v10287_v47, 16  ;;  %v10289_v1 = vld [vmem:[%s12157_s15 + $0x70] sm:$0xff] }
 0x24f   : >> { %v3433_v38 = vrot.slane %v3431_v53, 1  ;;  %v3095_v53 = vrot.slane %v10289_v1, 1 }
 0x250   : >> { %v2797_v26 = vpop.f32.mrf.mxu2 }
 0x251   : >> { %v2886_v62 = vadd.f32 %v2797_v26, %v2572_v32  ;;  %v10337_v26 = vld [vmem:[%s12147_s8 + $0x190] sm:$0xff] }
 0x252   : >> { %v2574_v5 = vpop.f32.mrf.mxu1  ;;  %v12500_v27 = vpop.f32.mrf.mxu3  ;;  %4222 = vmatpush.bf16.msra.mxu2 %v10337_v26 }
 0x253   : >> { %v3273_v58 = vadd.f32 %v3184_v49, %v2886_v62  ;;  %v2575_v12 = vadd.f32 %v2574_v5, %v12394_v40  ;;  %v3434_v49 = vshll.u32 %v10287_v47, 16  ;;  %v10312_v62 = vld [vmem:[%s12147_s8 + $0x150] sm:$0xff]  ;;  %v2704_v47 = vrot.slane %v12174_v56, 1 }
 0x254   : >> { %3835 = vmatpush.bf16.msra.mxu1 %v10312_v62  ;;  %v10601_v56 = vld [vmem:[%s12157_s15 + $0x50] sm:$0xff] }
 0x255   : >> { %v3582_v54 = vpop.f32.mrf.mxu0  ;;  %2613 = vmatmul.bf16.gmra.mxu1 %v12248_v28  ;;  %2839 = vmatmul.bf16.gmra.mxu2 %v2703_v18  ;;  %v12503_v42 = vadd.f32 %v3579_v52, %v3273_v58  ;;  %v3436_v32 = vrot.slane %v3434_v49, 2  ;;  %v10345_v52 = vld [vmem:[%s12147_s8 + $0x1d0] sm:$0xff] }
 0x256   : >> { %4617 = vmatpush.bf16.msra.mxu3 %v10345_v52 }
 0x257   : >> { %3236 = vmatmul.bf16.gmra.mxu3 %v3094_v7  ;;  %v3437_v5 = vor.u32 %v3436_v32, %v3433_v38 }
 0x258   : >> { %3621 = vmatmul.bf16.gmra.mxu0 %v3429_v21  ;;  %v2800_v13 = vpop.f32.mrf.mxu2 }
 0x259   : >> { %v2887_v46 = vadd.f32 %v2800_v13, %v2575_v12  ;;  %v2705_v12 = vsel %vm2682_vm9, %v2702_v34, %v2704_v47 }
 0x25a   : >> { %v2576_v60 = vpop.f32.mrf.mxu1  ;;  %v12510_v18 = vpop.f32.mrf.mxu3 }
 0x25b   : >> { %v3274_v59 = vadd.f32 %v3187_v9, %v2887_v46  ;;  %v2577_v9 = vadd.f32 %v2576_v60, %v12405_v33  ;;  %v10353_v46 = vld [vmem:[%s12147_s8 + $0x210] sm:$0xff]  ;;  %v3096_v33 = vsel %vm2682_vm9, %v3093_v2, %v3095_v53  ;;  %v3440_v60 = vshrl.u32 %v12494_v61, 16 }
 0x25c   : >> { %4879 = vmatpush.bf16.msra.mxu0 %v10353_v46 }
 0x25d   : >> { %v3584_v28 = vpop.f32.mrf.mxu0  ;;  %v12512_v40 = vadd.f32 %v3582_v54, %v3274_v59  ;;  %v3438_v54 = vsel %vm3331_vm10, %v3428_v6, %v3437_v5 }
 0x260   : >> { %v2802_v58 = vpop.f32.mrf.mxu2 }
 0x261   : >> { %v2888_v21 = vadd.f32 %v2802_v58, %v2577_v9 }
 0x262   : >> { %v2579_v7 = vpop.f32.mrf.mxu1  ;;  %v12521_v59 = vpop.f32.mrf.mxu3 }
 0x263   : >> { %v3275_v49 = vadd.f32 %v12483_v30, %v2888_v21  ;;  %v2580_v34 = vadd.f32 %v2579_v7, %v12418_v45  ;;  %v3443_v30 = vshll.u32 %v12494_v61, 16  ;;  %v2706_v45 = vrot.slane %v12220_v0, 1  ;;  %v12537_v21 = vld [vmem:[%s12157_s15 + $0x78] sm:$0xff] }
 0x264   : >> { %v3097_v46 = vrot.slane %v12537_v21, 1  ;;  %v10602_v0 = vld [vmem:[%s12157_s15 + $0x58] sm:$0xff] }
 0x265   : >> { %v3587_v13 = vpop.f32.mrf.mxu0  ;;  %2618 = vmatmul.bf16.gmra.mxu1 %v10601_v56  ;;  %2844 = vmatmul.bf16.gmra.mxu2 %v2705_v12  ;;  %v12524_v26 = vadd.f32 %v3584_v28, %v3275_v49  ;;  %v3442_v28 = vrot.slane %v3440_v60, 1  ;;  %v3445_v9 = vrot.slane %v3443_v30, 2  ;;  %v3449_v30 = vshrl.u32 %v10289_v1, 16 }
 0x266   : >> { %v3098_v60 = vsel %vm2682_vm9, %v3095_v53, %v3097_v46  ;;  %v12560_v53 = vld [vmem:[%s12157_s15 + $0x80] sm:$0xff] }
 0x267   : >> { %3241 = vmatmul.bf16.gmra.mxu3 %v3096_v33  ;;  %v3446_v7 = vor.u32 %v3445_v9, %v3442_v28  ;;  %v3451_v28 = vrot.slane %v3449_v30, 1  ;;  %v10311_v30 = vld [vmem:[%s12147_s8 + $0x148] sm:$0xff] }
 0x268   : >> { %3626 = vmatmul.bf16.gmra.mxu0 %v3438_v54  ;;  %v2805_v6 = vpop.f32.mrf.mxu2  ;;  %3836 = vmatpush.bf16.msra.mxu1 %v10311_v30 }
 0x269   : >> { %v2889_v38 = vadd.f32 %v2805_v6, %v2580_v34  ;;  %v3452_v6 = vshll.u32 %v10289_v1, 16  ;;  %v2708_v1 = vrot.slane %v12260_v55, 1 }
 0x26a   : >> { %v2581_v32 = vpop.f32.mrf.mxu1  ;;  %v12531_v58 = vpop.f32.mrf.mxu3 }
 0x26b   : >> { %v3276_v52 = vadd.f32 %v12488_v50, %v2889_v38  ;;  %v2582_v61 = vadd.f32 %v2581_v32, %v12431_v14  ;;  %v2707_v50 = vsel %vm2682_vm9, %v2704_v47, %v2706_v45  ;;  %v3454_v9 = vrot.slane %v3452_v6, 2 }
 0x26d   : >> { %v3589_v62 = vpop.f32.mrf.mxu0  ;;  %v12533_v2 = vadd.f32 %v3587_v13, %v3276_v52  ;;  %v3447_v13 = vsel %vm3331_vm10, %v3437_v5, %v3446_v7 }
 0x270   : >> { %v2807_v12 = vpop.f32.mrf.mxu2 }
 0x271   : >> { %v2890_v49 = vadd.f32 %v2807_v12, %v2582_v61  ;;  %v10336_v61 = vld [vmem:[%s12147_s8 + $0x188] sm:$0xff] }
 0x272   : >> { %v2584_v54 = vpop.f32.mrf.mxu1  ;;  %v12544_v34 = vpop.f32.mrf.mxu3  ;;  %4223 = vmatpush.bf16.msra.mxu2 %v10336_v61 }
 0x273   : >> { %v3277_v56 = vadd.f32 %v12500_v27, %v2890_v49  ;;  %v2585_v47 = vadd.f32 %v2584_v54, %v12442_v22 }
 0x275   : >> { %v3592_v33 = vpop.f32.mrf.mxu0  ;;  %2623 = vmatmul.bf16.gmra.mxu1 %v10602_v0  ;;  %2849 = vmatmul.bf16.gmra.mxu2 %v2707_v50  ;;  %v12547_v14 = vadd.f32 %v3589_v62, %v3277_v56  ;;  %v10344_v62 = vld [vmem:[%s12147_s8 + $0x1c8] sm:$0xff]  ;;  %v3099_v0 = vrot.slane %v12560_v53, 1 }
 0x276   : >> { %4618 = vmatpush.bf16.msra.mxu3 %v10344_v62 }
 0x277   : >> { %3246 = vmatmul.bf16.gmra.mxu3 %v3098_v60 }
 0x278   : >> { %3631 = vmatmul.bf16.gmra.mxu0 %v3447_v13  ;;  %v2810_v27 = vpop.f32.mrf.mxu2  ;;  %v2709_v13 = vsel %vm2682_vm9, %v2706_v45, %v2708_v1  ;;  %v10352_v45 = vld [vmem:[%s12147_s8 + $0x208] sm:$0xff] }
 0x279   : >> { %v2891_v38 = vadd.f32 %v2810_v27, %v2585_v47  ;;  %v10603_v27 = vld [vmem:[%s12157_s15 + $0x60] sm:$0xff]  ;;  %4880 = vmatpush.bf16.msra.mxu0 %v10352_v45 }
 0x27a   : >> { %v2586_v5 = vpop.f32.mrf.mxu1  ;;  %v12554_v12 = vpop.f32.mrf.mxu3 }
 0x27b   : >> { %v3278_v32 = vadd.f32 %v12510_v18, %v2891_v38  ;;  %v2587_v49 = vadd.f32 %v2586_v5, %v12453_v48  ;;  %v3455_v18 = vor.u32 %v3454_v9, %v3451_v28  ;;  %v3100_v38 = vsel %vm2682_vm9, %v3097_v46, %v3099_v0 }
 0x27d   : >> { %v3594_v52 = vpop.f32.mrf.mxu0  ;;  %v12556_v22 = vadd.f32 %v3592_v33, %v3278_v32  ;;  %v3456_v33 = vsel %vm3331_vm10, %v3446_v7, %v3455_v18  ;;  %v3461_v7 = vshll.u32 %v12537_v21, 16 }
 0x280   : >> { %v2812_v54 = vpop.f32.mrf.mxu2 }
 0x281   : >> { %v2892_v50 = vadd.f32 %v2812_v54, %v2587_v49  ;;  %v3463_v49 = vrot.slane %v3461_v7, 2 }
 0x282   : >> { %v2589_v56 = vpop.f32.mrf.mxu1  ;;  %v12568_v6 = vpop.f32.mrf.mxu3 }
 0x283   : >> { %v3279_v60 = vadd.f32 %v12521_v59, %v2892_v50  ;;  %v2590_v5 = vadd.f32 %v2589_v56, %v12462_v19  ;;  %v3458_v59 = vshrl.u32 %v12537_v21, 16  ;;  %v2710_v19 = vrot.slane %v12302_v41, 1  ;;  %v12585_v50 = vld [vmem:[%s12157_s15 + $0x88] sm:$0xff] }
 0x285   : >> { %v3597_v47 = vpop.f32.mrf.mxu0  ;;  %2628 = vmatmul.bf16.gmra.mxu1 %v10603_v27  ;;  %2854 = vmatmul.bf16.gmra.mxu2 %v2709_v13  ;;  %v12571_v48 = vadd.f32 %v3594_v52, %v3279_v60  ;;  %v3460_v62 = vrot.slane %v3458_v59, 1  ;;  %v2711_v30 = vsel %vm2682_vm9, %v2708_v1, %v2710_v19  ;;  %v3467_v59 = vshrl.u32 %v12560_v53, 16 }
 0x287   : >> { %3251 = vmatmul.bf16.gmra.mxu3 %v3100_v38  ;;  %v3464_v56 = vor.u32 %v3463_v49, %v3460_v62  ;;  %v12608_v49 = vld [vmem:[%s12157_s15 + $0x90] sm:$0xff] }
 0x288   : >> { %3636 = vmatmul.bf16.gmra.mxu0 %v3456_v33  ;;  %v2815_v32 = vpop.f32.mrf.mxu2 }
 0x289   : >> { %v2893_v28 = vadd.f32 %v2815_v32, %v2590_v5 }
 0x28a   : >> { %v2591_v9 = vpop.f32.mrf.mxu1  ;;  %v12579_v46 = vpop.f32.mrf.mxu3 }
 0x28b   : >> { %v3280_v52 = vadd.f32 %v12531_v58, %v2893_v28  ;;  %v2592_v21 = vadd.f32 %v2591_v9, %v12473_v10  ;;  %v3101_v58 = vrot.slane %v12585_v50, 1  ;;  %v3469_v9 = vrot.slane %v3467_v59, 1 }
 0x28d   : >> { %v3599_v61 = vpop.f32.mrf.mxu0  ;;  %v12581_v54 = vadd.f32 %v3597_v47, %v3280_v52  ;;  %v3465_v47 = vsel %vm3331_vm10, %v3455_v18, %v3464_v56  ;;  %v3102_v10 = vsel %vm2682_vm9, %v3099_v0, %v3101_v58 }
 0x290   : >> { %v2817_v13 = vpop.f32.mrf.mxu2 }
 0x291   : >> { %v2894_v60 = vadd.f32 %v2817_v13, %v2592_v21 }
 0x292   : >> { %v2594_v33 = vpop.f32.mrf.mxu1  ;;  %v12592_v45 = vpop.f32.mrf.mxu3 }
 0x293   : >> { %v3281_v27 = vadd.f32 %v12544_v34, %v2894_v60  ;;  %v2595_v1 = vadd.f32 %v2594_v33, %v12370_v44  ;;  %v3470_v34 = vshll.u32 %v12560_v53, 16  ;;  %v10604_v44 = vld [vmem:[%s12157_s15 + $0x78] sm:$0xff] }
 0x294   : >> { %v2712_v62 = vrot.slane %v10604_v44, 1 }
 0x295   : >> { %v3602_v38 = vpop.f32.mrf.mxu0  ;;  %2633 = vmatmul.bf16.gmra.mxu1 %v12260_v55  ;;  %2859 = vmatmul.bf16.gmra.mxu2 %v2711_v30  ;;  %v12595_v5 = vadd.f32 %v3599_v61, %v3281_v27  ;;  %v3472_v52 = vrot.slane %v3470_v34, 2  ;;  %v3103_v30 = vrot.slane %v12608_v49, 1 }
 0x296   : >> { %v2713_v33 = vsel %vm2682_vm9, %v2710_v19, %v2712_v62 }
 0x297   : >> { %3256 = vmatmul.bf16.gmra.mxu3 %v3102_v10  ;;  %v3473_v21 = vor.u32 %v3472_v52, %v3469_v9  ;;  %v10335_v10 = vld [vmem:[%s12147_s8 + $0x180] sm:$0xff]  ;;  %v3104_v19 = vsel %vm2682_vm9, %v3101_v58, %v3103_v30 }
 0x298   : >> { %3641 = vmatmul.bf16.gmra.mxu0 %v3465_v47  ;;  %v2820_v7 = vpop.f32.mrf.mxu2  ;;  %4224 = vmatpush.bf16.msra.mxu2 %v10335_v10 }
 0x299   : >> { %v2895_v18 = vadd.f32 %v2820_v7, %v2595_v1  ;;  %v10343_v1 = vld [vmem:[%s12147_s8 + $0x1c0] sm:$0xff]  ;;  %v3479_v7 = vshll.u32 %v12585_v50, 16 }
 0x29a   : >> { %v2596_v32 = vpop.f32.mrf.mxu1  ;;  %v12602_v61 = vpop.f32.mrf.mxu3  ;;  %4619 = vmatpush.bf16.msra.mxu3 %v10343_v1 }
 0x29b   : >> { %v3282_v55 = vadd.f32 %v12554_v12, %v2895_v18  ;;  %v2597_v53 = vadd.f32 %v2596_v32, %v12381_v43  ;;  %v10310_v43 = vld [vmem:[%s12147_s8 + $0x140] sm:$0xff]  ;;  %v2957_v18 = vld [vmem:[%s12157_s15 + $0x98] sm:$0x1] }
 0x29c   : >> { %3837 = vmatpush.bf16.msra.mxu1 %v10310_v43 }
 0x29d   : >> { %v3604_v28 = vpop.f32.mrf.mxu0  ;;  %v12604_v0 = vadd.f32 %v3602_v38, %v3282_v55  ;;  %v3474_v38 = vsel %vm3331_vm10, %v3464_v56, %v3473_v21  ;;  %v3476_v56 = vshrl.u32 %v12585_v50, 16 }
 0x29f   : >> { %14693 = vst [vmem:[#allocation49_spill] sm:$0xff] %v12604_v0  ;;  %v3478_v52 = vrot.slane %v3476_v56, 1 }
 0x2a0   : >> { %v2822_v13 = vpop.f32.mrf.mxu2 }
 0x2a1   : >> { %v2896_v60 = vadd.f32 %v2822_v13, %v2597_v53  ;;  %v3481_v53 = vrot.slane %v3479_v7, 2  ;;  %v10351_v13 = vld [vmem:[%s12147_s8 + $0x200] sm:$0xff]  ;;  %v3965_v7 = vld [vmem:[%s12157_s15 + $0x10] sm:$0xc] }
 0x2a2   : >> { %v2599_v12 = vpop.f32.mrf.mxu1  ;;  %v12617_v59 = vpop.f32.mrf.mxu3  ;;  %4881 = vmatpush.bf16.msra.mxu0 %v10351_v13 }
 0x2a3   : >> { %v3283_v27 = vadd.f32 %v12568_v6, %v2896_v60  ;;  %v2600_v6 = vadd.f32 %v2599_v12, %v12391_v31  ;;  %v12635_v60 = vld [vmem:[%s12157_s15 + $0x80] sm:$0xff] }
 0x2a4   : >> { %v2714_v12 = vrot.slane %v12635_v60, 1 }
 0x2a5   : >> { %v3607_v47 = vpop.f32.mrf.mxu0  ;;  %2638 = vmatmul.bf16.gmra.mxu1 %v12302_v41  ;;  %2864 = vmatmul.bf16.gmra.mxu2 %v2713_v33  ;;  %v12621_v34 = vadd.f32 %v3604_v28, %v3283_v27  ;;  %v3050_v28 = vunpack.c.l.b16 %v2957_v18  ;;  %v12644_v18 = vld [vmem:[%s12157_s15 + $0x14] sm:$0xf] }
 0x2a6   : >> { %v2715_v43 = vsel %vm2682_vm9, %v2712_v62, %v2714_v12 }
 0x2a7   : >> { %14694 = vst [vmem:[#allocation50_spill] sm:$0xff] %v12621_v34  ;;  %3261 = vmatmul.bf16.gmra.mxu3 %v3104_v19  ;;  %v3069_v33 = vpack.c.b16 %v3050_v28, %v3050_v28  ;;  %v12653_v28 = vld [vmem:[%s12157_s15 + $0x18] sm:$0xff] }
 0x2a8   : >> { %3646 = vmatmul.bf16.gmra.mxu0 %v3474_v38  ;;  %v2825_v41 = vpop.f32.mrf.mxu2  ;;  %v3482_v38 = vor.u32 %v3481_v53, %v3478_v52 }
 0x2a9   : >> { %v2897_v32 = vadd.f32 %v2825_v41, %v2600_v6  ;;  %v3105_v19 = vrot.slane %v3069_v33, 1  ;;  %v4385_v33 = vshrl.u32 %v12653_v28, 16 }
 0x2aa   : >> { %v2601_v55 = vpop.f32.mrf.mxu1  ;;  %v12630_v31 = vpop.f32.mrf.mxu3 }
 0x2ab   : >> { %v3284_v9 = vadd.f32 %v12579_v46, %v2897_v32  ;;  %v2602_v27 = vadd.f32 %v2601_v55, %v12403_v4  ;;  %v4058_v32 = vunpack.c.l.b16 %v3965_v7  ;;  %v14621_v4 = vunpack.c.l.b16 %v12644_v18 }
 0x2ac   : >> { %v3106_v62 = vsel %vm2682_vm9, %v3103_v30, %v3105_v19  ;;  %v10606_v19 = vld [vmem:[%s12157_s15 + $0x88] sm:$0xff] }
 0x2ad   : >> { %v3609_v58 = vpop.f32.mrf.mxu0  ;;  %v12632_v50 = vadd.f32 %v3607_v47, %v3284_v9  ;;  %v3483_v47 = vsel %vm3331_vm10, %v3473_v21, %v3482_v38  ;;  %v3485_v9 = vshrl.u32 %v12608_v49, 16 }
 0x2af   : >> { %14695 = vst [vmem:[#allocation51_spill] sm:$0xff] %v12632_v50 }
 0x2b0   : >> { %v2827_v46 = vpop.f32.mrf.mxu2 }
 0x2b1   : >> { %v2898_v10 = vadd.f32 %v2827_v46, %v2602_v27  ;;  %v4388_v27 = vshll.u32 %v12653_v28, 16 }
 0x2b2   : >> { %v2604_v1 = vpop.f32.mrf.mxu1  ;;  %v12646_v41 = vpop.f32.mrf.mxu3 }
 0x2b3   : >> { %v3285_v6 = vadd.f32 %v12592_v45, %v2898_v10  ;;  %v12657_v45 = vpack.c.b16 %v14621_v4, %v4058_v32  ;;  %v2605_v21 = vadd.f32 %v2604_v1, %v12414_v29  ;;  %v3487_v10 = vrot.slane %v3485_v9, 1 }
 0x2b5   : >> { %v3612_v56 = vpop.f32.mrf.mxu0  ;;  %2643 = vmatmul.bf16.gmra.mxu1 %v10604_v44  ;;  %2869 = vmatmul.bf16.gmra.mxu2 %v2715_v43  ;;  %v12649_v55 = vadd.f32 %v3609_v58, %v3285_v6  ;;  %v3488_v44 = vshll.u32 %v12608_v49, 16  ;;  %v4377_v30 = vshrl.u32 %v12657_v45, 16  ;;  %v4380_v13 = vshll.u32 %v12657_v45, 16  ;;  %v3308_v49 = vld [vmem:[%s12157_s15 + $0x98] sm:$0x3] }
 0x2b6   : >> { %v2716_v6 = vrot.slane %v10606_v19, 1 }
 0x2b7   : >> { %14696 = vst [vmem:[#allocation52_spill] sm:$0xff] %v12649_v55  ;;  %3266 = vmatmul.bf16.gmra.mxu3 %v3106_v62  ;;  %v3490_v1 = vrot.slane %v3488_v44, 2  ;;  %v4379_v7 = vrot.slane %v4377_v30, 2  ;;  %v4382_v32 = vrot.slane %v4380_v13, 3  ;;  %v4387_v62 = vrot.slane %v4385_v33, 2 }
 0x2b8   : >> { %3651 = vmatmul.bf16.gmra.mxu0 %v3483_v47  ;;  %v2830_v52 = vpop.f32.mrf.mxu2  ;;  %v3329_v55 = vunpack.c.l.b16 %v3308_v49  ;;  %v2717_v44 = vsel %vm2682_vm9, %v2714_v12, %v2716_v6  ;;  %v12686_v12 = vld [vmem:[%s12157_s15 + $0x20] sm:$0xff] }
 0x2b9   : >> { %v2899_v58 = vadd.f32 %v2830_v52, %v2605_v21  ;;  %v4390_v21 = vrot.slane %v4388_v27, 3  ;;  %v3491_v4 = vor.u32 %v3490_v1, %v3487_v10 }
 0x2ba   : >> { %v2606_v53 = vpop.f32.mrf.mxu1  ;;  %v12667_v43 = vpop.f32.mrf.mxu3  ;;  %v12677_v13 = vpack.c.b16 %v3329_v55, %v3329_v55 }
 0x2bb   : >> { %v3286_v29 = vadd.f32 %v12602_v61, %v2899_v58  ;;  %v2607_v52 = vadd.f32 %v2606_v53, %v12428_v23  ;;  %v4383_v58 = vor.u32 %v4382_v32, %v4379_v7  ;;  %v4391_v34 = vor.u32 %v4390_v21, %v4387_v62 }
 0x2bc   : >> { %v3492_v30 = vsel %vm3331_vm10, %v3482_v38, %v3491_v4  ;;  %v3494_v53 = vshrl.u32 %v12677_v13, 16  ;;  %v3497_v38 = vshll.u32 %v12677_v13, 16  ;;  %v2718_v32 = vrot.slane %v12284_v15, 1 }
 0x2bd   : >> { %v3614_v46 = vpop.f32.mrf.mxu0  ;;  %v12671_v47 = vadd.f32 %v3612_v56, %v3286_v29 }
 0x2be   : >> { %v3496_v1 = vrot.slane %v3494_v53, 1  ;;  %v3499_v49 = vrot.slane %v3497_v38, 2  ;;  %v4747_v38 = vld [vmem:[%s12157_s15 + $0x10] sm:$0x8] }
 0x2c0   : >> { %v2832_v50 = vpop.f32.mrf.mxu2 }
 0x2c1   : >> { %v2900_v61 = vadd.f32 %v2832_v50, %v2607_v52  ;;  %v4392_v50 = vsel %vm4375_vm11, %v4383_v58, %v4391_v34 }
 0x2c2   : >> { %v2609_v9 = vpop.f32.mrf.mxu1  ;;  %v12679_v33 = vpop.f32.mrf.mxu3 }
 0x2c3   : >> { %v3287_v0 = vadd.f32 %v12617_v59, %v2900_v61  ;;  %v2610_v59 = vadd.f32 %v2609_v9, %v12439_v51  ;;  %v3500_v61 = vor.u32 %v3499_v49, %v3496_v1 }
 0x2c5   : >> { %v3617_v56 = vpop.f32.mrf.mxu0  ;;  %2648 = vmatmul.bf16.gmra.mxu1 %v12635_v60  ;;  %2874 = vmatmul.bf16.gmra.mxu2 %v2717_v44  ;;  %v12682_v23 = vadd.f32 %v3614_v46, %v3287_v0  ;;  %v4394_v60 = vshrl.u32 %v12686_v12, 16  ;;  %v4397_v0 = vshll.u32 %v12686_v12, 16 }
 0x2c7   : >> { %4620 = vmatmul.bf16.vlgmr.msra.gmra.mxu3 %v4392_v50  ;;  %v4396_v62 = vrot.slane %v4394_v60, 2  ;;  %v4399_v21 = vrot.slane %v4397_v0, 3 }
 0x2c8   : >> { %3656 = vmatmul.bf16.gmra.mxu0 %v3492_v30  ;;  %v2835_v55 = vpop.f32.mrf.mxu2  ;;  %v3703_v30 = vld [vmem:[%s12157_s15 + $0x8] sm:$0xc] }
 0x2c9   : >> { %v2901_v27 = vadd.f32 %v2835_v55, %v2610_v59  ;;  %v4400_v50 = vor.u32 %v4399_v21, %v4396_v62 }
 0x2ca   : >> { %v2611_v29 = vpop.f32.mrf.mxu1  ;;  %v12694_v7 = vpop.f32.mrf.mxu3 }
 0x2cb   : >> { %v3288_v46 = vadd.f32 %v12630_v31, %v2901_v27  ;;  %v2612_v52 = vadd.f32 %v2611_v29, %v12451_v11  ;;  %v2719_v31 = vsel %vm2682_vm9, %v2716_v6, %v2718_v32  ;;  %v3724_v11 = vunpack.c.l.b16 %v3703_v30  ;;  %v12711_v6 = vld [vmem:[%s12157_s15 + $0x28] sm:$0xff] }
 0x2cc   : >> { %v4401_v27 = vsel %vm4375_vm11, %v4391_v34, %v4400_v50  ;;  %v4403_v1 = vshrl.u32 %v12711_v6, 16  ;;  %v14698_v32 = vunpack.c.l.b16 %v12644_v18  ;;  %v4772_v18 = vrot.slane %v12653_v28, 3 }
 0x2cd   : >> { %v3619_v10 = vpop.f32.mrf.mxu0  ;;  %v12696_v51 = vadd.f32 %v3617_v56, %v3288_v46  ;;  %v3501_v56 = vsel %vm3331_vm10, %v3491_v4, %v3500_v61  ;;  %v14697_v4 = vunpack.c.l.b16 %v12315_v25  ;;  %v4114_v25 = vrot.slane %v12657_v45, 2 }
 0x2cf   : >> { %v3725_v46 = vpack.c.b16 %v14697_v4, %v3724_v11 }
 0x2d0   : >> { %v2837_v9 = vpop.f32.mrf.mxu2 }
 0x2d1   : >> { %v2902_v44 = vadd.f32 %v2837_v9, %v2612_v52  ;;  %v10607_v52 = vld [vmem:[%s12157_s15 + $0x10] sm:$0xff] }
 0x2d2   : >> { %v2614_v58 = vpop.f32.mrf.mxu1  ;;  %v12705_v15 = vpop.f32.mrf.mxu3  ;;  %v3728_v61 = vrot.slane %v10607_v52, 2 }
 0x2d3   : >> { %v3289_v59 = vadd.f32 %v12646_v41, %v2902_v44  ;;  %v2615_v29 = vadd.f32 %v2614_v58, %v12459_v63  ;;  %v4768_v41 = vunpack.c.l.b16 %v4747_v38  ;;  %v3727_v63 = vrot.slane %v3725_v46, 2 }
 0x2d4   : >> { %v4115_v44 = vrot.slane %v12653_v28, 2  ;;  %v4405_v58 = vrot.slane %v4403_v1, 2 }
 0x2d5   : >> { %v3622_v53 = vpop.f32.mrf.mxu0  ;;  %2653 = vmatmul.bf16.gmra.mxu1 %v10606_v19  ;;  %2879 = vmatmul.bf16.gmra.mxu2 %v2719_v31  ;;  %v12707_v55 = vadd.f32 %v3619_v10, %v3289_v59  ;;  %v4406_v10 = vshll.u32 %v12711_v6, 16  ;;  %v4769_v62 = vpack.c.b16 %v14698_v32, %v4768_v41 }
 0x2d6   : >> { %v4116_v11 = vsel %vm3726_vm12, %v4114_v25, %v4115_v44 }
 0x2d7   : >> { %4625 = vmatmul.bf16.gmra.mxu3 %v4401_v27  ;;  %v4408_v31 = vrot.slane %v4406_v10, 3 }
 0x2d8   : >> { %3661 = vmatmul.bf16.gmra.mxu0 %v3501_v56  ;;  %v2840_v60 = vpop.f32.mrf.mxu2 }
 0x2d9   : >> { %v2903_v0 = vadd.f32 %v2840_v60, %v2615_v29  ;;  %v4409_v45 = vor.u32 %v4408_v31, %v4405_v58 }
 0x2da   : >> { %v2616_v19 = vpop.f32.mrf.mxu1  ;;  %v12721_v21 = vpop.f32.mrf.mxu3 }
 0x2db   : >> { %v3290_v49 = vadd.f32 %v12667_v43, %v2903_v0  ;;  %v2617_v30 = vadd.f32 %v2616_v19, %v12471_v17  ;;  %v4771_v43 = vrot.slane %v4769_v62, 3  ;;  %v4410_v60 = vsel %vm4375_vm11, %v4400_v50, %v4409_v45  ;;  %v12740_v0 = vld [vmem:[%s12157_s15 + $0x30] sm:$0xff] }
 0x2dc   : >> { %v4412_v1 = vshrl.u32 %v12740_v0, 16  ;;  %v4415_v10 = vshll.u32 %v12740_v0, 16 }
 0x2dd   : >> { %v3624_v34 = vpop.f32.mrf.mxu0  ;;  %v12724_v9 = vadd.f32 %v3622_v53, %v3290_v49  ;;  %v3729_v53 = vsel %vm3726_vm12, %v3727_v63, %v3728_v61  ;;  %v4773_v41 = vsel %vm4770_vm13, %v4771_v43, %v4772_v18  ;;  %v4117_v63 = vrot.slane %v12686_v12, 2 }
 0x2de   : >> { %v4414_v52 = vrot.slane %v4412_v1, 2  ;;  %v4417_v25 = vrot.slane %v4415_v10, 3 }
 0x2e0   : >> { %v2842_v59 = vpop.f32.mrf.mxu2 }
 0x2e1   : >> { %v2904_v56 = vadd.f32 %v2842_v59, %v2617_v30 }
 0x2e2   : >> { %v2619_v38 = vpop.f32.mrf.mxu1  ;;  %v12734_v17 = vpop.f32.mrf.mxu3 }
 0x2e3   : >> { %v3291_v27 = vadd.f32 %v12679_v33, %v2904_v56  ;;  %v2620_v4 = vadd.f32 %v2619_v38, %v12379_v35  ;;  %v10608_v35 = vld [vmem:[%s12157_s15 + $0x18] sm:$0xff]  ;;  %v4118_v56 = vsel %vm3726_vm12, %v4115_v44, %v4117_v63  ;;  %v4418_v38 = vor.u32 %v4417_v25, %v4414_v52 }
 0x2e4   : >> { %v3730_v62 = vrot.slane %v10608_v35, 2  ;;  %v4776_v52 = vrot.slane %v12711_v6, 3 }
 0x2e5   : >> { %v3627_v29 = vpop.f32.mrf.mxu0  ;;  %3838 = vmatmul.bf16.vlgmr.msra.gmra.mxu1 %v3729_v53  ;;  %4225 = vmatmul.bf16.vlgmr.msra.gmra.mxu2 %v4116_v11  ;;  %v12736_v28 = vadd.f32 %v3624_v34, %v3291_v27 }
 0x2e6   : >> { %v3731_v59 = vsel %vm3726_vm12, %v3728_v61, %v3730_v62 }
 0x2e7   : >> { %4630 = vmatmul.bf16.gmra.mxu3 %v4410_v60 }
 0x2e8   : >> { %4882 = vmatmul.bf16.vlgmr.msra.gmra.mxu0 %v4773_v41  ;;  %v2845_v46 = vpop.f32.mrf.mxu2  ;;  %v12770_v41 = vld [vmem:[%s12157_s15 + $0x38] sm:$0xff] }
 0x2e9   : >> { %v2905_v33 = vadd.f32 %v2845_v46, %v2620_v4  ;;  %v4424_v4 = vshll.u32 %v12770_v41, 16 }
 0x2ea   : >> { %v2621_v19 = vpop.f32.mrf.mxu1  ;;  %v12746_v32 = vpop.f32.mrf.mxu3 }
 0x2eb   : >> { %v3292_v49 = vadd.f32 %v12694_v7, %v2905_v33  ;;  %v2622_v58 = vadd.f32 %v2621_v19, %v12389_v37  ;;  %v4774_v7 = vrot.slane %v12686_v12, 3  ;;  %v4419_v12 = vsel %vm4375_vm11, %v4409_v45, %v4418_v38  ;;  %v10609_v45 = vld [vmem:[%s12157_s15 + $0x20] sm:$0xff] }
 0x2ec   : >> { %v3732_v10 = vrot.slane %v10609_v45, 2 }
 0x2ed   : >> { %v3629_v34 = vpop.f32.mrf.mxu0  ;;  %v12754_v50 = vadd.f32 %v3627_v29, %v3292_v49  ;;  %v4775_v27 = vsel %vm4770_vm13, %v4772_v18, %v4774_v7  ;;  %v4421_v18 = vshrl.u32 %v12770_v41, 16  ;;  %v4119_v49 = vrot.slane %v12711_v6, 2 }
 0x2f0   : >> { %v2847_v31 = vpop.f32.mrf.mxu2 }
 0x2f1   : >> { %v2906_v30 = vadd.f32 %v2847_v31, %v2622_v58 }
 0x2f2   : >> { %v2624_v43 = vpop.f32.mrf.mxu1  ;;  %v12764_v29 = vpop.f32.mrf.mxu3 }
 0x2f3   : >> { %v3293_v53 = vadd.f32 %v12705_v15, %v2906_v30  ;;  %v2625_v61 = vadd.f32 %v2624_v43, %v12401_v3  ;;  %v4423_v3 = vrot.slane %v4421_v18, 2  ;;  %v4120_v30 = vsel %vm3726_vm12, %v4117_v63, %v4119_v49 }
 0x2f5   : >> { %v3632_v11 = vpop.f32.mrf.mxu0  ;;  %3843 = vmatmul.bf16.gmra.mxu1 %v3731_v59  ;;  %4230 = vmatmul.bf16.gmra.mxu2 %v4118_v56  ;;  %v12766_v37 = vadd.f32 %v3629_v34, %v3293_v53  ;;  %v4426_v34 = vrot.slane %v4424_v4, 3  ;;  %v4777_v53 = vsel %vm4770_vm13, %v4774_v7, %v4776_v52 }
 0x2f7   : >> { %4635 = vmatmul.bf16.gmra.mxu3 %v4419_v12  ;;  %v4427_v43 = vor.u32 %v4426_v34, %v4423_v3  ;;  %v4778_v3 = vrot.slane %v12740_v0, 3 }
 0x2f8   : >> { %4887 = vmatmul.bf16.gmra.mxu0 %v4775_v27  ;;  %v2850_v44 = vpop.f32.mrf.mxu2  ;;  %v12794_v27 = vld [vmem:[%s12157_s15 + $0x40] sm:$0xff] }
 0x2f9   : >> { %v2907_v60 = vadd.f32 %v2850_v44, %v2625_v61  ;;  %v4428_v6 = vsel %vm4375_vm11, %v4418_v38, %v4427_v43  ;;  %v4430_v7 = vshrl.u32 %v12794_v27, 16  ;;  %v4433_v61 = vshll.u32 %v12794_v27, 16  ;;  %v10610_v38 = vld [vmem:[%s12157_s15 + $0x28] sm:$0xff] }
 0x2fa   : >> { %v2626_v15 = vpop.f32.mrf.mxu1  ;;  %v12776_v19 = vpop.f32.mrf.mxu3  ;;  %v3734_v4 = vrot.slane %v10610_v38, 2 }
 0x2fb   : >> { %v3294_v46 = vadd.f32 %v12721_v21, %v2907_v60  ;;  %v2627_v35 = vadd.f32 %v2626_v15, %v12411_v24  ;;  %v3733_v21 = vsel %vm3726_vm12, %v3730_v62, %v3732_v10 }
 0x2fd   : >> { %v3634_v33 = vpop.f32.mrf.mxu0  ;;  %v12778_v1 = vadd.f32 %v3632_v11, %v3294_v46  ;;  %v4121_v46 = vrot.slane %v12740_v0, 2 }
 0x300   : >> { %v2852_v25 = vpop.f32.mrf.mxu2 }
 0x301   : >> { %v2908_v58 = vadd.f32 %v2852_v25, %v2627_v35 }
 0x302   : >> { %v2629_v31 = vpop.f32.mrf.mxu1  ;;  %v12788_v11 = vpop.f32.mrf.mxu3 }
 0x303   : >> { %v3295_v59 = vadd.f32 %v12734_v17, %v2908_v58  ;;  %v2630_v62 = vadd.f32 %v2629_v31, %v12426_v16  ;;  %v4432_v16 = vrot.slane %v4430_v7, 2  ;;  %v4122_v58 = vsel %vm3726_vm12, %v4119_v49, %v4121_v46 }
 0x305   : >> { %v3637_v56 = vpop.f32.mrf.mxu0  ;;  %3848 = vmatmul.bf16.gmra.mxu1 %v3733_v21  ;;  %4235 = vmatmul.bf16.gmra.mxu2 %v4120_v30  ;;  %v12790_v24 = vadd.f32 %v3634_v33, %v3295_v59  ;;  %v4435_v33 = vrot.slane %v4433_v61, 3  ;;  %v4779_v59 = vsel %vm4770_vm13, %v4776_v52, %v4778_v3 }
 0x307   : >> { %4640 = vmatmul.bf16.gmra.mxu3 %v4428_v6  ;;  %v4436_v31 = vor.u32 %v4435_v33, %v4432_v16  ;;  %v4780_v16 = vrot.slane %v12770_v41, 3 }
 0x308   : >> { %4892 = vmatmul.bf16.gmra.mxu0 %v4777_v53  ;;  %v2855_v63 = vpop.f32.mrf.mxu2  ;;  %v12818_v53 = vld [vmem:[%s12157_s15 + $0x48] sm:$0xff] }
 0x309   : >> { %v2909_v12 = vadd.f32 %v2855_v63, %v2630_v62  ;;  %v4437_v0 = vsel %vm4375_vm11, %v4427_v43, %v4436_v31  ;;  %v4439_v52 = vshrl.u32 %v12818_v53, 16  ;;  %v4442_v62 = vshll.u32 %v12818_v53, 16  ;;  %v10611_v43 = vld [vmem:[%s12157_s15 + $0x30] sm:$0xff] }
 0x30a   : >> { %v2631_v17 = vpop.f32.mrf.mxu1  ;;  %v12800_v15 = vpop.f32.mrf.mxu3  ;;  %v3736_v61 = vrot.slane %v10611_v43, 2  ;;  %v14699_v43 = vld [vmem:[#allocation48_spill] sm:$0xff] }
 0x30b   : >> { %v3296_v44 = vadd.f32 %v12746_v32, %v2909_v12  ;;  %v2632_v45 = vadd.f32 %v2631_v17, %v12437_v39  ;;  %v3735_v32 = vsel %vm3726_vm12, %v3732_v10, %v3734_v4 }
 0x30d   : >> { %v3639_v60 = vpop.f32.mrf.mxu0  ;;  %v12802_v18 = vadd.f32 %v3637_v56, %v3296_v44  ;;  %v4123_v44 = vrot.slane %v12770_v41, 2 }
 0x310   : >> { %v2857_v34 = vpop.f32.mrf.mxu2 }
 0x311   : >> { %v2910_v35 = vadd.f32 %v2857_v34, %v2632_v45 }
 0x312   : >> { %v2634_v25 = vpop.f32.mrf.mxu1  ;;  %v12812_v56 = vpop.f32.mrf.mxu3 }
 0x313   : >> { %v3297_v21 = vadd.f32 %v12764_v29, %v2910_v35  ;;  %v2635_v10 = vadd.f32 %v2634_v25, %v12449_v8  ;;  %v4441_v8 = vrot.slane %v4439_v52, 2  ;;  %v4124_v35 = vsel %vm3726_vm12, %v4121_v46, %v4123_v44 }
 0x315   : >> { %v3642_v30 = vpop.f32.mrf.mxu0  ;;  %3853 = vmatmul.bf16.gmra.mxu1 %v3735_v32  ;;  %4240 = vmatmul.bf16.gmra.mxu2 %v4122_v58  ;;  %v12814_v39 = vadd.f32 %v3639_v60, %v3297_v21  ;;  %v4444_v60 = vrot.slane %v4442_v62, 3  ;;  %v4781_v21 = vsel %vm4770_vm13, %v4778_v3, %v4780_v16 }
 0x317   : >> { %4645 = vmatmul.bf16.gmra.mxu3 %v4437_v0  ;;  %v4445_v25 = vor.u32 %v4444_v60, %v4441_v8  ;;  %v4782_v60 = vrot.slane %v12794_v27, 3 }
 0x318   : >> { %4897 = vmatmul.bf16.gmra.mxu0 %v4779_v59  ;;  %v2860_v49 = vpop.f32.mrf.mxu2  ;;  %v12842_v59 = vld [vmem:[%s12157_s15 + $0x50] sm:$0xff] }
 0x319   : >> { %v2911_v6 = vadd.f32 %v2860_v49, %v2635_v10  ;;  %v4446_v41 = vsel %vm4375_vm11, %v4436_v31, %v4445_v25  ;;  %v4448_v3 = vshrl.u32 %v12842_v59, 16  ;;  %v4451_v10 = vshll.u32 %v12842_v59, 16  ;;  %v10612_v31 = vld [vmem:[%s12157_s15 + $0x38] sm:$0xff] }
 0x31a   : >> { %v2636_v29 = vpop.f32.mrf.mxu1  ;;  %v12824_v17 = vpop.f32.mrf.mxu3  ;;  %v3738_v62 = vrot.slane %v10612_v31, 2 }
 0x31b   : >> { %v3298_v63 = vadd.f32 %v12776_v19, %v2911_v6  ;;  %v2637_v38 = vadd.f32 %v2636_v29, %v12457_v57  ;;  %v3737_v19 = vsel %vm3726_vm12, %v3734_v4, %v3736_v61 }
 0x31d   : >> { %v3644_v12 = vpop.f32.mrf.mxu0  ;;  %v12826_v7 = vadd.f32 %v3642_v30, %v3298_v63  ;;  %v4125_v63 = vrot.slane %v12794_v27, 2 }
 0x320   : >> { %v2862_v33 = vpop.f32.mrf.mxu2 }
 0x321   : >> { %v2912_v45 = vadd.f32 %v2862_v33, %v2637_v38 }
 0x322   : >> { %v2639_v34 = vpop.f32.mrf.mxu1  ;;  %v12836_v30 = vpop.f32.mrf.mxu3 }
 0x323   : >> { %v3299_v32 = vadd.f32 %v12788_v11, %v2912_v45  ;;  %v2640_v4 = vadd.f32 %v2639_v34, %v12469_v20  ;;  %v4450_v20 = vrot.slane %v4448_v3, 2  ;;  %v4126_v34 = vsel %vm3726_vm12, %v4123_v44, %v4125_v63 }
 0x325   : >> { %v3647_v58 = vpop.f32.mrf.mxu0  ;;  %3858 = vmatmul.bf16.gmra.mxu1 %v3737_v19  ;;  %4245 = vmatmul.bf16.gmra.mxu2 %v4124_v35  ;;  %v12838_v57 = vadd.f32 %v3644_v12, %v3299_v32  ;;  %v4453_v12 = vrot.slane %v4451_v10, 3 }
 0x327   : >> { %4650 = vmatmul.bf16.gmra.mxu3 %v4446_v41  ;;  %v4454_v19 = vor.u32 %v4453_v12, %v4450_v20  ;;  %v4127_v20 = vrot.slane %v12818_v53, 2 }
 0x328   : >> { %4902 = vmatmul.bf16.gmra.mxu0 %v4781_v21  ;;  %v2865_v46 = vpop.f32.mrf.mxu2 }
 0x329   : >> { %v2913_v0 = vadd.f32 %v2865_v46, %v2640_v4  ;;  %v4455_v41 = vsel %vm4375_vm11, %v4445_v25, %v4454_v19  ;;  %v12866_v4 = vld [vmem:[%s12157_s15 + $0x58] sm:$0xff]  ;;  %v10613_v25 = vld [vmem:[%s12157_s15 + $0x40] sm:$0xff] }
 0x32a   : >> { %v2641_v11 = vpop.f32.mrf.mxu1  ;;  %v12848_v29 = vpop.f32.mrf.mxu3  ;;  %v3740_v31 = vrot.slane %v10613_v25, 2 }
 0x32b   : >> { %v3300_v49 = vadd.f32 %v12800_v15, %v2913_v0  ;;  %v2642_v8 = vadd.f32 %v2641_v11, %v14699_v43  ;;  %v3739_v15 = vsel %vm3726_vm12, %v3736_v61, %v3738_v62  ;;  %v14700_v61 = vld [vmem:[#allocation42_spill] sm:$0xff]  ;;  %v4460_v11 = vshll.u32 %v12866_v4, 16 }
 0x32d   : >> { %v3649_v6 = vpop.f32.mrf.mxu0  ;;  %v12850_v52 = vadd.f32 %v3647_v58, %v3300_v49  ;;  %v4783_v58 = vsel %vm4770_vm13, %v4780_v16, %v4782_v60  ;;  %v4457_v16 = vshrl.u32 %v12866_v4, 16  ;;  %v4462_v43 = vrot.slane %v4460_v11, 3 }
 0x32f   : >> { %v4459_v12 = vrot.slane %v4457_v16, 2 }
 0x330   : >> { %v2867_v38 = vpop.f32.mrf.mxu2 }
 0x331   : >> { %v2914_v33 = vadd.f32 %v2867_v38, %v2642_v8  ;;  %v14701_v8 = vld [vmem:[#allocation43_spill] sm:$0xff] }
 0x332   : >> { %v2644_v45 = vpop.f32.mrf.mxu1  ;;  %v12860_v21 = vpop.f32.mrf.mxu3 }
 0x333   : >> { %v3301_v35 = vadd.f32 %v12812_v56, %v2914_v33  ;;  %v2645_v44 = vadd.f32 %v2644_v45, %v14700_v61  ;;  %v4784_v33 = vrot.slane %v12818_v53, 3 }
 0x335   : >> { %v3652_v32 = vpop.f32.mrf.mxu0  ;;  %3863 = vmatmul.bf16.gmra.mxu1 %v3739_v15  ;;  %4250 = vmatmul.bf16.gmra.mxu2 %v4126_v34  ;;  %v12862_v27 = vadd.f32 %v3649_v6, %v3301_v35  ;;  %v4128_v35 = vsel %vm3726_vm12, %v4125_v63, %v4127_v20  ;;  %v4785_v61 = vsel %vm4770_vm13, %v4782_v60, %v4784_v33 }
 0x337   : >> { %4655 = vmatmul.bf16.gmra.mxu3 %v4455_v41 }
 0x338   : >> { %4907 = vmatmul.bf16.gmra.mxu0 %v4783_v58  ;;  %v2870_v46 = vpop.f32.mrf.mxu2 }
 0x339   : >> { %v2915_v0 = vadd.f32 %v2870_v46, %v2645_v44 }
 0x33a   : >> { %v2646_v56 = vpop.f32.mrf.mxu1  ;;  %v12872_v49 = vpop.f32.mrf.mxu3 }
 0x33b   : >> { %v3302_v3 = vadd.f32 %v12824_v17, %v2915_v0  ;;  %v2647_v38 = vadd.f32 %v2646_v56, %v14701_v8  ;;  %v3741_v17 = vsel %vm3726_vm12, %v3738_v62, %v3740_v31  ;;  %v12890_v0 = vld [vmem:[%s12157_s15 + $0x60] sm:$0xff]  ;;  %v14702_v62 = vld [vmem:[#allocation44_spill] sm:$0xff]  ;;  %v4129_v8 = vrot.slane %v12842_v59, 2 }
 0x33c   : >> { %v4466_v60 = vshrl.u32 %v12890_v0, 16  ;;  %v4469_v11 = vshll.u32 %v12890_v0, 16 }
 0x33d   : >> { %v3654_v10 = vpop.f32.mrf.mxu0  ;;  %v12874_v6 = vadd.f32 %v3652_v32, %v3302_v3  ;;  %v4463_v32 = vor.u32 %v4462_v43, %v4459_v12 }
 0x33f   : >> { %v4464_v46 = vsel %vm4375_vm11, %v4454_v19, %v4463_v32  ;;  %v10614_v19 = vld [vmem:[%s12157_s15 + $0x48] sm:$0xff] }
 0x340   : >> { %v2872_v45 = vpop.f32.mrf.mxu2  ;;  %v3742_v43 = vrot.slane %v10614_v19, 2 }
 0x341   : >> { %v2916_v15 = vadd.f32 %v2872_v45, %v2647_v38  ;;  %v4468_v38 = vrot.slane %v4466_v60, 2  ;;  %v4471_v45 = vrot.slane %v4469_v11, 3  ;;  %v12914_v60 = vld [vmem:[%s12157_s15 + $0x68] sm:$0xff] }
 0x342   : >> { %v2649_v34 = vpop.f32.mrf.mxu1  ;;  %v12884_v44 = vpop.f32.mrf.mxu3  ;;  %v4478_v19 = vshll.u32 %v12914_v60, 16 }
 0x343   : >> { %v3303_v58 = vadd.f32 %v12836_v30, %v2916_v15  ;;  %v2650_v63 = vadd.f32 %v2649_v34, %v14702_v62  ;;  %v14703_v15 = vld [vmem:[#allocation45_spill] sm:$0xff] }
 0x345   : >> { %v3657_v41 = vpop.f32.mrf.mxu0  ;;  %3868 = vmatmul.bf16.gmra.mxu1 %v3741_v17  ;;  %4255 = vmatmul.bf16.gmra.mxu2 %v4128_v35  ;;  %v12886_v53 = vadd.f32 %v3654_v10, %v3303_v58  ;;  %v4786_v17 = vrot.slane %v12842_v59, 3 }
 0x347   : >> { %4660 = vmatmul.bf16.gmra.mxu3 %v4464_v46  ;;  %v4130_v46 = vsel %vm3726_vm12, %v4127_v20, %v4129_v8 }
 0x348   : >> { %4912 = vmatmul.bf16.gmra.mxu0 %v4785_v61  ;;  %v2875_v56 = vpop.f32.mrf.mxu2 }
 0x349   : >> { %v2917_v16 = vadd.f32 %v2875_v56, %v2650_v63  ;;  %v4787_v56 = vsel %vm4770_vm13, %v4784_v33, %v4786_v17  ;;  %v4475_v33 = vshrl.u32 %v12914_v60, 16 }
 0x34a   : >> { %v2651_v30 = vpop.f32.mrf.mxu1  ;;  %v12896_v10 = vpop.f32.mrf.mxu3 }
 0x34b   : >> { %v3304_v3 = vadd.f32 %v12848_v29, %v2917_v16  ;;  %v2652_v34 = vadd.f32 %v2651_v30, %v14703_v15  ;;  %v3743_v29 = vsel %vm3726_vm12, %v3740_v31, %v3742_v43  ;;  %v14704_v31 = vld [vmem:[#allocation46_spill] sm:$0xff] }
 0x34d   : >> { %v3659_v25 = vpop.f32.mrf.mxu0  ;;  %v12898_v12 = vadd.f32 %v3657_v41, %v3304_v3  ;;  %v4472_v41 = vor.u32 %v4471_v45, %v4468_v38 }
 0x34f   : >> { %v4473_v30 = vsel %vm4375_vm11, %v4463_v32, %v4472_v41  ;;  %v10615_v32 = vld [vmem:[%s12157_s15 + $0x50] sm:$0xff] }
 0x350   : >> { %v2877_v35 = vpop.f32.mrf.mxu2 }
 0x351   : >> { %v2918_v58 = vadd.f32 %v2877_v35, %v2652_v34  ;;  %v3744_v34 = vrot.slane %v10615_v32, 2  ;;  %v4131_v35 = vrot.slane %v12866_v4, 2 }
 0x352   : >> { %v2654_v61 = vpop.f32.mrf.mxu1  ;;  %v12908_v16 = vpop.f32.mrf.mxu3 }
 0x353   : >> { %v3305_v62 = vadd.f32 %v12860_v21, %v2918_v58  ;;  %v2655_v20 = vadd.f32 %v2654_v61, %v14704_v31  ;;  %v4477_v58 = vrot.slane %v4475_v33, 2  ;;  %v4480_v61 = vrot.slane %v4478_v19, 3 }
 0x355   : >> { %v3662_v63 = vpop.f32.mrf.mxu0  ;;  %3873 = vmatmul.bf16.gmra.mxu1 %v3743_v29  ;;  %4260 = vmatmul.bf16.gmra.mxu2 %v4130_v46  ;;  %v12910_v59 = vadd.f32 %v3659_v25, %v3305_v62  ;;  %v14706_v29 = vld [vmem:[#allocation47_spill] sm:$0xff]  ;;  %v4788_v62 = vrot.slane %v12866_v4, 3 }
 0x357   : >> { %4665 = vmatmul.bf16.gmra.mxu3 %v4473_v30 }
 0x358   : >> { %4917 = vmatmul.bf16.gmra.mxu0 %v4787_v56  ;;  %v2880_v11 = vpop.f32.mrf.mxu2 }
 0x359   : >> { %v2919_v3 = vadd.f32 %v2880_v11, %v2655_v20  ;;  %v4132_v20 = vsel %vm3726_vm12, %v4129_v8, %v4131_v35 }
 0x35a   : >> { %v2656_v21 = vpop.f32.mrf.mxu1  ;;  %v12920_v25 = vpop.f32.mrf.mxu3 }
 0x35b   : >> { %v3306_v38 = vadd.f32 %v12872_v49, %v2919_v3  ;;  %v2657_v46 = vadd.f32 %v2656_v21, %v14706_v29  ;;  %v3745_v49 = vsel %vm3726_vm12, %v3742_v43, %v3744_v34  ;;  %v12938_v43 = vld [vmem:[%s12157_s15 + $0x70] sm:$0xff] }
 0x35d   : >> { %v3664_v45 = vpop.f32.mrf.mxu0  ;;  %v12922_v15 = vadd.f32 %v3662_v63, %v3306_v38  ;;  %v4481_v63 = vor.u32 %v4480_v61, %v4477_v58  ;;  %v4789_v38 = vsel %vm4770_vm13, %v4786_v17, %v4788_v62  ;;  %v4484_v17 = vshrl.u32 %v12938_v43, 16  ;;  %v12945_v61 = vld [vmem:[%s12752_s18] ss:$0 sm:$0xff] }
 0x35e   : >> { %v4487_v58 = vshll.u32 %v12938_v43, 16 }
 0x35f   : >> { %14705 = vst [vmem:[#allocation48_spill] sm:$0xff] %v12922_v15  ;;  %v4482_v21 = vsel %vm4375_vm11, %v4472_v41, %v4481_v63 }
 0x360   : >> { %v2882_v56 = vpop.f32.mrf.mxu2 }
 0x361   : >> { %v2920_v30 = vadd.f32 %v2882_v56, %v2657_v46  ;;  %v12950_v56 = vld [vmem:[%s12157_s15 + $0x58] sm:$0xff] }
 0x362   : >> { %v3839_v31 = vpop.f32.mrf.mxu1  ;;  %v12932_v33 = vpop.f32.mrf.mxu3 }
 0x363   : >> { %v3307_v11 = vadd.f32 %v12884_v44, %v2920_v30  ;;  %v3929_v8 = vadd.f32 %v3839_v31, %v12490_v36  ;;  %v14624_v36 = vrot.slane %v12950_v56, 2  ;;  %v14623_v30 = vrot.slane %v12890_v0, 2 }
 0x364   : >> { %v4486_v31 = vrot.slane %v4484_v17, 2 }
 0x365   : >> { %v4883_v3 = vpop.f32.mrf.mxu0  ;;  %3878 = vmatmul.bf16.gmra.mxu1 %v3745_v49  ;;  %4265 = vmatmul.bf16.gmra.mxu2 %v4132_v20  ;;  %v12934_v4 = vadd.f32 %v3664_v45, %v3307_v11  ;;  %v4489_v49 = vrot.slane %v4487_v58, 3  ;;  %v14708_v58 = vld [vmem:[#allocation11_spill] sm:$0xff] }
 0x367   : >> { %14707 = vst [vmem:[#allocation42_spill] sm:$0xff] %v12934_v4  ;;  %4670 = vmatmul.bf16.gmra.mxu3 %v4482_v21  ;;  %v12964_v17 = vor.u32 %v4489_v49, %v4486_v31  ;;  %v12976_v31 = vld [vmem:[%s12157_s15 + $0x78] sm:$0xff] }
 0x368   : >> { %4922 = vmatmul.bf16.gmra.mxu0 %v4789_v38  ;;  %v4226_v19 = vpop.f32.mrf.mxu2 }
 0x369   : >> { %v4316_v44 = vadd.f32 %v4226_v19, %v3929_v8 }
 0x36a   : >> { %v3841_v32 = vpop.f32.mrf.mxu1  ;;  %v12947_v46 = vpop.f32.mrf.mxu3 }
 0x36b   : >> { %v4711_v45 = vadd.f32 %v12896_v10, %v4316_v44  ;;  %v3930_v11 = vadd.f32 %v3841_v32, %v12503_v42  ;;  %v14622_v10 = vrot.slane %v12890_v0, 3  ;;  %v4134_v44 = vsel %vm3726_vm12, %v4131_v35, %v14623_v30 }
 0x36c   : >> { %v4491_v35 = vsel %vm4375_vm11, %v4481_v63, %v12964_v17  ;;  %v5557_v63 = vld [vmem:[%s12980_s23 + $0x8] sm:$0xe]  ;;  %v14626_v30 = vrot.slane %v12914_v60, 2 }
 0x36d   : >> { %v4885_v29 = vpop.f32.mrf.mxu0  ;;  %v4973_v41 = vadd.f32 %v4883_v3, %v4711_v45  ;;  %v3747_v3 = vsel %vm3726_vm12, %v3744_v34, %v14624_v36 }
 0x36f   : >> { %v5014_v20 = vadd.f32 %v12945_v61, %v4973_v41  ;;  %v4791_v41 = vsel %vm4770_vm13, %v4788_v62, %v14622_v10 }
 0x370   : >> { %v4228_v38 = vpop.f32.mrf.mxu2 }
 0x371   : >> { %v5050_v21 = vmax.f32 %v5014_v20, 0.0  ;;  %v4317_v8 = vadd.f32 %v4228_v38, %v3930_v11 }
 0x372   : >> { %v3844_v19 = vpop.f32.mrf.mxu1  ;;  %v12971_v20 = vpop.f32.mrf.mxu3 }
 0x373   : >> { %v5086_v42 = vmul.f32 %v5050_v21, %v14708_v58  ;;  %v4712_v32 = vadd.f32 %v12908_v16, %v4317_v8  ;;  %v3931_v21 = vadd.f32 %v3844_v19, %v12512_v40 }
 0x375   : >> { %v4888_v45 = vpop.f32.mrf.mxu0  ;;  %v5122_v11 = vpack.c.bf16 %v5086_v42, %v5086_v42  ;;  %v4974_v34 = vadd.f32 %v4885_v29, %v4712_v32  ;;  %3883 = vmatmul.bf16.gmra.mxu1 %v3747_v3  ;;  %4270 = vmatmul.bf16.gmra.mxu2 %v4134_v44  ;;  %v4493_v44 = vshrl.u32 %v12976_v31, 16  ;;  %v4496_v42 = vshll.u32 %v12976_v31, 16 }
 0x377   : >> { %v5159_v49 = vshrl.u32 %v5122_v11, 16  ;;  %v5162_v38 = vshll.u32 %v5122_v11, 16  ;;  %v5015_v16 = vadd.f32 %v12945_v61, %v4974_v34  ;;  %4675 = vmatmul.bf16.gmra.mxu3 %v4491_v35 }
 0x378   : >> { %4927 = vmatmul.bf16.gmra.mxu0 %v4791_v41  ;;  %v4231_v8 = vpop.f32.mrf.mxu2  ;;  %v14709_v41 = vld [vmem:[#allocation14_spill] sm:$0xff] }
 0x379   : >> { %v5161_v62 = vrot.slane %v5159_v49, 6  ;;  %v5164_v58 = vrot.slane %v5162_v38, 7  ;;  %v5051_v10 = vmax.f32 %v5015_v16, 0.0  ;;  %v4318_v29 = vadd.f32 %v4231_v8, %v3931_v21  ;;  %v12992_v21 = vld [vmem:[%s12157_s15 + $0x60] sm:$0xff] }
 0x37a   : >> { %v3846_v3 = vpop.f32.mrf.mxu1  ;;  %v12987_v34 = vpop.f32.mrf.mxu3  ;;  %v14625_v8 = vrot.slane %v12992_v21, 2 }
 0x37b   : >> { %v5165_v32 = vor.u32 %v5164_v58, %v5161_v62  ;;  %v5087_v40 = vmul.f32 %v5051_v10, %v14709_v41  ;;  %v4713_v19 = vadd.f32 %v12920_v25, %v4318_v29  ;;  %v4792_v62 = vrot.slane %v12914_v60, 3 }
 0x37c   : >> { %v4495_v10 = vrot.slane %v4493_v44, 2  ;;  %v4498_v58 = vrot.slane %v4496_v42, 3  ;;  %v3932_v49 = vadd.f32 %v3846_v3, %v12524_v26  ;;  %v14712_v42 = vrot.slane %v12890_v0, 2 }
 0x37d   : >> { %v4890_v11 = vpop.f32.mrf.mxu0  ;;  %v5558_v35 = vsel %vm11081_vm5, %v5165_v32, %v5557_v63  ;;  %v5123_v38 = vpack.c.bf16 %v5087_v40, %v5087_v40  ;;  %v4975_v16 = vadd.f32 %v4888_v45, %v4713_v19  ;;  %v14713_v26 = vrot.slane %v12890_v0, 3 }
 0x37e   : >> { %5559 = vst [vmem:[%s12980_s23 + $0x8] sm:$0xe] %v5558_v35  ;;  %v14711_v35 = vrot.slane %v12950_v56, 2 }
 0x37f   : >> { %v5168_v25 = vshrl.u32 %v5123_v38, 16  ;;  %v5171_v29 = vshll.u32 %v5123_v38, 16  ;;  %v5016_v41 = vadd.f32 %v12945_v61, %v4975_v16  ;;  %v4136_v38 = vsel %vm3726_vm12, %v14712_v42, %v14626_v30 }
 0x380   : >> { %v4233_v63 = vpop.f32.mrf.mxu2  ;;  %v3749_v44 = vsel %vm3726_vm12, %v14711_v35, %v14625_v8  ;;  %v4793_v3 = vsel %vm4770_vm13, %v14713_v26, %v4792_v62  ;;  %v13015_v16 = vor.u32 %v4498_v58, %v4495_v10  ;;  %v10389_v8 = vld [vmem:[%s14577_s4 + $0x60] sm:$0xff] (%p1992_p6) }
 0x381   : >> { %v5170_v40 = vrot.slane %v5168_v25, 6  ;;  %v5173_v45 = vrot.slane %v5171_v29, 7  ;;  %v5052_v19 = vmax.f32 %v5016_v41, 0.0  ;;  %v4319_v36 = vadd.f32 %v4233_v63, %v3932_v49  ;;  %v14714_v29 = vld [vmem:[#allocation10_spill] sm:$0xff] }
 0x382   : >> { %v3849_v4 = vpop.f32.mrf.mxu1  ;;  %v5166_v25 = vrot.slane %v5165_v32, 4  ;;  %v13019_v35 = vpop.f32.mrf.mxu3  ;;  %v4500_v0 = vsel %vm4375_vm11, %v12964_v17, %v13015_v16 }
 0x383   : >> { %v5174_v56 = vor.u32 %v5173_v45, %v5170_v40  ;;  %v5088_v41 = vmul.f32 %v5052_v19, %v14714_v29  ;;  %v4714_v49 = vadd.f32 %v12932_v33, %v4319_v36  ;;  %v3933_v58 = vadd.f32 %v3849_v4, %v12533_v2 }
 0x385   : >> { %v4893_v63 = vpop.f32.mrf.mxu0  ;;  %v5175_v42 = vsel %vm11142_vm7, %v5166_v25, %v5174_v56  ;;  %v5124_v30 = vpack.c.bf16 %v5088_v41, %v5088_v41  ;;  %v4976_v15 = vadd.f32 %v4890_v11, %v4714_v49  ;;  %3888 = vmatmul.bf16.gmra.mxu1 %v3749_v44  ;;  %4275 = vmatmul.bf16.gmra.mxu2 %v4136_v38 }
 0x386   : >> { %5560 = vst [vmem:[%s12980_s23 + $0xc] sm:$0xf] %v5175_v42 }
 0x387   : >> { %v5178_v10 = vshrl.u32 %v5124_v30, 16  ;;  %v5181_v33 = vshll.u32 %v5124_v30, 16  ;;  %v5017_v36 = vadd.f32 %v12945_v61, %v4976_v15  ;;  %4680 = vmatmul.bf16.gmra.mxu3 %v4500_v0  ;;  %v14716_v30 = vld [vmem:[#allocation13_spill] sm:$0xff] }
 0x388   : >> { %4932 = vmatmul.bf16.gmra.mxu0 %v4793_v3  ;;  %v4236_v40 = vpop.f32.mrf.mxu2  ;;  %v5176_v3 = vrot.slane %v5174_v56, 4  ;;  %v4137_v56 = vrot.slane %v12938_v43, 2 }
 0x389   : >> { %v5180_v45 = vrot.slane %v5178_v10, 6  ;;  %v5183_v19 = vrot.slane %v5181_v33, 7  ;;  %v5053_v11 = vmax.f32 %v5017_v36, 0.0  ;;  %v4320_v44 = vadd.f32 %v4236_v40, %v3933_v58 }
 0x38a   : >> { %v3851_v38 = vpop.f32.mrf.mxu1  ;;  %v13036_v4 = vpop.f32.mrf.mxu3  ;;  %v4794_v33 = vrot.slane %v12938_v43, 3 }
 0x38b   : >> { %v5184_v25 = vor.u32 %v5183_v19, %v5180_v45  ;;  %v5089_v29 = vmul.f32 %v5053_v11, %v14716_v30  ;;  %v4715_v15 = vadd.f32 %v12947_v46, %v4320_v44  ;;  %v3934_v19 = vadd.f32 %v3851_v38, %v12547_v14 }
 0x38c   : >> { %v4795_v14 = vsel %vm4770_vm13, %v4792_v62, %v4794_v33 }
 0x38d   : >> { %v13028_v32 = vld [vmem:[%s12157_s15 + $0x80] sm:$0xff]  ;;  %v4895_v2 = vpop.f32.mrf.mxu0  ;;  %v5185_v41 = vsel %vm11142_vm7, %v5176_v3, %v5184_v25  ;;  %v5125_v49 = vpack.c.bf16 %v5089_v29, %v5089_v29  ;;  %v4977_v42 = vadd.f32 %v4893_v63, %v4715_v15  ;;  %v13041_v0 = vld [vmem:[%s12157_s15 + $0x68] sm:$0xff]  ;;  %v14717_v15 = vrot.slane %v12992_v21, 2 }
 0x38e   : >> { %v4502_v26 = vshrl.u32 %v13028_v32, 16  ;;  %v4505_v17 = vshll.u32 %v13028_v32, 16  ;;  %v3750_v10 = vrot.slane %v13041_v0, 2  ;;  %5561 = vst [vmem:[%s12980_s23 + $0x10] sm:$0xf] %v5185_v41 }
 0x38f   : >> { %v5188_v46 = vshrl.u32 %v5125_v49, 16  ;;  %v5191_v40 = vshll.u32 %v5125_v49, 16  ;;  %v5018_v45 = vadd.f32 %v12945_v61, %v4977_v42  ;;  %v5186_v49 = vrot.slane %v5184_v25, 4  ;;  %v14719_v42 = vld [vmem:[#allocation4_spill] sm:$0xff] }
 0x390   : >> { %v4504_v36 = vrot.slane %v4502_v26, 2  ;;  %v4507_v58 = vrot.slane %v4505_v17, 3  ;;  %v4238_v11 = vpop.f32.mrf.mxu2  ;;  %v3751_v26 = vsel %vm3726_vm12, %v14717_v15, %v3750_v10  ;;  %v14718_v17 = vrot.slane %v12914_v60, 2 }
 0x391   : >> { %v5190_v44 = vrot.slane %v5188_v46, 6  ;;  %v5193_v63 = vrot.slane %v5191_v40, 7  ;;  %v5054_v3 = vmax.f32 %v5018_v45, 0.0  ;;  %v4321_v30 = vadd.f32 %v4238_v11, %v3934_v19 }
 0x392   : >> { %v3854_v29 = vpop.f32.mrf.mxu1  ;;  %v4138_v41 = vsel %vm3726_vm12, %v14718_v17, %v4137_v56  ;;  %v13064_v38 = vor.u32 %v4507_v58, %v4504_v36  ;;  %v13068_v19 = vpop.f32.mrf.mxu3 }
 0x393   : >> { %v5194_v21 = vor.u32 %v5193_v63, %v5190_v44  ;;  %v5090_v46 = vmul.f32 %v5054_v3, %v14719_v42  ;;  %v4716_v40 = vadd.f32 %v12971_v20, %v4321_v30  ;;  %v3935_v58 = vadd.f32 %v3854_v29, %v12556_v22  ;;  %v14720_v42 = vld [vmem:[#allocation6_spill] sm:$0xff] }
 0x394   : >> { %v4509_v60 = vsel %vm4375_vm11, %v13015_v16, %v13064_v38 }
 0x395   : >> { %v4898_v45 = vpop.f32.mrf.mxu0  ;;  %v5195_v11 = vsel %vm11142_vm7, %v5186_v49, %v5194_v21  ;;  %v5126_v15 = vpack.c.bf16 %v5090_v46, %v5090_v46  ;;  %v4978_v17 = vadd.f32 %v4895_v2, %v4716_v40  ;;  %3893 = vmatmul.bf16.gmra.mxu1 %v3751_v26  ;;  %4280 = vmatmul.bf16.gmra.mxu2 %v4138_v41 }
 0x396   : >> { %5562 = vst [vmem:[%s12980_s23 + $0x14] sm:$0xf] %v5195_v11 }
 0x397   : >> { %v5198_v25 = vshrl.u32 %v5126_v15, 16  ;;  %v5201_v20 = vshll.u32 %v5126_v15, 16  ;;  %v5019_v36 = vadd.f32 %v12945_v61, %v4978_v17  ;;  %4685 = vmatmul.bf16.gmra.mxu3 %v4509_v60 }
 0x398   : >> { %4937 = vmatmul.bf16.gmra.mxu0 %v4795_v14  ;;  %v4241_v44 = vpop.f32.mrf.mxu2  ;;  %v5196_v14 = vrot.slane %v5194_v21, 4  ;;  %v4139_v21 = vrot.slane %v12976_v31, 2 }
 0x399   : >> { %v5200_v63 = vrot.slane %v5198_v25, 6  ;;  %v5203_v3 = vrot.slane %v5201_v20, 7  ;;  %v5055_v2 = vmax.f32 %v5019_v36, 0.0  ;;  %v4322_v30 = vadd.f32 %v4241_v44, %v3935_v58 }
 0x39a   : >> { %v3856_v26 = vpop.f32.mrf.mxu1  ;;  %v13085_v29 = vpop.f32.mrf.mxu3  ;;  %v4796_v20 = vrot.slane %v12976_v31, 3 }
 0x39b   : >> { %v5204_v49 = vor.u32 %v5203_v3, %v5200_v63  ;;  %v5091_v46 = vmul.f32 %v5055_v2, %v14720_v42  ;;  %v4717_v40 = vadd.f32 %v12987_v34, %v4322_v30  ;;  %v3936_v3 = vadd.f32 %v3856_v26, %v12571_v48 }
 0x39c   : >> { %v4797_v48 = vsel %vm4770_vm13, %v4794_v33, %v4796_v20 }
 0x39d   : >> { %v13077_v62 = vld [vmem:[%s12157_s15 + $0x88] sm:$0xff]  ;;  %v4900_v22 = vpop.f32.mrf.mxu0  ;;  %v5205_v11 = vsel %vm11142_vm7, %v5196_v14, %v5204_v49  ;;  %v5127_v15 = vpack.c.bf16 %v5091_v46, %v5091_v46  ;;  %v4979_v17 = vadd.f32 %v4898_v45, %v4717_v40  ;;  %v13090_v60 = vld [vmem:[%s12157_s15 + $0x70] sm:$0xff]  ;;  %v5206_v40 = vrot.slane %v5204_v49, 4 }
 0x39e   : >> { %v4511_v41 = vshrl.u32 %v13077_v62, 16  ;;  %v4514_v16 = vshll.u32 %v13077_v62, 16  ;;  %v3752_v25 = vrot.slane %v13090_v60, 2  ;;  %5563 = vst [vmem:[%s12980_s23 + $0x18] sm:$0xf] %v5205_v11  ;;  %v14721_v11 = vld [vmem:[#allocation17_spill] sm:$0xff] }
 0x39f   : >> { %v5208_v34 = vshrl.u32 %v5127_v15, 16  ;;  %v5211_v44 = vshll.u32 %v5127_v15, 16  ;;  %v5020_v63 = vadd.f32 %v12945_v61, %v4979_v17 }
 0x3a0   : >> { %v4513_v36 = vrot.slane %v4511_v41, 2  ;;  %v4516_v58 = vrot.slane %v4514_v16, 3  ;;  %v4243_v2 = vpop.f32.mrf.mxu2  ;;  %v3753_v41 = vsel %vm3726_vm12, %v3750_v10, %v3752_v25  ;;  %v4140_v16 = vsel %vm3726_vm12, %v4137_v56, %v4139_v21 }
 0x3a1   : >> { %v5210_v30 = vrot.slane %v5208_v34, 6  ;;  %v5213_v45 = vrot.slane %v5211_v44, 7  ;;  %v5056_v14 = vmax.f32 %v5020_v63, 0.0  ;;  %v4323_v42 = vadd.f32 %v4243_v2, %v3936_v3 }
 0x3a2   : >> { %v3859_v46 = vpop.f32.mrf.mxu1  ;;  %v13113_v26 = vor.u32 %v4516_v58, %v4513_v36  ;;  %v13117_v34 = vpop.f32.mrf.mxu3 }
 0x3a3   : >> { %v5214_v0 = vor.u32 %v5213_v45, %v5210_v30  ;;  %v5092_v15 = vmul.f32 %v5056_v14, %v14721_v11  ;;  %v4718_v10 = vadd.f32 %v13019_v35, %v4323_v42  ;;  %v3937_v58 = vadd.f32 %v3859_v46, %v12581_v54 }
 0x3a4   : >> { %v4518_v43 = vsel %vm4375_vm11, %v13064_v38, %v13113_v26 }
 0x3a5   : >> { %v4903_v17 = vpop.f32.mrf.mxu0  ;;  %v5215_v56 = vsel %vm11142_vm7, %v5206_v40, %v5214_v0  ;;  %v5128_v44 = vpack.c.bf16 %v5092_v15, %v5092_v15  ;;  %v4980_v63 = vadd.f32 %v4900_v22, %v4718_v10  ;;  %3898 = vmatmul.bf16.gmra.mxu1 %v3753_v41  ;;  %4285 = vmatmul.bf16.gmra.mxu2 %v4140_v16  ;;  %v5216_v41 = vrot.slane %v5214_v0, 4 }
 0x3a6   : >> { %5564 = vst [vmem:[%s12980_s23 + $0x1c] sm:$0xf] %v5215_v56  ;;  %v4141_v0 = vrot.slane %v13028_v32, 2 }
 0x3a7   : >> { %v5218_v49 = vshrl.u32 %v5128_v44, 16  ;;  %v5221_v35 = vshll.u32 %v5128_v44, 16  ;;  %v5021_v36 = vadd.f32 %v12945_v61, %v4980_v63  ;;  %4690 = vmatmul.bf16.gmra.mxu3 %v4518_v43  ;;  %v4798_v43 = vrot.slane %v13028_v32, 3 }
 0x3a8   : >> { %4942 = vmatmul.bf16.gmra.mxu0 %v4797_v48  ;;  %v4246_v3 = vpop.f32.mrf.mxu2  ;;  %v14722_v48 = vld [vmem:[#allocation16_spill] sm:$0xff] }
 0x3a9   : >> { %v5220_v2 = vrot.slane %v5218_v49, 6  ;;  %v5223_v30 = vrot.slane %v5221_v35, 7  ;;  %v5057_v22 = vmax.f32 %v5021_v36, 0.0  ;;  %v4324_v45 = vadd.f32 %v4246_v3, %v3937_v58 }
 0x3aa   : >> { %v3861_v14 = vpop.f32.mrf.mxu1  ;;  %v13134_v46 = vpop.f32.mrf.mxu3 }
 0x3ab   : >> { %v5224_v16 = vor.u32 %v5223_v30, %v5220_v2  ;;  %v5093_v40 = vmul.f32 %v5057_v22, %v14722_v48  ;;  %v4719_v11 = vadd.f32 %v13036_v4, %v4324_v45  ;;  %v3938_v3 = vadd.f32 %v3861_v14, %v12595_v5 }
 0x3ac   : >> { %v4799_v5 = vsel %vm4770_vm13, %v4796_v20, %v4798_v43 }
 0x3ad   : >> { %v13126_v33 = vld [vmem:[%s12157_s15 + $0x90] sm:$0xff]  ;;  %v4905_v54 = vpop.f32.mrf.mxu0  ;;  %v5225_v15 = vsel %vm11142_vm7, %v5216_v41, %v5224_v16  ;;  %v5129_v10 = vpack.c.bf16 %v5093_v40, %v5093_v40  ;;  %v4981_v56 = vadd.f32 %v4903_v17, %v4719_v11  ;;  %v13139_v44 = vld [vmem:[%s12157_s15 + $0x78] sm:$0xff]  ;;  %v5226_v48 = vrot.slane %v5224_v16, 4 }
 0x3ae   : >> { %v4520_v42 = vshrl.u32 %v13126_v33, 16  ;;  %v4523_v38 = vshll.u32 %v13126_v33, 16  ;;  %v3754_v63 = vrot.slane %v13139_v44, 2  ;;  %5565 = vst [vmem:[%s12980_s23 + $0x20] sm:$0xf] %v5225_v15  ;;  %v14723_v40 = vld [vmem:[#allocation8_spill] sm:$0xff] }
 0x3af   : >> { %v5228_v4 = vshrl.u32 %v5129_v10, 16  ;;  %v5231_v36 = vshll.u32 %v5129_v10, 16  ;;  %v5022_v58 = vadd.f32 %v12945_v61, %v4981_v56  ;;  %v14727_v44 = vld [vmem:[#allocation19_spill] sm:$0xff] }
 0x3b0   : >> { %v4522_v49 = vrot.slane %v4520_v42, 2  ;;  %v4525_v35 = vrot.slane %v4523_v38, 3  ;;  %v4248_v2 = vpop.f32.mrf.mxu2  ;;  %v3755_v42 = vsel %vm3726_vm12, %v3752_v25, %v3754_v63  ;;  %v4142_v38 = vsel %vm3726_vm12, %v4139_v21, %v4141_v0 }
 0x3b1   : >> { %v5230_v30 = vrot.slane %v5228_v4, 6  ;;  %v5233_v17 = vrot.slane %v5231_v36, 7  ;;  %v5058_v22 = vmax.f32 %v5022_v58, 0.0  ;;  %v4325_v45 = vadd.f32 %v4248_v2, %v3938_v3 }
 0x3b2   : >> { %v3864_v41 = vpop.f32.mrf.mxu1  ;;  %v13162_v14 = vor.u32 %v4525_v35, %v4522_v49  ;;  %v13166_v10 = vpop.f32.mrf.mxu3  ;;  %v14724_v35 = vld [vmem:[#allocation49_spill] sm:$0xff] }
 0x3b3   : >> { %v5234_v60 = vor.u32 %v5233_v17, %v5230_v30  ;;  %v5094_v11 = vmul.f32 %v5058_v22, %v14723_v40  ;;  %v4720_v25 = vadd.f32 %v13068_v19, %v4325_v45  ;;  %v3939_v36 = vadd.f32 %v3864_v41, %v14724_v35 }
 0x3b4   : >> { %v4527_v31 = vsel %vm4375_vm11, %v13113_v26, %v13162_v14 }
 0x3b5   : >> { %v4908_v15 = vpop.f32.mrf.mxu0  ;;  %v5235_v21 = vsel %vm11142_vm7, %v5226_v48, %v5234_v60  ;;  %v5130_v56 = vpack.c.bf16 %v5094_v11, %v5094_v11  ;;  %v4982_v4 = vadd.f32 %v4905_v54, %v4720_v25  ;;  %3903 = vmatmul.bf16.gmra.mxu1 %v3755_v42  ;;  %4290 = vmatmul.bf16.gmra.mxu2 %v4142_v38  ;;  %v5236_v45 = vrot.slane %v5234_v60, 4  ;;  %v14725_v38 = vld [vmem:[#allocation20_spill] sm:$0xff] }
 0x3b6   : >> { %5566 = vst [vmem:[%s12980_s23 + $0x24] sm:$0xf] %v5235_v21  ;;  %v4143_v60 = vrot.slane %v13077_v62, 2 }
 0x3b7   : >> { %v5238_v16 = vshrl.u32 %v5130_v56, 16  ;;  %v5241_v19 = vshll.u32 %v5130_v56, 16  ;;  %v5023_v49 = vadd.f32 %v12945_v61, %v4982_v4  ;;  %4695 = vmatmul.bf16.gmra.mxu3 %v4527_v31  ;;  %v4800_v31 = vrot.slane %v13077_v62, 3 }
 0x3b8   : >> { %4947 = vmatmul.bf16.gmra.mxu0 %v4799_v5  ;;  %v4251_v58 = vpop.f32.mrf.mxu2 }
 0x3b9   : >> { %v5240_v3 = vrot.slane %v5238_v16, 6  ;;  %v5243_v2 = vrot.slane %v5241_v19, 7  ;;  %v5059_v54 = vmax.f32 %v5023_v49, 0.0  ;;  %v4326_v30 = vadd.f32 %v4251_v58, %v3939_v36  ;;  %v14726_v36 = vld [vmem:[#allocation50_spill] sm:$0xff] }
 0x3ba   : >> { %v3866_v17 = vpop.f32.mrf.mxu1  ;;  %v13183_v40 = vpop.f32.mrf.mxu3 }
 0x3bb   : >> { %v5244_v42 = vor.u32 %v5243_v2, %v5240_v3  ;;  %v5095_v5 = vmul.f32 %v5059_v54, %v14725_v38  ;;  %v4721_v48 = vadd.f32 %v13085_v29, %v4326_v30  ;;  %v3940_v58 = vadd.f32 %v3866_v17, %v14726_v36  ;;  %v14728_v36 = vld [vmem:[#allocation51_spill] sm:$0xff] }
 0x3bc   : >> { %v4801_v17 = vsel %vm4770_vm13, %v4798_v43, %v4800_v31 }
 0x3bd   : >> { %v13175_v20 = vld [vmem:[%s12157_s15 + $0x98] sm:$0xff]  ;;  %v4910_v41 = vpop.f32.mrf.mxu0  ;;  %v5245_v11 = vsel %vm11142_vm7, %v5236_v45, %v5244_v42  ;;  %v5131_v25 = vpack.c.bf16 %v5095_v5, %v5095_v5  ;;  %v4983_v21 = vadd.f32 %v4908_v15, %v4721_v48  ;;  %v13188_v56 = vld [vmem:[%s12157_s15 + $0x80] sm:$0xff]  ;;  %v5246_v5 = vrot.slane %v5244_v42, 4 }
 0x3be   : >> { %v4529_v22 = vshrl.u32 %v13175_v20, 16  ;;  %v4532_v26 = vshll.u32 %v13175_v20, 16  ;;  %v3756_v4 = vrot.slane %v13188_v56, 2  ;;  %5567 = vst [vmem:[%s12980_s23 + $0x28] sm:$0xf] %v5245_v11 }
 0x3bf   : >> { %v5248_v29 = vshrl.u32 %v5131_v25, 16  ;;  %v5251_v49 = vshll.u32 %v5131_v25, 16  ;;  %v5024_v35 = vadd.f32 %v12945_v61, %v4983_v21 }
 0x3c0   : >> { %v4531_v16 = vrot.slane %v4529_v22, 2  ;;  %v4534_v19 = vrot.slane %v4532_v26, 3  ;;  %v4253_v3 = vpop.f32.mrf.mxu2  ;;  %v3757_v22 = vsel %vm3726_vm12, %v3754_v63, %v3756_v4  ;;  %v4144_v26 = vsel %vm3726_vm12, %v4141_v0, %v4143_v60 }
 0x3c1   : >> { %v5250_v15 = vrot.slane %v5248_v29, 6  ;;  %v5253_v2 = vrot.slane %v5251_v49, 7  ;;  %v5060_v54 = vmax.f32 %v5024_v35, 0.0  ;;  %v4327_v30 = vadd.f32 %v4253_v3, %v3940_v58 }
 0x3c2   : >> { %v3869_v45 = vpop.f32.mrf.mxu1  ;;  %v13211_v38 = vor.u32 %v4534_v19, %v4531_v16  ;;  %v13216_v29 = vpop.f32.mrf.mxu3 }
 0x3c3   : >> { %v5254_v48 = vor.u32 %v5253_v2, %v5250_v15  ;;  %v5096_v11 = vmul.f32 %v5060_v54, %v14727_v44  ;;  %v4722_v63 = vadd.f32 %v13117_v34, %v4327_v30  ;;  %v3941_v58 = vadd.f32 %v3869_v45, %v14728_v36 }
 0x3c4   : >> { %v4536_v43 = vsel %vm4375_vm11, %v13162_v14, %v13211_v38 }
 0x3c5   : >> { %v4913_v25 = vpop.f32.mrf.mxu0  ;;  %v4352_v21 = vld [vmem:[%s12157_s15 + $0xa0] sm:$0x7]  ;;  %v5255_v49 = vsel %vm11142_vm7, %v5246_v5, %v5254_v48  ;;  %v5132_v32 = vpack.c.bf16 %v5096_v11, %v5096_v11  ;;  %v4984_v35 = vadd.f32 %v4910_v41, %v4722_v63  ;;  %3908 = vmatmul.bf16.gmra.mxu1 %v3757_v22  ;;  %4295 = vmatmul.bf16.gmra.mxu2 %v4144_v26  ;;  %v5256_v26 = vrot.slane %v5254_v48, 4  ;;  %v14729_v5 = vld [vmem:[#allocation9_spill] sm:$0xff] }
 0x3c6   : >> { %v4373_v0 = vunpack.c.l.b16 %v4352_v21  ;;  %5568 = vst [vmem:[%s12980_s23 + $0x2c] sm:$0xf] %v5255_v49  ;;  %v4145_v48 = vrot.slane %v13126_v33, 2 }
 0x3c7   : >> { %v5258_v34 = vshrl.u32 %v5132_v32, 16  ;;  %v5261_v16 = vshll.u32 %v5132_v32, 16  ;;  %v5025_v19 = vadd.f32 %v12945_v61, %v4984_v35  ;;  %4700 = vmatmul.bf16.gmra.mxu3 %v4536_v43  ;;  %v4802_v43 = vrot.slane %v13126_v33, 3 }
 0x3c8   : >> { %4952 = vmatmul.bf16.gmra.mxu0 %v4801_v17  ;;  %v13224_v42 = vpack.c.b16 %v4373_v0, %v4373_v0  ;;  %v4256_v3 = vpop.f32.mrf.mxu2 }
 0x3c9   : >> { %v5260_v15 = vrot.slane %v5258_v34, 6  ;;  %v5263_v2 = vrot.slane %v5261_v16, 7  ;;  %v5061_v41 = vmax.f32 %v5025_v19, 0.0  ;;  %v4328_v54 = vadd.f32 %v4256_v3, %v3941_v58  ;;  %v14730_v58 = vld [vmem:[#allocation52_spill] sm:$0xff] }
 0x3ca   : >> { %v3871_v30 = vpop.f32.mrf.mxu1  ;;  %v4538_v22 = vshrl.u32 %v13224_v42, 16  ;;  %v4541_v14 = vshll.u32 %v13224_v42, 16  ;;  %v13232_v63 = vpop.f32.mrf.mxu3 }
 0x3cb   : >> { %v5264_v17 = vor.u32 %v5263_v2, %v5260_v15  ;;  %v5097_v44 = vmul.f32 %v5061_v41, %v14729_v5  ;;  %v4723_v11 = vadd.f32 %v13134_v46, %v4328_v54  ;;  %v3942_v3 = vadd.f32 %v3871_v30, %v14730_v58 }
 0x3cc   : >> { %v4540_v34 = vrot.slane %v4538_v22, 2  ;;  %v4543_v16 = vrot.slane %v4541_v14, 3  ;;  %v4146_v14 = vsel %vm3726_vm12, %v4143_v60, %v4145_v48  ;;  %v4803_v30 = vsel %vm4770_vm13, %v4800_v31, %v4802_v43 }
 0x3cd   : >> { %v4915_v45 = vpop.f32.mrf.mxu0  ;;  %v5265_v21 = vsel %vm11142_vm7, %v5256_v26, %v5264_v17  ;;  %v5133_v0 = vpack.c.bf16 %v5097_v44, %v5097_v44  ;;  %v4985_v49 = vadd.f32 %v4913_v25, %v4723_v11  ;;  %v13237_v32 = vld [vmem:[%s12157_s15 + $0x88] sm:$0xff]  ;;  %v5266_v44 = vrot.slane %v5264_v17, 4 }
 0x3ce   : >> { %v3758_v35 = vrot.slane %v13237_v32, 2  ;;  %5569 = vst [vmem:[%s12980_s23 + $0x30] sm:$0xf] %v5265_v21  ;;  %v4544_v5 = vor.u32 %v4543_v16, %v4540_v34  ;;  %v14731_v21 = vld [vmem:[#allocation23_spill] sm:$0xff] }
 0x3cf   : >> { %v5268_v46 = vshrl.u32 %v5133_v0, 16  ;;  %v5271_v19 = vshll.u32 %v5133_v0, 16  ;;  %v5026_v36 = vadd.f32 %v12945_v61, %v4985_v49 }
 0x3d0   : >> { %v4258_v15 = vpop.f32.mrf.mxu2  ;;  %v3759_v22 = vsel %vm3726_vm12, %v3756_v4, %v3758_v35  ;;  %v4545_v62 = vsel %vm4375_vm11, %v13211_v38, %v4544_v5 }
 0x3d1   : >> { %v5270_v2 = vrot.slane %v5268_v46, 6  ;;  %v5273_v25 = vrot.slane %v5271_v19, 7  ;;  %v5062_v41 = vmax.f32 %v5026_v36, 0.0  ;;  %v4329_v54 = vadd.f32 %v4258_v15, %v3942_v3 }
 0x3d2   : >> { %v3874_v26 = vpop.f32.mrf.mxu1  ;;  %v13262_v49 = vpop.f32.mrf.mxu3 }
 0x3d3   : >> { %v5274_v11 = vor.u32 %v5273_v25, %v5270_v2  ;;  %v5098_v56 = vmul.f32 %v5062_v41, %v14731_v21  ;;  %v4724_v0 = vadd.f32 %v13166_v10, %v4329_v54  ;;  %v3943_v10 = vadd.f32 %v3874_v26, %v12671_v47  ;;  %v14732_v41 = vld [vmem:[#allocation22_spill] sm:$0xff] }
 0x3d4   : >> { %v4804_v21 = vrot.slane %v13175_v20, 3 }
 0x3d5   : >> { %v4918_v4 = vpop.f32.mrf.mxu0  ;;  %v5275_v46 = vsel %vm11142_vm7, %v5266_v44, %v5274_v11  ;;  %v5134_v60 = vpack.c.bf16 %v5098_v56, %v5098_v56  ;;  %v4986_v19 = vadd.f32 %v4915_v45, %v4724_v0  ;;  %3913 = vmatmul.bf16.gmra.mxu1 %v3759_v22  ;;  %4300 = vmatmul.bf16.gmra.mxu2 %v4146_v14  ;;  %v5276_v2 = vrot.slane %v5274_v11, 4 }
 0x3d6   : >> { %5570 = vst [vmem:[%s12980_s23 + $0x34] sm:$0xf] %v5275_v46  ;;  %v4147_v11 = vrot.slane %v13175_v20, 2 }
 0x3d7   : >> { %v5278_v31 = vshrl.u32 %v5134_v60, 16  ;;  %v5281_v17 = vshll.u32 %v5134_v60, 16  ;;  %v5027_v34 = vadd.f32 %v12945_v61, %v4986_v19  ;;  %4705 = vmatmul.bf16.gmra.mxu3 %v4545_v62 }
 0x3d8   : >> { %4957 = vmatmul.bf16.gmra.mxu0 %v4803_v30  ;;  %v4261_v16 = vpop.f32.mrf.mxu2 }
 0x3d9   : >> { %v5280_v36 = vrot.slane %v5278_v31, 6  ;;  %v5283_v58 = vrot.slane %v5281_v17, 7  ;;  %v5063_v3 = vmax.f32 %v5027_v34, 0.0  ;;  %v4330_v45 = vadd.f32 %v4261_v16, %v3943_v10 }
 0x3da   : >> { %v3876_v15 = vpop.f32.mrf.mxu1  ;;  %v13273_v14 = vpop.f32.mrf.mxu3  ;;  %v4148_v10 = vsel %vm3726_vm12, %v4145_v48, %v4147_v11 }
 0x3db   : >> { %v5284_v25 = vor.u32 %v5283_v58, %v5280_v36  ;;  %v5099_v54 = vmul.f32 %v5063_v3, %v14732_v41  ;;  %v4725_v38 = vadd.f32 %v13183_v40, %v4330_v45  ;;  %v3944_v46 = vadd.f32 %v3876_v15, %v12682_v23  ;;  %v14733_v58 = vld [vmem:[#allocation12_spill] sm:$0xff] }
 0x3dc   : >> { %v4805_v23 = vsel %vm4770_vm13, %v4802_v43, %v4804_v21 }
 0x3dd   : >> { %v4920_v22 = vpop.f32.mrf.mxu0  ;;  %v5285_v47 = vsel %vm11142_vm7, %v5276_v2, %v5284_v25  ;;  %v5135_v26 = vpack.c.bf16 %v5099_v54, %v5099_v54  ;;  %v4987_v30 = vadd.f32 %v4918_v4, %v4725_v38  ;;  %v5286_v16 = vrot.slane %v5284_v25, 4 }
 0x3de   : >> { %5571 = vst [vmem:[%s12980_s23 + $0x38] sm:$0xf] %v5285_v47 }
 0x3df   : >> { %v5288_v56 = vshrl.u32 %v5135_v26, 16  ;;  %v5291_v0 = vshll.u32 %v5135_v26, 16  ;;  %v5028_v40 = vadd.f32 %v12945_v61, %v4987_v30 }
 0x3e0   : >> { %v4263_v60 = vpop.f32.mrf.mxu2 }
 0x3e1   : >> { %v5290_v19 = vrot.slane %v5288_v56, 6  ;;  %v5293_v62 = vrot.slane %v5291_v0, 7  ;;  %v5064_v4 = vmax.f32 %v5028_v40, 0.0  ;;  %v4331_v31 = vadd.f32 %v4263_v60, %v3944_v46  ;;  %v14734_v60 = vld [vmem:[#allocation26_spill] sm:$0xff] }
 0x3e2   : >> { %v3879_v17 = vpop.f32.mrf.mxu1  ;;  %v13304_v15 = vpop.f32.mrf.mxu3 }
 0x3e3   : >> { %v5294_v36 = vor.u32 %v5293_v62, %v5290_v19  ;;  %v5100_v3 = vmul.f32 %v5064_v4, %v14733_v58  ;;  %v4726_v32 = vadd.f32 %v13216_v29, %v4331_v31  ;;  %v3945_v29 = vadd.f32 %v3879_v17, %v12696_v51 }
 0x3e5   : >> { %v13279_v5 = vld [vmem:[%s12157_s15 + $0x90] sm:$0xff]  ;;  %v4923_v45 = vpop.f32.mrf.mxu0  ;;  %v5295_v2 = vsel %vm11142_vm7, %v5286_v16, %v5294_v36  ;;  %v5136_v48 = vpack.c.bf16 %v5100_v3, %v5100_v3  ;;  %v4988_v41 = vadd.f32 %v4920_v22, %v4726_v32  ;;  %4305 = vmatmul.bf16.gmra.mxu2 %v4148_v10  ;;  %v5296_v22 = vrot.slane %v5294_v36, 4 }
 0x3e6   : >> { %v3760_v44 = vrot.slane %v13279_v5, 2  ;;  %v3762_v10 = vrot.slane %v12677_v13, 2  ;;  %v4806_v16 = vrot.slane %v13224_v42, 3 }
 0x3e7   : >> { %v5298_v43 = vshrl.u32 %v5136_v48, 16  ;;  %v5301_v25 = vshll.u32 %v5136_v48, 16  ;;  %v5029_v54 = vadd.f32 %v12945_v61, %v4988_v41 }
 0x3e8   : >> { %v3761_v34 = vsel %vm3726_vm12, %v3758_v35, %v3760_v44  ;;  %v4001_v35 = vld [vmem:[%s12157_s15 + $0xa0] sm:$0x3]  ;;  %4962 = vmatmul.bf16.gmra.mxu0 %v4805_v23  ;;  %v4266_v38 = vpop.f32.mrf.mxu2  ;;  %v3763_v13 = vsel %vm3726_vm12, %v3760_v44, %v3762_v10 }
 0x3e9   : >> { %3918 = vmatmul.bf16.gmra.mxu1 %v3761_v34  ;;  %5572 = vst [vmem:[%s12980_s23 + $0x3c] sm:$0xf] %v5295_v2  ;;  %v4094_v33 = vunpack.c.l.b16 %v4001_v35  ;;  %v5300_v47 = vrot.slane %v5298_v43, 6  ;;  %v5303_v26 = vrot.slane %v5301_v25, 7  ;;  %v5065_v30 = vmax.f32 %v5029_v54, 0.0  ;;  %v14735_v25 = vld [vmem:[#allocation25_spill] sm:$0xff] }
 0x3ea   : >> { %v4332_v56 = vadd.f32 %v4266_v38, %v3945_v29  ;;  %v3881_v0 = vpop.f32.mrf.mxu1  ;;  %v13313_v31 = vpop.f32.mrf.mxu3 }
 0x3eb   : >> { %v4113_v40 = vpack.c.b16 %v4094_v33, %v4094_v33  ;;  %v5304_v46 = vor.u32 %v5303_v26, %v5300_v47  ;;  %v5101_v19 = vmul.f32 %v5065_v30, %v14734_v60 }
 0x3ec   : >> { %v4727_v62 = vadd.f32 %v13232_v63, %v4332_v56  ;;  %v3946_v63 = vadd.f32 %v3881_v0, %v12707_v55 }
 0x3ed   : >> { %v4925_v4 = vpop.f32.mrf.mxu0  ;;  %v5305_v51 = vsel %vm11142_vm7, %v5296_v22, %v5304_v46  ;;  %v5137_v17 = vpack.c.bf16 %v5101_v19, %v5101_v19  ;;  %v4149_v23 = vrot.slane %v4113_v40, 2  ;;  %v5306_v55 = vrot.slane %v5304_v46, 4 }
 0x3ee   : >> { %v4989_v34 = vadd.f32 %v4923_v45, %v4727_v62  ;;  %5573 = vst [vmem:[%s12980_s23 + $0x40] sm:$0xf] %v5305_v51  ;;  %v4807_v45 = vsel %vm4770_vm13, %v4804_v21, %v4806_v16  ;;  %v14736_v62 = vld [vmem:[#allocation15_spill] sm:$0xff] }
 0x3ef   : >> { %v5308_v36 = vshrl.u32 %v5137_v17, 16  ;;  %v5311_v58 = vshll.u32 %v5137_v17, 16  ;;  %v4150_v42 = vsel %vm3726_vm12, %v4147_v11, %v4149_v23 }
 0x3f0   : >> { %v5030_v3 = vadd.f32 %v12945_v61, %v4989_v34  ;;  %v4268_v32 = vpop.f32.mrf.mxu2 }
 0x3f1   : >> { %v5310_v35 = vrot.slane %v5308_v36, 6  ;;  %v5313_v2 = vrot.slane %v5311_v58, 7  ;;  %v4333_v41 = vadd.f32 %v4268_v32, %v3946_v63 }
 0x3f2   : >> { %v5066_v48 = vmax.f32 %v5030_v3, 0.0  ;;  %v3884_v33 = vpop.f32.mrf.mxu1  ;;  %v13336_v11 = vpop.f32.mrf.mxu3 }
 0x3f3   : >> { %v5314_v43 = vor.u32 %v5313_v2, %v5310_v35  ;;  %v4728_v29 = vadd.f32 %v13262_v49, %v4333_v41  ;;  %v3947_v30 = vadd.f32 %v3884_v33, %v12724_v9 }
 0x3f4   : >> { %v5102_v54 = vmul.f32 %v5066_v48, %v14735_v25 }
 0x3f5   : >> { %v4928_v38 = vpop.f32.mrf.mxu0  ;;  %v5315_v5 = vsel %vm11142_vm7, %v5306_v55, %v5314_v43  ;;  %v4990_v44 = vadd.f32 %v4925_v4, %v4728_v29  ;;  %4310 = vmatmul.bf16.gmra.mxu2 %v4150_v42  ;;  %v5316_v60 = vrot.slane %v5314_v43, 4  ;;  %v13355_v29 = vld [vmem:[%s12752_s18] ss:$0 sm:$0xff] }
 0x3f6   : >> { %v5138_v47 = vpack.c.bf16 %v5102_v54, %v5102_v54  ;;  %5574 = vst [vmem:[%s12980_s23 + $0x44] sm:$0xf] %v5315_v5 }
 0x3f7   : >> { %v5031_v26 = vadd.f32 %v12945_v61, %v4990_v44 }
 0x3f8   : >> { %4967 = vmatmul.bf16.gmra.mxu0 %v4807_v45  ;;  %v5318_v20 = vshrl.u32 %v5138_v47, 16  ;;  %v5321_v21 = vshll.u32 %v5138_v47, 16  ;;  %v4271_v49 = vpop.f32.mrf.mxu2 }
 0x3f9   : >> { %3923 = vmatmul.bf16.gmra.mxu1 %v3763_v13  ;;  %v5067_v40 = vmax.f32 %v5031_v26, 0.0  ;;  %v4334_v22 = vadd.f32 %v4271_v49, %v3947_v30  ;;  %v14737_v13 = vld [vmem:[#allocation29_spill] sm:$0xff] }
 0x3fa   : >> { %v5320_v56 = vrot.slane %v5318_v20, 6  ;;  %v5323_v0 = vrot.slane %v5321_v21, 7  ;;  %v3886_v46 = vpop.f32.mrf.mxu1  ;;  %v13347_v63 = vpop.f32.mrf.mxu3 }
 0x3fb   : >> { %v5103_v4 = vmul.f32 %v5067_v40, %v14736_v62  ;;  %v4729_v51 = vadd.f32 %v13273_v14, %v4334_v22  ;;  %v3948_v58 = vadd.f32 %v3886_v46, %v12736_v28 }
 0x3fc   : >> { %v5324_v19 = vor.u32 %v5323_v0, %v5320_v56  ;;  %v14738_v0 = vld [vmem:[#allocation28_spill] sm:$0xff] }
 0x3fd   : >> { %v4930_v17 = vpop.f32.mrf.mxu0  ;;  %v5139_v10 = vpack.c.bf16 %v5103_v4, %v5103_v4  ;;  %v4991_v23 = vadd.f32 %v4928_v38, %v4729_v51 }
 0x3fe   : >> { %v5325_v34 = vsel %vm11142_vm7, %v5316_v60, %v5324_v19  ;;  %v5326_v41 = vrot.slane %v5324_v19, 4 }
 0x3ff   : >> { %5575 = vst [vmem:[%s12980_s23 + $0x48] sm:$0xf] %v5325_v34  ;;  %v5328_v9 = vshrl.u32 %v5139_v10, 16  ;;  %v5331_v16 = vshll.u32 %v5139_v10, 16  ;;  %v5032_v36 = vadd.f32 %v12945_v61, %v4991_v23 }
 0x400   : >> { %v4273_v3 = vpop.f32.mrf.mxu2 }
 0x401   : >> { %v5330_v32 = vrot.slane %v5328_v9, 6  ;;  %v5333_v14 = vrot.slane %v5331_v16, 7  ;;  %v5068_v35 = vmax.f32 %v5032_v36, 0.0  ;;  %v4335_v2 = vadd.f32 %v4273_v3, %v3948_v58  ;;  %v14739_v3 = vld [vmem:[#allocation18_spill] sm:$0xff] }
 0x402   : >> { %v3889_v48 = vpop.f32.mrf.mxu1  ;;  %v13359_v30 = vpop.f32.mrf.mxu3 }
 0x403   : >> { %v5334_v33 = vor.u32 %v5333_v14, %v5330_v32  ;;  %v5104_v42 = vmul.f32 %v5068_v35, %v14737_v13  ;;  %v4730_v45 = vadd.f32 %v13304_v15, %v4335_v2  ;;  %v3949_v5 = vadd.f32 %v3889_v48, %v12754_v50 }
 0x405   : >> { %v4933_v55 = vpop.f32.mrf.mxu0  ;;  %v5335_v28 = vsel %vm11142_vm7, %v5326_v41, %v5334_v33  ;;  %v5140_v61 = vpack.c.bf16 %v5104_v42, %v5104_v42  ;;  %v4992_v43 = vadd.f32 %v4930_v17, %v4730_v45  ;;  %v5336_v49 = vrot.slane %v5334_v33, 4 }
 0x406   : >> { %5576 = vst [vmem:[%s12980_s23 + $0x4c] sm:$0xf] %v5335_v28 }
 0x407   : >> { %v5338_v25 = vshrl.u32 %v5140_v61, 16  ;;  %v5341_v54 = vshll.u32 %v5140_v61, 16  ;;  %v5033_v38 = vadd.f32 %v13355_v29, %v4992_v43 }
 0x408   : >> { %v4276_v47 = vpop.f32.mrf.mxu2 }
 0x409   : >> { %v5340_v44 = vrot.slane %v5338_v25, 6  ;;  %v5343_v20 = vrot.slane %v5341_v54, 7  ;;  %v5069_v15 = vmax.f32 %v5033_v38, 0.0  ;;  %v4336_v21 = vadd.f32 %v4276_v47, %v3949_v5  ;;  %v14740_v5 = vld [vmem:[#allocation32_spill] sm:$0xff] }
 0x40a   : >> { %v3891_v26 = vpop.f32.mrf.mxu1  ;;  %v4681_v2 = vpop.f32.mrf.mxu3 }
 0x40b   : >> { %v5344_v56 = vor.u32 %v5343_v20, %v5340_v44  ;;  %v5105_v40 = vmul.f32 %v5069_v15, %v14738_v0  ;;  %v4731_v22 = vadd.f32 %v13313_v31, %v4336_v21  ;;  %v3950_v17 = vadd.f32 %v3891_v26, %v12766_v37 }
 0x40d   : >> { %v4935_v46 = vpop.f32.mrf.mxu0  ;;  %v5345_v60 = vsel %vm11142_vm7, %v5336_v49, %v5344_v56  ;;  %v5141_v50 = vpack.c.bf16 %v5105_v40, %v5105_v40  ;;  %v4993_v19 = vadd.f32 %v4933_v55, %v4731_v22  ;;  %v5346_v36 = vrot.slane %v5344_v56, 4 }
 0x40e   : >> { %5577 = vst [vmem:[%s12980_s23 + $0x50] sm:$0xf] %v5345_v60 }
 0x40f   : >> { %v5348_v62 = vshrl.u32 %v5141_v50, 16  ;;  %v5351_v4 = vshll.u32 %v5141_v50, 16  ;;  %v5034_v51 = vadd.f32 %v13355_v29, %v4993_v19 }
 0x410   : >> { %v4278_v34 = vpop.f32.mrf.mxu2 }
 0x411   : >> { %v5350_v10 = vrot.slane %v5348_v62, 6  ;;  %v5353_v23 = vrot.slane %v5351_v4, 7  ;;  %v5070_v9 = vmax.f32 %v5034_v51, 0.0  ;;  %v4337_v16 = vadd.f32 %v4278_v34, %v3950_v17  ;;  %v14741_v51 = vld [vmem:[#allocation31_spill] sm:$0xff] }
 0x412   : >> { %v3894_v31 = vpop.f32.mrf.mxu1 }
 0x413   : >> { %v5354_v58 = vor.u32 %v5353_v23, %v5350_v10  ;;  %v5106_v32 = vmul.f32 %v5070_v9, %v14739_v3  ;;  %v4732_v14 = vadd.f32 %v13336_v11, %v4337_v16  ;;  %v3951_v45 = vadd.f32 %v3894_v31, %v12778_v1  ;;  %v4683_v1 = vpop.f32.mrf.mxu3 }
 0x415   : >> { %v4938_v35 = vpop.f32.mrf.mxu0  ;;  %v5355_v48 = vsel %vm11142_vm7, %v5346_v36, %v5354_v58  ;;  %v5142_v41 = vpack.c.bf16 %v5106_v32, %v5106_v32  ;;  %v4994_v37 = vadd.f32 %v4935_v46, %v4732_v14  ;;  %v5356_v54 = vrot.slane %v5354_v58, 4 }
 0x416   : >> { %5578 = vst [vmem:[%s12980_s23 + $0x54] sm:$0xf] %v5355_v48 }
 0x417   : >> { %v5358_v33 = vshrl.u32 %v5142_v41, 16  ;;  %v5361_v13 = vshll.u32 %v5142_v41, 16  ;;  %v5035_v42 = vadd.f32 %v13355_v29, %v4994_v37 }
 0x418   : >> { %v4281_v55 = vpop.f32.mrf.mxu2 }
 0x419   : >> { %v5360_v28 = vrot.slane %v5358_v33, 6  ;;  %v5363_v61 = vrot.slane %v5361_v13, 7  ;;  %v5071_v43 = vmax.f32 %v5035_v42, 0.0  ;;  %v4338_v11 = vadd.f32 %v4281_v55, %v3951_v45  ;;  %v14742_v13 = vld [vmem:[#allocation21_spill] sm:$0xff] }
 0x41a   : >> { %v3896_v25 = vpop.f32.mrf.mxu1 }
 0x41b   : >> { %v5364_v38 = vor.u32 %v5363_v61, %v5360_v28  ;;  %v5107_v47 = vmul.f32 %v5071_v43, %v14740_v5  ;;  %v4733_v44 = vadd.f32 %v13347_v63, %v4338_v11  ;;  %v3952_v40 = vadd.f32 %v3896_v25, %v12790_v24  ;;  %v4686_v32 = vpop.f32.mrf.mxu3 }
 0x41d   : >> { %v4940_v20 = vpop.f32.mrf.mxu0  ;;  %v5365_v15 = vsel %vm11142_vm7, %v5356_v54, %v5364_v38  ;;  %v5143_v21 = vpack.c.bf16 %v5107_v47, %v5107_v47  ;;  %v4995_v26 = vadd.f32 %v4938_v35, %v4733_v44  ;;  %v5366_v62 = vrot.slane %v5364_v38, 4 }
 0x41e   : >> { %5579 = vst [vmem:[%s12980_s23 + $0x58] sm:$0xf] %v5365_v15 }
 0x41f   : >> { %v5368_v49 = vshrl.u32 %v5143_v21, 16  ;;  %v5371_v56 = vshll.u32 %v5143_v21, 16  ;;  %v5036_v0 = vadd.f32 %v13355_v29, %v4995_v26 }
 0x420   : >> { %v4283_v22 = vpop.f32.mrf.mxu2 }
 0x421   : >> { %v5370_v46 = vrot.slane %v5368_v49, 6  ;;  %v5373_v60 = vrot.slane %v5371_v56, 7  ;;  %v5072_v50 = vmax.f32 %v5036_v0, 0.0  ;;  %v4339_v63 = vadd.f32 %v4283_v22, %v3952_v40  ;;  %v14743_v49 = vld [vmem:[#allocation35_spill] sm:$0xff] }
 0x422   : >> { %v3899_v19 = vpop.f32.mrf.mxu1 }
 0x423   : >> { %v5374_v4 = vor.u32 %v5373_v60, %v5370_v46  ;;  %v5108_v17 = vmul.f32 %v5072_v50, %v14741_v51  ;;  %v4734_v34 = vadd.f32 %v13359_v30, %v4339_v63  ;;  %v3953_v58 = vadd.f32 %v3899_v19, %v12802_v18  ;;  %v4688_v15 = vpop.f32.mrf.mxu3 }
 0x425   : >> { %v4943_v10 = vpop.f32.mrf.mxu0  ;;  %v5375_v23 = vsel %vm11142_vm7, %v5366_v62, %v5374_v4  ;;  %v5144_v9 = vpack.c.bf16 %v5108_v17, %v5108_v17  ;;  %v4996_v16 = vadd.f32 %v4940_v20, %v4734_v34  ;;  %v5376_v37 = vrot.slane %v5374_v4, 4 }
 0x426   : >> { %5580 = vst [vmem:[%s12980_s23 + $0x5c] sm:$0xf] %v5375_v23 }
 0x427   : >> { %v5378_v24 = vshrl.u32 %v5144_v9, 16  ;;  %v5381_v31 = vshll.u32 %v5144_v9, 16  ;;  %v5037_v36 = vadd.f32 %v13355_v29, %v4996_v16  ;;  %v14744_v9 = vld [vmem:[#allocation34_spill] sm:$0xff] }
 0x428   : >> { %v4286_v3 = vpop.f32.mrf.mxu2 }
 0x429   : >> { %v5380_v14 = vrot.slane %v5378_v24, 6  ;;  %v5383_v35 = vrot.slane %v5381_v31, 7  ;;  %v5073_v48 = vmax.f32 %v5037_v36, 0.0  ;;  %v4340_v30 = vadd.f32 %v4286_v3, %v3953_v58 }
 0x42a   : >> { %v3901_v41 = vpop.f32.mrf.mxu1 }
 0x42b   : >> { %v5384_v33 = vor.u32 %v5383_v35, %v5380_v14  ;;  %v5109_v42 = vmul.f32 %v5073_v48, %v14742_v13  ;;  %v4735_v45 = vadd.f32 %v4681_v2, %v4340_v30  ;;  %v3954_v54 = vadd.f32 %v3901_v41, %v12814_v39  ;;  %v4691_v36 = vpop.f32.mrf.mxu3 }
 0x42d   : >> { %v4945_v55 = vpop.f32.mrf.mxu0  ;;  %v5385_v28 = vsel %vm11142_vm7, %v5376_v37, %v5384_v33  ;;  %v5145_v61 = vpack.c.bf16 %v5109_v42, %v5109_v42  ;;  %v4997_v43 = vadd.f32 %v4943_v10, %v4735_v45  ;;  %v5386_v21 = vrot.slane %v5384_v33, 4 }
 0x42e   : >> { %5581 = vst [vmem:[%s12980_s23 + $0x60] sm:$0xf] %v5385_v28  ;;  %v14745_v28 = vld [vmem:[#allocation24_spill] sm:$0xff] }
 0x42f   : >> { %v5388_v18 = vshrl.u32 %v5145_v61, 16  ;;  %v5391_v11 = vshll.u32 %v5145_v61, 16  ;;  %v5038_v25 = vadd.f32 %v13355_v29, %v4997_v43 }
 0x430   : >> { %v4288_v38 = vpop.f32.mrf.mxu2 }
 0x431   : >> { %v5390_v5 = vrot.slane %v5388_v18, 6  ;;  %v5393_v47 = vrot.slane %v5391_v11, 7  ;;  %v5074_v44 = vmax.f32 %v5038_v25, 0.0  ;;  %v4341_v20 = vadd.f32 %v4288_v38, %v3954_v54 }
 0x432   : >> { %v3904_v2 = vpop.f32.mrf.mxu1 }
 0x433   : >> { %v5394_v26 = vor.u32 %v5393_v47, %v5390_v5  ;;  %v5110_v56 = vmul.f32 %v5074_v44, %v14743_v49  ;;  %v4736_v0 = vadd.f32 %v4683_v1, %v4341_v20  ;;  %v3955_v19 = vadd.f32 %v3904_v2, %v12826_v7  ;;  %v4693_v38 = vpop.f32.mrf.mxu3 }
 0x435   : >> { %v4948_v40 = vpop.f32.mrf.mxu0  ;;  %v5395_v22 = vsel %vm11142_vm7, %v5386_v21, %v5394_v26  ;;  %v5146_v46 = vpack.c.bf16 %v5110_v56, %v5110_v56  ;;  %v4998_v60 = vadd.f32 %v4945_v55, %v4736_v0  ;;  %v5396_v10 = vrot.slane %v5394_v26, 4 }
 0x436   : >> { %5582 = vst [vmem:[%s12980_s23 + $0x64] sm:$0xf] %v5395_v22 }
 0x437   : >> { %v5398_v39 = vshrl.u32 %v5146_v46, 16  ;;  %v5401_v50 = vshll.u32 %v5146_v46, 16  ;;  %v5039_v63 = vadd.f32 %v13355_v29, %v4998_v60 }
 0x438   : >> { %v4291_v62 = vpop.f32.mrf.mxu2 }
 0x439   : >> { %v5400_v4 = vrot.slane %v5398_v39, 6  ;;  %v5403_v51 = vrot.slane %v5401_v50, 7  ;;  %v5075_v17 = vmax.f32 %v5039_v63, 0.0  ;;  %v4342_v34 = vadd.f32 %v4291_v62, %v3955_v19 }
 0x43a   : >> { %v3906_v1 = vpop.f32.mrf.mxu1 }
 0x43b   : >> { %v5404_v23 = vor.u32 %v5403_v51, %v5400_v4  ;;  %v5111_v16 = vmul.f32 %v5075_v17, %v14744_v9  ;;  %v4737_v24 = vadd.f32 %v4686_v32, %v4342_v34  ;;  %v3956_v30 = vadd.f32 %v3906_v1, %v12838_v57  ;;  %v4696_v17 = vpop.f32.mrf.mxu3 }
 0x43d   : >> { %v4950_v31 = vpop.f32.mrf.mxu0  ;;  %v5405_v58 = vsel %vm11142_vm7, %v5396_v10, %v5404_v23  ;;  %v5147_v3 = vpack.c.bf16 %v5111_v16, %v5111_v16  ;;  %v4999_v14 = vadd.f32 %v4948_v40, %v4737_v24  ;;  %v5406_v45 = vrot.slane %v5404_v23, 4  ;;  %v14746_v40 = vld [vmem:[#allocation37_spill] sm:$0xff] }
 0x43e   : >> { %5583 = vst [vmem:[%s12980_s23 + $0x68] sm:$0xf] %v5405_v58 }
 0x43f   : >> { %v5408_v7 = vshrl.u32 %v5147_v3, 16  ;;  %v5411_v35 = vshll.u32 %v5147_v3, 16  ;;  %v5040_v48 = vadd.f32 %v13355_v29, %v4999_v14 }
 0x440   : >> { %v4293_v41 = vpop.f32.mrf.mxu2 }
 0x441   : >> { %v5410_v37 = vrot.slane %v5408_v7, 6  ;;  %v5413_v33 = vrot.slane %v5411_v35, 7  ;;  %v5076_v13 = vmax.f32 %v5040_v48, 0.0  ;;  %v4343_v32 = vadd.f32 %v4293_v41, %v3956_v30 }
 0x442   : >> { %v3909_v42 = vpop.f32.mrf.mxu1 }
 0x443   : >> { %v5414_v55 = vor.u32 %v5413_v33, %v5410_v37  ;;  %v5112_v61 = vmul.f32 %v5076_v13, %v14745_v28  ;;  %v4738_v43 = vadd.f32 %v4688_v15, %v4343_v32  ;;  %v3957_v44 = vadd.f32 %v3909_v42, %v12850_v52 }
 0x445   : >> { %v4953_v18 = vpop.f32.mrf.mxu0  ;;  %v5415_v11 = vsel %vm11142_vm7, %v5406_v45, %v5414_v55  ;;  %v5148_v25 = vpack.c.bf16 %v5112_v61, %v5112_v61  ;;  %v5000_v54 = vadd.f32 %v4950_v31, %v4738_v43  ;;  %v5416_v56 = vrot.slane %v5414_v55, 4  ;;  %v14747_v31 = vld [vmem:[#allocation36_spill] sm:$0xff]  ;;  %v4698_v55 = vpop.f32.mrf.mxu3  ;;  %v14748_v43 = vld [vmem:[#allocation27_spill] sm:$0xff] }
 0x446   : >> { %5584 = vst [vmem:[%s12980_s23 + $0x6c] sm:$0xf] %v5415_v11 }
 0x447   : >> { %v5418_v57 = vshrl.u32 %v5148_v25, 16  ;;  %v5421_v5 = vshll.u32 %v5148_v25, 16  ;;  %v5041_v47 = vadd.f32 %v13355_v29, %v5000_v54 }
 0x448   : >> { %v4296_v20 = vpop.f32.mrf.mxu2 }
 0x449   : >> { %v5420_v2 = vrot.slane %v5418_v57, 6  ;;  %v5423_v21 = vrot.slane %v5421_v5, 7  ;;  %v5077_v26 = vmax.f32 %v5041_v47, 0.0  ;;  %v4344_v15 = vadd.f32 %v4296_v20, %v3957_v44 }
 0x44a   : >> { %v3911_v49 = vpop.f32.mrf.mxu1 }
 0x44b   : >> { %v5424_v0 = vor.u32 %v5423_v21, %v5420_v2  ;;  %v5113_v22 = vmul.f32 %v5077_v26, %v14746_v40  ;;  %v4739_v46 = vadd.f32 %v4691_v36, %v4344_v15  ;;  %v3958_v4 = vadd.f32 %v3911_v49, %v12862_v27  ;;  %v14749_v40 = vld [vmem:[#allocation39_spill] sm:$0xff] }
 0x44d   : >> { %v4955_v60 = vpop.f32.mrf.mxu0  ;;  %v5425_v39 = vsel %vm11142_vm7, %v5416_v56, %v5424_v0  ;;  %v5149_v50 = vpack.c.bf16 %v5113_v22, %v5113_v22  ;;  %v5001_v63 = vadd.f32 %v4953_v18, %v4739_v46  ;;  %v5426_v16 = vrot.slane %v5424_v0, 4 }
 0x44e   : >> { %5585 = vst [vmem:[%s12980_s23 + $0x70] sm:$0xf] %v5425_v39 }
 0x44f   : >> { %v5428_v19 = vshrl.u32 %v5149_v50, 16  ;;  %v5431_v52 = vshll.u32 %v5149_v50, 16  ;;  %v5042_v62 = vadd.f32 %v13355_v29, %v5001_v63 }
 0x450   : >> { %v4298_v51 = vpop.f32.mrf.mxu2 }
 0x451   : >> { %v5430_v34 = vrot.slane %v5428_v19, 6  ;;  %v5433_v1 = vrot.slane %v5431_v52, 7  ;;  %v5078_v10 = vmax.f32 %v5042_v62, 0.0  ;;  %v4345_v23 = vadd.f32 %v4298_v51, %v3958_v4 }
 0x452   : >> { %v3914_v9 = vpop.f32.mrf.mxu1 }
 0x453   : >> { %v5434_v24 = vor.u32 %v5433_v1, %v5430_v34  ;;  %v5114_v36 = vmul.f32 %v5078_v10, %v14747_v31  ;;  %v4740_v58 = vadd.f32 %v4693_v38, %v4345_v23  ;;  %v3959_v41 = vadd.f32 %v3914_v9, %v12874_v6 }
 0x455   : >> { %v4958_v3 = vpop.f32.mrf.mxu0  ;;  %v5435_v14 = vsel %vm11142_vm7, %v5426_v16, %v5434_v24  ;;  %v5150_v7 = vpack.c.bf16 %v5114_v36, %v5114_v36  ;;  %v5002_v35 = vadd.f32 %v4955_v60, %v4740_v58  ;;  %v5436_v28 = vrot.slane %v5434_v24, 4  ;;  %v4701_v60 = vpop.f32.mrf.mxu3  ;;  %v14750_v24 = vld [vmem:[#allocation38_spill] sm:$0xff] }
 0x456   : >> { %5586 = vst [vmem:[%s12980_s23 + $0x74] sm:$0xf] %v5435_v14 }
 0x457   : >> { %v5438_v27 = vshrl.u32 %v5150_v7, 16  ;;  %v5441_v48 = vshll.u32 %v5150_v7, 16  ;;  %v5043_v30 = vadd.f32 %v13355_v29, %v5002_v35 }
 0x458   : >> { %v4301_v37 = vpop.f32.mrf.mxu2 }
 0x459   : >> { %v5440_v33 = vrot.slane %v5438_v27, 6  ;;  %v5443_v13 = vrot.slane %v5441_v48, 7  ;;  %v5079_v32 = vmax.f32 %v5043_v30, 0.0  ;;  %v4346_v42 = vadd.f32 %v4301_v37, %v3959_v41 }
 0x45a   : >> { %v3916_v45 = vpop.f32.mrf.mxu1 }
 0x45b   : >> { %v5444_v61 = vor.u32 %v5443_v13, %v5440_v33  ;;  %v5115_v18 = vmul.f32 %v5079_v32, %v14748_v43  ;;  %v4741_v11 = vadd.f32 %v4696_v17, %v4346_v42  ;;  %v3960_v44 = vadd.f32 %v3916_v45, %v12886_v53 }
 0x45d   : >> { %v4960_v25 = vpop.f32.mrf.mxu0  ;;  %v5445_v54 = vsel %vm11142_vm7, %v5436_v28, %v5444_v61  ;;  %v5151_v38 = vpack.c.bf16 %v5115_v18, %v5115_v18  ;;  %v5003_v57 = vadd.f32 %v4958_v3, %v4741_v11  ;;  %v5446_v56 = vrot.slane %v5444_v61, 4  ;;  %v4703_v7 = vpop.f32.mrf.mxu3  ;;  %v14751_v28 = vld [vmem:[#allocation30_spill] sm:$0xff] }
 0x45e   : >> { %5587 = vst [vmem:[%s12980_s23 + $0x78] sm:$0xf] %v5445_v54 }
 0x45f   : >> { %v5448_v6 = vshrl.u32 %v5151_v38, 16  ;;  %v5451_v5 = vshll.u32 %v5151_v38, 16  ;;  %v5044_v47 = vadd.f32 %v13355_v29, %v5003_v57  ;;  %v14752_v57 = vld [vmem:[#allocation48_spill] sm:$0xff] }
 0x460   : >> { %v4303_v20 = vpop.f32.mrf.mxu2 }
 0x461   : >> { %v5450_v2 = vrot.slane %v5448_v6, 6  ;;  %v5453_v21 = vrot.slane %v5451_v5, 7  ;;  %v5080_v26 = vmax.f32 %v5044_v47, 0.0  ;;  %v4347_v15 = vadd.f32 %v4303_v20, %v3960_v44 }
 0x463   : >> { %v5454_v0 = vor.u32 %v5453_v21, %v5450_v2  ;;  %v5116_v22 = vmul.f32 %v5080_v26, %v14749_v40  ;;  %v4742_v46 = vadd.f32 %v4698_v55, %v4347_v15 }
 0x465   : >> { %v5455_v39 = vsel %vm11142_vm7, %v5446_v56, %v5454_v0  ;;  %v5152_v50 = vpack.c.bf16 %v5116_v22, %v5116_v22  ;;  %v5004_v63 = vadd.f32 %v4960_v25, %v4742_v46  ;;  %v4963_v19 = vpop.f32.mrf.mxu0  ;;  %v5456_v9 = vrot.slane %v5454_v0, 4  ;;  %v4706_v5 = vpop.f32.mrf.mxu3  ;;  %v14753_v56 = vld [vmem:[#allocation41_spill] sm:$0xff] }
 0x466   : >> { %v3919_v49 = vpop.f32.mrf.mxu1  ;;  %5588 = vst [vmem:[%s12980_s23 + $0x7c] sm:$0xf] %v5455_v39 }
 0x467   : >> { %v5458_v53 = vshrl.u32 %v5152_v50, 16  ;;  %v5461_v52 = vshll.u32 %v5152_v50, 16  ;;  %v5045_v62 = vadd.f32 %v13355_v29, %v5004_v63  ;;  %v3961_v4 = vadd.f32 %v3919_v49, %v12898_v12 }
 0x468   : >> { %v4306_v51 = vpop.f32.mrf.mxu2 }
 0x469   : >> { %v5460_v17 = vrot.slane %v5458_v53, 6  ;;  %v5463_v34 = vrot.slane %v5461_v52, 7  ;;  %v5081_v1 = vmax.f32 %v5045_v62, 0.0  ;;  %v4348_v10 = vadd.f32 %v4306_v51, %v3961_v4  ;;  %v14754_v53 = vld [vmem:[#allocation42_spill] sm:$0xff] }
 0x46b   : >> { %v5464_v16 = vor.u32 %v5463_v34, %v5460_v17  ;;  %v5117_v31 = vmul.f32 %v5081_v1, %v14750_v24  ;;  %v4743_v36 = vadd.f32 %v4701_v60, %v4348_v10 }
 0x46d   : >> { %v5465_v58 = vsel %vm11142_vm7, %v5456_v9, %v5464_v16  ;;  %v5153_v3 = vpack.c.bf16 %v5117_v31, %v5117_v31  ;;  %v5005_v14 = vadd.f32 %v4963_v19, %v4743_v36  ;;  %v4965_v30 = vpop.f32.mrf.mxu0  ;;  %v5466_v45 = vrot.slane %v5464_v16, 4  ;;  %v4708_v1 = vpop.f32.mrf.mxu3  ;;  %v14755_v9 = vld [vmem:[#allocation40_spill] sm:$0xff] }
 0x46e   : >> { %v3921_v23 = vpop.f32.mrf.mxu1  ;;  %5589 = vst [vmem:[%s12980_s23 + $0x80] sm:$0xf] %v5465_v58 }
 0x46f   : >> { %v5468_v35 = vshrl.u32 %v5153_v3, 16  ;;  %v5471_v12 = vshll.u32 %v5153_v3, 16  ;;  %v5046_v27 = vadd.f32 %v13355_v29, %v5005_v14  ;;  %v3962_v48 = vadd.f32 %v3921_v23, %v12910_v59 }
 0x470   : >> { %v4308_v41 = vpop.f32.mrf.mxu2 }
 0x471   : >> { %v5470_v37 = vrot.slane %v5468_v35, 6  ;;  %v5473_v33 = vrot.slane %v5471_v12, 7  ;;  %v5082_v13 = vmax.f32 %v5046_v27, 0.0  ;;  %v4349_v32 = vadd.f32 %v4308_v41, %v3962_v48 }
 0x473   : >> { %v5474_v55 = vor.u32 %v5473_v33, %v5470_v37  ;;  %v5118_v61 = vmul.f32 %v5082_v13, %v14751_v28  ;;  %v4744_v43 = vadd.f32 %v4703_v7, %v4349_v32  ;;  %v14756_v37 = vld [vmem:[#allocation33_spill] sm:$0xff] }
 0x475   : >> { %v5475_v18 = vsel %vm11142_vm7, %v5466_v45, %v5474_v55  ;;  %v5154_v11 = vpack.c.bf16 %v5118_v61, %v5118_v61  ;;  %v5006_v25 = vadd.f32 %v4965_v30, %v4744_v43  ;;  %v4968_v26 = vpop.f32.mrf.mxu0  ;;  %v5476_v15 = vrot.slane %v5474_v55, 4  ;;  %v5595_v43 = vld [vmem:[%s12980_s23 + $0x98] sm:$0x3] }
 0x476   : >> { %v3924_v42 = vpop.f32.mrf.mxu1  ;;  %5590 = vst [vmem:[%s12980_s23 + $0x84] sm:$0xf] %v5475_v18 }
 0x477   : >> { %v5478_v54 = vshrl.u32 %v5154_v11, 16  ;;  %v5481_v59 = vshll.u32 %v5154_v11, 16  ;;  %v5047_v38 = vadd.f32 %v13355_v29, %v5006_v25  ;;  %v3963_v6 = vadd.f32 %v3924_v42, %v14752_v57  ;;  %v10390_v57 = vld [vmem:[%s14577_s4 + $0x68] sm:$0xff] (%p1992_p6) }
 0x478   : >> { %v4311_v47 = vpop.f32.mrf.mxu2 }
 0x479   : >> { %v5480_v44 = vrot.slane %v5478_v54, 6  ;;  %v5483_v20 = vrot.slane %v5481_v59, 7  ;;  %v5083_v2 = vmax.f32 %v5047_v38, 0.0  ;;  %v4350_v21 = vadd.f32 %v4311_v47, %v3963_v6  ;;  %v10392_v59 = vld [vmem:[%s14577_s4 + $0x78] sm:$0xff] (%p1992_p6)  ;;  %v10391_v38 = vld [vmem:[%s14577_s4 + $0x70] sm:$0xff] (%p1992_p6) }
 0x47a   : > { %10521 = vmatpush.bf16.msra.mxu1 (%p1992_p6), %v10392_v59  ;;  %10522 = vmatpush.bf16.msra.mxu2 (%p1992_p6), %v10392_v59 }
 0x47b   : >> { %v5484_v49 = vor.u32 %v5483_v20, %v5480_v44  ;;  %v5119_v0 = vmul.f32 %v5083_v2, %v14753_v56  ;;  %v4745_v40 = vadd.f32 %v4706_v5, %v4350_v21  ;;  %5976 = vmatpush.bf16.msra.mxu0 (%p1992_p6), %v10392_v59  ;;  %10523 = vmatpush.bf16.msra.mxu3 (%p1992_p6), %v10392_v59  ;;  %v10388_v5 = vld [vmem:[%s14577_s4 + $0x58] sm:$0xff] (%p1992_p6) }
 0x47d   : >> { %v5485_v46 = vsel %vm11142_vm7, %v5476_v15, %v5484_v49  ;;  %v5155_v60 = vpack.c.bf16 %v5119_v0, %v5119_v0  ;;  %v5007_v39 = vadd.f32 %v4968_v26, %v4745_v40  ;;  %v5486_v10 = vrot.slane %v5484_v49, 4  ;;  %v4970_v31 = vpop.f32.mrf.mxu0  ;;  %v10387_v26 = vld [vmem:[%s14577_s4 + $0x50] sm:$0xff] (%p1992_p6) }
 0x47e   : >> { %v3926_v22 = vpop.f32.mrf.mxu1  ;;  %5591 = vst [vmem:[%s12980_s23 + $0x88] sm:$0xf] %v5485_v46  ;;  %10524 = vmatpush.bf16.msra.mxu1 (%p1992_p6), %v10391_v38  ;;  %10525 = vmatpush.bf16.msra.mxu2 (%p1992_p6), %v10391_v38 }
 0x47f   : >> { %v5488_v50 = vshrl.u32 %v5155_v60, 16  ;;  %v5491_v63 = vshll.u32 %v5155_v60, 16  ;;  %v5048_v19 = vadd.f32 %v13355_v29, %v5007_v39  ;;  %v3964_v52 = vadd.f32 %v3926_v22, %v14754_v53  ;;  %5977 = vmatpush.bf16.msra.mxu0 (%p1992_p6), %v10391_v38  ;;  %10526 = vmatpush.bf16.msra.mxu3 (%p1992_p6), %v10391_v38  ;;  %v10386_v39 = vld [vmem:[%s14577_s4 + $0x48] sm:$0xff] (%p1992_p6)  ;;  %v10397_v38 = vld [vmem:[%s14577_s4 + $0xa0] sm:$0xff] (%p1992_p6) }
 0x480   : >> { %v4313_v62 = vpop.f32.mrf.mxu2 }
 0x481   : >> { %v5490_v4 = vrot.slane %v5488_v50, 6  ;;  %v5493_v51 = vrot.slane %v5491_v63, 7  ;;  %v5084_v17 = vmax.f32 %v5048_v19, 0.0  ;;  %v4351_v34 = vadd.f32 %v4313_v62, %v3964_v52 }
 0x482   : > { %10527 = vmatpush.bf16.msra.mxu1 (%p1992_p6), %v10390_v57  ;;  %10528 = vmatpush.bf16.msra.mxu2 (%p1992_p6), %v10390_v57 }
 0x483   : >> { %v5494_v23 = vor.u32 %v5493_v51, %v5490_v4  ;;  %v5120_v16 = vmul.f32 %v5084_v17, %v14755_v9  ;;  %v4746_v24 = vadd.f32 %v4708_v1, %v4351_v34  ;;  %5978 = vmatpush.bf16.msra.mxu0 (%p1992_p6), %v10390_v57  ;;  %10529 = vmatpush.bf16.msra.mxu3 (%p1992_p6), %v10390_v57  ;;  %v10385_v1 = vld [vmem:[%s14577_s4 + $0x40] sm:$0xff] (%p1992_p6) }
 0x484   : > { %v10381_v57 = vld [vmem:[%s14577_s4 + $0x20] sm:$0xff] (%p1992_p6) }
 0x485   : >> { %v5495_v36 = vsel %vm11142_vm7, %v5486_v10, %v5494_v23  ;;  %v5156_v58 = vpack.c.bf16 %v5120_v16, %v5120_v16  ;;  %v5008_v3 = vadd.f32 %v4970_v31, %v4746_v24  ;;  %v5496_v30 = vrot.slane %v5494_v23, 4  ;;  %v10400_v24 = vld [vmem:[%s14577_s4 + $0xb8] sm:$0xff] (%p1992_p6) }
 0x486   : >> { %5592 = vst [vmem:[%s12980_s23 + $0x8c] sm:$0xf] %v5495_v36  ;;  %10530 = vmatpush.bf16.msra.mxu1 (%p1992_p6), %v10389_v8  ;;  %10531 = vmatpush.bf16.msra.mxu2 (%p1992_p6), %v10389_v8 }
 0x487   : >> { %v5498_v14 = vshrl.u32 %v5156_v58, 16  ;;  %v5501_v7 = vshll.u32 %v5156_v58, 16  ;;  %v5049_v35 = vadd.f32 %v13355_v29, %v5008_v3  ;;  %5979 = vmatpush.bf16.msra.mxu0 (%p1992_p6), %v10389_v8  ;;  %10532 = vmatpush.bf16.msra.mxu3 (%p1992_p6), %v10389_v8  ;;  %v10384_v58 = vld [vmem:[%s14577_s4 + $0x38] sm:$0xff] (%p1992_p6)  ;;  %v10430_v8 = vld [vmem:[%s14577_s4 + $0x120] sm:$0xff] (%p1992_p6) }
 0x488   : > { %v10433_v3 = vld [vmem:[%s14577_s4 + $0x138] sm:$0xff] (%p1992_p6) }
 0x489   : >> { %v5500_v12 = vrot.slane %v5498_v14, 6  ;;  %v5503_v27 = vrot.slane %v5501_v7, 7  ;;  %v5085_v48 = vmax.f32 %v5049_v35, 0.0 }
 0x48a   : > { %10533 = vmatpush.bf16.msra.mxu1 (%p1992_p6), %v10388_v5  ;;  %10534 = vmatpush.bf16.msra.mxu2 (%p1992_p6), %v10388_v5 }
 0x48b   : >> { %v5504_v41 = vor.u32 %v5503_v27, %v5500_v12  ;;  %v5121_v33 = vmul.f32 %v5085_v48, %v14756_v37  ;;  %5980 = vmatpush.bf16.msra.mxu0 (%p1992_p6), %v10388_v5  ;;  %10535 = vmatpush.bf16.msra.mxu3 (%p1992_p6), %v10388_v5  ;;  %v10399_v48 = vld [vmem:[%s14577_s4 + $0xb0] sm:$0xff] (%p1992_p6) }
 0x48d   : >> { %v5505_v13 = vsel %vm11142_vm7, %v5496_v30, %v5504_v41  ;;  %v5157_v32 = vpack.c.bf16 %v5121_v33, %v5121_v33  ;;  %v5506_v29 = vrot.slane %v5504_v41, 4  ;;  %v10383_v30 = vld [vmem:[%s14577_s4 + $0x30] sm:$0xff] (%p1992_p6) }
 0x48e   : >> { %5593 = vst [vmem:[%s12980_s23 + $0x90] sm:$0xf] %v5505_v13  ;;  %10536 = vmatpush.bf16.msra.mxu1 (%p1992_p6), %v10387_v26  ;;  %10537 = vmatpush.bf16.msra.mxu2 (%p1992_p6), %v10387_v26  ;;  %v10432_v41 = vld [vmem:[%s14577_s4 + $0x130] sm:$0xff] (%p1992_p6) }
 0x48f   : >> { %v5508_v42 = vshrl.u32 %v5157_v32, 16  ;;  %v5511_v45 = vshll.u32 %v5157_v32, 16  ;;  %5981 = vmatpush.bf16.msra.mxu0 (%p1992_p6), %v10387_v26  ;;  %10538 = vmatpush.bf16.msra.mxu3 (%p1992_p6), %v10387_v26  ;;  %v10425_v32 = vld [vmem:[%s14577_s4 + $0xf8] sm:$0xff] (%p1992_p6) }
 0x491   : >> { %v5510_v55 = vrot.slane %v5508_v42, 6  ;;  %v5513_v28 = vrot.slane %v5511_v45, 7  ;;  %v10398_v45 = vld [vmem:[%s14577_s4 + $0xa8] sm:$0xff] (%p1992_p6) }
 0x492   : > { %10539 = vmatpush.bf16.msra.mxu1 (%p1992_p6), %v10386_v39  ;;  %10540 = vmatpush.bf16.msra.mxu2 (%p1992_p6), %v10386_v39 }
 0x493   : >> { %v5514_v61 = vor.u32 %v5513_v28, %v5510_v55  ;;  %5982 = vmatpush.bf16.msra.mxu0 (%p1992_p6), %v10386_v39  ;;  %10541 = vmatpush.bf16.msra.mxu3 (%p1992_p6), %v10386_v39  ;;  %v10382_v55 = vld [vmem:[%s14577_s4 + $0x28] sm:$0xff] (%p1992_p6)  ;;  %v10396_v39 = vld [vmem:[%s14577_s4 + $0x98] sm:$0xff] (%p1992_p6) }
 0x494   : > { %1994 = sbr.rel (!%p1992_p6) target bundleno = 338 (0x152), region = 109  ;;  %v10431_v28 = vld [vmem:[%s14577_s4 + $0x128] sm:$0xff] (%p1992_p6) }
 0x495   : >> { %v5515_v18 = vsel %vm11142_vm7, %v5506_v29, %v5514_v61  ;;  %v5516_v11 = vrot.slane %v5514_v61, 4 }
 0x496   : >> { %5594 = vst [vmem:[%s12980_s23 + $0x94] sm:$0xf] %v5515_v18  ;;  %10542 = vmatpush.bf16.msra.mxu1 (%p1992_p6), %v10385_v1  ;;  %10543 = vmatpush.bf16.msra.mxu2 (%p1992_p6), %v10385_v1 }
 0x497   : >> { %v5596_v54 = vsel %vm11022_vm2, %v5516_v11, %v5595_v43  ;;  %5983 = vmatpush.bf16.msra.mxu0 (%p1992_p6), %v10385_v1  ;;  %10544 = vmatpush.bf16.msra.mxu3 (%p1992_p6), %v10385_v1  ;;  %v10424_v11 = vld [vmem:[%s14577_s4 + $0xf0] sm:$0xff] (%p1992_p6) }
 0x498   : >> { %5597 = vst [vmem:[%s12980_s23 + $0x98] sm:$0x3] %v5596_v54 }
 0x49a   : > { %6365 = vmatpush.bf16.msrb.mxu2 %v10400_v24  ;;  %6141 = vmatpush.bf16.msrb.mxu1 %v10384_v58  ;;  %v10394_v58 = vld [vmem:[%s14577_s4 + $0x88] sm:$0xff] }
 0x49b   : > { %7143 = vmatpush.bf16.msrb.mxu0 %v10433_v3  ;;  %6750 = vmatpush.bf16.msrb.mxu3 %v10425_v32  ;;  %v10428_v3 = vld [vmem:[%s14577_s4 + $0x110] sm:$0xff] }
 0x49e   : > { %6366 = vmatpush.bf16.msrb.mxu2 %v10399_v48  ;;  %6142 = vmatpush.bf16.msrb.mxu1 %v10383_v30  ;;  %v10421_v48 = vld [vmem:[%s14577_s4 + $0xd8] sm:$0xff] }
 0x49f   : > { %v13486_v6 = vld [vmem:[#allocation2 + $0x28] sm:$0xff]  ;;  %v13491_v47 = vld [vmem:[#allocation2 + $0x50] sm:$0xff]  ;;  %v13493_v44 = vld [vmem:[#allocation2] sm:$0xff]   ;;  %7144 = vmatpush.bf16.msrb.mxu0 %v10432_v41  ;;  %6751 = vmatpush.bf16.msrb.mxu3 %v10424_v11 }
 0x4a0   : > { %v13495_v20 = vld [vmem:[#allocation2 + $0x30] sm:$0xff]  ;;  %v5802_v2 = vshll.u32 %v13486_v6, 16  ;;  %v13498_v21 = vld [vmem:[#allocation2 + $0x58] sm:$0xff]  ;;  %v5842_v15 = vshll.u32 %v13491_v47, 16  ;;  %v13504_v49 = vld [vmem:[#allocation2 + $0x8] sm:$0xff]  ;;  %v5765_v56 = vshll.u32 %v13493_v44, 16 }
 0x4a1   : > { %v10374_v0 = vld [vmem:[#allocation2 + $0x78] sm:$0xff]  ;;  %v5806_v22 = vshrl.u32 %v13486_v6, 16  ;;  %v5810_v46 = vshll.u32 %v13495_v20, 16  ;;  %v5850_v60 = vshll.u32 %v13498_v21, 16  ;;  %v5846_v63 = vshrl.u32 %v13491_v47, 16  ;;  %v13518_v19 = vld [vmem:[#allocation2 + $0x80] sm:$0xff] }
 0x4a2   : > { %v13507_v40 = vrot.slane %v5802_v2, 1  ;;  %v13515_v50 = vrot.slane %v5842_v15, 1  ;;  %v5882_v53 = vshll.u32 %v10374_v0, 16  ;;  %v5763_v52 = vshrl.u32 %v13493_v44, 16  ;;  %v13552_v37 = vld [vmem:[#allocation2 + $0x38] sm:$0xff]  ;;  %v13554_v33 = vld [vmem:[#allocation2 + $0x60] sm:$0xff]  ;;  %6367 = vmatpush.bf16.msrb.mxu2 %v10398_v45  ;;  %6143 = vmatpush.bf16.msrb.mxu1 %v10382_v55 }
 0x4a3   : > { %v5767_v62 = vrot.slane %v5765_v56, 1  ;;  %v5770_v4 = vshll.u32 %v13504_v49, 16  ;;  %v5812_v17 = vrot.slane %v5810_v46, 1  ;;  %v5852_v34 = vrot.slane %v5850_v60, 1  ;;  %v13560_v42 = vld [vmem:[#allocation2 + $0x10] sm:$0xff]  ;;  %v13578_v25 = vld [vmem:[#allocation2 + $0x88] sm:$0xff]  ;;  %7145 = vmatpush.bf16.msrb.mxu0 %v10431_v28 }
 0x4a4   : > { %v5808_v51 = vor.u32 %v5806_v22, %v13507_v40  ;;  %v5848_v10 = vor.u32 %v5846_v63, %v13515_v50  ;;  %v13527_v23 = vrot.slane %v5882_v53, 1  ;;  %v5886_v9 = vshrl.u32 %v10374_v0, 16  ;;  %v10423_v22 = vld [vmem:[%s14577_s4 + $0xe8] sm:$0xff]  ;;  %v10380_v63 = vld [vmem:[%s14577_s4 + $0x18] sm:$0xff] }
 0x4a5   : > { %v5890_v16 = vshll.u32 %v13518_v19, 16  ;;  %v5768_v31 = vor.u32 %v5767_v62, %v5763_v52  ;;  %v5772_v36 = vrot.slane %v5770_v4, 1  ;;  %v5814_v29 = vshrl.u32 %v13495_v20, 16  ;;  %6752 = vmatpush.bf16.msrb.mxu3 %v10423_v22  ;;  %v10377_v22 = vld [vmem:[%s14577_s4] sm:$0xff] }
 0x4a6   : > { %v5813_v14 = vsel %vm2180_vm8, %v5808_v51, %v5812_v17  ;;  %v5853_v7 = vsel %vm2180_vm8, %v5848_v10, %v5852_v34  ;;  %v5888_v35 = vor.u32 %v5886_v9, %v13527_v23  ;;  %v5818_v61 = vshll.u32 %v13552_v37, 16  ;;  %6368 = vmatpush.bf16.msrb.mxu2 %v10397_v38  ;;  %6144 = vmatpush.bf16.msrb.mxu1 %v10381_v57  ;;  %v13605_v51 = vld [vmem:[#allocation2 + $0x40] sm:$0xff]  ;;  %v10395_v10 = vld [vmem:[%s14577_s4 + $0x90] sm:$0xff]  ;;  %v10429_v9 = vld [vmem:[%s14577_s4 + $0x118] sm:$0xff] }
 0x4a7   : > { %v5892_v12 = vrot.slane %v5890_v16, 1  ;;  %v5773_v27 = vsel %vm2180_vm8, %v5768_v31, %v5772_v36  ;;  %6009 = vmatmul.bf16.vlgmr.msra.gmra.mxu1 %v5813_v14  ;;  %6034 = vmatmul.bf16.vlgmr.msra.gmra.mxu2 %v5853_v7  ;;  %v5854_v43 = vshrl.u32 %v13498_v21, 16  ;;  %v5858_v18 = vshll.u32 %v13554_v33, 16  ;;  %v10422_v16 = vld [vmem:[%s14577_s4 + $0xe0] sm:$0xff]  ;;  %v13619_v31 = vld [vmem:[#allocation2 + $0x18] sm:$0xff] }
 0x4a8   : > { %5984 = vmatmul.bf16.vlgmr.msra.gmra.mxu0 %v5773_v27  ;;  %v5774_v54 = vshrl.u32 %v13504_v49, 16  ;;  %v5778_v59 = vshll.u32 %v13560_v42, 16  ;;  %v5816_v5 = vor.u32 %v5814_v29, %v5812_v17  ;;  %v5820_v2 = vrot.slane %v5818_v61, 1  ;;  %v13607_v17 = vld [vmem:[#allocation2 + $0x68] sm:$0xff]  ;;  %v10420_v61 = vld [vmem:[%s14577_s4 + $0xd0] sm:$0xff] }
 0x4a9   : > { %v5893_v13 = vsel %vm2180_vm8, %v5888_v35, %v5892_v12  ;;  %v5856_v26 = vor.u32 %v5854_v43, %v5852_v34  ;;  %v5860_v15 = vrot.slane %v5858_v18, 1  ;;  %v5894_v56 = vshrl.u32 %v13518_v19, 16  ;;  %7146 = vmatpush.bf16.msrb.mxu0 %v10430_v8  ;;  %v5650_v34 = vld [vmem:[#allocation2 + $0x90] sm:$0x1]  ;;  %6753 = vmatpush.bf16.msrb.mxu3 %v10422_v16 }
 0x4aa   : > { %6059 = vmatmul.bf16.vlgmr.msra.gmra.mxu3 %v5893_v13  ;;  %v5898_v0 = vshll.u32 %v13578_v25, 16  ;;  %v5776_v46 = vor.u32 %v5774_v54, %v5772_v36  ;;  %v5780_v60 = vrot.slane %v5778_v59, 1  ;;  %v5821_v19 = vsel %vm2180_vm8, %v5816_v5, %v5820_v2  ;;  %6369 = vmatpush.bf16.msrb.mxu2 %v10396_v39  ;;  %v10379_v36 = vld [vmem:[%s14577_s4 + $0x10] sm:$0xff]  ;;  %v10378_v5 = vld [vmem:[%s14577_s4 + $0x8] sm:$0xff] }
 0x4ab   : > { %v5861_v53 = vsel %vm2180_vm8, %v5856_v26, %v5860_v15  ;;  %v5896_v52 = vor.u32 %v5894_v56, %v5892_v12  ;;  %6145 = vmatpush.bf16.msrb.mxu1 %v10380_v63  ;;  %v5741_v24 = vunpack.c.l.b16 %v5650_v34  ;;  %v5822_v14 = vshrl.u32 %v13552_v37, 16  ;;  %v13651_v8 = vld [vmem:[#allocation2 + $0x70] sm:$0xff]  ;;  %v10419_v26 = vld [vmem:[%s14577_s4 + $0xc8] sm:$0xff] }
 0x4ac   : > { %v5900_v62 = vrot.slane %v5898_v0, 1  ;;  %v5781_v4 = vsel %vm2180_vm8, %v5776_v46, %v5780_v60  ;;  %v5826_v7 = vshll.u32 %v13605_v51, 16  ;;  %v5862_v35 = vshrl.u32 %v13554_v33, 16  ;;  %v10427_v56 = vld [vmem:[%s14577_s4 + $0x108] sm:$0xff]  ;;  %v13666_v0 = vld [vmem:[#allocation2 + $0x20] sm:$0xff] }
 0x4ad   : > { %7147 = vmatpush.bf16.msrb.mxu0 %v10429_v9  ;;  %v5866_v12 = vshll.u32 %v13607_v17, 16  ;;  %v13634_v27 = vpack.c.b16 %v5741_v24, %v5741_v24  ;;  %v5782_v30 = vshrl.u32 %v13560_v42, 16  ;;  %v5786_v41 = vshll.u32 %v13619_v31, 16  ;;  %6754 = vmatpush.bf16.msrb.mxu3 %v10421_v48  ;;  %v6500_v46 = vld [vmem:[#allocation2 + $0x8] sm:$0xe] }
 0x4ae   : > { %v5901_v1 = vsel %vm2180_vm8, %v5896_v52, %v5900_v62  ;;  %6370 = vmatpush.bf16.msrb.mxu2 %v10395_v10  ;;  %v5824_v13 = vor.u32 %v5822_v14, %v5820_v2  ;;  %v5828_v32 = vrot.slane %v5826_v7, 1  ;;  %v5864_v45 = vor.u32 %v5862_v35, %v5860_v15  ;;  %v10393_v15 = vld [vmem:[%s14577_s4 + $0x80] sm:$0xff]  ;;  %v13674_v39 = vld [vmem:[#allocation2 + $0xc] sm:$0xf] }
 0x4af   : > { %6146 = vmatpush.bf16.msrb.mxu1 %v10379_v36  ;;  %v5868_v55 = vrot.slane %v5866_v12, 1  ;;  %v5902_v28 = vshrl.u32 %v13578_v25, 16  ;;  %v5906_v29 = vshll.u32 %v13634_v27, 16  ;;  %v5784_v43 = vor.u32 %v5782_v30, %v5780_v60  ;;  %v13649_v25 = vld [vmem:[#allocation2 + $0x48] sm:$0xff]  ;;  %v10418_v60 = vld [vmem:[%s14577_s4 + $0xc0] sm:$0xff] }
 0x4b0   : > { %v5788_v18 = vrot.slane %v5786_v41, 1  ;;  %v5829_v11 = vsel %vm2180_vm8, %v5824_v13, %v5828_v32  ;;  %v5830_v63 = vshrl.u32 %v13605_v51, 16  ;;  %v5870_v52 = vshrl.u32 %v13607_v17, 16  ;;  %v10466_v13 = vld [vmem:[%s14577_s4 + $0x1b8] sm:$0xff] }
 0x4b1   : > { %7148 = vmatpush.bf16.msrb.mxu0 %v10428_v3  ;;  %v5869_v54 = vsel %vm2180_vm8, %v5864_v45, %v5868_v55  ;;  %v5904_v59 = vor.u32 %v5902_v28, %v5900_v62  ;;  %v5908_v38 = vrot.slane %v5906_v29, 1  ;;  %6755 = vmatpush.bf16.msrb.mxu3 %v10420_v61  ;;  %v5874_v62 = vshll.u32 %v13651_v8, 16  ;;  %v10474_v45 = vld [vmem:[%s14577_s4 + $0x1f8] sm:$0xff] }
 0x4b2   : > { %6371 = vmatpush.bf16.msrb.mxu2 %v10394_v58  ;;  %v5789_v57 = vsel %vm2180_vm8, %v5784_v43, %v5788_v18  ;;  %v14627_v34 = vunpack.c.l.b16 %v13674_v39  ;;  %v5794_v10 = vshll.u32 %v13666_v0, 16  ;;  %v5832_v9 = vor.u32 %v5830_v63, %v5828_v32  ;;  %v10401_v58 = vld [vmem:[#allocation2 + $0x10] sm:$0xff]  ;;  %v10482_v28 = vld [vmem:[%s14577_s4 + $0x238] sm:$0xff] }
 0x4b3   : > { %v5909_v2 = vsel %vm2180_vm8, %v5904_v59, %v5908_v38  ;;  %6147 = vmatpush.bf16.msrb.mxu1 %v10378_v5  ;;  %v5872_v24 = vor.u32 %v5870_v52, %v5868_v55  ;;  %v5876_v36 = vrot.slane %v5874_v62, 1  ;;  %v6648_v30 = vrot.slane %v10401_v58, 1  ;;  %v10441_v55 = vld [vmem:[%s14577_s4 + $0x178] sm:$0xff] }
 0x4b4   : > { %v5796_v7 = vrot.slane %v5794_v10, 1  ;;  %v5838_v29 = vshrl.u32 %v13649_v25, 16  ;;  %v5878_v61 = vshrl.u32 %v13651_v8, 16  ;;  %v5798_v43 = vshrl.u32 %v13666_v0, 16 }
 0x4b5   : > { %6756 = vmatpush.bf16.msrb.mxu3 %v10419_v26  ;;  %7149 = vmatpush.bf16.msrb.mxu0 %v10427_v56  ;;  %v5877_v12 = vsel %vm2180_vm8, %v5872_v24, %v5876_v36  ;;  %v10494_v26 = vld [vmem:[#allocation2] sm:$0xf0]  ;;  %v10495_v56 = vld [vmem:[#allocation2] sm:$0xe]  ;;  %v6919_v63 = vshll.u32 %v10401_v58, 16 }
 0x4b6   : > { %6372 = vmatpush.bf16.msrb.mxu2 %v10393_v15  ;;  %v5800_v59 = vor.u32 %v5798_v43, %v5796_v7 }
 0x4b7   : > { %6014 = vmatmul.bf16.gmra.mxu1 %v5821_v19  ;;  %6039 = vmatmul.bf16.gmra.mxu2 %v5861_v53  ;;  %v5834_v19 = vshll.u32 %v13649_v25, 16  ;;  %v10426_v53 = vld [vmem:[%s14577_s4 + $0x100] sm:$0xff]  ;;  %v6921_v52 = vrot.slane %v6919_v63, 2 }
 0x4b8   : > { %5989 = vmatmul.bf16.gmra.mxu0 %v5781_v4  ;;  %v6591_v4 = vunpack.c.l.b16 %v6500_v46  ;;  %6148 = vmatpush.bf16.msrb.mxu1 %v10377_v22 }
 0x4b9   : > { %6757 = vmatpush.bf16.msrb.mxu3 %v10418_v60  ;;  %7150 = vmatpush.bf16.msrb.mxu0 %v10426_v53  ;;  %v5836_v16 = vrot.slane %v5834_v19, 1  ;;  %v6916_v60 = vshrl.u32 %v10401_v58, 16  ;;  %v10465_v58 = vld [vmem:[%s14577_s4 + $0x1b0] sm:$0xff] }
 0x4ba   : > { %6064 = vmatmul.bf16.gmra.mxu3 %v5901_v1  ;;  %v5790_v1 = vshrl.u32 %v13619_v31, 16  ;;  %v6628_v3 = vpack.c.b16 %v14627_v34, %v6591_v4  ;;  %7788 = vmatpush.bf16.msra.mxu2 %v10466_v13  ;;  %v10403_v4 = vld [vmem:[#allocation2 + $0x20] sm:$0xff] }
 0x4bb   : > { %v5837_v35 = vsel %vm2180_vm8, %v5832_v9, %v5836_v16 }
 0x4bc   : > { %v5792_v14 = vor.u32 %v5790_v1, %v5788_v18  ;;  %v6647_v48 = vrot.slane %v6628_v3, 1  ;;  %7403 = vmatpush.bf16.msra.mxu1 %v10441_v55  ;;  %v5840_v18 = vor.u32 %v5838_v29, %v5836_v16  ;;  %v6908_v22 = vshrl.u32 %v6628_v3, 16 }
 0x4bd   : > { %8181 = vmatpush.bf16.msra.mxu3 %v10474_v45  ;;  %8441 = vmatpush.bf16.msra.mxu0 %v10482_v28  ;;  %v6911_v46 = vshll.u32 %v6628_v3, 16  ;;  %v6652_v16 = vrot.slane %v10403_v4, 1  ;;  %v10473_v3 = vld [vmem:[%s14577_s4 + $0x1f0] sm:$0xff]  ;;  %v6934_v29 = vshrl.u32 %v10403_v4, 16 }
 0x4be   : > { %v5797_v41 = vsel %vm2180_vm8, %v5792_v14, %v5796_v7  ;;  %v6649_v32 = vsel %vm2682_vm9, %v6647_v48, %v6648_v30  ;;  %v5845_v38 = vsel %vm2180_vm8, %v5840_v18, %v13515_v50  ;;  %v10496_v50 = vor.u32 %v10495_v56, %v10494_v26  ;;  %v10440_v14 = vld [vmem:[%s14577_s4 + $0x170] sm:$0xff]  ;;  %7789 = vmatpush.bf16.msra.mxu2 %v10465_v58 }
 0x4bf   : > { %v6910_v19 = vrot.slane %v6908_v22, 1  ;;  %v6913_v53 = vrot.slane %v6911_v46, 2  ;;  %v6265_v48 = vrot.slane %v13560_v42, 1  ;;  %v10481_v45 = vld [vmem:[%s14577_s4 + $0x230] sm:$0xff]  ;;  %v6936_v43 = vrot.slane %v6934_v29, 1  ;;  %v10464_v22 = vld [vmem:[%s14577_s4 + $0x1a8] sm:$0xff] }
 0x4c0   : > { %v6262_v62 = vrot.slane %v10496_v50, 1  ;;  %7404 = vmatpush.bf16.msra.mxu1 %v10440_v14  ;;  %v10472_v46 = vld [vmem:[%s14577_s4 + $0x1e8] sm:$0xff]  ;;  %v10407_v14 = vld [vmem:[#allocation2 + $0x40] sm:$0xff] }
 0x4c1   : > { %v6914_v1 = vor.u32 %v6913_v53, %v6910_v19  ;;  %8182 = vmatpush.bf16.msra.mxu3 %v10473_v3  ;;  %8442 = vmatpush.bf16.msra.mxu0 %v10481_v45  ;;  %v10439_v50 = vld [vmem:[%s14577_s4 + $0x168] sm:$0xff]  ;;  %v6271_v3 = vrot.slane %v13486_v6, 1 }
 0x4c2   : > { %7790 = vmatpush.bf16.msra.mxu2 %v10464_v22 }
 0x4c4   : > { %7405 = vmatpush.bf16.msra.mxu1 %v10439_v50 }
 0x4c5   : > { %8183 = vmatpush.bf16.msra.mxu3 %v10472_v46  ;;  %v10438_v46 = vld [vmem:[%s14577_s4 + $0x160] sm:$0xff] }
 0x4c7   : > { %6019 = vmatmul.bf16.gmra.mxu1 %v5829_v11  ;;  %6044 = vmatmul.bf16.gmra.mxu2 %v5869_v54  ;;  %v5880_v11 = vor.u32 %v5878_v61, %v5876_v36  ;;  %v10402_v54 = vld [vmem:[#allocation2 + $0x18] sm:$0xff]  ;;  %v6937_v61 = vshll.u32 %v10403_v4, 16  ;;  %v10480_v4 = vld [vmem:[%s14577_s4 + $0x228] sm:$0xff] }
 0x4c8   : > { %5994 = vmatmul.bf16.gmra.mxu0 %v5789_v57  ;;  %v6650_v5 = vrot.slane %v10402_v54, 1  ;;  %v6925_v7 = vshrl.u32 %v10402_v54, 16  ;;  %7406 = vmatpush.bf16.msra.mxu1 %v10438_v46 }
 0x4c9   : > { %v5885_v57 = vsel %vm2180_vm8, %v5880_v11, %v13527_v23  ;;  %v6918_v23 = vrot.slane %v6916_v60, 1  ;;  %v6939_v18 = vrot.slane %v6937_v61, 2  ;;  %v6267_v11 = vrot.slane %v13619_v31, 1  ;;  %v10406_v60 = vld [vmem:[#allocation2 + $0x38] sm:$0xff]  ;;  %8443 = vmatpush.bf16.msra.mxu0 %v10480_v4 }
 0x4ca   : > { %6069 = vmatmul.bf16.gmra.mxu3 %v5909_v2  ;;  %v5805_v2 = vsel %vm2180_vm8, %v5800_v59, %v13507_v40  ;;  %v6651_v15 = vsel %vm2682_vm9, %v6648_v30, %v6650_v5  ;;  %v6263_v40 = vrot.slane %v13504_v49, 1  ;;  %v6653_v36 = vsel %vm2682_vm9, %v6650_v5, %v6652_v16  ;;  %v10404_v30 = vld [vmem:[#allocation2 + $0x28] sm:$0xff] }
 0x4cb   : > { %v6922_v10 = vor.u32 %v6921_v52, %v6918_v23  ;;  %v6940_v59 = vor.u32 %v6939_v18, %v6936_v43  ;;  %v6946_v26 = vshll.u32 %v10404_v30, 16  ;;  %v6658_v23 = vrot.slane %v10406_v60, 1 }
 0x4cc   : > { %v6264_v9 = vsel %vm2682_vm9, %v6262_v62, %v6263_v40  ;;  %v6266_v13 = vsel %vm2682_vm9, %v6263_v40, %v6265_v48  ;;  %v6961_v45 = vshrl.u32 %v10406_v60, 16 }
 0x4cd   : > { %v6923_v24 = vsel %vm3331_vm10, %v6914_v1, %v6922_v10  ;;  %v6948_v56 = vrot.slane %v6946_v26, 2  ;;  %v10471_v26 = vld [vmem:[%s14577_s4 + $0x1e0] sm:$0xff] }
 0x4ce   : > { %v6963_v43 = vrot.slane %v6961_v45, 1  ;;  %8184 = vmatpush.bf16.msra.mxu3 %v10471_v26  ;;  %v6277_v26 = vrot.slane %v13605_v51, 1 }
 0x4d7   : > { %6024 = vmatmul.bf16.gmra.mxu1 %v5837_v35  ;;  %6049 = vmatmul.bf16.gmra.mxu2 %v5877_v12  ;;  %v6928_v35 = vshll.u32 %v10402_v54, 16  ;;  %v10405_v54 = vld [vmem:[#allocation2 + $0x30] sm:$0xff] }
 0x4d8   : > { %5999 = vmatmul.bf16.gmra.mxu0 %v5797_v41  ;;  %v6952_v1 = vshrl.u32 %v10405_v54, 16 }
 0x4d9   : > { %v6930_v12 = vrot.slane %v6928_v35, 2 }
 0x4da   : > { %6758 = vmatmul.bf16.vlgmr.msrb.gmra.mxu3 %v6649_v32  ;;  %v6654_v32 = vrot.slane %v10404_v30, 1 }
 0x4dc   : > { %v6655_v28 = vsel %vm2682_vm9, %v6652_v16, %v6654_v32 }
 0x4e7   : > { %6029 = vmatmul.bf16.gmra.mxu1 %v5845_v38  ;;  %6054 = vmatmul.bf16.gmra.mxu2 %v5885_v57  ;;  %v6268_v38 = vsel %vm2682_vm9, %v6265_v48, %v6267_v11  ;;  %v6656_v57 = vrot.slane %v10405_v54, 1  ;;  %v6660_v48 = vrot.slane %v10407_v14, 1 }
 0x4e8   : > { %6004 = vmatmul.bf16.gmra.mxu0 %v5805_v2  ;;  %v6943_v2 = vshrl.u32 %v10404_v30, 16 }
 0x4e9   : > { %v6659_v40 = vsel %vm2682_vm9, %v6656_v57, %v6658_v23 }
 0x4ea   : > { %6763 = vmatmul.bf16.gmra.mxu3 %v6651_v15  ;;  %v6945_v15 = vrot.slane %v6943_v2, 1 }
 0x4ec   : > { %v6949_v63 = vor.u32 %v6948_v56, %v6945_v15 }
 0x4ee   : > { %v6950_v62 = vsel %vm3331_vm10, %v6940_v59, %v6949_v63 }
 0x4f7   : > { %6149 = vmatmul.bf16.vlgmr.msrb.gmra.mxu1 %v13493_v44  ;;  %6373 = vmatmul.bf16.vlgmr.msrb.gmra.mxu2 %v6264_v9  ;;  %v6927_v44 = vrot.slane %v6925_v7, 1 }
 0x4f8   : > { %7151 = vmatmul.bf16.vlgmr.msrb.gmra.mxu0 %v6923_v24 }
 0x4f9   : > { %v6931_v41 = vor.u32 %v6930_v12, %v6927_v44 }
 0x4fa   : > { %6768 = vmatmul.bf16.gmra.mxu3 %v6653_v36  ;;  %v6954_v36 = vrot.slane %v6952_v1, 1  ;;  %v6275_v1 = vrot.slane %v13552_v37, 1 }
 0x4fb   : > { %v6932_v55 = vsel %vm3331_vm10, %v6922_v10, %v6931_v41  ;;  %v6941_v5 = vsel %vm3331_vm10, %v6931_v41, %v6940_v59  ;;  %v6955_v10 = vshll.u32 %v10405_v54, 16  ;;  %v6273_v54 = vrot.slane %v13495_v20, 1 }
 0x507   : > { %6154 = vmatmul.bf16.gmra.mxu1 %v13504_v49  ;;  %6378 = vmatmul.bf16.gmra.mxu2 %v6266_v13  ;;  %v6657_v49 = vsel %vm2682_vm9, %v6654_v32, %v6656_v57  ;;  %v6661_v32 = vsel %vm2682_vm9, %v6658_v23, %v6660_v48  ;;  %v10463_v57 = vld [vmem:[%s14577_s4 + $0x1a0] sm:$0xff] }
 0x508   : > { %7156 = vmatmul.bf16.gmra.mxu0 %v6932_v55  ;;  %v6964_v55 = vshll.u32 %v10406_v60, 16  ;;  %7791 = vmatpush.bf16.msra.mxu2 %v10463_v57  ;;  %v6970_v60 = vshrl.u32 %v10407_v14, 16 }
 0x50a   : > { %6773 = vmatmul.bf16.gmra.mxu3 %v6655_v28  ;;  %v6966_v18 = vrot.slane %v6964_v55, 2 }
 0x50c   : > { %v6967_v59 = vor.u32 %v6966_v18, %v6963_v43 }
 0x517   : > { %6159 = vmatmul.bf16.gmra.mxu1 %v13560_v42  ;;  %6383 = vmatmul.bf16.gmra.mxu2 %v6268_v38  ;;  %v6269_v42 = vrot.slane %v13666_v0, 1 }
 0x518   : > { %7161 = vmatmul.bf16.gmra.mxu0 %v6941_v5 }
 0x519   : > { %v6270_v53 = vsel %vm2682_vm9, %v6267_v11, %v6269_v42  ;;  %v6272_v12 = vsel %vm2682_vm9, %v6269_v42, %v6271_v3 }
 0x51a   : > { %6778 = vmatmul.bf16.gmra.mxu3 %v6657_v49  ;;  %v6274_v49 = vsel %vm2682_vm9, %v6271_v3, %v6273_v54 }
 0x524   : > { %v13751_v19 = vpop.f32.mrf.mxu1 }
 0x525   : > { %v13754_v52 = vpop.f32.mrf.mxu0 }
 0x527   : > { %6164 = vmatmul.bf16.gmra.mxu1 %v13619_v31  ;;  %6388 = vmatmul.bf16.gmra.mxu2 %v6270_v53  ;;  %v6957_v31 = vrot.slane %v6955_v10, 2  ;;  %v10409_v10 = vld [vmem:[#allocation2 + $0x50] sm:$0xff] }
 0x528   : > { %7166 = vmatmul.bf16.gmra.mxu0 %v6950_v62  ;;  %v6972_v62 = vrot.slane %v6970_v60, 1 }
 0x529   : > { %v6958_v7 = vor.u32 %v6957_v31, %v6954_v36 }
 0x52a   : > { %v13762_v9 = vpop.f32.mrf.mxu2  ;;  %6783 = vmatmul.bf16.gmra.mxu3 %v6659_v40 }
 0x52b   : > { %v6959_v41 = vsel %vm3331_vm10, %v6949_v63, %v6958_v7  ;;  %v6968_v56 = vsel %vm3331_vm10, %v6958_v7, %v6967_v59  ;;  %v6973_v63 = vshll.u32 %v10407_v14, 16  ;;  %v6276_v14 = vsel %vm2682_vm9, %v6273_v54, %v6275_v1 }
 0x52c   : > { %v13764_v16 = vpop.f32.mrf.mxu1  ;;  %v6664_v7 = vrot.slane %v10409_v10, 1 }
 0x52d   : > { %v13766_v24 = vpop.f32.mrf.mxu0  ;;  %v13768_v58 = vpop.f32.mrf.mxu3  ;;  %v6975_v40 = vrot.slane %v6973_v63, 2 }
 0x52e   : > { %14758 = vst [vmem:[#allocation3_spill] sm:$0xff] %v13768_v58 }
 0x52f   : > { %v6976_v36 = vor.u32 %v6975_v40, %v6972_v62  ;;  %v10462_v62 = vld [vmem:[%s14577_s4 + $0x198] sm:$0xff] }
 0x530   : > { %7792 = vmatpush.bf16.msra.mxu2 %v10462_v62 }
 0x532   : > { %v13771_v35 = vpop.f32.mrf.mxu2 }
 0x534   : > { %v13773_v44 = vpop.f32.mrf.mxu1 }
 0x535   : > { %v13776_v30 = vpop.f32.mrf.mxu0  ;;  %v13779_v13 = vpop.f32.mrf.mxu3 }
 0x536   : > { %14759 = vst [vmem:[#allocation4_spill] sm:$0xff] %v13779_v13 }
 0x537   : > { %6169 = vmatmul.bf16.gmra.mxu1 %v13666_v0  ;;  %6393 = vmatmul.bf16.gmra.mxu2 %v6272_v12  ;;  %v10408_v0 = vld [vmem:[#allocation2 + $0x48] sm:$0xff] }
 0x538   : > { %7171 = vmatmul.bf16.gmra.mxu0 %v6959_v41  ;;  %v6662_v2 = vrot.slane %v10408_v0, 1  ;;  %v6979_v45 = vshrl.u32 %v10408_v0, 16  ;;  %v6982_v55 = vshll.u32 %v10408_v0, 16  ;;  %v6278_v0 = vsel %vm2682_vm9, %v6275_v1, %v6277_v26  ;;  %v10470_v1 = vld [vmem:[%s14577_s4 + $0x1d8] sm:$0xff] }
 0x539   : > { %8185 = vmatpush.bf16.msra.mxu3 %v10470_v1 }
 0x53a   : > { %v13783_v28 = vpop.f32.mrf.mxu2  ;;  %6788 = vmatmul.bf16.gmra.mxu3 %v6661_v32  ;;  %v6663_v42 = vsel %vm2682_vm9, %v6660_v48, %v6662_v2  ;;  %v6977_v48 = vsel %vm3331_vm10, %v6967_v59, %v6976_v36  ;;  %v6665_v32 = vsel %vm2682_vm9, %v6662_v2, %v6664_v7  ;;  %v6981_v57 = vrot.slane %v6979_v45, 1 }
 0x53c   : > { %v13785_v29 = vpop.f32.mrf.mxu1 }
 0x53d   : > { %v13787_v61 = vpop.f32.mrf.mxu0  ;;  %v13789_v11 = vpop.f32.mrf.mxu3 }
 0x53e   : > { %14760 = vst [vmem:[#allocation5_spill] sm:$0xff] %v13789_v11 }
 0x542   : > { %v13792_v38 = vpop.f32.mrf.mxu2 }
 0x544   : > { %v13797_v5 = vpop.f32.mrf.mxu1 }
 0x545   : > { %v13803_v15 = vpop.f32.mrf.mxu0  ;;  %v13806_v22 = vpop.f32.mrf.mxu3 }
 0x546   : > { %14761 = vst [vmem:[#allocation6_spill] sm:$0xff] %v13806_v22 }
 0x547   : > { %6174 = vmatmul.bf16.gmra.mxu1 %v13486_v6  ;;  %6398 = vmatmul.bf16.gmra.mxu2 %v6274_v49  ;;  %v10479_v6 = vld [vmem:[%s14577_s4 + $0x220] sm:$0xff]  ;;  %v6984_v49 = vrot.slane %v6982_v55, 2 }
 0x548   : > { %7176 = vmatmul.bf16.gmra.mxu0 %v6968_v56  ;;  %v10410_v56 = vld [vmem:[#allocation2 + $0x58] sm:$0xff] }
 0x549   : > { %8444 = vmatpush.bf16.msra.mxu0 %v10479_v6  ;;  %v6666_v2 = vrot.slane %v10410_v56, 1 }
 0x54a   : > { %v13813_v50 = vpop.f32.mrf.mxu2  ;;  %6793 = vmatmul.bf16.gmra.mxu3 %v6663_v42 }
 0x54b   : > { %v6667_v40 = vsel %vm2682_vm9, %v6664_v7, %v6666_v2  ;;  %v10437_v7 = vld [vmem:[%s14577_s4 + $0x158] sm:$0xff] }
 0x54c   : > { %v13815_v53 = vpop.f32.mrf.mxu1  ;;  %7407 = vmatpush.bf16.msra.mxu1 %v10437_v7 }
 0x54d   : > { %v13820_v23 = vpop.f32.mrf.mxu0  ;;  %v13822_v4 = vpop.f32.mrf.mxu3 }
 0x54e   : > { %14762 = vst [vmem:[#allocation7_spill] sm:$0xff] %v13822_v4 }
 0x552   : > { %v13825_v31 = vpop.f32.mrf.mxu2 }
 0x554   : > { %v13827_v3 = vpop.f32.mrf.mxu1 }
 0x555   : > { %v13830_v12 = vpop.f32.mrf.mxu0  ;;  %v13833_v41 = vpop.f32.mrf.mxu3 }
 0x556   : > { %14763 = vst [vmem:[#allocation8_spill] sm:$0xff] %v13833_v41 }
 0x557   : > { %6179 = vmatmul.bf16.gmra.mxu1 %v13495_v20  ;;  %6403 = vmatmul.bf16.gmra.mxu2 %v6276_v14  ;;  %v6985_v20 = vor.u32 %v6984_v49, %v6981_v57  ;;  %v6988_v14 = vshrl.u32 %v10409_v10, 16  ;;  %v10478_v57 = vld [vmem:[%s14577_s4 + $0x218] sm:$0xff]  ;;  %v6279_v49 = vrot.slane %v13649_v25, 1 }
 0x558   : > { %7181 = vmatmul.bf16.gmra.mxu0 %v6977_v48  ;;  %v6991_v48 = vshll.u32 %v10409_v10, 16 }
 0x559   : > { %v6986_v63 = vsel %vm3331_vm10, %v6976_v36, %v6985_v20  ;;  %v6990_v45 = vrot.slane %v6988_v14, 1  ;;  %8445 = vmatpush.bf16.msra.mxu0 %v10478_v57  ;;  %v6280_v1 = vsel %vm2682_vm9, %v6277_v26, %v6279_v49 }
 0x55a   : > { %v13837_v43 = vpop.f32.mrf.mxu2  ;;  %6798 = vmatmul.bf16.gmra.mxu3 %v6665_v32  ;;  %v6993_v55 = vrot.slane %v6991_v48, 2 }
 0x55c   : > { %v13839_v18 = vpop.f32.mrf.mxu1 }
 0x55d   : > { %v13841_v54 = vpop.f32.mrf.mxu0  ;;  %v6759_v59 = vpop.f32.mrf.mxu3 }
 0x562   : > { %v13844_v46 = vpop.f32.mrf.mxu2 }
 0x564   : > { %v13846_v42 = vpop.f32.mrf.mxu1 }
 0x565   : > { %v13849_v60 = vpop.f32.mrf.mxu0  ;;  %v6761_v6 = vpop.f32.mrf.mxu3 }
 0x567   : > { %6184 = vmatmul.bf16.gmra.mxu1 %v13552_v37  ;;  %6408 = vmatmul.bf16.gmra.mxu2 %v6278_v0  ;;  %v10411_v0 = vld [vmem:[#allocation2 + $0x60] sm:$0xff] }
 0x568   : > { %7186 = vmatmul.bf16.gmra.mxu0 %v6986_v63  ;;  %v6994_v63 = vor.u32 %v6993_v55, %v6990_v45  ;;  %v6668_v14 = vrot.slane %v10411_v0, 1  ;;  %v6997_v45 = vshrl.u32 %v10410_v56, 16  ;;  %v7000_v55 = vshll.u32 %v10410_v56, 16 }
 0x56a   : > { %v13860_v32 = vpop.f32.mrf.mxu2  ;;  %6803 = vmatmul.bf16.gmra.mxu3 %v6667_v40  ;;  %v6995_v34 = vsel %vm3331_vm10, %v6985_v20, %v6994_v63  ;;  %v6669_v7 = vsel %vm2682_vm9, %v6666_v2, %v6668_v14  ;;  %v6999_v58 = vrot.slane %v6997_v45, 1  ;;  %v7002_v20 = vrot.slane %v7000_v55, 2 }
 0x56b   : > { %14764 = vst [vmem:[#allocation9_spill] sm:$0xff] %v13860_v32 }
 0x56c   : > { %v13862_v37 = vpop.f32.mrf.mxu1  ;;  %v7003_v2 = vor.u32 %v7002_v20, %v6999_v58 }
 0x56d   : > { %v13864_v36 = vpop.f32.mrf.mxu0  ;;  %v6764_v10 = vpop.f32.mrf.mxu3 }
 0x572   : > { %v13873_v62 = vpop.f32.mrf.mxu2 }
 0x573   : > { %14765 = vst [vmem:[#allocation10_spill] sm:$0xff] %v13873_v62 }
 0x574   : > { %v6150_v40 = vpop.f32.mrf.mxu1 }
 0x575   : > { %v7152_v48 = vpop.f32.mrf.mxu0  ;;  %v13877_v41 = vpop.f32.mrf.mxu3  ;;  %v6151_v57 = vadd.f32 %v6150_v40, %v13754_v52 }
 0x577   : > { %6189 = vmatmul.bf16.gmra.mxu1 %v13605_v51  ;;  %6413 = vmatmul.bf16.gmra.mxu2 %v6280_v1  ;;  %v6281_v51 = vrot.slane %v13491_v47, 1 }
 0x578   : > { %7191 = vmatmul.bf16.gmra.mxu0 %v6995_v34  ;;  %v13887_v34 = vld [vmem:[#allocation2 + $0x68] sm:$0xff] }
 0x579   : > { %v6282_v1 = vsel %vm2682_vm9, %v6279_v49, %v6281_v51  ;;  %v7009_v49 = vshll.u32 %v10411_v0, 16 }
 0x57a   : > { %v6374_v4 = vpop.f32.mrf.mxu2  ;;  %6808 = vmatmul.bf16.gmra.mxu3 %v6669_v7 }
 0x57b   : > { %v6464_v22 = vadd.f32 %v6374_v4, %v6151_v57  ;;  %v7004_v57 = vsel %vm3331_vm10, %v6994_v63, %v7003_v2 }
 0x57c   : > { %v6152_v26 = vpop.f32.mrf.mxu1 }
 0x57d   : > { %v6849_v11 = vadd.f32 %v6759_v59, %v6464_v22  ;;  %v7154_v13 = vpop.f32.mrf.mxu0  ;;  %v13882_v62 = vpop.f32.mrf.mxu3  ;;  %v6153_v52 = vadd.f32 %v6152_v26, %v13766_v24  ;;  %v6670_v22 = vrot.slane %v13887_v34, 1 }
 0x57f   : > { %v13884_v32 = vadd.f32 %v7152_v48, %v6849_v11  ;;  %v6671_v24 = vsel %vm2682_vm9, %v6668_v14, %v6670_v22  ;;  %v7006_v48 = vshrl.u32 %v10411_v0, 16  ;;  %v6283_v14 = vrot.slane %v13498_v21, 1  ;;  %v10477_v21 = vld [vmem:[%s14577_s4 + $0x210] sm:$0xff] }
 0x580   : > { %8446 = vmatpush.bf16.msra.mxu0 %v10477_v21 }
 0x581   : > { %v7008_v20 = vrot.slane %v7006_v48, 1 }
 0x582   : > { %v6376_v56 = vpop.f32.mrf.mxu2 }
 0x583   : > { %v6465_v40 = vadd.f32 %v6376_v56, %v6153_v52  ;;  %v7011_v52 = vrot.slane %v7009_v49, 2  ;;  %v10413_v56 = vld [vmem:[#allocation2 + $0x70] sm:$0xff] }
 0x584   : > { %v6155_v4 = vpop.f32.mrf.mxu1 }
 0x585   : > { %v6850_v59 = vadd.f32 %v6761_v6, %v6465_v40  ;;  %v7157_v7 = vpop.f32.mrf.mxu0  ;;  %v13893_v11 = vpop.f32.mrf.mxu3  ;;  %v6156_v58 = vadd.f32 %v6155_v4, %v13776_v30  ;;  %v10436_v30 = vld [vmem:[%s14577_s4 + $0x150] sm:$0xff]  ;;  %v7012_v4 = vor.u32 %v7011_v52, %v7008_v20 }
 0x586   : > { %7408 = vmatpush.bf16.msra.mxu1 %v10436_v30 }
 0x587   : > { %6194 = vmatmul.bf16.gmra.mxu1 %v13649_v25  ;;  %6418 = vmatmul.bf16.gmra.mxu2 %v6282_v1  ;;  %v13896_v47 = vadd.f32 %v7154_v13, %v6850_v59  ;;  %v10461_v25 = vld [vmem:[%s14577_s4 + $0x190] sm:$0xff] }
 0x588   : > { %7196 = vmatmul.bf16.gmra.mxu0 %v7004_v57  ;;  %v10469_v13 = vld [vmem:[%s14577_s4 + $0x1d0] sm:$0xff]  ;;  %7793 = vmatpush.bf16.msra.mxu2 %v10461_v25 }
 0x589   : > { %8186 = vmatpush.bf16.msra.mxu3 %v10469_v13 }
 0x58a   : > { %v6379_v45 = vpop.f32.mrf.mxu2  ;;  %6813 = vmatmul.bf16.gmra.mxu3 %v6671_v24  ;;  %v6284_v24 = vsel %vm2682_vm9, %v6281_v51, %v6283_v14 }
 0x58b   : > { %v6466_v55 = vadd.f32 %v6379_v45, %v6156_v58  ;;  %v6672_v58 = vrot.slane %v10413_v56, 1  ;;  %v7013_v45 = vsel %vm3331_vm10, %v7003_v2, %v7012_v4  ;;  %v7018_v2 = vshll.u32 %v13887_v34, 16 }
 0x58c   : > { %v6157_v6 = vpop.f32.mrf.mxu1 }
 0x58d   : > { %v6851_v26 = vadd.f32 %v6764_v10, %v6466_v55  ;;  %v7159_v63 = vpop.f32.mrf.mxu0  ;;  %v13909_v0 = vpop.f32.mrf.mxu3  ;;  %v6158_v40 = vadd.f32 %v6157_v6, %v13787_v61  ;;  %v10628_v55 = vld [vmem:[#allocation2 + $0x50] sm:$0xff]  ;;  %v6673_v51 = vsel %vm2682_vm9, %v6670_v22, %v6672_v58  ;;  %v13935_v22 = vld [vmem:[#allocation2 + $0x78] sm:$0xff] }
 0x58f   : > { %v13911_v10 = vadd.f32 %v7157_v7, %v6851_v26 }
 0x592   : > { %v6381_v1 = vpop.f32.mrf.mxu2 }
 0x593   : > { %v6467_v59 = vadd.f32 %v6381_v1, %v6158_v40 }
 0x594   : > { %v6160_v57 = vpop.f32.mrf.mxu1 }
 0x595   : > { %v6852_v48 = vadd.f32 %v13877_v41, %v6467_v59  ;;  %v7162_v49 = vpop.f32.mrf.mxu0  ;;  %v13921_v7 = vpop.f32.mrf.mxu3  ;;  %v6161_v6 = vadd.f32 %v6160_v57, %v13803_v15  ;;  %v7015_v41 = vshrl.u32 %v13887_v34, 16  ;;  %v6285_v15 = vrot.slane %v13554_v33, 1  ;;  %v10629_v33 = vld [vmem:[#allocation2 + $0x58] sm:$0xff] }
 0x597   : > { %6199 = vmatmul.bf16.gmra.mxu1 %v10628_v55  ;;  %6423 = vmatmul.bf16.gmra.mxu2 %v6284_v24  ;;  %v13923_v61 = vadd.f32 %v7159_v63, %v6852_v48  ;;  %v7017_v30 = vrot.slane %v7015_v41, 1  ;;  %v7020_v63 = vrot.slane %v7018_v2, 2  ;;  %v7027_v2 = vshll.u32 %v10413_v56, 16 }
 0x598   : > { %7201 = vmatmul.bf16.gmra.mxu0 %v7013_v45  ;;  %v6286_v45 = vsel %vm2682_vm9, %v6283_v14, %v6285_v15  ;;  %v7024_v14 = vshrl.u32 %v10413_v56, 16 }
 0x599   : > { %v7021_v59 = vor.u32 %v7020_v63, %v7017_v30  ;;  %v7029_v30 = vrot.slane %v7027_v2, 2  ;;  %v6287_v63 = vrot.slane %v13607_v17, 1 }
 0x59a   : > { %v6384_v26 = vpop.f32.mrf.mxu2  ;;  %6818 = vmatmul.bf16.gmra.mxu3 %v6673_v51 }
 0x59b   : > { %v6468_v20 = vadd.f32 %v6384_v26, %v6161_v6 }
 0x59c   : > { %v6162_v52 = vpop.f32.mrf.mxu1 }
 0x59d   : > { %v6853_v25 = vadd.f32 %v13882_v62, %v6468_v20  ;;  %v7164_v13 = vpop.f32.mrf.mxu0  ;;  %v13930_v40 = vpop.f32.mrf.mxu3  ;;  %v6163_v34 = vadd.f32 %v6162_v52, %v13820_v23  ;;  %v6674_v62 = vrot.slane %v13935_v22, 1 }
 0x59f   : > { %v13932_v1 = vadd.f32 %v7162_v49, %v6853_v25  ;;  %v7022_v49 = vsel %vm3331_vm10, %v7012_v4, %v7021_v59  ;;  %v6675_v23 = vsel %vm2682_vm9, %v6672_v58, %v6674_v62  ;;  %v7026_v25 = vrot.slane %v7024_v14, 1  ;;  %v10468_v58 = vld [vmem:[%s14577_s4 + $0x1c8] sm:$0xff] }
 0x5a0   : > { %8187 = vmatpush.bf16.msra.mxu3 %v10468_v58 }
 0x5a2   : > { %v6386_v57 = vpop.f32.mrf.mxu2 }
 0x5a3   : > { %v6469_v24 = vadd.f32 %v6386_v57, %v6163_v34  ;;  %v7030_v57 = vor.u32 %v7029_v30, %v7026_v25 }
 0x5a4   : > { %v6165_v48 = vpop.f32.mrf.mxu1 }
 0x5a5   : > { %v6854_v21 = vadd.f32 %v13893_v11, %v6469_v24  ;;  %v7167_v55 = vpop.f32.mrf.mxu0  ;;  %v13942_v51 = vpop.f32.mrf.mxu3  ;;  %v6166_v41 = vadd.f32 %v6165_v48, %v13830_v12 }
 0x5a7   : > { %6204 = vmatmul.bf16.gmra.mxu1 %v10629_v33  ;;  %6428 = vmatmul.bf16.gmra.mxu2 %v6286_v45  ;;  %v13944_v6 = vadd.f32 %v7164_v13, %v6854_v21  ;;  %v10460_v13 = vld [vmem:[%s14577_s4 + $0x188] sm:$0xff]  ;;  %v6288_v21 = vsel %vm2682_vm9, %v6285_v15, %v6287_v63 }
 0x5a8   : > { %7206 = vmatmul.bf16.gmra.mxu0 %v7022_v49  ;;  %7794 = vmatpush.bf16.msra.mxu2 %v10460_v13 }
 0x5aa   : > { %v6389_v26 = vpop.f32.mrf.mxu2  ;;  %6823 = vmatmul.bf16.gmra.mxu3 %v6675_v23 }
 0x5ab   : > { %v6470_v20 = vadd.f32 %v6389_v26, %v6166_v41  ;;  %v10435_v41 = vld [vmem:[%s14577_s4 + $0x148] sm:$0xff]  ;;  %v7033_v26 = vshrl.u32 %v13935_v22, 16 }
 0x5ac   : > { %v6167_v11 = vpop.f32.mrf.mxu1  ;;  %7409 = vmatpush.bf16.msra.mxu1 %v10435_v41 }
 0x5ad   : > { %v6855_v4 = vadd.f32 %v13909_v0, %v6470_v20  ;;  %v7169_v52 = vpop.f32.mrf.mxu0  ;;  %v13955_v12 = vpop.f32.mrf.mxu3  ;;  %v13960_v0 = vld [vmem:[#allocation2 + $0x80] sm:$0xff]  ;;  %v6168_v34 = vadd.f32 %v6167_v11, %v13841_v54  ;;  %v7036_v20 = vshll.u32 %v13935_v22, 16 }
 0x5ae   : > { %v6676_v49 = vrot.slane %v13960_v0, 1  ;;  %v10630_v54 = vld [vmem:[#allocation2 + $0x60] sm:$0xff] }
 0x5af   : > { %v13957_v56 = vadd.f32 %v7167_v55, %v6855_v4  ;;  %v7031_v55 = vsel %vm3331_vm10, %v7021_v59, %v7030_v57  ;;  %v7038_v13 = vrot.slane %v7036_v20, 2 }
 0x5b0   : > { %v6677_v15 = vsel %vm2682_vm9, %v6674_v62, %v6676_v49  ;;  %v7035_v62 = vrot.slane %v7033_v26, 1  ;;  %v7045_v26 = vshll.u32 %v13960_v0, 16 }
 0x5b2   : > { %v6391_v24 = vpop.f32.mrf.mxu2 }
 0x5b3   : > { %v6471_v48 = vadd.f32 %v6391_v24, %v6168_v34  ;;  %v13987_v24 = vld [vmem:[#allocation2 + $0x88] sm:$0xff] }
 0x5b4   : > { %v6170_v45 = vpop.f32.mrf.mxu1 }
 0x5b5   : > { %v6856_v33 = vadd.f32 %v13921_v7, %v6471_v48  ;;  %v7172_v23 = vpop.f32.mrf.mxu0  ;;  %v13970_v14 = vpop.f32.mrf.mxu3  ;;  %v10476_v7 = vld [vmem:[%s14577_s4 + $0x208] sm:$0xff]  ;;  %v6171_v59 = vadd.f32 %v6170_v45, %v13849_v60  ;;  %v6289_v60 = vrot.slane %v13651_v8, 1  ;;  %v7039_v48 = vor.u32 %v7038_v13, %v7035_v62 }
 0x5b6   : > { %8447 = vmatpush.bf16.msra.mxu0 %v10476_v7 }
 0x5b7   : > { %6209 = vmatmul.bf16.gmra.mxu1 %v10630_v54  ;;  %6433 = vmatmul.bf16.gmra.mxu2 %v6288_v21  ;;  %v13972_v2 = vadd.f32 %v7169_v52, %v6856_v33 }
 0x5b8   : > { %7211 = vmatmul.bf16.gmra.mxu0 %v7031_v55  ;;  %v6290_v55 = vsel %vm2682_vm9, %v6287_v63, %v6289_v60  ;;  %v7042_v63 = vshrl.u32 %v13960_v0, 16 }
 0x5ba   : > { %v6394_v11 = vpop.f32.mrf.mxu2  ;;  %6828 = vmatmul.bf16.gmra.mxu3 %v6677_v15 }
 0x5bb   : > { %v6472_v4 = vadd.f32 %v6394_v11, %v6171_v59 }
 0x5bc   : > { %v6172_v52 = vpop.f32.mrf.mxu1 }
 0x5bd   : > { %v6857_v25 = vadd.f32 %v13930_v40, %v6472_v4  ;;  %v7174_v30 = vpop.f32.mrf.mxu0  ;;  %v13982_v58 = vpop.f32.mrf.mxu3  ;;  %v6173_v22 = vadd.f32 %v6172_v52, %v13864_v36  ;;  %v6678_v40 = vrot.slane %v13987_v24, 1  ;;  %v7047_v52 = vrot.slane %v7045_v26, 2 }
 0x5be   : > { %v7054_v26 = vshll.u32 %v13987_v24, 16 }
 0x5bf   : > { %v13984_v34 = vadd.f32 %v7172_v23, %v6857_v25  ;;  %v7040_v23 = vsel %vm3331_vm10, %v7030_v57, %v7039_v48  ;;  %v6679_v36 = vsel %vm2682_vm9, %v6676_v49, %v6678_v40  ;;  %v10631_v49 = vld [vmem:[#allocation2 + $0x78] sm:$0xff] }
 0x5c0   : > { %v6291_v62 = vrot.slane %v10631_v49, 1 }
 0x5c2   : > { %v6396_v45 = vpop.f32.mrf.mxu2 }
 0x5c3   : > { %v6473_v21 = vadd.f32 %v6396_v45, %v6173_v22 }
 0x5c4   : > { %v6175_v33 = vpop.f32.mrf.mxu1 }
 0x5c5   : > { %v6858_v41 = vadd.f32 %v13942_v51, %v6473_v21  ;;  %v7177_v54 = vpop.f32.mrf.mxu0  ;;  %v13994_v15 = vpop.f32.mrf.mxu3  ;;  %v6176_v59 = vadd.f32 %v6175_v33, %v13751_v19  ;;  %v14008_v19 = vld [vmem:[#allocation2 + $0x90] sm:$0xff]  ;;  %v6292_v33 = vsel %vm2682_vm9, %v6289_v60, %v6291_v62 }
 0x5c7   : > { %6214 = vmatmul.bf16.gmra.mxu1 %v13607_v17  ;;  %6438 = vmatmul.bf16.gmra.mxu2 %v6290_v55  ;;  %v13997_v7 = vadd.f32 %v7174_v30, %v6858_v41  ;;  %v7044_v17 = vrot.slane %v7042_v63, 1  ;;  %v7051_v63 = vshrl.u32 %v13987_v24, 16 }
 0x5c8   : > { %7216 = vmatmul.bf16.gmra.mxu0 %v7040_v23  ;;  %v10459_v23 = vld [vmem:[%s14577_s4 + $0x180] sm:$0xff] }
 0x5c9   : > { %v7048_v0 = vor.u32 %v7047_v52, %v7044_v17  ;;  %7795 = vmatpush.bf16.msra.mxu2 %v10459_v23  ;;  %v7053_v52 = vrot.slane %v7051_v63, 1 }
 0x5ca   : > { %v6399_v51 = vpop.f32.mrf.mxu2  ;;  %6833 = vmatmul.bf16.gmra.mxu3 %v6679_v36 }
 0x5cb   : > { %v6474_v20 = vadd.f32 %v6399_v51, %v6176_v59 }
 0x5cc   : > { %v6177_v57 = vpop.f32.mrf.mxu1 }
 0x5cd   : > { %v6859_v11 = vadd.f32 %v13955_v12, %v6474_v20  ;;  %v7179_v4 = vpop.f32.mrf.mxu0  ;;  %v14004_v25 = vpop.f32.mrf.mxu3  ;;  %v6178_v13 = vadd.f32 %v6177_v57, %v13764_v16  ;;  %v6680_v12 = vrot.slane %v14008_v19, 1  ;;  %v10467_v16 = vld [vmem:[%s14577_s4 + $0x1c0] sm:$0xff] }
 0x5ce   : > { %8188 = vmatpush.bf16.msra.mxu3 %v10467_v16 }
 0x5cf   : > { %v14006_v30 = vadd.f32 %v7177_v54, %v6859_v11  ;;  %v7049_v54 = vsel %vm3331_vm10, %v7039_v48, %v7048_v0  ;;  %v6681_v48 = vsel %vm2682_vm9, %v6678_v40, %v6680_v12  ;;  %v7056_v40 = vrot.slane %v7054_v26, 2  ;;  %v7538_v26 = vld [vmem:[#allocation2 + $0x10] sm:$0xc] }
 0x5d1   : > { %14766 = vst [vmem:[#allocation11_spill] sm:$0xff] %v14006_v30 }
 0x5d2   : > { %v6401_v22 = vpop.f32.mrf.mxu2 }
 0x5d3   : > { %v6475_v45 = vadd.f32 %v6401_v22, %v6178_v13  ;;  %v10632_v22 = vld [vmem:[#allocation2 + $0x80] sm:$0xff] }
 0x5d4   : > { %v6180_v21 = vpop.f32.mrf.mxu1 }
 0x5d5   : > { %v6860_v55 = vadd.f32 %v13970_v14, %v6475_v45  ;;  %v7182_v41 = vpop.f32.mrf.mxu0  ;;  %v14021_v36 = vpop.f32.mrf.mxu3  ;;  %v10434_v14 = vld [vmem:[%s14577_s4 + $0x140] sm:$0xff]  ;;  %v6181_v59 = vadd.f32 %v6180_v21, %v13773_v44  ;;  %v6293_v45 = vrot.slane %v10632_v22, 1 }
 0x5d6   : > { %7410 = vmatpush.bf16.msra.mxu1 %v10434_v14  ;;  %v10475_v44 = vld [vmem:[%s14577_s4 + $0x200] sm:$0xff] }
 0x5d7   : > { %6219 = vmatmul.bf16.gmra.mxu1 %v13651_v8  ;;  %6443 = vmatmul.bf16.gmra.mxu2 %v6292_v33  ;;  %v14027_v60 = vadd.f32 %v7179_v4, %v6860_v55  ;;  %v6536_v8 = vld [vmem:[#allocation2 + $0x98] sm:$0x1]  ;;  %v7057_v55 = vor.u32 %v7056_v40, %v7053_v52  ;;  %v6294_v16 = vsel %vm2682_vm9, %v6291_v62, %v6293_v45 }
 0x5d8   : > { %7221 = vmatmul.bf16.gmra.mxu0 %v7049_v54  ;;  %v6627_v11 = vunpack.c.l.b16 %v6536_v8 }
 0x5d9   : > { %14767 = vst [vmem:[#allocation12_spill] sm:$0xff] %v14027_v60  ;;  %8448 = vmatpush.bf16.msra.mxu0 %v10475_v44  ;;  %v7058_v63 = vsel %vm3331_vm10, %v7048_v0, %v7057_v55 }
 0x5da   : > { %v6404_v51 = vpop.f32.mrf.mxu2  ;;  %6838 = vmatmul.bf16.gmra.mxu3 %v6681_v48  ;;  %v6646_v21 = vpack.c.b16 %v6627_v11, %v6627_v11  ;;  %v7060_v11 = vshrl.u32 %v14008_v19, 16 }
 0x5db   : > { %v6476_v20 = vadd.f32 %v6404_v51, %v6181_v59  ;;  %v7629_v51 = vunpack.c.l.b16 %v7538_v26 }
 0x5dc   : > { %v6182_v57 = vpop.f32.mrf.mxu1  ;;  %v6682_v14 = vrot.slane %v6646_v21, 1 }
 0x5dd   : > { %v6861_v4 = vadd.f32 %v13982_v58, %v6476_v20  ;;  %v7184_v17 = vpop.f32.mrf.mxu0  ;;  %v14037_v13 = vpop.f32.mrf.mxu3  ;;  %v6183_v33 = vadd.f32 %v6182_v57, %v13785_v29  ;;  %v14053_v57 = vld [vmem:[#allocation2 + $0x18] sm:$0xff] }
 0x5de   : > { %v6683_v62 = vsel %vm2682_vm9, %v6680_v12, %v6682_v14  ;;  %v7954_v44 = vshrl.u32 %v14053_v57, 16  ;;  %v7957_v21 = vshll.u32 %v14053_v57, 16 }
 0x5df   : > { %v14039_v24 = vadd.f32 %v7182_v41, %v6861_v4  ;;  %v14045_v41 = vld [vmem:[#allocation2 + $0x14] sm:$0xf]  ;;  %v7063_v4 = vshll.u32 %v14008_v19, 16  ;;  %v6885_v19 = vld [vmem:[#allocation2 + $0x98] sm:$0x3] }
 0x5e0   : > { %v14628_v29 = vunpack.c.l.b16 %v14045_v41 }
 0x5e1   : > { %14768 = vst [vmem:[#allocation13_spill] sm:$0xff] %v14039_v24 }
 0x5e2   : > { %v6406_v54 = vpop.f32.mrf.mxu2 }
 0x5e3   : > { %v6477_v58 = vadd.f32 %v6406_v54, %v6183_v33 }
 0x5e4   : > { %v6185_v23 = vpop.f32.mrf.mxu1 }
 0x5e5   : > { %v6862_v48 = vadd.f32 %v13994_v15, %v6477_v58  ;;  %v7187_v59 = vpop.f32.mrf.mxu0  ;;  %v14047_v8 = vpop.f32.mrf.mxu3  ;;  %v14057_v15 = vpack.c.b16 %v14628_v29, %v7629_v51  ;;  %v6186_v0 = vadd.f32 %v6185_v23, %v13797_v5  ;;  %v7062_v5 = vrot.slane %v7060_v11, 1 }
 0x5e6   : > { %v7065_v58 = vrot.slane %v7063_v4, 2  ;;  %v7956_v51 = vrot.slane %v7954_v44, 2  ;;  %v6904_v29 = vunpack.c.l.b16 %v6885_v19 }
 0x5e7   : > { %6224 = vmatmul.bf16.gmra.mxu1 %v10631_v49  ;;  %6448 = vmatmul.bf16.gmra.mxu2 %v6294_v16  ;;  %v14050_v20 = vadd.f32 %v7184_v17, %v6862_v48  ;;  %v7946_v40 = vshrl.u32 %v14057_v15, 16  ;;  %v7949_v12 = vshll.u32 %v14057_v15, 16  ;;  %v10633_v16 = vld [vmem:[#allocation2 + $0x88] sm:$0xff] }
 0x5e8   : > { %7226 = vmatmul.bf16.gmra.mxu0 %v7058_v63  ;;  %v6295_v14 = vrot.slane %v10633_v16, 1 }
 0x5e9   : > { %14769 = vst [vmem:[#allocation14_spill] sm:$0xff] %v14050_v20  ;;  %v7948_v63 = vrot.slane %v7946_v40, 2  ;;  %v7951_v26 = vrot.slane %v7949_v12, 3  ;;  %v14075_v40 = vpack.c.b16 %v6904_v29, %v6904_v29 }
 0x5ea   : > { %v6409_v52 = vpop.f32.mrf.mxu2  ;;  %6843 = vmatmul.bf16.gmra.mxu3 %v6683_v62  ;;  %v7959_v62 = vrot.slane %v7957_v21, 3  ;;  %v6296_v11 = vsel %vm2682_vm9, %v6293_v45, %v6295_v14 }
 0x5eb   : > { %v6478_v49 = vadd.f32 %v6409_v52, %v6186_v0  ;;  %v7066_v52 = vor.u32 %v7065_v58, %v7062_v5  ;;  %v7952_v4 = vor.u32 %v7951_v26, %v7948_v63  ;;  %v7072_v44 = vshll.u32 %v14075_v40, 16 }
 0x5ec   : > { %v6187_v17 = vpop.f32.mrf.mxu1  ;;  %v7960_v24 = vor.u32 %v7959_v62, %v7956_v51  ;;  %v6297_v63 = vrot.slane %v13634_v27, 1 }
 0x5ed   : > { %v6863_v33 = vadd.f32 %v14004_v25, %v6478_v49  ;;  %v7189_v54 = vpop.f32.mrf.mxu0  ;;  %v14067_v23 = vpop.f32.mrf.mxu3  ;;  %v6188_v0 = vadd.f32 %v6187_v17, %v13815_v53  ;;  %v14082_v17 = vld [vmem:[#allocation2 + $0x20] sm:$0xff]  ;;  %v7074_v58 = vrot.slane %v7072_v44, 2 }
 0x5ef   : > { %v14069_v48 = vadd.f32 %v7187_v59, %v6863_v33  ;;  %v7067_v59 = vsel %vm3331_vm10, %v7057_v55, %v7066_v52 }
 0x5f2   : > { %v6411_v20 = vpop.f32.mrf.mxu2 }
 0x5f3   : > { %v6479_v25 = vadd.f32 %v6411_v20, %v6188_v0  ;;  %v7961_v20 = vsel %vm4375_vm11, %v7952_v4, %v7960_v24  ;;  %v6298_v4 = vsel %vm2682_vm9, %v6295_v14, %v6297_v63  ;;  %v14104_v14 = vld [vmem:[#allocation2 + $0x28] sm:$0xff] }
 0x5f4   : > { %v6190_v49 = vpop.f32.mrf.mxu1 }
 0x5f5   : > { %v6864_v60 = vadd.f32 %v14021_v36, %v6479_v25  ;;  %v7192_v30 = vpop.f32.mrf.mxu0  ;;  %v14077_v12 = vpop.f32.mrf.mxu3  ;;  %v6191_v45 = vadd.f32 %v6190_v49, %v13827_v3  ;;  %v7069_v36 = vshrl.u32 %v14075_v40, 16 }
 0x5f7   : > { %6229 = vmatmul.bf16.gmra.mxu1 %v10632_v22  ;;  %6453 = vmatmul.bf16.gmra.mxu2 %v6296_v11  ;;  %v14079_v53 = vadd.f32 %v7189_v54, %v6864_v60  ;;  %v7963_v22 = vshrl.u32 %v14082_v17, 16  ;;  %v7966_v60 = vshll.u32 %v14082_v17, 16  ;;  %v7071_v5 = vrot.slane %v7069_v36, 1  ;;  %v8316_v36 = vld [vmem:[#allocation2 + $0x10] sm:$0x8] }
 0x5f8   : > { %7231 = vmatmul.bf16.gmra.mxu0 %v7067_v59 }
 0x5f9   : > { %v7965_v26 = vrot.slane %v7963_v22, 2  ;;  %v7968_v51 = vrot.slane %v7966_v60, 3  ;;  %v7075_v0 = vor.u32 %v7074_v58, %v7071_v5  ;;  %v14771_v58 = vunpack.c.l.b16 %v14045_v41 }
 0x5fa   : > { %v6414_v55 = vpop.f32.mrf.mxu2  ;;  %8189 = vmatmul.bf16.vlgmr.msra.gmra.mxu3 %v7961_v20 }
 0x5fb   : > { %v6480_v29 = vadd.f32 %v6414_v55, %v6191_v45  ;;  %v7969_v59 = vor.u32 %v7968_v51, %v7965_v26  ;;  %v10668_v26 = vmov 71  }
 0x5fc   : > { %v6192_v21 = vpop.f32.mrf.mxu1  ;;  %10625 = vset.pattern.permute.xlu0 %v10668_v26  ;;  %10626 = vset.pattern.permute.xlu1 %v10668_v26 }
 0x5fd   : > { %v6865_v33 = vadd.f32 %v14037_v13, %v6480_v29  ;;  %v7194_v54 = vpop.f32.mrf.mxu0  ;;  %v14090_v19 = vpop.f32.mrf.mxu3  ;;  %v6193_v62 = vadd.f32 %v6192_v21, %v13839_v18  ;;  %v7278_v13 = vld [vmem:[#allocation2 + $0x8] sm:$0xc]  ;;  %v7970_v55 = vsel %vm4375_vm11, %v7960_v24, %v7969_v59  ;;  %10627 = vset.pattern.permute.xlu2 %v10668_v26 }
 0x5fe   : > { %v7297_v27 = vunpack.c.l.b16 %v7278_v13 }
 0x5ff   : > { %v14092_v3 = vadd.f32 %v7192_v30, %v6865_v33  ;;  %v7076_v30 = vsel %vm3331_vm10, %v7066_v52, %v7075_v0  ;;  %v14770_v52 = vunpack.c.l.b16 %v13674_v39  ;;  %v7972_v33 = vshrl.u32 %v14104_v14, 16 }
 0x601   : > { %v7298_v60 = vpack.c.b16 %v14770_v52, %v7297_v27  ;;  %v7974_v41 = vrot.slane %v7972_v33, 2 }
 0x602   : > { %v6416_v25 = vpop.f32.mrf.mxu2 }
 0x603   : > { %v6481_v49 = vadd.f32 %v6416_v25, %v6193_v62  ;;  %v7300_v39 = vrot.slane %v7298_v60, 2  ;;  %v10634_v62 = vld [vmem:[#allocation2 + $0x10] sm:$0xff] }
 0x604   : > { %v6195_v11 = vpop.f32.mrf.mxu1  ;;  %v7301_v0 = vrot.slane %v10634_v62, 2  ;;  %v14133_v60 = vld [vmem:[#allocation2 + $0x30] sm:$0xff]  ;;  %v7688_v62 = vrot.slane %v14082_v17, 2 }
 0x605   : > { %v6866_v20 = vadd.f32 %v14047_v8, %v6481_v49  ;;  %v7197_v45 = vpop.f32.mrf.mxu0  ;;  %v14099_v44 = vpop.f32.mrf.mxu3  ;;  %v6196_v29 = vadd.f32 %v6195_v11, %v13846_v42  ;;  %v8335_v8 = vunpack.c.l.b16 %v8316_v36  ;;  %v8576_v42 = vld [vmem:[%s10809_s12 + $0x13] sm:$0xff]  ;;  %v7685_v49 = vrot.slane %v14057_v15, 2 }
 0x606   : > { %8614 = vperm.xlu0 %10625, %v8576_v42  }
 0x607   : > { %6234 = vmatmul.bf16.gmra.mxu1 %v10633_v16  ;;  %6458 = vmatmul.bf16.gmra.mxu2 %v6298_v4  ;;  %v14101_v18 = vadd.f32 %v7194_v54, %v6866_v20  ;;  %v7975_v54 = vshll.u32 %v14104_v14, 16  ;;  %v8336_v63 = vpack.c.b16 %v14771_v58, %v8335_v8  ;;  %v8339_v20 = vrot.slane %v14053_v57, 3 }
 0x608   : > { %7236 = vmatmul.bf16.gmra.mxu0 %v7076_v30  ;;  %v7984_v58 = vshll.u32 %v14133_v60, 16 }
 0x609   : > { %v7977_v11 = vrot.slane %v7975_v54, 3  ;;  %v8338_v13 = vrot.slane %v8336_v63, 3 }
 0x60a   : > { %v6419_v21 = vpop.f32.mrf.mxu2  ;;  %8194 = vmatmul.bf16.gmra.mxu3 %v7970_v55  ;;  %v7302_v55 = vsel %vm3726_vm12, %v7300_v39, %v7301_v0  ;;  %v10635_v39 = vld [vmem:[#allocation2 + $0x18] sm:$0xff] }
 0x60b   : > { %v6482_v22 = vadd.f32 %v6419_v21, %v6196_v29  ;;  %v7978_v29 = vor.u32 %v7977_v11, %v7974_v41  ;;  %v8340_v21 = vsel %vm4770_vm13, %v8338_v13, %v8339_v20  ;;  %v7986_v41 = vrot.slane %v7984_v58, 3 }
 0x60c   : > { %v6197_v16 = vpop.f32.mrf.mxu1 }
 0x60d   : > { %v6867_v5 = vadd.f32 %v14067_v23, %v6482_v22  ;;  %v7199_v24 = vpop.f32.mrf.mxu0  ;;  %v14115_v51 = vpop.f32.mrf.mxu3  ;;  %v7686_v23 = vrot.slane %v14053_v57, 2  ;;  %v6198_v4 = vadd.f32 %v6197_v16, %v13862_v37  ;;  %v8577_v22 = vld [vmem:[%s10809_s12 + $0x1b] sm:$0xff]  ;;  %v7979_v57 = vsel %vm4375_vm11, %v7969_v59, %v7978_v29 }
 0x60e   : > { %8619 = vperm.xlu0 %10625, %v8577_v22  }
 0x60f   : > { %v14117_v25 = vadd.f32 %v7197_v45, %v6867_v5  ;;  %v7687_v45 = vsel %vm3726_vm12, %v7685_v49, %v7686_v23  ;;  %v7981_v5 = vshrl.u32 %v14133_v60, 16 }
 0x611   : > { %v7983_v49 = vrot.slane %v7981_v5, 2 }
 0x612   : > { %v6421_v30 = vpop.f32.mrf.mxu2 }
 0x613   : > { %v6483_v36 = vadd.f32 %v6421_v30, %v6198_v4  ;;  %v8341_v4 = vrot.slane %v14082_v17, 3 }
 0x614   : > { %v6200_v27 = vpop.f32.mrf.mxu1 }
 0x615   : > { %v6868_v15 = vadd.f32 %v14077_v12, %v6483_v36  ;;  %v7202_v8 = vpop.f32.mrf.mxu0  ;;  %v14128_v52 = vpop.f32.mrf.mxu3  ;;  %v6201_v16 = vadd.f32 %v6200_v27, %v13762_v9  ;;  %v7303_v9 = vrot.slane %v10635_v39, 2  ;;  %v7689_v27 = vsel %vm3726_vm12, %v7686_v23, %v7688_v62 }
 0x617   : > { %7411 = vmatmul.bf16.vlgmr.msra.gmra.mxu1 %v7302_v55  ;;  %7796 = vmatmul.bf16.vlgmr.msra.gmra.mxu2 %v7687_v45  ;;  %v14130_v37 = vadd.f32 %v7199_v24, %v6868_v15  ;;  %v8578_v24 = vld [vmem:[%s10809_s12 + $0x23] sm:$0xff]  ;;  %v7304_v36 = vsel %vm3726_vm12, %v7301_v0, %v7303_v9  ;;  %v7987_v55 = vor.u32 %v7986_v41, %v7983_v49  ;;  %v14157_v0 = vld [vmem:[#allocation2 + $0x38] sm:$0xff]  ;;  %v8343_v49 = vrot.slane %v14104_v14, 3 }
 0x618   : > { %8449 = vmatmul.bf16.vlgmr.msra.gmra.mxu0 %v8340_v21  ;;  %8624 = vperm.xlu1 %10626, %v8578_v24   ;;  %v8579_v21 = vld [vmem:[%s10809_s12 + $0x2b] sm:$0xff] }
 0x619   : > { %v7988_v17 = vsel %vm4375_vm11, %v7978_v29, %v7987_v55  ;;  %v10636_v29 = vld [vmem:[#allocation2 + $0x20] sm:$0xff] }
 0x61a   : > { %v6424_v12 = vpop.f32.mrf.mxu2  ;;  %8199 = vmatmul.bf16.gmra.mxu3 %v7979_v57 }
 0x61b   : > { %v6484_v33 = vadd.f32 %v6424_v12, %v6201_v16  ;;  %v7993_v12 = vshll.u32 %v14157_v0, 16 }
 0x61c   : > { %v6202_v54 = vpop.f32.mrf.mxu1 }
 0x61d   : > { %v6869_v63 = vadd.f32 %v14090_v19, %v6484_v33  ;;  %v7204_v26 = vpop.f32.mrf.mxu0  ;;  %v14140_v42 = vpop.f32.mrf.mxu3  ;;  %v6203_v11 = vadd.f32 %v6202_v54, %v13771_v35  ;;  %v7995_v24 = vrot.slane %v7993_v12, 3  ;;  %v7692_v12 = vrot.slane %v14133_v60, 2 }
 0x61f   : > { %v14142_v59 = vadd.f32 %v7202_v8, %v6869_v63  ;;  %v8342_v8 = vsel %vm4770_vm13, %v8339_v20, %v8341_v4  ;;  %v7990_v20 = vshrl.u32 %v14157_v0, 16  ;;  %v7305_v63 = vrot.slane %v10636_v29, 2 }
 0x620   : > { %8629 = vperm.xlu1 %10626, %v8579_v21  }
 0x622   : > { %v6426_v13 = vpop.f32.mrf.mxu2 }
 0x623   : > { %v6485_v19 = vadd.f32 %v6426_v13, %v6203_v11 }
 0x624   : > { %v6205_v30 = vpop.f32.mrf.mxu1 }
 0x625   : > { %v6870_v45 = vadd.f32 %v14099_v44, %v6485_v19  ;;  %v7207_v15 = vpop.f32.mrf.mxu0  ;;  %v14152_v22 = vpop.f32.mrf.mxu3  ;;  %v6206_v23 = vadd.f32 %v6205_v30, %v13783_v28  ;;  %v7992_v28 = vrot.slane %v7990_v20, 2  ;;  %v10637_v20 = vld [vmem:[#allocation2 + $0x28] sm:$0xff] }
 0x627   : > { %7416 = vmatmul.bf16.gmra.mxu1 %v7304_v36  ;;  %7801 = vmatmul.bf16.gmra.mxu2 %v7689_v27  ;;  %v14154_v35 = vadd.f32 %v7204_v26, %v6870_v45  ;;  %v7690_v26 = vrot.slane %v14104_v14, 2  ;;  %v7996_v30 = vor.u32 %v7995_v24, %v7992_v28  ;;  %v8344_v45 = vsel %vm4770_vm13, %v8341_v4, %v8343_v49 }
 0x628   : > { %8454 = vmatmul.bf16.gmra.mxu0 %v8342_v8  ;;  %v14179_v8 = vld [vmem:[#allocation2 + $0x40] sm:$0xff]  ;;  %v8345_v28 = vrot.slane %v14133_v60, 3 }
 0x629   : > { %v7691_v19 = vsel %vm3726_vm12, %v7688_v62, %v7690_v26  ;;  %v7997_v14 = vsel %vm4375_vm11, %v7987_v55, %v7996_v30  ;;  %v7999_v4 = vshrl.u32 %v14179_v8, 16 }
 0x62a   : > { %v6429_v57 = vpop.f32.mrf.mxu2  ;;  %8204 = vmatmul.bf16.gmra.mxu3 %v7988_v17  ;;  %v8002_v17 = vshll.u32 %v14179_v8, 16 }
 0x62b   : > { %v6486_v44 = vadd.f32 %v6429_v57, %v6206_v23 }
 0x62c   : > { %v6207_v16 = vpop.f32.mrf.mxu1 }
 0x62d   : > { %v6871_v33 = vadd.f32 %v14115_v51, %v6486_v44  ;;  %v7209_v54 = vpop.f32.mrf.mxu0  ;;  %v14163_v5 = vpop.f32.mrf.mxu3  ;;  %v6208_v39 = vadd.f32 %v6207_v16, %v13792_v38  ;;  %v7306_v51 = vsel %vm3726_vm12, %v7303_v9, %v7305_v63  ;;  %v8582_v44 = vld [vmem:[%s10809_s12 + $0x43] sm:$0xff] }
 0x62e   : > { %8644 = vperm.xlu0 %10625, %v8582_v44   ;;  %v7694_v44 = vrot.slane %v14157_v0, 2 }
 0x62f   : > { %v14165_v58 = vadd.f32 %v7207_v15, %v6871_v33  ;;  %v8001_v33 = vrot.slane %v7999_v4, 2 }
 0x632   : > { %v6431_v41 = vpop.f32.mrf.mxu2 }
 0x633   : > { %v6487_v11 = vadd.f32 %v6431_v41, %v6208_v39 }
 0x634   : > { %v6210_v13 = vpop.f32.mrf.mxu1 }
 0x635   : > { %v6872_v36 = vadd.f32 %v14128_v52, %v6487_v11  ;;  %v7212_v27 = vpop.f32.mrf.mxu0  ;;  %v14174_v15 = vpop.f32.mrf.mxu3  ;;  %v6211_v9 = vadd.f32 %v6210_v13, %v13813_v50  ;;  %v7307_v50 = vrot.slane %v10637_v20, 2  ;;  %v7693_v11 = vsel %vm3726_vm12, %v7690_v26, %v7692_v12 }
 0x637   : > { %7421 = vmatmul.bf16.gmra.mxu1 %v7306_v51  ;;  %7806 = vmatmul.bf16.gmra.mxu2 %v7691_v19  ;;  %v14176_v38 = vadd.f32 %v7209_v54, %v6872_v36  ;;  %v8004_v54 = vrot.slane %v8002_v17, 3  ;;  %v7308_v41 = vsel %vm3726_vm12, %v7305_v63, %v7307_v50  ;;  %v8346_v36 = vsel %vm4770_vm13, %v8343_v49, %v8345_v28  ;;  %v14204_v63 = vld [vmem:[#allocation2 + $0x48] sm:$0xff]  ;;  %v8581_v17 = vld [vmem:[%s10809_s12 + $0x3b] sm:$0xff] }
 0x638   : > { %8459 = vmatmul.bf16.gmra.mxu0 %v8344_v45  ;;  %v8583_v45 = vld [vmem:[%s10809_s12 + $0x4b] sm:$0xff] }
 0x639   : > { %v8005_v13 = vor.u32 %v8004_v54, %v8001_v33  ;;  %8649 = vperm.xlu1 %10626, %v8583_v45  }
 0x63a   : > { %v6434_v62 = vpop.f32.mrf.mxu2  ;;  %8209 = vmatmul.bf16.gmra.mxu3 %v7997_v14 }
 0x63b   : > { %v6488_v21 = vadd.f32 %v6434_v62, %v6211_v9  ;;  %v8006_v60 = vsel %vm4375_vm11, %v7996_v30, %v8005_v13  ;;  %v8008_v62 = vshrl.u32 %v14204_v63, 16 }
 0x63c   : > { %v6212_v52 = vpop.f32.mrf.mxu1 }
 0x63d   : > { %v6873_v23 = vadd.f32 %v14140_v42, %v6488_v21  ;;  %v7214_v57 = vpop.f32.mrf.mxu0  ;;  %v14186_v16 = vpop.f32.mrf.mxu3  ;;  %v6213_v29 = vadd.f32 %v6212_v52, %v13825_v31  ;;  %v8011_v21 = vshll.u32 %v14204_v63, 16  ;;  %v8010_v20 = vrot.slane %v8008_v62, 2 }
 0x63f   : > { %v14188_v55 = vadd.f32 %v7212_v27, %v6873_v23  ;;  %v8580_v27 = vld [vmem:[%s10809_s12 + $0x33] sm:$0xff]  ;;  %v8013_v33 = vrot.slane %v8011_v21, 3  ;;  %v8586_v21 = vld [vmem:[%s10809_s12 + $0x63] sm:$0xff] }
 0x640   : > { %8634 = vperm.xlu2 %10627, %v8580_v27   ;;  %v8585_v27 = vld [vmem:[%s10809_s12 + $0x5b] sm:$0xff] }
 0x641   : > { %8659 = vperm.xlu0 %10625, %v8585_v27   ;;  %8664 = vperm.xlu1 %10626, %v8586_v21  }
 0x642   : > { %v6436_v42 = vpop.f32.mrf.mxu2 }
 0x643   : > { %v6489_v24 = vadd.f32 %v6436_v42, %v6213_v29  ;;  %v8347_v29 = vrot.slane %v14157_v0, 3 }
 0x644   : > { %v6215_v39 = vpop.f32.mrf.mxu1 }
 0x645   : > { %v6874_v51 = vadd.f32 %v14152_v22, %v6489_v24  ;;  %v7217_v19 = vpop.f32.mrf.mxu0  ;;  %v14199_v14 = vpop.f32.mrf.mxu3  ;;  %v6216_v22 = vadd.f32 %v6215_v39, %v13837_v43 }
 0x647   : > { %7426 = vmatmul.bf16.gmra.mxu1 %v7308_v41  ;;  %7811 = vmatmul.bf16.gmra.mxu2 %v7693_v11  ;;  %v14201_v31 = vadd.f32 %v7214_v57, %v6874_v51  ;;  %v10638_v57 = vld [vmem:[#allocation2 + $0x30] sm:$0xff]  ;;  %v7695_v41 = vsel %vm3726_vm12, %v7692_v12, %v7694_v44  ;;  %v8014_v11 = vor.u32 %v8013_v33, %v8010_v20  ;;  %v14772_v12 = vld [vmem:[#allocation9_spill] sm:$0xff] }
 0x648   : > { %8464 = vmatmul.bf16.gmra.mxu0 %v8346_v36  ;;  %8639 = vperm.xlu2 %10627, %v8581_v17   ;;  %v7309_v43 = vrot.slane %v10638_v57, 2  ;;  %v8348_v36 = vsel %vm4770_vm13, %v8345_v28, %v8347_v29  ;;  %v7696_v57 = vrot.slane %v14179_v8, 2 }
 0x649   : > { %v8015_v0 = vsel %vm4375_vm11, %v8005_v13, %v8014_v11 }
 0x64a   : > { %v6439_v26 = vpop.f32.mrf.mxu2  ;;  %8214 = vmatmul.bf16.gmra.mxu3 %v8006_v60  ;;  %v7310_v39 = vsel %vm3726_vm12, %v7307_v50, %v7309_v43  ;;  %v14228_v50 = vld [vmem:[#allocation2 + $0x50] sm:$0xff] }
 0x64b   : > { %v6490_v49 = vadd.f32 %v6439_v26, %v6216_v22  ;;  %v8017_v26 = vshrl.u32 %v14228_v50, 16 }
 0x64c   : > { %v6217_v9 = vpop.f32.mrf.mxu1 }
 0x64d   : > { %v6875_v52 = vadd.f32 %v14163_v5, %v6490_v49  ;;  %v7219_v4 = vpop.f32.mrf.mxu0  ;;  %v14211_v23 = vpop.f32.mrf.mxu3  ;;  %v6218_v54 = vadd.f32 %v6217_v9, %v13844_v46  ;;  %v8020_v49 = vshll.u32 %v14228_v50, 16  ;;  %v8019_v20 = vrot.slane %v8017_v26, 2 }
 0x64f   : > { %v14213_v30 = vadd.f32 %v7217_v19, %v6875_v52  ;;  %v8022_v33 = vrot.slane %v8020_v49, 3 }
 0x652   : > { %v6441_v42 = vpop.f32.mrf.mxu2 }
 0x653   : > { %v6491_v5 = vadd.f32 %v6441_v42, %v6218_v54  ;;  %v14773_v54 = vld [vmem:[#allocation10_spill] sm:$0xff] }
 0x654   : > { %v6220_v24 = vpop.f32.mrf.mxu1 }
 0x655   : > { %v6876_v51 = vadd.f32 %v14174_v15, %v6491_v5  ;;  %v7222_v19 = vpop.f32.mrf.mxu0  ;;  %v14223_v45 = vpop.f32.mrf.mxu3  ;;  %v6221_v60 = vadd.f32 %v6220_v24, %v14772_v12  ;;  %v8349_v5 = vrot.slane %v14179_v8, 3  ;;  %v8584_v12 = vld [vmem:[%s10809_s12 + $0x53] sm:$0xff] }
 0x656   : > { %8654 = vperm.xlu2 %10627, %v8584_v12  }
 0x657   : > { %7431 = vmatmul.bf16.gmra.mxu1 %v7310_v39  ;;  %7816 = vmatmul.bf16.gmra.mxu2 %v7695_v41  ;;  %v14225_v46 = vadd.f32 %v7219_v4, %v6876_v51  ;;  %v10639_v4 = vld [vmem:[#allocation2 + $0x38] sm:$0xff]  ;;  %v7697_v51 = vsel %vm3726_vm12, %v7694_v44, %v7696_v57  ;;  %v14774_v44 = vld [vmem:[#allocation3_spill] sm:$0xff] }
 0x658   : > { %8469 = vmatmul.bf16.gmra.mxu0 %v8348_v36  ;;  %v7311_v17 = vrot.slane %v10639_v4, 2 }
 0x65a   : > { %v6444_v15 = vpop.f32.mrf.mxu2  ;;  %8219 = vmatmul.bf16.gmra.mxu3 %v8015_v0  ;;  %v7312_v41 = vsel %vm3726_vm12, %v7309_v43, %v7311_v17  ;;  %v8350_v0 = vsel %vm4770_vm13, %v8347_v29, %v8349_v5 }
 0x65b   : > { %v6492_v22 = vadd.f32 %v6444_v15, %v6221_v60  ;;  %v14252_v15 = vld [vmem:[#allocation2 + $0x58] sm:$0xff] }
 0x65c   : > { %v6222_v28 = vpop.f32.mrf.mxu1  ;;  %v8026_v26 = vshrl.u32 %v14252_v15, 16  ;;  %v8029_v49 = vshll.u32 %v14252_v15, 16 }
 0x65d   : > { %v6877_v9 = vadd.f32 %v14186_v16, %v6492_v22  ;;  %v7224_v62 = vpop.f32.mrf.mxu0  ;;  %v14235_v52 = vpop.f32.mrf.mxu3  ;;  %v6223_v42 = vadd.f32 %v6222_v28, %v14773_v54  ;;  %v7698_v54 = vrot.slane %v14204_v63, 2 }
 0x65f   : > { %v14237_v13 = vadd.f32 %v7222_v19, %v6877_v9  ;;  %v8023_v19 = vor.u32 %v8022_v33, %v8019_v20  ;;  %v10640_v20 = vld [vmem:[#allocation2 + $0x40] sm:$0xff]  ;;  %v7699_v12 = vsel %vm3726_vm12, %v7696_v57, %v7698_v54  ;;  %v14776_v57 = vld [vmem:[#allocation5_spill] sm:$0xff] }
 0x660   : > { %v7313_v33 = vrot.slane %v10640_v20, 2 }
 0x661   : > { %v8024_v43 = vsel %vm4375_vm11, %v8014_v11, %v8023_v19 }
 0x662   : > { %v6446_v24 = vpop.f32.mrf.mxu2 }
 0x663   : > { %v6493_v16 = vadd.f32 %v6446_v24, %v6223_v42  ;;  %v8028_v42 = vrot.slane %v8026_v26, 2  ;;  %v8031_v24 = vrot.slane %v8029_v49, 3 }
 0x664   : > { %v6225_v39 = vpop.f32.mrf.mxu1 }
 0x665   : > { %v6878_v36 = vadd.f32 %v14199_v14, %v6493_v16  ;;  %v7227_v27 = vpop.f32.mrf.mxu0  ;;  %v14247_v60 = vpop.f32.mrf.mxu3  ;;  %v6226_v22 = vadd.f32 %v6225_v39, %v14774_v44  ;;  %v14775_v16 = vld [vmem:[#allocation4_spill] sm:$0xff] }
 0x667   : > { %7436 = vmatmul.bf16.gmra.mxu1 %v7312_v41  ;;  %7821 = vmatmul.bf16.gmra.mxu2 %v7697_v51  ;;  %v14249_v8 = vadd.f32 %v7224_v62, %v6878_v36  ;;  %v8588_v62 = vld [vmem:[%s10809_s12 + $0x73] sm:$0xff]  ;;  %v8351_v41 = vrot.slane %v14204_v63, 3 }
 0x668   : > { %8474 = vmatmul.bf16.gmra.mxu0 %v8350_v0  ;;  %8674 = vperm.xlu0 %10625, %v8588_v62   ;;  %v7314_v0 = vsel %vm3726_vm12, %v7311_v17, %v7313_v33 }
 0x66a   : > { %v6449_v14 = vpop.f32.mrf.mxu2  ;;  %8224 = vmatmul.bf16.gmra.mxu3 %v8024_v43 }
 0x66b   : > { %v6494_v28 = vadd.f32 %v6449_v14, %v6226_v22  ;;  %v8352_v22 = vsel %vm4770_vm13, %v8349_v5, %v8351_v41  ;;  %v8589_v14 = vld [vmem:[%s10809_s12 + $0x7b] sm:$0xff] }
 0x66c   : > { %v6227_v29 = vpop.f32.mrf.mxu1  ;;  %8679 = vperm.xlu1 %10626, %v8589_v14  }
 0x66d   : > { %v6879_v9 = vadd.f32 %v14211_v23, %v6494_v28  ;;  %v7229_v21 = vpop.f32.mrf.mxu0  ;;  %v14259_v4 = vpop.f32.mrf.mxu3  ;;  %v6228_v39 = vadd.f32 %v6227_v29, %v14775_v16  ;;  %v14276_v29 = vld [vmem:[#allocation2 + $0x60] sm:$0xff]  ;;  %v10641_v16 = vld [vmem:[#allocation2 + $0x48] sm:$0xff] }
 0x66e   : > { %v8038_v62 = vshll.u32 %v14276_v29, 16 }
 0x66f   : > { %v14261_v11 = vadd.f32 %v7227_v27, %v6879_v9  ;;  %v8032_v27 = vor.u32 %v8031_v24, %v8028_v42  ;;  %v8035_v9 = vshrl.u32 %v14276_v29, 16 }
 0x671   : > { %v8033_v17 = vsel %vm4375_vm11, %v8023_v19, %v8032_v27 }
 0x672   : > { %v6451_v51 = vpop.f32.mrf.mxu2 }
 0x673   : > { %v6495_v23 = vadd.f32 %v6451_v51, %v6228_v39  ;;  %v7315_v39 = vrot.slane %v10641_v16, 2  ;;  %v7700_v51 = vrot.slane %v14228_v50, 2 }
 0x674   : > { %v6230_v36 = vpop.f32.mrf.mxu1 }
 0x675   : > { %v6880_v43 = vadd.f32 %v14223_v45, %v6495_v23  ;;  %v7232_v44 = vpop.f32.mrf.mxu0  ;;  %v14271_v28 = vpop.f32.mrf.mxu3  ;;  %v6231_v26 = vadd.f32 %v6230_v36, %v14776_v57  ;;  %v8037_v23 = vrot.slane %v8035_v9, 2  ;;  %v8040_v36 = vrot.slane %v8038_v62, 3 }
 0x676   : > { %v7701_v57 = vsel %vm3726_vm12, %v7698_v54, %v7700_v51  ;;  %v14778_v54 = vld [vmem:[#allocation7_spill] sm:$0xff] }
 0x677   : > { %7441 = vmatmul.bf16.gmra.mxu1 %v7314_v0  ;;  %7826 = vmatmul.bf16.gmra.mxu2 %v7699_v12  ;;  %v14273_v63 = vadd.f32 %v7229_v21, %v6880_v43  ;;  %v8587_v21 = vld [vmem:[%s10809_s12 + $0x6b] sm:$0xff]  ;;  %v14777_v0 = vld [vmem:[#allocation6_spill] sm:$0xff]  ;;  %v8353_v43 = vrot.slane %v14228_v50, 3 }
 0x678   : > { %8479 = vmatmul.bf16.gmra.mxu0 %v8352_v22  ;;  %8669 = vperm.xlu2 %10627, %v8587_v21  }
 0x67a   : > { %v6454_v45 = vpop.f32.mrf.mxu2  ;;  %8229 = vmatmul.bf16.gmra.mxu3 %v8033_v17  ;;  %v7316_v17 = vsel %vm3726_vm12, %v7313_v33, %v7315_v39 }
 0x67b   : > { %v6496_v49 = vadd.f32 %v6454_v45, %v6231_v26 }
 0x67c   : > { %v6232_v5 = vpop.f32.mrf.mxu1 }
 0x67d   : > { %v6881_v20 = vadd.f32 %v14235_v52, %v6496_v49  ;;  %v7234_v42 = vpop.f32.mrf.mxu0  ;;  %v14283_v24 = vpop.f32.mrf.mxu3  ;;  %v6233_v12 = vadd.f32 %v6232_v5, %v14777_v0  ;;  %v8354_v49 = vsel %vm4770_vm13, %v8351_v41, %v8353_v43  ;;  %v14300_v5 = vld [vmem:[#allocation2 + $0x68] sm:$0xff] }
 0x67e   : > { %v8044_v16 = vshrl.u32 %v14300_v5, 16 }
 0x67f   : > { %v14285_v19 = vadd.f32 %v7232_v44, %v6881_v20  ;;  %v8041_v44 = vor.u32 %v8040_v36, %v8037_v23  ;;  %v8591_v20 = vld [vmem:[%s10809_s12 + $0x8b] sm:$0xff]  ;;  %v8047_v23 = vshll.u32 %v14300_v5, 16 }
 0x680   : > { %8689 = vperm.xlu0 %10625, %v8591_v20   ;;  %v8355_v20 = vrot.slane %v14252_v15, 3 }
 0x681   : > { %v8042_v33 = vsel %vm4375_vm11, %v8032_v27, %v8041_v44 }
 0x682   : > { %v6456_v22 = vpop.f32.mrf.mxu2 }
 0x683   : > { %v6497_v52 = vadd.f32 %v6456_v22, %v6233_v12  ;;  %v10642_v22 = vld [vmem:[#allocation2 + $0x50] sm:$0xff] }
 0x684   : > { %v6235_v14 = vpop.f32.mrf.mxu1 }
 0x685   : > { %v6882_v26 = vadd.f32 %v14247_v60, %v6497_v52  ;;  %v7237_v45 = vpop.f32.mrf.mxu0  ;;  %v14295_v9 = vpop.f32.mrf.mxu3  ;;  %v6236_v62 = vadd.f32 %v6235_v14, %v14778_v54  ;;  %v7317_v52 = vrot.slane %v10642_v22, 2  ;;  %v7702_v14 = vrot.slane %v14252_v15, 2  ;;  %v8590_v22 = vld [vmem:[%s10809_s12 + $0x83] sm:$0xff] }
 0x686   : > { %8684 = vperm.xlu2 %10627, %v8590_v22  }
 0x687   : > { %7446 = vmatmul.bf16.gmra.mxu1 %v7316_v17  ;;  %7831 = vmatmul.bf16.gmra.mxu2 %v7701_v57  ;;  %v14297_v50 = vadd.f32 %v7234_v42, %v6882_v26  ;;  %v8592_v42 = vld [vmem:[%s10809_s12 + $0x93] sm:$0xff]  ;;  %v8046_v17 = vrot.slane %v8044_v16, 2  ;;  %v8049_v57 = vrot.slane %v8047_v23, 3 }
 0x688   : > { %8484 = vmatmul.bf16.gmra.mxu0 %v8354_v49  ;;  %8694 = vperm.xlu1 %10626, %v8592_v42   ;;  %v14779_v26 = vld [vmem:[#allocation8_spill] sm:$0xff]  ;;  %v8356_v42 = vsel %vm4770_vm13, %v8353_v43, %v8355_v20 }
 0x68a   : > { %v6459_v60 = vpop.f32.mrf.mxu2  ;;  %8234 = vmatmul.bf16.gmra.mxu3 %v8042_v33 }
 0x68b   : > { %v6498_v21 = vadd.f32 %v6459_v60, %v6236_v62  ;;  %v7318_v62 = vsel %vm3726_vm12, %v7315_v39, %v7317_v52  ;;  %v7703_v60 = vsel %vm3726_vm12, %v7700_v51, %v7702_v14 }
 0x68c   : > { %v6237_v41 = vpop.f32.mrf.mxu1 }
 0x68d   : > { %v6883_v36 = vadd.f32 %v14259_v4, %v6498_v21  ;;  %v7239_v0 = vpop.f32.mrf.mxu0  ;;  %v14307_v12 = vpop.f32.mrf.mxu3  ;;  %v6238_v49 = vadd.f32 %v6237_v41, %v14779_v26  ;;  %v14324_v41 = vld [vmem:[#allocation2 + $0x70] sm:$0xff] }
 0x68e   : > { %v8056_v26 = vshll.u32 %v14324_v41, 16 }
 0x68f   : > { %v14309_v27 = vadd.f32 %v7237_v45, %v6883_v36  ;;  %v8050_v45 = vor.u32 %v8049_v57, %v8046_v17  ;;  %v8615_v17 = vpop.permute.xlu0 %8614  ;;  %v8053_v57 = vshrl.u32 %v14324_v41, 16 }
 0x691   : > { %v8051_v39 = vsel %vm4375_vm11, %v8041_v44, %v8050_v45 }
 0x692   : > { %v6461_v33 = vpop.f32.mrf.mxu2 }
 0x693   : > { %v6499_v4 = vadd.f32 %v6461_v33, %v6238_v49  ;;  %v8594_v33 = vld [vmem:[%s10809_s12 + $0xa3] sm:$0xff] }
 0x694   : > { %v7412_v54 = vpop.f32.mrf.mxu1  ;;  %8704 = vperm.xlu0 %10625, %v8594_v33  }
 0x695   : > { %v6884_v21 = vadd.f32 %v14271_v28, %v6499_v4  ;;  %v8450_v36 = vpop.f32.mrf.mxu0  ;;  %v14319_v16 = vpop.f32.mrf.mxu3  ;;  %v7502_v51 = vadd.f32 %v7412_v54, %v13884_v32  ;;  %v7704_v54 = vrot.slane %v14276_v29, 2 }
 0x697   : > { %7451 = vmatmul.bf16.gmra.mxu1 %v7318_v62  ;;  %7836 = vmatmul.bf16.gmra.mxu2 %v7703_v60  ;;  %v14321_v15 = vadd.f32 %v7239_v0, %v6884_v21  ;;  %v10643_v62 = vld [vmem:[#allocation2 + $0x58] sm:$0xff]  ;;  %v8055_v60 = vrot.slane %v8053_v57, 2  ;;  %v8058_v21 = vrot.slane %v8056_v26, 3  ;;  %v8595_v26 = vld [vmem:[%s10809_s12 + $0xab] sm:$0xff] }
 0x698   : > { %8489 = vmatmul.bf16.gmra.mxu0 %v8356_v42  ;;  %v7319_v32 = vrot.slane %v10643_v62, 2  ;;  %8709 = vperm.xlu1 %10626, %v8595_v26  }
 0x69a   : > { %v7797_v28 = vpop.f32.mrf.mxu2  ;;  %8239 = vmatmul.bf16.gmra.mxu3 %v8051_v39  ;;  %v8357_v39 = vrot.slane %v14276_v29, 3 }
 0x69b   : > { %v7887_v23 = vadd.f32 %v7797_v28, %v7502_v51 }
 0x69c   : > { %v7414_v43 = vpop.f32.mrf.mxu1  ;;  %v8358_v57 = vsel %vm4770_vm13, %v8355_v20, %v8357_v39 }
 0x69d   : > { %v8280_v0 = vadd.f32 %v14283_v24, %v7887_v23  ;;  %v8452_v49 = vpop.f32.mrf.mxu0  ;;  %v14331_v4 = vpop.f32.mrf.mxu3  ;;  %v7503_v42 = vadd.f32 %v7414_v43, %v13896_v47  ;;  %v7320_v23 = vsel %vm3726_vm12, %v7317_v52, %v7319_v32 }
 0x69e   : > { %v8620_v47 = vpop.permute.xlu0 %8619 }
 0x69f   : > { %v8540_v44 = vadd.f32 %v8450_v36, %v8280_v0  ;;  %v7705_v36 = vsel %vm3726_vm12, %v7702_v14, %v7704_v54  ;;  %v8059_v0 = vor.u32 %v8058_v21, %v8055_v60  ;;  %v14345_v14 = vld [vmem:[#allocation2 + $0x78] sm:$0xff]  ;;  %v8625_v21 = vpop.permute.xlu1 %8624 }
 0x6a1   : > { %v8792_v22 = vsub.f32 %v8615_v17, %v8540_v44  ;;  %v8060_v52 = vsel %vm4375_vm11, %v8050_v45, %v8059_v0  ;;  %v8593_v45 = vld [vmem:[%s10809_s12 + $0x9b] sm:$0xff] }
 0x6a2   : > { %v7799_v51 = vpop.f32.mrf.mxu2  ;;  %8699 = vperm.xlu2 %10627, %v8593_v45  }
 0x6a3   : > { %8828 = vst [vmem:[%s11216_s22] sm:$0xff] %v8792_v22  ;;  %v7888_v24 = vadd.f32 %v7799_v51, %v7503_v42  ;;  %v8062_v42 = vshrl.u32 %v14345_v14, 16 }
 0x6a4   : > { %v7417_v28 = vpop.f32.mrf.mxu1 }
 0x6a5   : > { %v8281_v33 = vadd.f32 %v14295_v9, %v7888_v24  ;;  %v8455_v62 = vpop.f32.mrf.mxu0  ;;  %v14342_v43 = vpop.f32.mrf.mxu3  ;;  %v7504_v9 = vadd.f32 %v7417_v28, %v13911_v10  ;;  %v8598_v24 = vld [vmem:[%s10809_s12 + $0xc3] sm:$0xff]  ;;  %v8064_v26 = vrot.slane %v8062_v42, 2 }
 0x6a6   : > { %8724 = vperm.xlu1 %10626, %v8598_v24   ;;  %v14357_v28 = vld [vmem:[#allocation2 + $0x60] sm:$0xff] }
 0x6a7   : > { %7456 = vmatmul.bf16.gmra.mxu1 %v7320_v23  ;;  %7841 = vmatmul.bf16.gmra.mxu2 %v7705_v36  ;;  %v8541_v29 = vadd.f32 %v8452_v49, %v8281_v33  ;;  %v8065_v49 = vshll.u32 %v14345_v14, 16  ;;  %v8597_v23 = vld [vmem:[%s10809_s12 + $0xbb] sm:$0xff]  ;;  %v7321_v33 = vrot.slane %v14357_v28, 2 }
 0x6a8   : > { %8494 = vmatmul.bf16.gmra.mxu0 %v8358_v57  ;;  %8719 = vperm.xlu0 %10625, %v8597_v23   ;;  %v7706_v57 = vrot.slane %v14300_v5, 2 }
 0x6a9   : > { %v8793_v17 = vsub.f32 %v8620_v47, %v8541_v29 }
 0x6aa   : > { %v7802_v20 = vpop.f32.mrf.mxu2  ;;  %8244 = vmatmul.bf16.gmra.mxu3 %v8060_v52  ;;  %v8359_v52 = vrot.slane %v14300_v5, 3 }
 0x6ab   : > { %8829 = vst [vmem:[%s11216_s22 + $0x8] sm:$0xff] %v8793_v17  ;;  %v7889_v44 = vadd.f32 %v7802_v20, %v7504_v9  ;;  %v7322_v20 = vsel %vm3726_vm12, %v7319_v32, %v7321_v33 }
 0x6ac   : > { %v7419_v60 = vpop.f32.mrf.mxu1 }
 0x6ad   : > { %v8282_v22 = vadd.f32 %v14307_v12, %v7889_v44  ;;  %v8457_v51 = vpop.f32.mrf.mxu0  ;;  %v14355_v36 = vpop.f32.mrf.mxu3  ;;  %v8067_v12 = vrot.slane %v8065_v49, 3  ;;  %v7505_v47 = vadd.f32 %v7419_v60, %v13923_v61  ;;  %v7707_v44 = vsel %vm3726_vm12, %v7704_v54, %v7706_v57  ;;  %v8601_v61 = vld [vmem:[%s10809_s12 + $0xdb] sm:$0xff]  ;;  %v8600_v60 = vld [vmem:[%s10809_s12 + $0xd3] sm:$0xff] }
 0x6ae   : > { %v8360_v49 = vsel %vm4770_vm13, %v8357_v39, %v8359_v52  ;;  %8739 = vperm.xlu1 %10626, %v8601_v61  }
 0x6af   : > { %v8542_v10 = vadd.f32 %v8455_v62, %v8282_v22  ;;  %v14366_v22 = vor.u32 %v8067_v12, %v8064_v26  ;;  %v8635_v26 = vpop.permute.xlu2 %8634 }
 0x6b0   : > { %8734 = vperm.xlu0 %10625, %v8600_v60  }
 0x6b1   : > { %v8794_v29 = vsub.f32 %v8625_v21, %v8542_v10  ;;  %v8630_v21 = vpop.permute.xlu1 %8629  ;;  %v8069_v32 = vsel %vm4375_vm11, %v8059_v0, %v14366_v22 }
 0x6b2   : > { %v7804_v9 = vpop.f32.mrf.mxu2 }
 0x6b3   : > { %8830 = vst [vmem:[%s11216_s22 + $0x10] sm:$0xff] %v8794_v29  ;;  %v7890_v17 = vadd.f32 %v7804_v9, %v7505_v47  ;;  %v8596_v29 = vld [vmem:[%s10809_s12 + $0xb3] sm:$0xff] }
 0x6b4   : > { %v7422_v62 = vpop.f32.mrf.mxu1  ;;  %v8604_v9 = vld [vmem:[%s10809_s12 + $0xf3] sm:$0xff]  ;;  %8714 = vperm.xlu2 %10627, %v8596_v29  }
 0x6b5   : > { %v8283_v45 = vadd.f32 %v14319_v16, %v7890_v17  ;;  %v8460_v42 = vpop.f32.mrf.mxu0  ;;  %v14372_v5 = vpop.f32.mrf.mxu3  ;;  %v14376_v16 = vld [vmem:[#allocation2 + $0x80] sm:$0xff]  ;;  %v7506_v54 = vadd.f32 %v7422_v62, %v13932_v1  ;;  %v8603_v17 = vld [vmem:[%s10809_s12 + $0xeb] sm:$0xff] }
 0x6b6   : > { %v8074_v12 = vshll.u32 %v14376_v16, 16  ;;  %8754 = vperm.xlu1 %10626, %v8604_v9   ;;  %v14388_v62 = vld [vmem:[#allocation2 + $0x68] sm:$0xff] }
 0x6b7   : > { %7461 = vmatmul.bf16.gmra.mxu1 %v7322_v20  ;;  %7846 = vmatmul.bf16.gmra.mxu2 %v7707_v44  ;;  %v8543_v24 = vadd.f32 %v8457_v51, %v8283_v45  ;;  %v8071_v51 = vshrl.u32 %v14376_v16, 16  ;;  %v7323_v44 = vrot.slane %v14388_v62, 2  ;;  %v7708_v45 = vrot.slane %v14324_v41, 2 }
 0x6b8   : > { %8499 = vmatmul.bf16.gmra.mxu0 %v8360_v49  ;;  %8749 = vperm.xlu0 %10625, %v8603_v17  }
 0x6b9   : > { %v8795_v39 = vsub.f32 %v8630_v21, %v8543_v24  ;;  %v8073_v49 = vrot.slane %v8071_v51, 2  ;;  %v8361_v21 = vrot.slane %v14324_v41, 3  ;;  %v8607_v51 = vld [vmem:[%s10809_s12 + $0x10b] sm:$0xff] }
 0x6ba   : > { %v7807_v23 = vpop.f32.mrf.mxu2  ;;  %8249 = vmatmul.bf16.gmra.mxu3 %v8069_v32 }
 0x6bb   : > { %8831 = vst [vmem:[%s11216_s22 + $0x18] sm:$0xff] %v8795_v39  ;;  %v7891_v10 = vadd.f32 %v7807_v23, %v7506_v54  ;;  %v7324_v54 = vsel %vm3726_vm12, %v7321_v33, %v7323_v44  ;;  %v7709_v39 = vsel %vm3726_vm12, %v7706_v57, %v7708_v45  ;;  %v14415_v57 = vld [vmem:[#allocation2 + $0x88] sm:$0xff] }
 0x6bc   : > { %v7424_v28 = vpop.f32.mrf.mxu1 }
 0x6bd   : > { %v8284_v0 = vadd.f32 %v14331_v4, %v7891_v10  ;;  %v8462_v47 = vpop.f32.mrf.mxu0  ;;  %v14386_v20 = vpop.f32.mrf.mxu3  ;;  %v8076_v4 = vrot.slane %v8074_v12, 3  ;;  %v7507_v61 = vadd.f32 %v7424_v28, %v13944_v6  ;;  %v8362_v28 = vsel %vm4770_vm13, %v8359_v52, %v8361_v21  ;;  %v8606_v12 = vld [vmem:[%s10809_s12 + $0x103] sm:$0xff] }
 0x6be   : > { %8769 = vperm.xlu1 %10626, %v8607_v51  }
 0x6bf   : > { %v8544_v1 = vadd.f32 %v8460_v42, %v8284_v0  ;;  %v14401_v23 = vor.u32 %v8076_v4, %v8073_v49  ;;  %v8640_v0 = vpop.permute.xlu2 %8639  ;;  %v8083_v4 = vshll.u32 %v14415_v57, 16 }
 0x6c0   : > { %8764 = vperm.xlu0 %10625, %v8606_v12  }
 0x6c1   : > { %v8796_v60 = vsub.f32 %v8635_v26, %v8544_v1  ;;  %v8599_v26 = vld [vmem:[%s10809_s12 + $0xcb] sm:$0xff]  ;;  %v8085_v51 = vrot.slane %v8083_v4, 3 }
 0x6c2   : > { %v7809_v24 = vpop.f32.mrf.mxu2  ;;  %8729 = vperm.xlu2 %10627, %v8599_v26  }
 0x6c3   : > { %8832 = vst [vmem:[%s11216_s22 + $0x20] sm:$0xff] %v8796_v60  ;;  %v7892_v42 = vadd.f32 %v7809_v24, %v7507_v61  ;;  %v8610_v24 = vld [vmem:[%s10809_s12 + $0x123] sm:$0xff] }
 0x6c4   : > { %v7427_v32 = vpop.f32.mrf.mxu1 }
 0x6c5   : > { %v8285_v10 = vadd.f32 %v14342_v43, %v7892_v42  ;;  %v8465_v6 = vpop.f32.mrf.mxu0  ;;  %v14410_v29 = vpop.f32.mrf.mxu3  ;;  %v8078_v43 = vsel %vm4375_vm11, %v14366_v22, %v14401_v23  ;;  %v7508_v52 = vadd.f32 %v7427_v32, %v13957_v56  ;;  %v8602_v22 = vld [vmem:[%s10809_s12 + $0xe3] sm:$0xff]  ;;  %v8609_v42 = vld [vmem:[%s10809_s12 + $0x11b] sm:$0xff]  ;;  %v10646_v32 = vld [vmem:[#allocation2 + $0x70] sm:$0xff] }
 0x6c6   : > { %8784 = vperm.xlu1 %10626, %v8610_v24  }
 0x6c7   : > { %7466 = vmatmul.bf16.gmra.mxu1 %v7324_v54  ;;  %7851 = vmatmul.bf16.gmra.mxu2 %v7709_v39  ;;  %v8545_v33 = vadd.f32 %v8462_v47, %v8285_v10  ;;  %v8080_v47 = vshrl.u32 %v14415_v57, 16  ;;  %v8645_v54 = vpop.permute.xlu0 %8644  ;;  %v7325_v10 = vrot.slane %v10646_v32, 2 }
 0x6c8   : > { %8504 = vmatmul.bf16.gmra.mxu0 %v8362_v28  ;;  %v7710_v28 = vrot.slane %v14345_v14, 2  ;;  %8779 = vperm.xlu0 %10625, %v8609_v42  }
 0x6c9   : > { %v8797_v9 = vsub.f32 %v8640_v0, %v8545_v33  ;;  %v8082_v26 = vrot.slane %v8080_v47, 2  ;;  %v8363_v0 = vrot.slane %v14345_v14, 3  ;;  %v8650_v47 = vpop.permute.xlu1 %8649 }
 0x6ca   : > { %v7812_v17 = vpop.f32.mrf.mxu2  ;;  %8254 = vmatmul.bf16.gmra.mxu3 %v8078_v43  ;;  %8744 = vperm.xlu2 %10627, %v8602_v22  }
 0x6cb   : > { %8833 = vst [vmem:[%s11216_s22 + $0x28] sm:$0xff] %v8797_v9  ;;  %v7893_v1 = vadd.f32 %v7812_v17, %v7508_v52  ;;  %v7711_v9 = vsel %vm3726_vm12, %v7708_v45, %v7710_v28  ;;  %v8086_v17 = vor.u32 %v8085_v51, %v8082_v26  ;;  %v8364_v14 = vsel %vm4770_vm13, %v8361_v21, %v8363_v0  ;;  %v10647_v26 = vld [vmem:[#allocation2 + $0x78] sm:$0xff] }
 0x6cc   : > { %v7429_v49 = vpop.f32.mrf.mxu1  ;;  %v7327_v51 = vrot.slane %v10647_v26, 2  ;;  %v10648_v26 = vld [vmem:[#allocation2 + $0x80] sm:$0xff] }
 0x6cd   : > { %v8286_v61 = vadd.f32 %v14355_v36, %v7893_v1  ;;  %v8467_v60 = vpop.f32.mrf.mxu0  ;;  %v14425_v39 = vpop.f32.mrf.mxu3  ;;  %v7509_v36 = vadd.f32 %v7429_v49, %v13972_v2  ;;  %v8605_v49 = vld [vmem:[%s10809_s12 + $0xfb] sm:$0xff] }
 0x6cf   : > { %v8546_v56 = vadd.f32 %v8465_v6, %v8286_v61  ;;  %v7326_v6 = vsel %vm3726_vm12, %v7323_v44, %v7325_v10  ;;  %v8087_v44 = vsel %vm4375_vm11, %v14401_v23, %v8086_v17  ;;  %v8655_v23 = vpop.permute.xlu2 %8654 }
 0x6d1   : > { %v8798_v12 = vsub.f32 %v8645_v54, %v8546_v56  ;;  %v8608_v56 = vld [vmem:[%s10809_s12 + $0x113] sm:$0xff] }
 0x6d2   : > { %v7814_v33 = vpop.f32.mrf.mxu2  ;;  %8759 = vperm.xlu2 %10627, %v8605_v49  }
 0x6d3   : > { %8834 = vst [vmem:[%s11216_s22 + $0x30] sm:$0xff] %v8798_v12  ;;  %v7894_v43 = vadd.f32 %v7814_v33, %v7509_v36  ;;  %v7712_v36 = vrot.slane %v14376_v16, 2 }
 0x6d4   : > { %v7432_v52 = vpop.f32.mrf.mxu1 }
 0x6d5   : > { %v8287_v1 = vadd.f32 %v14372_v5, %v7894_v43  ;;  %v8470_v2 = vpop.f32.mrf.mxu0  ;;  %v14442_v4 = vpop.f32.mrf.mxu3  ;;  %v14446_v5 = vld [vmem:[#allocation2 + $0x90] sm:$0xff]  ;;  %v7510_v45 = vadd.f32 %v7432_v52, %v13984_v34 }
 0x6d6   : > { %v8089_v24 = vshrl.u32 %v14446_v5, 16  ;;  %v8092_v42 = vshll.u32 %v14446_v5, 16 }
 0x6d7   : > { %7471 = vmatmul.bf16.gmra.mxu1 %v7326_v6  ;;  %7856 = vmatmul.bf16.gmra.mxu2 %v7711_v9  ;;  %v8547_v62 = vadd.f32 %v8467_v60, %v8287_v1 }
 0x6d8   : > { %8509 = vmatmul.bf16.gmra.mxu0 %v8364_v14  ;;  %v8091_v12 = vrot.slane %v8089_v24, 2  ;;  %v8094_v33 = vrot.slane %v8092_v42, 3  ;;  %v7328_v14 = vsel %vm3726_vm12, %v7325_v10, %v7327_v51 }
 0x6d9   : > { %v8799_v41 = vsub.f32 %v8650_v47, %v8547_v62 }
 0x6da   : > { %v7817_v61 = vpop.f32.mrf.mxu2  ;;  %8259 = vmatmul.bf16.gmra.mxu3 %v8087_v44  ;;  %8774 = vperm.xlu2 %10627, %v8608_v56   ;;  %v8095_v49 = vor.u32 %v8094_v33, %v8091_v12  ;;  %v7329_v12 = vrot.slane %v10648_v26, 2  ;;  %v7714_v33 = vrot.slane %v14415_v57, 2 }
 0x6db   : > { %8835 = vst [vmem:[%s11216_s22 + $0x38] sm:$0xff] %v8799_v41  ;;  %v7895_v21 = vadd.f32 %v7817_v61, %v7510_v45  ;;  %v8611_v45 = vld [vmem:[%s10809_s12 + $0x12b] sm:$0xff]  ;;  %v14468_v61 = vld [vmem:[#allocation2 + $0x98] sm:$0xff] }
 0x6dc   : > { %v7434_v22 = vpop.f32.mrf.mxu1  ;;  %v8096_v10 = vsel %vm4375_vm11, %v8086_v17, %v8095_v49  ;;  %v8098_v42 = vshrl.u32 %v14468_v61, 16 }
 0x6dd   : > { %v8288_v60 = vadd.f32 %v14386_v20, %v7895_v21  ;;  %v8472_v54 = vpop.f32.mrf.mxu0  ;;  %v14454_v32 = vpop.f32.mrf.mxu3  ;;  %v7511_v43 = vadd.f32 %v7434_v22, %v13997_v7  ;;  %v8365_v20 = vrot.slane %v14376_v16, 3 }
 0x6de   : > { %v8660_v7 = vpop.permute.xlu0 %8659 }
 0x6df   : > { %v8548_v34 = vadd.f32 %v8470_v2, %v8288_v60  ;;  %v7713_v2 = vsel %vm3726_vm12, %v7710_v28, %v7712_v36  ;;  %v8366_v44 = vsel %vm4770_vm13, %v8363_v0, %v8365_v20  ;;  %v14780_v28 = vld [vmem:[#allocation11_spill] sm:$0xff]  ;;  %v8101_v60 = vshll.u32 %v14468_v61, 16 }
 0x6e1   : > { %v8800_v52 = vsub.f32 %v8655_v23, %v8548_v34  ;;  %v8665_v23 = vpop.permute.xlu1 %8664 }
 0x6e2   : > { %v7819_v6 = vpop.f32.mrf.mxu2  ;;  %8789 = vperm.xlu2 %10627, %v8611_v45   ;;  %v7715_v45 = vsel %vm3726_vm12, %v7712_v36, %v7714_v33  ;;  %v14782_v36 = vld [vmem:[#allocation13_spill] sm:$0xff] }
 0x6e3   : > { %8836 = vst [vmem:[%s11216_s22 + $0x40] sm:$0xff] %v8800_v52  ;;  %v7896_v9 = vadd.f32 %v7819_v6, %v7511_v43  ;;  %v8100_v43 = vrot.slane %v8098_v42, 2  ;;  %v8103_v52 = vrot.slane %v8101_v60, 3  ;;  %v14781_v6 = vld [vmem:[#allocation12_spill] sm:$0xff] }
 0x6e4   : > { %v7437_v1 = vpop.f32.mrf.mxu1 }
 0x6e5   : > { %v8289_v47 = vadd.f32 %v14410_v29, %v7896_v9  ;;  %v8475_v62 = vpop.f32.mrf.mxu0  ;;  %v14465_v41 = vpop.f32.mrf.mxu3  ;;  %v7512_v21 = vadd.f32 %v7437_v1, %v14780_v28  ;;  %v7923_v28 = vld [vmem:[#allocation2 + $0xa0] sm:$0x7] }
 0x6e6   : > { %v8675_v26 = vpop.permute.xlu0 %8674 }
 0x6e7   : > { %7476 = vmatmul.bf16.gmra.mxu1 %v7328_v14  ;;  %7861 = vmatmul.bf16.gmra.mxu2 %v7713_v2  ;;  %v8549_v16 = vadd.f32 %v8472_v54, %v8289_v47  ;;  %v8367_v14 = vrot.slane %v14415_v57, 3  ;;  %v7942_v57 = vunpack.c.l.b16 %v7923_v28 }
 0x6e8   : > { %8514 = vmatmul.bf16.gmra.mxu0 %v8366_v44  ;;  %v7330_v44 = vsel %vm3726_vm12, %v7327_v51, %v7329_v12 }
 0x6e9   : > { %v8801_v29 = vsub.f32 %v8660_v7, %v8549_v16 }
 0x6ea   : > { %v7822_v22 = vpop.f32.mrf.mxu2  ;;  %8264 = vmatmul.bf16.gmra.mxu3 %v8096_v10  ;;  %v8368_v10 = vsel %vm4770_vm13, %v8365_v20, %v8367_v14 }
 0x6eb   : > { %8837 = vst [vmem:[%s11216_s22 + $0x48] sm:$0xff] %v8801_v29  ;;  %v7897_v24 = vadd.f32 %v7822_v22, %v7512_v21  ;;  %v8670_v21 = vpop.permute.xlu2 %8669 }
 0x6ec   : > { %v7439_v0 = vpop.f32.mrf.mxu1 }
 0x6ed   : > { %v8290_v54 = vadd.f32 %v14425_v39, %v7897_v24  ;;  %v8477_v56 = vpop.f32.mrf.mxu0  ;;  %v14475_v17 = vpop.f32.mrf.mxu3  ;;  %v7513_v9 = vadd.f32 %v7439_v0, %v14781_v6  ;;  %v14488_v24 = vpack.c.b16 %v7942_v57, %v7942_v57 }
 0x6ef   : > { %v8550_v34 = vadd.f32 %v8475_v62, %v8290_v54  ;;  %v8104_v62 = vor.u32 %v8103_v52, %v8100_v43  ;;  %v8107_v54 = vshrl.u32 %v14488_v24, 16  ;;  %v10649_v52 = vld [vmem:[#allocation2 + $0x88] sm:$0xff] }
 0x6f0   : > { %v7331_v6 = vrot.slane %v10649_v52, 2  ;;  %v8371_v52 = vrot.slane %v14468_v61, 3 }
 0x6f1   : > { %v8802_v1 = vsub.f32 %v8665_v23, %v8550_v34  ;;  %v8105_v51 = vsel %vm4375_vm11, %v8095_v49, %v8104_v62  ;;  %v8110_v23 = vshll.u32 %v14488_v24, 16 }
 0x6f2   : > { %v7824_v2 = vpop.f32.mrf.mxu2  ;;  %v7332_v28 = vsel %vm3726_vm12, %v7329_v12, %v7331_v6 }
 0x6f3   : > { %8838 = vst [vmem:[%s11216_s22 + $0x50] sm:$0xff] %v8802_v1  ;;  %v7898_v47 = vadd.f32 %v7824_v2, %v7513_v9  ;;  %v7716_v9 = vrot.slane %v14446_v5, 2  ;;  %v8109_v1 = vrot.slane %v8107_v54, 2  ;;  %v8112_v2 = vrot.slane %v8110_v23, 3  ;;  %v8685_v54 = vpop.permute.xlu2 %8684 }
 0x6f4   : > { %v7442_v39 = vpop.f32.mrf.mxu1 }
 0x6f5   : > { %v8291_v7 = vadd.f32 %v14442_v4, %v7898_v47  ;;  %v8480_v16 = vpop.f32.mrf.mxu0  ;;  %v14485_v29 = vpop.f32.mrf.mxu3  ;;  %v7514_v0 = vadd.f32 %v7442_v39, %v14782_v36  ;;  %v14783_v47 = vld [vmem:[#allocation14_spill] sm:$0xff] }
 0x6f6   : > { %v8680_v36 = vpop.permute.xlu1 %8679 }
 0x6f7   : > { %7481 = vmatmul.bf16.gmra.mxu1 %v7330_v44  ;;  %7866 = vmatmul.bf16.gmra.mxu2 %v7715_v45  ;;  %v8551_v22 = vadd.f32 %v8477_v56, %v8291_v7  ;;  %v8369_v45 = vrot.slane %v14446_v5, 3 }
 0x6f8   : > { %8519 = vmatmul.bf16.gmra.mxu0 %v8368_v10 }
 0x6f9   : > { %v8803_v4 = vsub.f32 %v8670_v21, %v8551_v22  ;;  %v8113_v21 = vor.u32 %v8112_v2, %v8109_v1 }
 0x6fa   : > { %v7827_v42 = vpop.f32.mrf.mxu2  ;;  %8269 = vmatmul.bf16.gmra.mxu3 %v8105_v51  ;;  %v8370_v51 = vsel %vm4770_vm13, %v8367_v14, %v8369_v45 }
 0x6fb   : > { %8839 = vst [vmem:[%s11216_s22 + $0x58] sm:$0xff] %v8803_v4  ;;  %v7899_v60 = vadd.f32 %v7827_v42, %v7514_v0  ;;  %v8114_v4 = vsel %vm4375_vm11, %v8104_v62, %v8113_v21  ;;  %v7718_v62 = vrot.slane %v14468_v61, 2 }
 0x6fc   : > { %v7444_v20 = vpop.f32.mrf.mxu1 }
 0x6fd   : > { %v8292_v56 = vadd.f32 %v14454_v32, %v7899_v60  ;;  %v8482_v34 = vpop.f32.mrf.mxu0  ;;  %v14495_v49 = vpop.f32.mrf.mxu3  ;;  %v7515_v39 = vadd.f32 %v7444_v20, %v14783_v47 }
 0x6ff   : > { %v8552_v43 = vadd.f32 %v8480_v16, %v8292_v56  ;;  %v7717_v16 = vsel %vm3726_vm12, %v7714_v33, %v7716_v9 }
 0x701   : > { %v8804_v44 = vsub.f32 %v8675_v26, %v8552_v43 }
 0x702   : > { %v7829_v7 = vpop.f32.mrf.mxu2 }
 0x703   : > { %8840 = vst [vmem:[%s11216_s22 + $0x60] sm:$0xff] %v8804_v44  ;;  %v7900_v10 = vadd.f32 %v7829_v7, %v7515_v39  ;;  %v7719_v39 = vsel %vm3726_vm12, %v7716_v9, %v7718_v62 }
 0x704   : > { %v7447_v32 = vpop.f32.mrf.mxu1 }
 0x705   : > { %v8293_v57 = vadd.f32 %v14465_v41, %v7900_v10  ;;  %v8485_v22 = vpop.f32.mrf.mxu0  ;;  %v14505_v0 = vpop.f32.mrf.mxu3  ;;  %v7516_v12 = vadd.f32 %v7447_v32, %v14069_v48  ;;  %v8372_v10 = vsel %vm4770_vm13, %v8369_v45, %v8371_v52  ;;  %v7574_v32 = vld [vmem:[#allocation2 + $0xa0] sm:$0x3] }
 0x707   : > { %7486 = vmatmul.bf16.gmra.mxu1 %v7332_v28  ;;  %7871 = vmatmul.bf16.gmra.mxu2 %v7717_v16  ;;  %v8553_v5 = vadd.f32 %v8482_v34, %v8293_v57  ;;  %v10650_v34 = vld [vmem:[#allocation2 + $0x90] sm:$0xff]  ;;  %v8690_v28 = vpop.permute.xlu0 %8689  ;;  %v7665_v16 = vunpack.c.l.b16 %v7574_v32 }
 0x708   : > { %8524 = vmatmul.bf16.gmra.mxu0 %v8370_v51  ;;  %v7333_v26 = vrot.slane %v10650_v34, 2 }
 0x709   : > { %v8805_v42 = vsub.f32 %v8680_v36, %v8553_v5  ;;  %v8695_v36 = vpop.permute.xlu1 %8694 }
 0x70a   : > { %v7832_v60 = vpop.f32.mrf.mxu2  ;;  %8274 = vmatmul.bf16.gmra.mxu3 %v8114_v4 }
 0x70b   : > { %8841 = vst [vmem:[%s11216_s22 + $0x68] sm:$0xff] %v8805_v42  ;;  %v7901_v33 = vadd.f32 %v7832_v60, %v7516_v12  ;;  %v7335_v12 = vrot.slane %v14075_v40, 2 }
 0x70c   : > { %v7449_v41 = vpop.f32.mrf.mxu1 }
 0x70d   : > { %v8294_v14 = vadd.f32 %v14475_v17, %v7901_v33  ;;  %v8487_v20 = vpop.f32.mrf.mxu0  ;;  %v14511_v23 = vpop.f32.mrf.mxu3  ;;  %v7517_v48 = vadd.f32 %v7449_v41, %v14079_v53  ;;  %v7334_v17 = vsel %vm3726_vm12, %v7331_v6, %v7333_v26 }
 0x70f   : > { %v8554_v56 = vadd.f32 %v8485_v22, %v8294_v14 }
 0x711   : > { %v8806_v43 = vsub.f32 %v8685_v54, %v8554_v56  ;;  %v7336_v54 = vsel %vm3726_vm12, %v7333_v26, %v7335_v12 }
 0x712   : > { %v7834_v1 = vpop.f32.mrf.mxu2 }
 0x713   : > { %8842 = vst [vmem:[%s11216_s22 + $0x70] sm:$0xff] %v8806_v43  ;;  %v7902_v2 = vadd.f32 %v7834_v1, %v7517_v48  ;;  %v8700_v48 = vpop.permute.xlu2 %8699 }
 0x714   : > { %v7452_v47 = vpop.f32.mrf.mxu1 }
 0x715   : > { %v8295_v44 = vadd.f32 %v14485_v29, %v7902_v2  ;;  %v8490_v7 = vpop.f32.mrf.mxu0  ;;  %v8237_v53 = vpop.f32.mrf.mxu3  ;;  %v7518_v21 = vadd.f32 %v7452_v47, %v14092_v3  ;;  %v7684_v29 = vpack.c.b16 %v7665_v16, %v7665_v16  ;;  %v8373_v3 = vrot.slane %v14488_v24, 3 }
 0x716   : > { %v8710_v16 = vpop.permute.xlu1 %8709 }
 0x717   : > { %7491 = vmatmul.bf16.gmra.mxu1 %v7334_v17  ;;  %7876 = vmatmul.bf16.gmra.mxu2 %v7719_v39  ;;  %v8555_v61 = vadd.f32 %v8487_v20, %v8295_v44  ;;  %v7720_v42 = vrot.slane %v7684_v29, 2  ;;  %v8374_v40 = vsel %vm4770_vm13, %v8371_v52, %v8373_v3  ;;  %v8705_v17 = vpop.permute.xlu0 %8704 }
 0x718   : > { %8529 = vmatmul.bf16.gmra.mxu0 %v8372_v10 }
 0x719   : > { %v8807_v57 = vsub.f32 %v8690_v28, %v8555_v61 }
 0x71a   : > { %v7837_v6 = vpop.f32.mrf.mxu2 }
 0x71b   : > { %8843 = vst [vmem:[%s11216_s22 + $0x78] sm:$0xff] %v8807_v57  ;;  %v7903_v9 = vadd.f32 %v7837_v6, %v7518_v21 }
 0x71c   : > { %v7454_v22 = vpop.f32.mrf.mxu1 }
 0x71d   : > { %v8296_v51 = vadd.f32 %v14495_v49, %v7903_v9  ;;  %v8492_v45 = vpop.f32.mrf.mxu0  ;;  %v8240_v5 = vpop.f32.mrf.mxu3  ;;  %v7519_v60 = vadd.f32 %v7454_v22, %v14101_v18  ;;  %v7721_v49 = vsel %vm3726_vm12, %v7718_v62, %v7720_v42 }
 0x71f   : > { %v8556_v4 = vadd.f32 %v8490_v7, %v8296_v51 }
 0x721   : > { %v8808_v33 = vsub.f32 %v8695_v36, %v8556_v4  ;;  %v8715_v36 = vpop.permute.xlu2 %8714 }
 0x722   : > { %v7839_v41 = vpop.f32.mrf.mxu2 }
 0x723   : > { %8844 = vst [vmem:[%s11216_s22 + $0x80] sm:$0xff] %v8808_v33  ;;  %v7904_v14 = vadd.f32 %v7839_v41, %v7519_v60 }
 0x724   : > { %v7457_v20 = vpop.f32.mrf.mxu1 }
 0x725   : > { %v8297_v56 = vadd.f32 %v14505_v0, %v7904_v14  ;;  %v8495_v34 = vpop.f32.mrf.mxu0  ;;  %v8242_v24 = vpop.f32.mrf.mxu3  ;;  %v7520_v43 = vadd.f32 %v7457_v20, %v14117_v25 }
 0x726   : > { %v8720_v14 = vpop.permute.xlu0 %8719 }
 0x727   : > { %7496 = vmatmul.bf16.gmra.mxu1 %v7336_v54  ;;  %7881 = vmatmul.bf16.gmra.mxu2 %v7721_v49  ;;  %v8557_v18 = vadd.f32 %v8492_v45, %v8297_v56 }
 0x728   : > { %8534 = vmatmul.bf16.gmra.mxu0 %v8374_v40 }
 0x729   : > { %v8809_v1 = vsub.f32 %v8700_v48, %v8557_v18  ;;  %v8725_v48 = vpop.permute.xlu1 %8724 }
 0x72a   : > { %v7842_v2 = vpop.f32.mrf.mxu2 }
 0x72b   : > { %8845 = vst [vmem:[%s11216_s22 + $0x88] sm:$0xff] %v8809_v1  ;;  %v7905_v26 = vadd.f32 %v7842_v2, %v7520_v43 }
 0x72c   : > { %v7459_v47 = vpop.f32.mrf.mxu1 }
 0x72d   : > { %v8298_v62 = vadd.f32 %v14511_v23, %v7905_v26  ;;  %v8497_v0 = vpop.f32.mrf.mxu0  ;;  %v7521_v39 = vadd.f32 %v7459_v47, %v14130_v37  ;;  %v8245_v10 = vpop.f32.mrf.mxu3 }
 0x72f   : > { %v8558_v52 = vadd.f32 %v8495_v34, %v8298_v62 }
 0x731   : > { %v8810_v44 = vsub.f32 %v8705_v17, %v8558_v52 }
 0x732   : > { %v7844_v7 = vpop.f32.mrf.mxu2 }
 0x733   : > { %8846 = vst [vmem:[%s11216_s22 + $0x90] sm:$0xff] %v8810_v44  ;;  %v7906_v32 = vadd.f32 %v7844_v7, %v7521_v39 }
 0x734   : > { %v7462_v28 = vpop.f32.mrf.mxu1 }
 0x735   : > { %v8299_v25 = vadd.f32 %v8237_v53, %v7906_v32  ;;  %v8500_v61 = vpop.f32.mrf.mxu0  ;;  %v7522_v57 = vadd.f32 %v7462_v28, %v14142_v59  ;;  %v8247_v29 = vpop.f32.mrf.mxu3 }
 0x737   : > { %v8559_v21 = vadd.f32 %v8497_v0, %v8299_v25  ;;  %v8730_v0 = vpop.permute.xlu2 %8729  ;;  %v8735_v25 = vpop.permute.xlu0 %8734 }
 0x739   : > { %v8811_v23 = vsub.f32 %v8710_v16, %v8559_v21 }
 0x73a   : > { %v7847_v6 = vpop.f32.mrf.mxu2 }
 0x73b   : > { %8847 = vst [vmem:[%s11216_s22 + $0x98] sm:$0xff] %v8811_v23  ;;  %v7907_v9 = vadd.f32 %v7847_v6, %v7522_v57 }
 0x73c   : > { %v7464_v22 = vpop.f32.mrf.mxu1 }
 0x73d   : > { %v8300_v37 = vadd.f32 %v8240_v5, %v7907_v9  ;;  %v8502_v51 = vpop.f32.mrf.mxu0  ;;  %v7523_v53 = vadd.f32 %v7464_v22, %v14154_v35  ;;  %v8250_v3 = vpop.f32.mrf.mxu3 }
 0x73f   : > { %v8560_v45 = vadd.f32 %v8500_v61, %v8300_v37 }
 0x741   : > { %v8812_v4 = vsub.f32 %v8715_v36, %v8560_v45 }
 0x742   : > { %v7849_v12 = vpop.f32.mrf.mxu2 }
 0x743   : > { %8848 = vst [vmem:[%s11216_s22 + $0xa0] sm:$0xff] %v8812_v4  ;;  %v7908_v42 = vadd.f32 %v7849_v12, %v7523_v53 }
 0x744   : > { %v7467_v60 = vpop.f32.mrf.mxu1 }
 0x745   : > { %v8301_v33 = vadd.f32 %v8242_v24, %v7908_v42  ;;  %v8505_v59 = vpop.f32.mrf.mxu0  ;;  %v7524_v5 = vadd.f32 %v7467_v60, %v14165_v58  ;;  %v8252_v18 = vpop.f32.mrf.mxu3 }
 0x746   : > { %v8745_v60 = vpop.permute.xlu2 %8744 }
 0x747   : > { %v8561_v41 = vadd.f32 %v8502_v51, %v8301_v33 }
 0x749   : > { %v8813_v20 = vsub.f32 %v8720_v14, %v8561_v41 }
 0x74a   : > { %v7852_v54 = vpop.f32.mrf.mxu2 }
 0x74b   : > { %8849 = vst [vmem:[%s11216_s22 + $0xa8] sm:$0xff] %v8813_v20  ;;  %v7909_v49 = vadd.f32 %v7852_v54, %v7524_v5  ;;  %v8750_v54 = vpop.permute.xlu0 %8749 }
 0x74c   : > { %v7469_v56 = vpop.f32.mrf.mxu1 }
 0x74d   : > { %v8302_v34 = vadd.f32 %v8245_v10, %v7909_v49  ;;  %v8507_v40 = vpop.f32.mrf.mxu0  ;;  %v7525_v24 = vadd.f32 %v7469_v56, %v14176_v38  ;;  %v8255_v44 = vpop.f32.mrf.mxu3 }
 0x74f   : > { %v8562_v35 = vadd.f32 %v8505_v59, %v8302_v34 }
 0x751   : > { %v8814_v43 = vsub.f32 %v8725_v48, %v8562_v35 }
 0x752   : > { %v7854_v1 = vpop.f32.mrf.mxu2 }
 0x753   : > { %8850 = vst [vmem:[%s11216_s22 + $0xb0] sm:$0xff] %v8814_v43  ;;  %v7910_v2 = vadd.f32 %v7854_v1, %v7525_v24 }
 0x754   : > { %v7472_v26 = vpop.f32.mrf.mxu1 }
 0x755   : > { %v8303_v47 = vadd.f32 %v8247_v29, %v7910_v2  ;;  %v8510_v62 = vpop.f32.mrf.mxu0  ;;  %v7526_v52 = vadd.f32 %v7472_v26, %v14188_v55  ;;  %v8257_v6 = vpop.f32.mrf.mxu3 }
 0x756   : > { %v8740_v29 = vpop.permute.xlu1 %8739 }
 0x757   : > { %v8563_v58 = vadd.f32 %v8507_v40, %v8303_v47 }
 0x759   : > { %v8815_v17 = vsub.f32 %v8730_v0, %v8563_v58 }
 0x75a   : > { %v7857_v39 = vpop.f32.mrf.mxu2 }
 0x75b   : > { %8851 = vst [vmem:[%s11216_s22 + $0xb8] sm:$0xff] %v8815_v17  ;;  %v7911_v7 = vadd.f32 %v7857_v39, %v7526_v52  ;;  %v8760_v52 = vpop.permute.xlu2 %8759 }
 0x75c   : > { %v7474_v10 = vpop.f32.mrf.mxu1 }
 0x75d   : > { %v8304_v32 = vadd.f32 %v8250_v3, %v7911_v7  ;;  %v8512_v28 = vpop.f32.mrf.mxu0  ;;  %v7527_v16 = vadd.f32 %v7474_v10, %v14201_v31  ;;  %v8260_v31 = vpop.f32.mrf.mxu3 }
 0x75e   : > { %v8755_v24 = vpop.permute.xlu1 %8754 }
 0x75f   : > { %v8564_v38 = vadd.f32 %v8510_v62, %v8304_v32 }
 0x761   : > { %v8816_v61 = vsub.f32 %v8735_v25, %v8564_v38 }
 0x762   : > { %v7859_v21 = vpop.f32.mrf.mxu2 }
 0x763   : > { %8852 = vst [vmem:[%s11216_s22 + $0xc0] sm:$0xff] %v8816_v61  ;;  %v7912_v57 = vadd.f32 %v7859_v21, %v7527_v16  ;;  %v8765_v61 = vpop.permute.xlu0 %8764 }
 0x764   : > { %v7477_v23 = vpop.f32.mrf.mxu1 }
 0x765   : > { %v8305_v9 = vadd.f32 %v8252_v18, %v7912_v57  ;;  %v8515_v55 = vpop.f32.mrf.mxu0  ;;  %v7528_v51 = vadd.f32 %v7477_v23, %v14213_v30  ;;  %v8262_v49 = vpop.f32.mrf.mxu3 }
 0x767   : > { %v8565_v22 = vadd.f32 %v8512_v28, %v8305_v9 }
 0x769   : > { %v8817_v37 = vsub.f32 %v8740_v29, %v8565_v22  ;;  %v8770_v22 = vpop.permute.xlu1 %8769 }
 0x76a   : > { %v7862_v45 = vpop.f32.mrf.mxu2 }
 0x76b   : > { %8853 = vst [vmem:[%s11216_s22 + $0xc8] sm:$0xff] %v8817_v37  ;;  %v7913_v36 = vadd.f32 %v7862_v45, %v7528_v51 }
 0x76c   : > { %v7479_v4 = vpop.f32.mrf.mxu1 }
 0x76d   : > { %v8306_v53 = vadd.f32 %v8255_v44, %v7913_v36  ;;  %v8517_v12 = vpop.f32.mrf.mxu0  ;;  %v7529_v59 = vadd.f32 %v7479_v4, %v14225_v46  ;;  %v8265_v47 = vpop.f32.mrf.mxu3 }
 0x76f   : > { %v8566_v42 = vadd.f32 %v8515_v55, %v8306_v53 }
 0x771   : > { %v8818_v33 = vsub.f32 %v8745_v60, %v8566_v42 }
 0x772   : > { %v7864_v3 = vpop.f32.mrf.mxu2 }
 0x773   : > { %8854 = vst [vmem:[%s11216_s22 + $0xd0] sm:$0xff] %v8818_v33  ;;  %v7914_v41 = vadd.f32 %v7864_v3, %v7529_v59 }
 0x774   : > { %v7482_v14 = vpop.f32.mrf.mxu1 }
 0x775   : > { %v8307_v20 = vadd.f32 %v8257_v6, %v7914_v41  ;;  %v8520_v5 = vpop.f32.mrf.mxu0  ;;  %v7530_v34 = vadd.f32 %v7482_v14, %v14237_v13  ;;  %v8267_v28 = vpop.f32.mrf.mxu3 }
 0x777   : > { %v8567_v30 = vadd.f32 %v8517_v12, %v8307_v20 }
 0x779   : > { %v8819_v56 = vsub.f32 %v8750_v54, %v8567_v30 }
 0x77a   : > { %v7867_v40 = vpop.f32.mrf.mxu2 }
 0x77b   : > { %8855 = vst [vmem:[%s11216_s22 + $0xd8] sm:$0xff] %v8819_v56  ;;  %v7915_v35 = vadd.f32 %v7867_v40, %v7530_v34 }
 0x77c   : > { %v7484_v48 = vpop.f32.mrf.mxu1 }
 0x77d   : > { %v8308_v18 = vadd.f32 %v8260_v31, %v7915_v35  ;;  %v8522_v43 = vpop.f32.mrf.mxu0  ;;  %v7531_v2 = vadd.f32 %v7484_v48, %v14249_v8  ;;  %v8270_v55 = vpop.f32.mrf.mxu3 }
 0x77e   : > { %v8785_v48 = vpop.permute.xlu1 %8784 }
 0x77f   : > { %v8568_v46 = vadd.f32 %v8520_v5, %v8308_v18 }
 0x781   : > { %v8820_v1 = vsub.f32 %v8755_v24, %v8568_v46 }
 0x782   : > { %v7869_v26 = vpop.f32.mrf.mxu2 }
 0x783   : > { %8856 = vst [vmem:[%s11216_s22 + $0xe0] sm:$0xff] %v8820_v1  ;;  %v7916_v62 = vadd.f32 %v7869_v26, %v7531_v2 }
 0x784   : > { %v7487_v58 = vpop.f32.mrf.mxu1 }
 0x785   : > { %v8309_v0 = vadd.f32 %v8262_v49, %v7916_v62  ;;  %v8525_v17 = vpop.f32.mrf.mxu0  ;;  %v7532_v44 = vadd.f32 %v7487_v58, %v14261_v11  ;;  %v8272_v31 = vpop.f32.mrf.mxu3 }
 0x787   : > { %v8569_v13 = vadd.f32 %v8522_v43, %v8309_v0 }
 0x789   : > { %v8821_v39 = vsub.f32 %v8760_v52, %v8569_v13 }
 0x78a   : > { %v7872_v7 = vpop.f32.mrf.mxu2 }
 0x78b   : > { %8857 = vst [vmem:[%s11216_s22 + $0xe8] sm:$0xff] %v8821_v39  ;;  %v7917_v10 = vadd.f32 %v7872_v7, %v7532_v44 }
 0x78c   : > { %v7489_v32 = vpop.f32.mrf.mxu1 }
 0x78d   : > { %v8310_v38 = vadd.f32 %v8265_v47, %v7917_v10  ;;  %v8527_v8 = vpop.f32.mrf.mxu0  ;;  %v7533_v21 = vadd.f32 %v7489_v32, %v14273_v63  ;;  %v8775_v63 = vpop.permute.xlu2 %8774 }
 0x78e   : > { %v8275_v54 = vpop.f32.mrf.mxu3 }
 0x78f   : > { %v8570_v25 = vadd.f32 %v8525_v17, %v8310_v38 }
 0x791   : > { %v8822_v16 = vsub.f32 %v8765_v61, %v8570_v25 }
 0x792   : > { %v7874_v57 = vpop.f32.mrf.mxu2 }
 0x793   : > { %8858 = vst [vmem:[%s11216_s22 + $0xf0] sm:$0xff] %v8822_v16  ;;  %v7918_v23 = vadd.f32 %v7874_v57, %v7533_v21 }
 0x794   : > { %v7492_v6 = vpop.f32.mrf.mxu1 }
 0x795   : > { %v8311_v9 = vadd.f32 %v8267_v28, %v7918_v23  ;;  %v8530_v29 = vpop.f32.mrf.mxu0  ;;  %v7534_v51 = vadd.f32 %v7492_v6, %v14285_v19  ;;  %v8780_v19 = vpop.permute.xlu0 %8779 }
 0x796   : > { %v8277_v1 = vpop.f32.mrf.mxu3  ;;  %v8790_v47 = vpop.permute.xlu2 %8789 }
 0x797   : > { %v8571_v11 = vadd.f32 %v8527_v8, %v8311_v9 }
 0x799   : > { %v8823_v37 = vsub.f32 %v8770_v22, %v8571_v11 }
 0x79a   : > { %v7877_v45 = vpop.f32.mrf.mxu2 }
 0x79b   : > { %8859 = vst [vmem:[%s11216_s22 + $0xf8] sm:$0xff] %v8823_v37  ;;  %v7919_v36 = vadd.f32 %v7877_v45, %v7534_v51 }
 0x79c   : > { %v7494_v4 = vpop.f32.mrf.mxu1 }
 0x79d   : > { %v8312_v53 = vadd.f32 %v8270_v55, %v7919_v36  ;;  %v7535_v60 = vadd.f32 %v7494_v4, %v14297_v50  ;;  %v8532_v33 = vpop.f32.mrf.mxu0 }
 0x79f   : > { %v8572_v12 = vadd.f32 %v8530_v29, %v8312_v53 }
 0x7a1   : > { %v8824_v42 = vsub.f32 %v8775_v63, %v8572_v12 }
 0x7a2   : > { %v7879_v59 = vpop.f32.mrf.mxu2 }
 0x7a3   : > { %8860 = vst [vmem:[%s11216_s22 + $0x100] sm:$0xff] %v8824_v42  ;;  %v7920_v3 = vadd.f32 %v7879_v59, %v7535_v60 }
 0x7a4   : > { %v7497_v41 = vpop.f32.mrf.mxu1 }
 0x7a5   : > { %v8313_v14 = vadd.f32 %v8272_v31, %v7920_v3  ;;  %v7536_v30 = vadd.f32 %v7497_v41, %v14309_v27  ;;  %v8535_v34 = vpop.f32.mrf.mxu0 }
 0x7a7   : > { %v8573_v20 = vadd.f32 %v8532_v33, %v8313_v14 }
 0x7a9   : > { %v8825_v5 = vsub.f32 %v8780_v19, %v8573_v20 }
 0x7aa   : > { %v7882_v49 = vpop.f32.mrf.mxu2 }
 0x7ab   : > { %8861 = vst [vmem:[%s11216_s22 + $0x108] sm:$0xff] %v8825_v5  ;;  %v7921_v56 = vadd.f32 %v7882_v49, %v7536_v30 }
 0x7ac   : > { %v7499_v50 = vpop.f32.mrf.mxu1 }
 0x7ad   : > { %v8314_v40 = vadd.f32 %v8275_v54, %v7921_v56  ;;  %v7537_v43 = vadd.f32 %v7499_v50, %v14321_v15  ;;  %v8537_v26 = vpop.f32.mrf.mxu0 }
 0x7af   : > { %v8574_v35 = vadd.f32 %v8535_v34, %v8314_v40 }
 0x7b1   : > { %v8826_v18 = vsub.f32 %v8785_v48, %v8574_v35 }
 0x7b2   : > { %v7884_v46 = vpop.f32.mrf.mxu2 }
 0x7b3   : > { %8862 = vst [vmem:[%s11216_s22 + $0x110] sm:$0xff] %v8826_v18  ;;  %v7922_v24 = vadd.f32 %v7884_v46, %v7537_v43 }
 0x7b5   : > { %v8315_v2 = vadd.f32 %v8277_v1, %v7922_v24 }
 0x7b7   : > { %v8575_v27 = vadd.f32 %v8537_v26, %v8315_v2 }
 0x7b9   : > { %v8827_v62 = vsub.f32 %v8790_v47, %v8575_v27 }
 0x7bb   : > { %8863 = vst [vmem:[%s11216_s22 + $0x118] sm:$0xff] %v8827_v62 }
 0x7bc PF: > { %s16_s21 = sadd.s32 1, %s10661_s21  }
 0x7bd   : > { %p13_p7 = scmp.ge.s32.totalorder %s16_s21, 4  }
 0x7bf   :  { %15 = sbr.rel (!%p13_p7) target bundleno = 1 (0x1), region = 120 }

</bundles_post_ra>
